<compile_context>
chip_gen: v7x
topology: tpu7x:2x2x1
jax: 0.10.0
libtpu: 0.0.40
codegen_flags: <defaults>
</compile_context>

<pallas_src>
import functools
import math

import jax
import jax.numpy as jnp
from jax.experimental import pallas as pl
from jax.experimental.pallas import tpu as pltpu

NEG_INF = -1e9
LN_EPS = 1e-5

_PAR1 = pltpu.CompilerParams(dimension_semantics=("parallel",))


# ----------------------------- in-kernel helpers -----------------------------

def _layernorm(h, g, b, eps):
    mu = jnp.mean(h, axis=-1, keepdims=True)
    var = jnp.mean((h - mu) ** 2, axis=-1, keepdims=True)
    return (h - mu) * jax.lax.rsqrt(var + eps) * g + b


def _mha(xq, xkv, wq, bq, wkv, bkv, wo, bo, mask, *, nhead, scale):
    """Multi-head attention on VMEM tiles; heads via static column slices."""
    hidden = xq.shape[-1]
    dh = hidden // nhead
    # scale folded into q (bias included, matching PyTorch: (xW+b)/sqrt(dh))
    q = (jnp.dot(xq, wq, preferred_element_type=jnp.float32) + bq) * scale   # (Sq, H)
    kv = jnp.dot(xkv, wkv, preferred_element_type=jnp.float32) + bkv          # (Sk, 2H)
    k = kv[:, :hidden]
    v = kv[:, hidden:]
    heads = []
    for h in range(nhead):
        sl = slice(h * dh, (h + 1) * dh)
        s = jnp.dot(q[:, sl], k[:, sl].T, preferred_element_type=jnp.float32)  # (Sq, Sk)
        if mask is not None:
            s = s + mask
        s = s - jnp.max(s, axis=-1, keepdims=True)
        p = jnp.exp(s)
        p = p * pl.reciprocal(jnp.sum(p, axis=-1, keepdims=True), approx=True)
        heads.append(jnp.dot(p, v[:, sl], preferred_element_type=jnp.float32))
    attn = jnp.concatenate(heads, axis=-1)                                     # (Sq, H)
    return jnp.dot(attn, wo, preferred_element_type=jnp.float32) + bo


def _ffn(x, w1, b1, w2, b2):
    f = jnp.maximum(jnp.dot(x, w1, preferred_element_type=jnp.float32) + b1, 0.0)
    return jnp.dot(f, w2, preferred_element_type=jnp.float32) + b2


# ----------------------------- Pallas kernels -----------------------------

def _encode_pe_kernel(x_ref, w_ref, b_ref, pe_ref, o_ref):
    # x: (1, S, Din), w: (Din, H), b: (1, H), pe: (S, H) -> o: (1, S, H)
    y = jnp.dot(x_ref[0], w_ref[...], preferred_element_type=jnp.float32)
    o_ref[0] = y + b_ref[...] + pe_ref[...]


def _encoder_layer_kernel(*refs, nhead, scale, eps, fuse_final_ln):
    # Full post-LN encoder layer: self-attn block + FFN block (+ optional final LN).
    if fuse_final_ln:
        (x_ref, m_ref, wq, bq, wkv, bkv, wo, bo, g1, b1,
         fw1, fb1, fw2, fb2, g2, b2, gf, bf, o_ref) = refs
    else:
        (x_ref, m_ref, wq, bq, wkv, bkv, wo, bo, g1, b1,
         fw1, fb1, fw2, fb2, g2, b2, o_ref) = refs
        gf = bf = None

    x = x_ref[0]                                                      # (S, H)
    a = _mha(x, x, wq[...], bq[...], wkv[...], bkv[...], wo[...], bo[...],
             m_ref[...], nhead=nhead, scale=scale)
    h = _layernorm(x + a, g1[...], b1[...], eps)
    f = _ffn(h, fw1[...], fb1[...], fw2[...], fb2[...])
    h = _layernorm(h + f, g2[...], b2[...], eps)
    if fuse_final_ln:
        h = _layernorm(h, gf[...], bf[...], eps)
    o_ref[0] = h


def _decoder_layer_kernel(*refs, nhead, scale, eps, fuse_final_ln):
    # Full post-LN decoder layer: masked self-attn + cross-attn (no memory mask)
    # + FFN (+ optional final LN).
    if fuse_final_ln:
        (x_ref, mem_ref, m_ref,
         swq, sbq, swkv, sbkv, swo, sbo, g1, b1,
         cwq, cbq, cwkv, cbkv, cwo, cbo, g2, b2,
         fw1, fb1, fw2, fb2, g3, b3, gf, bf, o_ref) = refs
    else:
        (x_ref, mem_ref, m_ref,
         swq, sbq, swkv, sbkv, swo, sbo, g1, b1,
         cwq, cbq, cwkv, cbkv, cwo, cbo, g2, b2,
         fw1, fb1, fw2, fb2, g3, b3, o_ref) = refs
        gf = bf = None

    x = x_ref[0]                                                      # (T, H)
    mem = mem_ref[0]                                                  # (S, H)
    a = _mha(x, x, swq[...], sbq[...], swkv[...], sbkv[...], swo[...], sbo[...],
             m_ref[...], nhead=nhead, scale=scale)
    h = _layernorm(x + a, g1[...], b1[...], eps)
    c = _mha(h, mem, cwq[...], cbq[...], cwkv[...], cbkv[...], cwo[...], cbo[...],
             None, nhead=nhead, scale=scale)
    h = _layernorm(h + c, g2[...], b2[...], eps)
    f = _ffn(h, fw1[...], fb1[...], fw2[...], fb2[...])
    h = _layernorm(h + f, g3[...], b3[...], eps)
    if fuse_final_ln:
        h = _layernorm(h, gf[...], bf[...], eps)
    o_ref[0] = h


def _layernorm_kernel(x_ref, g_ref, b_ref, o_ref, *, eps):
    # Fallback only (0-layer stacks); final norms are otherwise fused into layers.
    o_ref[...] = _layernorm(x_ref[...], g_ref[...], b_ref[...], eps)


def _out_head_kernel(x_ref, w1_ref, b1_ref, w2_ref, b2_ref, o_ref):
    x = x_ref[...]
    f = jnp.maximum(
        jnp.dot(x, w1_ref[...], preferred_element_type=jnp.float32) + b1_ref[...], 0.0)
    o_ref[...] = jnp.dot(f, w2_ref[...], preferred_element_type=jnp.float32) + b2_ref[...]


# ----------------------------- pallas_call wrappers -----------------------------

def _row_tile(m, cap=512):
    """Largest row tile: whole slab if small, else biggest multiple-of-8 divisor <= cap."""
    if m <= cap:
        return m
    for t in range(cap - cap % 8, 7, -8):
        if m % t == 0:
            return t
    return m


def _c2(r, c):
    """Constant-index 2D BlockSpec (weights / biases broadcast across the batch grid)."""
    return pl.BlockSpec((r, c), lambda i: (0, 0))


def encode_with_pe(x, w, b, pe):
    bsz, s, din = x.shape
    h = w.shape[1]
    return pl.pallas_call(
        _encode_pe_kernel,
        grid=(bsz,),
        in_specs=[pl.BlockSpec((1, s, din), lambda i: (i, 0, 0)),
                  _c2(din, h), _c2(1, h), _c2(s, h)],
        out_specs=pl.BlockSpec((1, s, h), lambda i: (i, 0, 0)),
        out_shape=jax.ShapeDtypeStruct((bsz, s, h), jnp.float32),
        compiler_params=_PAR1,
    )(x, w, b.reshape(1, h), pe[:s])


def encoder_layer(x, p, src_mask, nhead, final_ln=None):
    """One fused post-LN encoder layer (optionally also applies the final encoder LN)."""
    bsz, s, hd = x.shape
    fdim = p['ff_w1'].shape[1]
    scale = 1.0 / math.sqrt(hd // nhead)
    fuse = final_ln is not None

    kernel = functools.partial(_encoder_layer_kernel, nhead=nhead, scale=scale,
                               eps=LN_EPS, fuse_final_ln=fuse)

    in_specs = [pl.BlockSpec((1, s, hd), lambda i: (i, 0, 0)),
                _c2(s, s),
                _c2(hd, hd), _c2(1, hd),
                _c2(hd, 2 * hd), _c2(1, 2 * hd),
                _c2(hd, hd), _c2(1, hd),
                _c2(1, hd), _c2(1, hd),
                _c2(hd, fdim), _c2(1, fdim),
                _c2(fdim, hd), _c2(1, hd),
                _c2(1, hd), _c2(1, hd)]
    sa = p['sa']
    args = [x, src_mask,
            sa['wq'], sa['bq'].reshape(1, hd),
            sa['wkv'], sa['bkv'].reshape(1, 2 * hd),
            sa['wo'], sa['bo'].reshape(1, hd),
            p['ln1_g'].reshape(1, hd), p['ln1_b'].reshape(1, hd),
            p['ff_w1'], p['ff_b1'].reshape(1, fdim),
            p['ff_w2'], p['ff_b2'].reshape(1, hd),
            p['ln2_g'].reshape(1, hd), p['ln2_b'].reshape(1, hd)]
    if fuse:
        in_specs += [_c2(1, hd), _c2(1, hd)]
        args += [final_ln[0].reshape(1, hd), final_ln[1].reshape(1, hd)]

    flops = int(2 * bsz * s * (4 * hd * hd + 2 * s * hd + 2 * hd * fdim))
    cost = pl.CostEstimate(
        flops=flops,
        transcendentals=int(bsz * nhead * s * s),
        bytes_accessed=int(4 * (2 * bsz * s * hd + 4 * hd * hd + 2 * hd * fdim)))

    return pl.pallas_call(
        kernel,
        grid=(bsz,),
        in_specs=in_specs,
        out_specs=pl.BlockSpec((1, s, hd), lambda i: (i, 0, 0)),
        out_shape=jax.ShapeDtypeStruct((bsz, s, hd), jnp.float32),
        compiler_params=_PAR1,
        cost_estimate=cost,
    )(*args)


def decoder_layer(x, mem, p, tgt_mask, nhead, final_ln=None):
    """One fused post-LN decoder layer (optionally also applies the final decoder LN)."""
    bsz, t, hd = x.shape
    s = mem.shape[1]
    fdim = p['ff_w1'].shape[1]
    scale = 1.0 / math.sqrt(hd // nhead)
    fuse = final_ln is not None

    kernel = functools.partial(_decoder_layer_kernel, nhead=nhead, scale=scale,
                               eps=LN_EPS, fuse_final_ln=fuse)

    in_specs = [pl.BlockSpec((1, t, hd), lambda i: (i, 0, 0)),
                pl.BlockSpec((1, s, hd), lambda i: (i, 0, 0)),
                _c2(t, t),
                # self-attention
                _c2(hd, hd), _c2(1, hd), _c2(hd, 2 * hd), _c2(1, 2 * hd),
                _c2(hd, hd), _c2(1, hd),
                _c2(1, hd), _c2(1, hd),
                # cross-attention (memory_mask=None -> mask-free)
                _c2(hd, hd), _c2(1, hd), _c2(hd, 2 * hd), _c2(1, 2 * hd),
                _c2(hd, hd), _c2(1, hd),
                _c2(1, hd), _c2(1, hd),
                # FFN
                _c2(hd, fdim), _c2(1, fdim), _c2(fdim, hd), _c2(1, hd),
                _c2(1, hd), _c2(1, hd)]
    sa, ca = p['sa'], p['ca']
    args = [x, mem, tgt_mask,
            sa['wq'], sa['bq'].reshape(1, hd),
            sa['wkv'], sa['bkv'].reshape(1, 2 * hd),
            sa['wo'], sa['bo'].reshape(1, hd),
            p['ln1_g'].reshape(1, hd), p['ln1_b'].reshape(1, hd),
            ca['wq'], ca['bq'].reshape(1, hd),
            ca['wkv'], ca['bkv'].reshape(1, 2 * hd),
            ca['wo'], ca['bo'].reshape(1, hd),
            p['ln2_g'].reshape(1, hd), p['ln2_b'].reshape(1, hd),
            p['ff_w1'], p['ff_b1'].reshape(1, fdim),
            p['ff_w2'], p['ff_b2'].reshape(1, hd),
            p['ln3_g'].reshape(1, hd), p['ln3_b'].reshape(1, hd)]
    if fuse:
        in_specs += [_c2(1, hd), _c2(1, hd)]
        args += [final_ln[0].reshape(1, hd), final_ln[1].reshape(1, hd)]

    flops = int(2 * bsz * (4 * t * hd * hd + 2 * t * t * hd
                           + 2 * t * hd * hd + 2 * s * hd * hd + 2 * t * s * hd
                           + 2 * t * hd * fdim))
    cost = pl.CostEstimate(
        flops=flops,
        transcendentals=int(bsz * nhead * (t * t + t * s)),
        bytes_accessed=int(4 * (2 * bsz * t * hd + bsz * s * hd
                                + 8 * hd * hd + 2 * hd * fdim)))

    return pl.pallas_call(
        kernel,
        grid=(bsz,),
        in_specs=in_specs,
        out_specs=pl.BlockSpec((1, t, hd), lambda i: (i, 0, 0)),
        out_shape=jax.ShapeDtypeStruct((bsz, t, hd), jnp.float32),
        compiler_params=_PAR1,
        cost_estimate=cost,
    )(*args)


def layernorm(x, g, b):
    bsz, s, hd = x.shape
    m = bsz * s
    tm = _row_tile(m)
    out = pl.pallas_call(
        functools.partial(_layernorm_kernel, eps=LN_EPS),
        grid=(m // tm,),
        in_specs=[pl.BlockSpec((tm, hd), lambda i: (i, 0)), _c2(1, hd), _c2(1, hd)],
        out_specs=pl.BlockSpec((tm, hd), lambda i: (i, 0)),
        out_shape=jax.ShapeDtypeStruct((m, hd), jnp.float32),
        compiler_params=_PAR1,
    )(x.reshape(m, hd), g.reshape(1, hd), b.reshape(1, hd))
    return out.reshape(bsz, s, hd)


def out_head(x, w1, b1, w2, b2):
    bsz, s, hd = x.shape
    fdim = w1.shape[1]
    trg = w2.shape[1]
    m = bsz * s
    tm = _row_tile(m)
    cost = pl.CostEstimate(flops=int(2 * m * (hd * fdim + fdim * trg)), transcendentals=0,
                           bytes_accessed=int(4 * (m * hd + m * trg + hd * fdim + fdim * trg)))
    out = pl.pallas_call(
        _out_head_kernel,
        grid=(m // tm,),
        in_specs=[pl.BlockSpec((tm, hd), lambda i: (i, 0)),
                  _c2(hd, fdim), _c2(1, fdim),
                  _c2(fdim, trg), _c2(1, trg)],
        out_specs=pl.BlockSpec((tm, trg), lambda i: (i, 0)),
        out_shape=jax.ShapeDtypeStruct((m, trg), jnp.float32),
        compiler_params=_PAR1,
        cost_estimate=cost,
    )(x.reshape(m, hd), w1, b1.reshape(1, fdim), w2, b2.reshape(1, trg))
    return out.reshape(bsz, s, trg)


# ----------------------------- model glue -----------------------------

def forward(params, src, trg, src_mask, tgt_mask, *, nhead):
    src_h = encode_with_pe(src, params['src_enc_w'], params['src_enc_b'], params['pos_emb'])
    trg_h = encode_with_pe(trg, params['trg_enc_w'], params['trg_enc_b'], params['pos_emb'])

    # encoder stack (post-LN layers; final LN fused into the last layer's kernel)
    enc_final = (params['enc_norm_g'], params['enc_norm_b'])
    mem = src_h
    n_enc = len(params['enc_layers'])
    if n_enc:
        for li, lp in enumerate(params['enc_layers']):
            mem = encoder_layer(mem, lp, src_mask, nhead,
                                final_ln=enc_final if li == n_enc - 1 else None)
    else:
        mem = layernorm(mem, *enc_final)

    # decoder stack (memory_mask=None -> mask-free cross-attention inside the kernel)
    dec_final = (params['dec_norm_g'], params['dec_norm_b'])
    x = trg_h
    n_dec = len(params['dec_layers'])
    if n_dec:
        for li, lp in enumerate(params['dec_layers']):
            x = decoder_layer(x, mem, lp, tgt_mask, nhead,
                              final_ln=dec_final if li == n_dec - 1 else None)
    else:
        x = layernorm(x, *dec_final)

    return out_head(x, params['out1_w'], params['out1_b'], params['out2_w'], params['out2_b'])


# ----------------------------- deterministic parameter init -----------------------------

def positional_encoding(maxlen, hidden):
    den = jnp.exp(-jnp.arange(0, hidden, 2, dtype=jnp.float32) * math.log(10000.0) / hidden)
    pos = jnp.arange(0, maxlen, dtype=jnp.float32)[:, None]
    arg = pos * den[None, :]
    pe = jnp.zeros((maxlen, hidden), dtype=jnp.float32)
    pe = pe.at[:, 0::2].set(jnp.sin(arg))
    pe = pe.at[:, 1::2].set(jnp.cos(arg))
    return pe


def init_params(key, *, src_dim, trg_dim, hidden, n_enc, n_dec, ffn, maxlen=64):
    keys = iter(jax.random.split(key, 128))

    def w(shape):
        return 0.02 * jax.random.normal(next(keys), shape, dtype=jnp.float32)

    def zeros(shape):
        return jnp.zeros(shape, jnp.float32)

    def ones(shape):
        return jnp.ones(shape, jnp.float32)

    def mha_params():
        # K and V projections stored pre-fused along the output axis (single matmul in-kernel).
        return dict(wq=w((hidden, hidden)), bq=zeros((hidden,)),
                    wkv=w((hidden, 2 * hidden)), bkv=zeros((2 * hidden,)),
                    wo=w((hidden, hidden)), bo=zeros((hidden,)))

    def enc_layer():
        return dict(sa=mha_params(),
                    ff_w1=w((hidden, ffn)), ff_b1=zeros((ffn,)),
                    ff_w2=w((ffn, hidden)), ff_b2=zeros((hidden,)),
                    ln1_g=ones((hidden,)), ln1_b=zeros((hidden,)),
                    ln2_g=ones((hidden,)), ln2_b=zeros((hidden,)))

    def dec_layer():
        return dict(sa=mha_params(), ca=mha_params(),
                    ff_w1=w((hidden, ffn)), ff_b1=zeros((ffn,)),
                    ff_w2=w((ffn, hidden)), ff_b2=zeros((hidden,)),
                    ln1_g=ones((hidden,)), ln1_b=zeros((hidden,)),
                    ln2_g=ones((hidden,)), ln2_b=zeros((hidden,)),
                    ln3_g=ones((hidden,)), ln3_b=zeros((hidden,)))

    return dict(
        src_enc_w=w((src_dim, hidden)), src_enc_b=zeros((hidden,)),
        trg_enc_w=w((trg_dim, hidden)), trg_enc_b=zeros((hidden,)),
        pos_emb=positional_encoding(maxlen, hidden),
        enc_layers=[enc_layer() for _ in range(n_enc)],
        dec_layers=[dec_layer() for _ in range(n_dec)],
        enc_norm_g=ones((hidden,)), enc_norm_b=zeros((hidden,)),
        dec_norm_g=ones((hidden,)), dec_norm_b=zeros((hidden,)),
        out1_w=w((hidden, ffn)), out1_b=zeros((ffn,)),
        out2_w=w((ffn, trg_dim)), out2_b=zeros((trg_dim,)),
    )


# ----------------------------- demo -----------------------------

if __name__ == "__main__":
    # Small, shape-consistent config.
    B, S, T = 2, 8, 8
    SRC_DIM, TRG_DIM = 6, 5
    HIDDEN, NHEAD = 32, 4
    N_ENC, N_DEC = 2, 2
    FFN = 64

    root = jax.random.PRNGKey(0)
    k_p, k_src, k_trg = jax.random.split(root, 3)

    params = init_params(k_p, src_dim=SRC_DIM, trg_dim=TRG_DIM, hidden=HIDDEN,
                         n_enc=N_ENC, n_dec=N_DEC, ffn=FFN)

    src = jax.random.normal(k_src, (B, S, SRC_DIM), dtype=jnp.float32)
    trg = jax.random.normal(k_trg, (B, T, TRG_DIM), dtype=jnp.float32)
    src_mask = jnp.zeros((S, S), dtype=jnp.float32)
    tgt_mask = jnp.triu(jnp.full((T, T), NEG_INF, dtype=jnp.float32), k=1)  # causal

    fwd = jax.jit(functools.partial(forward, nhead=NHEAD))
    out = fwd(params, src, trg, src_mask, tgt_mask)
    out = jax.block_until_ready(out)

    assert out.shape == (B, T, TRG_DIM), out.shape
    assert bool(jnp.all(jnp.isfinite(out)))
    print("KERNEL_OK")
</pallas_src>

<mosaic_0001>
module attributes {stable_mosaic.version = 11 : i64} {
  func.func @_encode_pe_kernel(%arg0: i32, %arg1: memref<1x8x6xf32, #tpu.memory_space<vmem>>, %arg2: memref<6x32xf32, #tpu.memory_space<vmem>>, %arg3: memref<1x32xf32, #tpu.memory_space<vmem>>, %arg4: memref<8x32xf32, #tpu.memory_space<vmem>>, %arg5: memref<1x8x32xf32, #tpu.memory_space<vmem>>) attributes {dimension_semantics = [#tpu.dimension_semantics<parallel>], iteration_bounds = array<i64: 2>, scalar_prefetch = 0 : i64, scratch_operands = 0 : i64, tpu.core_type = #tpu.core_type<tc>, window_params = [{transform_indices = @transform_0, window_bounds = array<i64: 1, 8, 6>}, {pipeline_mode = #tpu.pipeline_mode<synchronous>, transform_indices = @transform_1, window_bounds = array<i64: 6, 32>}, {pipeline_mode = #tpu.pipeline_mode<synchronous>, transform_indices = @transform_2, window_bounds = array<i64: 1, 32>}, {pipeline_mode = #tpu.pipeline_mode<synchronous>, transform_indices = @transform_3, window_bounds = array<i64: 8, 32>}, {transform_indices = @transform_4, window_bounds = array<i64: 1, 8, 32>}]} {
    %c0 = arith.constant 0 : index
    %c0_0 = arith.constant 0 : index
    %c0_1 = arith.constant 0 : index
    %0 = vector.load %arg1[%c0, %c0_0, %c0_1] : memref<1x8x6xf32, #tpu.memory_space<vmem>>, vector<1x8x6xf32>
    %1 = vector.shape_cast %0 : vector<1x8x6xf32> to vector<8x6xf32>
    %c0_2 = arith.constant 0 : index
    %c0_3 = arith.constant 0 : index
    %2 = vector.load %arg2[%c0_2, %c0_3] : memref<6x32xf32, #tpu.memory_space<vmem>>, vector<6x32xf32>
    %cst = arith.constant dense<0.000000e+00> : vector<8x32xf32>
    %3 = tpu.matmul %1, %2, %cst {dimension_numbers = #tpu.dot_dimension_numbers<[1], [0], [0], [1], [0, 0, 1, 1], [], []>} : vector<8x6xf32>, vector<6x32xf32>, vector<8x32xf32> -> vector<8x32xf32>
    %c0_4 = arith.constant 0 : index
    %c0_5 = arith.constant 0 : index
    %4 = vector.load %arg3[%c0_4, %c0_5] : memref<1x32xf32, #tpu.memory_space<vmem>>, vector<1x32xf32>
    %5 = vector.broadcast %4 : vector<1x32xf32> to vector<8x32xf32>
    %6 = arith.addf %3, %5 : vector<8x32xf32>
    %c0_6 = arith.constant 0 : index
    %c0_7 = arith.constant 0 : index
    %7 = vector.load %arg4[%c0_6, %c0_7] : memref<8x32xf32, #tpu.memory_space<vmem>>, vector<8x32xf32>
    %8 = arith.addf %6, %7 : vector<8x32xf32>
    %c0_8 = arith.constant 0 : index
    %c0_9 = arith.constant 0 : index
    %c0_10 = arith.constant 0 : index
    %9 = vector.load %arg5[%c0_8, %c0_9, %c0_10] : memref<1x8x32xf32, #tpu.memory_space<vmem>>, vector<1x8x32xf32>
    %10 = vector.shape_cast %9 : vector<1x8x32xf32> to vector<8x32xf32>
    %11 = vector.shape_cast %8 : vector<8x32xf32> to vector<1x8x32xf32>
    tpu.vector_store %arg5[%c0_8, %c0_9, %c0_10], %11 {strides = array<i32>} : memref<1x8x32xf32, #tpu.memory_space<vmem>>, vector<1x8x32xf32>,
    return
  }
  func.func @transform_0(%arg0: i32) -> (i32, i32, i32) {
    %c0_i32 = arith.constant 0 : i32
    %c0_i32_0 = arith.constant 0 : i32
    %c0_i32_1 = arith.constant 0 : i32
    return %arg0, %c0_i32, %c0_i32_0 : i32, i32, i32
  }
  func.func @transform_1(%arg0: i32) -> (i32, i32) {
    %c0_i32 = arith.constant 0 : i32
    %c0_i32_0 = arith.constant 0 : i32
    %c0_i32_1 = arith.constant 0 : i32
    return %c0_i32, %c0_i32_0 : i32, i32
  }
  func.func @transform_2(%arg0: i32) -> (i32, i32) {
    %c0_i32 = arith.constant 0 : i32
    %c0_i32_0 = arith.constant 0 : i32
    %c0_i32_1 = arith.constant 0 : i32
    return %c0_i32, %c0_i32_0 : i32, i32
  }
  func.func @transform_3(%arg0: i32) -> (i32, i32) {
    %c0_i32 = arith.constant 0 : i32
    %c0_i32_0 = arith.constant 0 : i32
    %c0_i32_1 = arith.constant 0 : i32
    return %c0_i32, %c0_i32_0 : i32, i32
  }
  func.func @transform_4(%arg0: i32) -> (i32, i32, i32) {
    %c0_i32 = arith.constant 0 : i32
    %c0_i32_0 = arith.constant 0 : i32
    %c0_i32_1 = arith.constant 0 : i32
    return %arg0, %c0_i32, %c0_i32_0 : i32, i32, i32
  }
}

module attributes {stable_mosaic.version = 11 : i64} {
  func.func @_encoder_layer_kernel(%arg0: i32, %arg1: memref<1x8x32xf32, #tpu.memory_space<vmem>>, %arg2: memref<8x8xf32, #tpu.memory_space<vmem>>, %arg3: memref<32x32xf32, #tpu.memory_space<vmem>>, %arg4: memref<1x32xf32, #tpu.memory_space<vmem>>, %arg5: memref<32x64xf32, #tpu.memory_space<vmem>>, %arg6: memref<1x64xf32, #tpu.memory_space<vmem>>, %arg7: memref<32x32xf32, #tpu.memory_space<vmem>>, %arg8: memref<1x32xf32, #tpu.memory_space<vmem>>, %arg9: memref<1x32xf32, #tpu.memory_space<vmem>>, %arg10: memref<1x32xf32, #tpu.memory_space<vmem>>, %arg11: memref<32x64xf32, #tpu.memory_space<vmem>>, %arg12: memref<1x64xf32, #tpu.memory_space<vmem>>, %arg13: memref<64x32xf32, #tpu.memory_space<vmem>>, %arg14: memref<1x32xf32, #tpu.memory_space<vmem>>, %arg15: memref<1x32xf32, #tpu.memory_space<vmem>>, %arg16: memref<1x32xf32, #tpu.memory_space<vmem>>, %arg17: memref<1x8x32xf32, #tpu.memory_space<vmem>>) attributes {dimension_semantics = [#tpu.dimension_semantics<parallel>], iteration_bounds = array<i64: 2>, scalar_prefetch = 0 : i64, scratch_operands = 0 : i64, tpu.core_type = #tpu.core_type<tc>, window_params = [{transform_indices = @transform_0, window_bounds = array<i64: 1, 8, 32>}, {pipeline_mode = #tpu.pipeline_mode<synchronous>, transform_indices = @transform_1, window_bounds = array<i64: 8, 8>}, {pipeline_mode = #tpu.pipeline_mode<synchronous>, transform_indices = @transform_2, window_bounds = array<i64: 32, 32>}, {pipeline_mode = #tpu.pipeline_mode<synchronous>, transform_indices = @transform_3, window_bounds = array<i64: 1, 32>}, {pipeline_mode = #tpu.pipeline_mode<synchronous>, transform_indices = @transform_4, window_bounds = array<i64: 32, 64>}, {pipeline_mode = #tpu.pipeline_mode<synchronous>, transform_indices = @transform_5, window_bounds = array<i64: 1, 64>}, {pipeline_mode = #tpu.pipeline_mode<synchronous>, transform_indices = @transform_6, window_bounds = array<i64: 32, 32>}, {pipeline_mode = #tpu.pipeline_mode<synchronous>, transform_indices = @transform_7, window_bounds = array<i64: 1, 32>}, {pipeline_mode = #tpu.pipeline_mode<synchronous>, transform_indices = @transform_8, window_bounds = array<i64: 1, 32>}, {pipeline_mode = #tpu.pipeline_mode<synchronous>, transform_indices = @transform_9, window_bounds = array<i64: 1, 32>}, {pipeline_mode = #tpu.pipeline_mode<synchronous>, transform_indices = @transform_10, window_bounds = array<i64: 32, 64>}, {pipeline_mode = #tpu.pipeline_mode<synchronous>, transform_indices = @transform_11, window_bounds = array<i64: 1, 64>}, {pipeline_mode = #tpu.pipeline_mode<synchronous>, transform_indices = @transform_12, window_bounds = array<i64: 64, 32>}, {pipeline_mode = #tpu.pipeline_mode<synchronous>, transform_indices = @transform_13, window_bounds = array<i64: 1, 32>}, {pipeline_mode = #tpu.pipeline_mode<synchronous>, transform_indices = @transform_14, window_bounds = array<i64: 1, 32>}, {pipeline_mode = #tpu.pipeline_mode<synchronous>, transform_indices = @transform_15, window_bounds = array<i64: 1, 32>}, {transform_indices = @transform_16, window_bounds = array<i64: 1, 8, 32>}]} {
    %c0 = arith.constant 0 : index
    %c0_0 = arith.constant 0 : index
    %c0_1 = arith.constant 0 : index
    %0 = vector.load %arg1[%c0, %c0_0, %c0_1] : memref<1x8x32xf32, #tpu.memory_space<vmem>>, vector<1x8x32xf32>
    %1 = vector.shape_cast %0 : vector<1x8x32xf32> to vector<8x32xf32>
    %c0_2 = arith.constant 0 : index
    %c0_3 = arith.constant 0 : index
    %2 = vector.load %arg3[%c0_2, %c0_3] : memref<32x32xf32, #tpu.memory_space<vmem>>, vector<32x32xf32>
    %c0_4 = arith.constant 0 : index
    %c0_5 = arith.constant 0 : index
    %3 = vector.load %arg4[%c0_4, %c0_5] : memref<1x32xf32, #tpu.memory_space<vmem>>, vector<1x32xf32>
    %c0_6 = arith.constant 0 : index
    %c0_7 = arith.constant 0 : index
    %4 = vector.load %arg5[%c0_6, %c0_7] : memref<32x64xf32, #tpu.memory_space<vmem>>, vector<32x64xf32>
    %c0_8 = arith.constant 0 : index
    %c0_9 = arith.constant 0 : index
    %5 = vector.load %arg6[%c0_8, %c0_9] : memref<1x64xf32, #tpu.memory_space<vmem>>, vector<1x64xf32>
    %c0_10 = arith.constant 0 : index
    %c0_11 = arith.constant 0 : index
    %6 = vector.load %arg7[%c0_10, %c0_11] : memref<32x32xf32, #tpu.memory_space<vmem>>, vector<32x32xf32>
    %c0_12 = arith.constant 0 : index
    %c0_13 = arith.constant 0 : index
    %7 = vector.load %arg8[%c0_12, %c0_13] : memref<1x32xf32, #tpu.memory_space<vmem>>, vector<1x32xf32>
    %c0_14 = arith.constant 0 : index
    %c0_15 = arith.constant 0 : index
    %8 = vector.load %arg2[%c0_14, %c0_15] : memref<8x8xf32, #tpu.memory_space<vmem>>, vector<8x8xf32>
    %cst = arith.constant dense<0.000000e+00> : vector<8x32xf32>
    %9 = tpu.matmul %1, %2, %cst {dimension_numbers = #tpu.dot_dimension_numbers<[1], [0], [0], [1], [0, 0, 1, 1], [], []>} : vector<8x32xf32>, vector<32x32xf32>, vector<8x32xf32> -> vector<8x32xf32>
    %10 = vector.broadcast %3 : vector<1x32xf32> to vector<8x32xf32>
    %11 = arith.addf %9, %10 : vector<8x32xf32>
    %cst_16 = arith.constant 0.353553385 : f32
    %12 = vector.broadcast %cst_16 : f32 to vector<8x32xf32>
    %13 = arith.mulf %11, %12 : vector<8x32xf32>
    %cst_17 = arith.constant dense<0.000000e+00> : vector<8x64xf32>
    %14 = tpu.matmul %1, %4, %cst_17 {dimension_numbers = #tpu.dot_dimension_numbers<[1], [0], [0], [1], [0, 0, 1, 1], [], []>} : vector<8x32xf32>, vector<32x64xf32>, vector<8x64xf32> -> vector<8x64xf32>
    %15 = vector.broadcast %5 : vector<1x64xf32> to vector<8x64xf32>
    %16 = arith.addf %14, %15 : vector<8x64xf32>
    %17 = vector.extract_strided_slice %16 {offsets = [0, 0], sizes = [8, 32], strides = [1, 1]} : vector<8x64xf32> to vector<8x32xf32>
    %18 = vector.extract_strided_slice %16 {offsets = [0, 32], sizes = [8, 32], strides = [1, 1]} : vector<8x64xf32> to vector<8x32xf32>
    %19 = vector.extract_strided_slice %13 {offsets = [0, 0], sizes = [8, 8], strides = [1, 1]} : vector<8x32xf32> to vector<8x8xf32>
    %20 = vector.extract_strided_slice %17 {offsets = [0, 0], sizes = [8, 8], strides = [1, 1]} : vector<8x32xf32> to vector<8x8xf32>
    %21 = tpu.transpose %20, [1, 0] : vector<8x8xf32> -> vector<8x8xf32>
    %cst_18 = arith.constant dense<0.000000e+00> : vector<8x8xf32>
    %22 = tpu.matmul %19, %21, %cst_18 {dimension_numbers = #tpu.dot_dimension_numbers<[1], [0], [0], [1], [0, 0, 1, 1], [], []>} : vector<8x8xf32>, vector<8x8xf32>, vector<8x8xf32> -> vector<8x8xf32>
    %23 = arith.addf %22, %8 : vector<8x8xf32>
    %cst_19 = arith.constant dense<0xFF800000> : vector<8xf32>
    %24 = vector.multi_reduction <maximumf>, %23, %cst_19 [1] : vector<8x8xf32> to vector<8xf32>
    %25 = vector.shape_cast %24 : vector<8xf32> to vector<8x1xf32>
    %26 = vector.broadcast %25 : vector<8x1xf32> to vector<8x8xf32>
    %27 = arith.subf %23, %26 : vector<8x8xf32>
    %28 = math.exp %27 : vector<8x8xf32>
    %cst_20 = arith.constant dense<0.000000e+00> : vector<8xf32>
    %29 = vector.multi_reduction <add>, %28, %cst_20 [1] : vector<8x8xf32> to vector<8xf32>
    %30 = vector.shape_cast %29 : vector<8xf32> to vector<8x1xf32>
    %31 = tpu.reciprocal %30 {approx = true} : vector<8x1xf32> -> vector<8x1xf32>
    %32 = vector.broadcast %31 : vector<8x1xf32> to vector<8x8xf32>
    %33 = arith.mulf %28, %32 : vector<8x8xf32>
    %34 = vector.extract_strided_slice %18 {offsets = [0, 0], sizes = [8, 8], strides = [1, 1]} : vector<8x32xf32> to vector<8x8xf32>
    %cst_21 = arith.constant dense<0.000000e+00> : vector<8x8xf32>
    %35 = tpu.matmul %33, %34, %cst_21 {dimension_numbers = #tpu.dot_dimension_numbers<[1], [0], [0], [1], [0, 0, 1, 1], [], []>} : vector<8x8xf32>, vector<8x8xf32>, vector<8x8xf32> -> vector<8x8xf32>
    %36 = vector.extract_strided_slice %13 {offsets = [0, 8], sizes = [8, 8], strides = [1, 1]} : vector<8x32xf32> to vector<8x8xf32>
    %37 = vector.extract_strided_slice %17 {offsets = [0, 8], sizes = [8, 8], strides = [1, 1]} : vector<8x32xf32> to vector<8x8xf32>
    %38 = tpu.transpose %37, [1, 0] : vector<8x8xf32> -> vector<8x8xf32>
    %cst_22 = arith.constant dense<0.000000e+00> : vector<8x8xf32>
    %39 = tpu.matmul %36, %38, %cst_22 {dimension_numbers = #tpu.dot_dimension_numbers<[1], [0], [0], [1], [0, 0, 1, 1], [], []>} : vector<8x8xf32>, vector<8x8xf32>, vector<8x8xf32> -> vector<8x8xf32>
    %40 = arith.addf %39, %8 : vector<8x8xf32>
    %cst_23 = arith.constant dense<0xFF800000> : vector<8xf32>
    %41 = vector.multi_reduction <maximumf>, %40, %cst_23 [1] : vector<8x8xf32> to vector<8xf32>
    %42 = vector.shape_cast %41 : vector<8xf32> to vector<8x1xf32>
    %43 = vector.broadcast %42 : vector<8x1xf32> to vector<8x8xf32>
    %44 = arith.subf %40, %43 : vector<8x8xf32>
    %45 = math.exp %44 : vector<8x8xf32>
    %cst_24 = arith.constant dense<0.000000e+00> : vector<8xf32>
    %46 = vector.multi_reduction <add>, %45, %cst_24 [1] : vector<8x8xf32> to vector<8xf32>
    %47 = vector.shape_cast %46 : vector<8xf32> to vector<8x1xf32>
    %48 = tpu.reciprocal %47 {approx = true} : vector<8x1xf32> -> vector<8x1xf32>
    %49 = vector.broadcast %48 : vector<8x1xf32> to vector<8x8xf32>
    %50 = arith.mulf %45, %49 : vector<8x8xf32>
    %51 = vector.extract_strided_slice %18 {offsets = [0, 8], sizes = [8, 8], strides = [1, 1]} : vector<8x32xf32> to vector<8x8xf32>
    %cst_25 = arith.constant dense<0.000000e+00> : vector<8x8xf32>
    %52 = tpu.matmul %50, %51, %cst_25 {dimension_numbers = #tpu.dot_dimension_numbers<[1], [0], [0], [1], [0, 0, 1, 1], [], []>} : vector<8x8xf32>, vector<8x8xf32>, vector<8x8xf32> -> vector<8x8xf32>
    %53 = vector.extract_strided_slice %13 {offsets = [0, 16], sizes = [8, 8], strides = [1, 1]} : vector<8x32xf32> to vector<8x8xf32>
    %54 = vector.extract_strided_slice %17 {offsets = [0, 16], sizes = [8, 8], strides = [1, 1]} : vector<8x32xf32> to vector<8x8xf32>
    %55 = tpu.transpose %54, [1, 0] : vector<8x8xf32> -> vector<8x8xf32>
    %cst_26 = arith.constant dense<0.000000e+00> : vector<8x8xf32>
    %56 = tpu.matmul %53, %55, %cst_26 {dimension_numbers = #tpu.dot_dimension_numbers<[1], [0], [0], [1], [0, 0, 1, 1], [], []>} : vector<8x8xf32>, vector<8x8xf32>, vector<8x8xf32> -> vector<8x8xf32>
    %57 = arith.addf %56, %8 : vector<8x8xf32>
    %cst_27 = arith.constant dense<0xFF800000> : vector<8xf32>
    %58 = vector.multi_reduction <maximumf>, %57, %cst_27 [1] : vector<8x8xf32> to vector<8xf32>
    %59 = vector.shape_cast %58 : vector<8xf32> to vector<8x1xf32>
    %60 = vector.broadcast %59 : vector<8x1xf32> to vector<8x8xf32>
    %61 = arith.subf %57, %60 : vector<8x8xf32>
    %62 = math.exp %61 : vector<8x8xf32>
    %cst_28 = arith.constant dense<0.000000e+00> : vector<8xf32>
    %63 = vector.multi_reduction <add>, %62, %cst_28 [1] : vector<8x8xf32> to vector<8xf32>
    %64 = vector.shape_cast %63 : vector<8xf32> to vector<8x1xf32>
    %65 = tpu.reciprocal %64 {approx = true} : vector<8x1xf32> -> vector<8x1xf32>
    %66 = vector.broadcast %65 : vector<8x1xf32> to vector<8x8xf32>
    %67 = arith.mulf %62, %66 : vector<8x8xf32>
    %68 = vector.extract_strided_slice %18 {offsets = [0, 16], sizes = [8, 8], strides = [1, 1]} : vector<8x32xf32> to vector<8x8xf32>
    %cst_29 = arith.constant dense<0.000000e+00> : vector<8x8xf32>
    %69 = tpu.matmul %67, %68, %cst_29 {dimension_numbers = #tpu.dot_dimension_numbers<[1], [0], [0], [1], [0, 0, 1, 1], [], []>} : vector<8x8xf32>, vector<8x8xf32>, vector<8x8xf32> -> vector<8x8xf32>
    %70 = vector.extract_strided_slice %13 {offsets = [0, 24], sizes = [8, 8], strides = [1, 1]} : vector<8x32xf32> to vector<8x8xf32>
    %71 = vector.extract_strided_slice %17 {offsets = [0, 24], sizes = [8, 8], strides = [1, 1]} : vector<8x32xf32> to vector<8x8xf32>
    %72 = tpu.transpose %71, [1, 0] : vector<8x8xf32> -> vector<8x8xf32>
    %cst_30 = arith.constant dense<0.000000e+00> : vector<8x8xf32>
    %73 = tpu.matmul %70, %72, %cst_30 {dimension_numbers = #tpu.dot_dimension_numbers<[1], [0], [0], [1], [0, 0, 1, 1], [], []>} : vector<8x8xf32>, vector<8x8xf32>, vector<8x8xf32> -> vector<8x8xf32>
    %74 = arith.addf %73, %8 : vector<8x8xf32>
    %cst_31 = arith.constant dense<0xFF800000> : vector<8xf32>
    %75 = vector.multi_reduction <maximumf>, %74, %cst_31 [1] : vector<8x8xf32> to vector<8xf32>
    %76 = vector.shape_cast %75 : vector<8xf32> to vector<8x1xf32>
    %77 = vector.broadcast %76 : vector<8x1xf32> to vector<8x8xf32>
    %78 = arith.subf %74, %77 : vector<8x8xf32>
    %79 = math.exp %78 : vector<8x8xf32>
    %cst_32 = arith.constant dense<0.000000e+00> : vector<8xf32>
    %80 = vector.multi_reduction <add>, %79, %cst_32 [1] : vector<8x8xf32> to vector<8xf32>
    %81 = vector.shape_cast %80 : vector<8xf32> to vector<8x1xf32>
    %82 = tpu.reciprocal %81 {approx = true} : vector<8x1xf32> -> vector<8x1xf32>
    %83 = vector.broadcast %82 : vector<8x1xf32> to vector<8x8xf32>
    %84 = arith.mulf %79, %83 : vector<8x8xf32>
    %85 = vector.extract_strided_slice %18 {offsets = [0, 24], sizes = [8, 8], strides = [1, 1]} : vector<8x32xf32> to vector<8x8xf32>
    %cst_33 = arith.constant dense<0.000000e+00> : vector<8x8xf32>
    %86 = tpu.matmul %84, %85, %cst_33 {dimension_numbers = #tpu.dot_dimension_numbers<[1], [0], [0], [1], [0, 0, 1, 1], [], []>} : vector<8x8xf32>, vector<8x8xf32>, vector<8x8xf32> -> vector<8x8xf32>
    %87 = tpu.concatenate %35, %52, %69, %86 in 1 : vector<8x8xf32>, vector<8x8xf32>, vector<8x8xf32>, vector<8x8xf32> -> vector<8x32xf32>
    %cst_34 = arith.constant dense<0.000000e+00> : vector<8x32xf32>
    %88 = tpu.matmul %87, %6, %cst_34 {dimension_numbers = #tpu.dot_dimension_numbers<[1], [0], [0], [1], [0, 0, 1, 1], [], []>} : vector<8x32xf32>, vector<32x32xf32>, vector<8x32xf32> -> vector<8x32xf32>
    %89 = vector.broadcast %7 : vector<1x32xf32> to vector<8x32xf32>
    %90 = arith.addf %88, %89 : vector<8x32xf32>
    %91 = arith.addf %1, %90 : vector<8x32xf32>
    %c0_35 = arith.constant 0 : index
    %c0_36 = arith.constant 0 : index
    %92 = vector.load %arg9[%c0_35, %c0_36] : memref<1x32xf32, #tpu.memory_space<vmem>>, vector<1x32xf32>
    %c0_37 = arith.constant 0 : index
    %c0_38 = arith.constant 0 : index
    %93 = vector.load %arg10[%c0_37, %c0_38] : memref<1x32xf32, #tpu.memory_space<vmem>>, vector<1x32xf32>
    %cst_39 = arith.constant dense<0.000000e+00> : vector<8xf32>
    %94 = vector.multi_reduction <add>, %91, %cst_39 [1] : vector<8x32xf32> to vector<8xf32>
    %95 = vector.shape_cast %94 : vector<8xf32> to vector<8x1xf32>
    %cst_40 = arith.constant 3.200000e+01 : f32
    %96 = vector.broadcast %cst_40 : f32 to vector<8x1xf32>
    %97 = arith.divf %95, %96 : vector<8x1xf32>
    %98 = vector.broadcast %97 : vector<8x1xf32> to vector<8x32xf32>
    %99 = arith.subf %91, %98 : vector<8x32xf32>
    %100 = arith.mulf %99, %99 : vector<8x32xf32>
    %cst_41 = arith.constant dense<0.000000e+00> : vector<8xf32>
    %101 = vector.multi_reduction <add>, %100, %cst_41 [1] : vector<8x32xf32> to vector<8xf32>
    %102 = vector.shape_cast %101 : vector<8xf32> to vector<8x1xf32>
    %cst_42 = arith.constant 3.200000e+01 : f32
    %103 = vector.broadcast %cst_42 : f32 to vector<8x1xf32>
    %104 = arith.divf %102, %103 : vector<8x1xf32>
    %105 = vector.broadcast %97 : vector<8x1xf32> to vector<8x32xf32>
    %106 = arith.subf %91, %105 : vector<8x32xf32>
    %cst_43 = arith.constant 9.99999974E-6 : f32
    %107 = vector.broadcast %cst_43 : f32 to vector<8x1xf32>
    %108 = arith.addf %104, %107 : vector<8x1xf32>
    %109 = math.rsqrt %108 : vector<8x1xf32>
    %110 = vector.broadcast %109 : vector<8x1xf32> to vector<8x32xf32>
    %111 = arith.mulf %106, %110 : vector<8x32xf32>
    %112 = vector.broadcast %92 : vector<1x32xf32> to vector<8x32xf32>
    %113 = arith.mulf %111, %112 : vector<8x32xf32>
    %114 = vector.broadcast %93 : vector<1x32xf32> to vector<8x32xf32>
    %115 = arith.addf %113, %114 : vector<8x32xf32>
    %c0_44 = arith.constant 0 : index
    %c0_45 = arith.constant 0 : index
    %116 = vector.load %arg11[%c0_44, %c0_45] : memref<32x64xf32, #tpu.memory_space<vmem>>, vector<32x64xf32>
    %c0_46 = arith.constant 0 : index
    %c0_47 = arith.constant 0 : index
    %117 = vector.load %arg12[%c0_46, %c0_47] : memref<1x64xf32, #tpu.memory_space<vmem>>, vector<1x64xf32>
    %c0_48 = arith.constant 0 : index
    %c0_49 = arith.constant 0 : index
    %118 = vector.load %arg13[%c0_48, %c0_49] : memref<64x32xf32, #tpu.memory_space<vmem>>, vector<64x32xf32>
    %c0_50 = arith.constant 0 : index
    %c0_51 = arith.constant 0 : index
    %119 = vector.load %arg14[%c0_50, %c0_51] : memref<1x32xf32, #tpu.memory_space<vmem>>, vector<1x32xf32>
    %cst_52 = arith.constant dense<0.000000e+00> : vector<8x64xf32>
    %120 = tpu.matmul %115, %116, %cst_52 {dimension_numbers = #tpu.dot_dimension_numbers<[1], [0], [0], [1], [0, 0, 1, 1], [], []>} : vector<8x32xf32>, vector<32x64xf32>, vector<8x64xf32> -> vector<8x64xf32>
    %121 = vector.broadcast %117 : vector<1x64xf32> to vector<8x64xf32>
    %122 = arith.addf %120, %121 : vector<8x64xf32>
    %cst_53 = arith.constant 0.000000e+00 : f32
    %123 = vector.broadcast %cst_53 : f32 to vector<8x64xf32>
    %124 = arith.maximumf %122, %123 : vector<8x64xf32>
    %cst_54 = arith.constant dense<0.000000e+00> : vector<8x32xf32>
    %125 = tpu.matmul %124, %118, %cst_54 {dimension_numbers = #tpu.dot_dimension_numbers<[1], [0], [0], [1], [0, 0, 1, 1], [], []>} : vector<8x64xf32>, vector<64x32xf32>, vector<8x32xf32> -> vector<8x32xf32>
    %126 = vector.broadcast %119 : vector<1x32xf32> to vector<8x32xf32>
    %127 = arith.addf %125, %126 : vector<8x32xf32>
    %128 = arith.addf %115, %127 : vector<8x32xf32>
    %c0_55 = arith.constant 0 : index
    %c0_56 = arith.constant 0 : index
    %129 = vector.load %arg15[%c0_55, %c0_56] : memref<1x32xf32, #tpu.memory_space<vmem>>, vector<1x32xf32>
    %c0_57 = arith.constant 0 : index
    %c0_58 = arith.constant 0 : index
    %130 = vector.load %arg16[%c0_57, %c0_58] : memref<1x32xf32, #tpu.memory_space<vmem>>, vector<1x32xf32>
    %cst_59 = arith.constant dense<0.000000e+00> : vector<8xf32>
    %131 = vector.multi_reduction <add>, %128, %cst_59 [1] : vector<8x32xf32> to vector<8xf32>
    %132 = vector.shape_cast %131 : vector<8xf32> to vector<8x1xf32>
    %cst_60 = arith.constant 3.200000e+01 : f32
    %133 = vector.broadcast %cst_60 : f32 to vector<8x1xf32>
    %134 = arith.divf %132, %133 : vector<8x1xf32>
    %135 = vector.broadcast %134 : vector<8x1xf32> to vector<8x32xf32>
    %136 = arith.subf %128, %135 : vector<8x32xf32>
    %137 = arith.mulf %136, %136 : vector<8x32xf32>
    %cst_61 = arith.constant dense<0.000000e+00> : vector<8xf32>
    %138 = vector.multi_reduction <add>, %137, %cst_61 [1] : vector<8x32xf32> to vector<8xf32>
    %139 = vector.shape_cast %138 : vector<8xf32> to vector<8x1xf32>
    %cst_62 = arith.constant 3.200000e+01 : f32
    %140 = vector.broadcast %cst_62 : f32 to vector<8x1xf32>
    %141 = arith.divf %139, %140 : vector<8x1xf32>
    %142 = vector.broadcast %134 : vector<8x1xf32> to vector<8x32xf32>
    %143 = arith.subf %128, %142 : vector<8x32xf32>
    %cst_63 = arith.constant 9.99999974E-6 : f32
    %144 = vector.broadcast %cst_63 : f32 to vector<8x1xf32>
    %145 = arith.addf %141, %144 : vector<8x1xf32>
    %146 = math.rsqrt %145 : vector<8x1xf32>
    %147 = vector.broadcast %146 : vector<8x1xf32> to vector<8x32xf32>
    %148 = arith.mulf %143, %147 : vector<8x32xf32>
    %149 = vector.broadcast %129 : vector<1x32xf32> to vector<8x32xf32>
    %150 = arith.mulf %148, %149 : vector<8x32xf32>
    %151 = vector.broadcast %130 : vector<1x32xf32> to vector<8x32xf32>
    %152 = arith.addf %150, %151 : vector<8x32xf32>
    %c0_64 = arith.constant 0 : index
    %c0_65 = arith.constant 0 : index
    %c0_66 = arith.constant 0 : index
    %153 = vector.load %arg17[%c0_64, %c0_65, %c0_66] : memref<1x8x32xf32, #tpu.memory_space<vmem>>, vector<1x8x32xf32>
    %154 = vector.shape_cast %153 : vector<1x8x32xf32> to vector<8x32xf32>
    %155 = vector.shape_cast %152 : vector<8x32xf32> to vector<1x8x32xf32>
    tpu.vector_store %arg17[%c0_64, %c0_65, %c0_66], %155 {strides = array<i32>} : memref<1x8x32xf32, #tpu.memory_space<vmem>>, vector<1x8x32xf32>,
    return
  }
  func.func @transform_0(%arg0: i32) -> (i32, i32, i32) {
    %c0_i32 = arith.constant 0 : i32
    %c0_i32_0 = arith.constant 0 : i32
    %c0_i32_1 = arith.constant 0 : i32
    return %arg0, %c0_i32, %c0_i32_0 : i32, i32, i32
  }
  func.func @transform_1(%arg0: i32) -> (i32, i32) {
    %c0_i32 = arith.constant 0 : i32
    %c0_i32_0 = arith.constant 0 : i32
    %c0_i32_1 = arith.constant 0 : i32
    return %c0_i32, %c0_i32_0 : i32, i32
  }
  func.func @transform_2(%arg0: i32) -> (i32, i32) {
    %c0_i32 = arith.constant 0 : i32
    %c0_i32_0 = arith.constant 0 : i32
    %c0_i32_1 = arith.constant 0 : i32
    return %c0_i32, %c0_i32_0 : i32, i32
  }
  func.func @transform_3(%arg0: i32) -> (i32, i32) {
    %c0_i32 = arith.constant 0 : i32
    %c0_i32_0 = arith.constant 0 : i32
    %c0_i32_1 = arith.constant 0 : i32
    return %c0_i32, %c0_i32_0 : i32, i32
  }
  func.func @transform_4(%arg0: i32) -> (i32, i32) {
    %c0_i32 = arith.constant 0 : i32
    %c0_i32_0 = arith.constant 0 : i32
    %c0_i32_1 = arith.constant 0 : i32
    return %c0_i32, %c0_i32_0 : i32, i32
  }
  func.func @transform_5(%arg0: i32) -> (i32, i32) {
    %c0_i32 = arith.constant 0 : i32
    %c0_i32_0 = arith.constant 0 : i32
    %c0_i32_1 = arith.constant 0 : i32
    return %c0_i32, %c0_i32_0 : i32, i32
  }
  func.func @transform_6(%arg0: i32) -> (i32, i32) {
    %c0_i32 = arith.constant 0 : i32
    %c0_i32_0 = arith.constant 0 : i32
    %c0_i32_1 = arith.constant 0 : i32
    return %c0_i32, %c0_i32_0 : i32, i32
  }
  func.func @transform_7(%arg0: i32) -> (i32, i32) {
    %c0_i32 = arith.constant 0 : i32
    %c0_i32_0 = arith.constant 0 : i32
    %c0_i32_1 = arith.constant 0 : i32
    return %c0_i32, %c0_i32_0 : i32, i32
  }
  func.func @transform_8(%arg0: i32) -> (i32, i32) {
    %c0_i32 = arith.constant 0 : i32
    %c0_i32_0 = arith.constant 0 : i32
    %c0_i32_1 = arith.constant 0 : i32
    return %c0_i32, %c0_i32_0 : i32, i32
  }
  func.func @transform_9(%arg0: i32) -> (i32, i32) {
    %c0_i32 = arith.constant 0 : i32
    %c0_i32_0 = arith.constant 0 : i32
    %c0_i32_1 = arith.constant 0 : i32
    return %c0_i32, %c0_i32_0 : i32, i32
  }
  func.func @transform_10(%arg0: i32) -> (i32, i32) {
    %c0_i32 = arith.constant 0 : i32
    %c0_i32_0 = arith.constant 0 : i32
    %c0_i32_1 = arith.constant 0 : i32
    return %c0_i32, %c0_i32_0 : i32, i32
  }
  func.func @transform_11(%arg0: i32) -> (i32, i32) {
    %c0_i32 = arith.constant 0 : i32
    %c0_i32_0 = arith.constant 0 : i32
    %c0_i32_1 = arith.constant 0 : i32
    return %c0_i32, %c0_i32_0 : i32, i32
  }
  func.func @transform_12(%arg0: i32) -> (i32, i32) {
    %c0_i32 = arith.constant 0 : i32
    %c0_i32_0 = arith.constant 0 : i32
    %c0_i32_1 = arith.constant 0 : i32
    return %c0_i32, %c0_i32_0 : i32, i32
  }
  func.func @transform_13(%arg0: i32) -> (i32, i32) {
    %c0_i32 = arith.constant 0 : i32
    %c0_i32_0 = arith.constant 0 : i32
    %c0_i32_1 = arith.constant 0 : i32
    return %c0_i32, %c0_i32_0 : i32, i32
  }
  func.func @transform_14(%arg0: i32) -> (i32, i32) {
    %c0_i32 = arith.constant 0 : i32
    %c0_i32_0 = arith.constant 0 : i32
    %c0_i32_1 = arith.constant 0 : i32
    return %c0_i32, %c0_i32_0 : i32, i32
  }
  func.func @transform_15(%arg0: i32) -> (i32, i32) {
    %c0_i32 = arith.constant 0 : i32
    %c0_i32_0 = arith.constant 0 : i32
    %c0_i32_1 = arith.constant 0 : i32
    return %c0_i32, %c0_i32_0 : i32, i32
  }
  func.func @transform_16(%arg0: i32) -> (i32, i32, i32) {
    %c0_i32 = arith.constant 0 : i32
    %c0_i32_0 = arith.constant 0 : i32
    %c0_i32_1 = arith.constant 0 : i32
    return %arg0, %c0_i32, %c0_i32_0 : i32, i32, i32
  }
}

module attributes {stable_mosaic.version = 11 : i64} {
  func.func @_encoder_layer_kernel(%arg0: i32, %arg1: memref<1x8x32xf32, #tpu.memory_space<vmem>>, %arg2: memref<8x8xf32, #tpu.memory_space<vmem>>, %arg3: memref<32x32xf32, #tpu.memory_space<vmem>>, %arg4: memref<1x32xf32, #tpu.memory_space<vmem>>, %arg5: memref<32x64xf32, #tpu.memory_space<vmem>>, %arg6: memref<1x64xf32, #tpu.memory_space<vmem>>, %arg7: memref<32x32xf32, #tpu.memory_space<vmem>>, %arg8: memref<1x32xf32, #tpu.memory_space<vmem>>, %arg9: memref<1x32xf32, #tpu.memory_space<vmem>>, %arg10: memref<1x32xf32, #tpu.memory_space<vmem>>, %arg11: memref<32x64xf32, #tpu.memory_space<vmem>>, %arg12: memref<1x64xf32, #tpu.memory_space<vmem>>, %arg13: memref<64x32xf32, #tpu.memory_space<vmem>>, %arg14: memref<1x32xf32, #tpu.memory_space<vmem>>, %arg15: memref<1x32xf32, #tpu.memory_space<vmem>>, %arg16: memref<1x32xf32, #tpu.memory_space<vmem>>, %arg17: memref<1x32xf32, #tpu.memory_space<vmem>>, %arg18: memref<1x32xf32, #tpu.memory_space<vmem>>, %arg19: memref<1x8x32xf32, #tpu.memory_space<vmem>>) attributes {dimension_semantics = [#tpu.dimension_semantics<parallel>], iteration_bounds = array<i64: 2>, scalar_prefetch = 0 : i64, scratch_operands = 0 : i64, tpu.core_type = #tpu.core_type<tc>, window_params = [{transform_indices = @transform_0, window_bounds = array<i64: 1, 8, 32>}, {pipeline_mode = #tpu.pipeline_mode<synchronous>, transform_indices = @transform_1, window_bounds = array<i64: 8, 8>}, {pipeline_mode = #tpu.pipeline_mode<synchronous>, transform_indices = @transform_2, window_bounds = array<i64: 32, 32>}, {pipeline_mode = #tpu.pipeline_mode<synchronous>, transform_indices = @transform_3, window_bounds = array<i64: 1, 32>}, {pipeline_mode = #tpu.pipeline_mode<synchronous>, transform_indices = @transform_4, window_bounds = array<i64: 32, 64>}, {pipeline_mode = #tpu.pipeline_mode<synchronous>, transform_indices = @transform_5, window_bounds = array<i64: 1, 64>}, {pipeline_mode = #tpu.pipeline_mode<synchronous>, transform_indices = @transform_6, window_bounds = array<i64: 32, 32>}, {pipeline_mode = #tpu.pipeline_mode<synchronous>, transform_indices = @transform_7, window_bounds = array<i64: 1, 32>}, {pipeline_mode = #tpu.pipeline_mode<synchronous>, transform_indices = @transform_8, window_bounds = array<i64: 1, 32>}, {pipeline_mode = #tpu.pipeline_mode<synchronous>, transform_indices = @transform_9, window_bounds = array<i64: 1, 32>}, {pipeline_mode = #tpu.pipeline_mode<synchronous>, transform_indices = @transform_10, window_bounds = array<i64: 32, 64>}, {pipeline_mode = #tpu.pipeline_mode<synchronous>, transform_indices = @transform_11, window_bounds = array<i64: 1, 64>}, {pipeline_mode = #tpu.pipeline_mode<synchronous>, transform_indices = @transform_12, window_bounds = array<i64: 64, 32>}, {pipeline_mode = #tpu.pipeline_mode<synchronous>, transform_indices = @transform_13, window_bounds = array<i64: 1, 32>}, {pipeline_mode = #tpu.pipeline_mode<synchronous>, transform_indices = @transform_14, window_bounds = array<i64: 1, 32>}, {pipeline_mode = #tpu.pipeline_mode<synchronous>, transform_indices = @transform_15, window_bounds = array<i64: 1, 32>}, {pipeline_mode = #tpu.pipeline_mode<synchronous>, transform_indices = @transform_16, window_bounds = array<i64: 1, 32>}, {pipeline_mode = #tpu.pipeline_mode<synchronous>, transform_indices = @transform_17, window_bounds = array<i64: 1, 32>}, {transform_indices = @transform_18, window_bounds = array<i64: 1, 8, 32>}]} {
    %c0 = arith.constant 0 : index
    %c0_0 = arith.constant 0 : index
    %c0_1 = arith.constant 0 : index
    %0 = vector.load %arg1[%c0, %c0_0, %c0_1] : memref<1x8x32xf32, #tpu.memory_space<vmem>>, vector<1x8x32xf32>
    %1 = vector.shape_cast %0 : vector<1x8x32xf32> to vector<8x32xf32>
    %c0_2 = arith.constant 0 : index
    %c0_3 = arith.constant 0 : index
    %2 = vector.load %arg3[%c0_2, %c0_3] : memref<32x32xf32, #tpu.memory_space<vmem>>, vector<32x32xf32>
    %c0_4 = arith.constant 0 : index
    %c0_5 = arith.constant 0 : index
    %3 = vector.load %arg4[%c0_4, %c0_5] : memref<1x32xf32, #tpu.memory_space<vmem>>, vector<1x32xf32>
    %c0_6 = arith.constant 0 : index
    %c0_7 = arith.constant 0 : index
    %4 = vector.load %arg5[%c0_6, %c0_7] : memref<32x64xf32, #tpu.memory_space<vmem>>, vector<32x64xf32>
    %c0_8 = arith.constant 0 : index
    %c0_9 = arith.constant 0 : index
    %5 = vector.load %arg6[%c0_8, %c0_9] : memref<1x64xf32, #tpu.memory_space<vmem>>, vector<1x64xf32>
    %c0_10 = arith.constant 0 : index
    %c0_11 = arith.constant 0 : index
    %6 = vector.load %arg7[%c0_10, %c0_11] : memref<32x32xf32, #tpu.memory_space<vmem>>, vector<32x32xf32>
    %c0_12 = arith.constant 0 : index
    %c0_13 = arith.constant 0 : index
    %7 = vector.load %arg8[%c0_12, %c0_13] : memref<1x32xf32, #tpu.memory_space<vmem>>, vector<1x32xf32>
    %c0_14 = arith.constant 0 : index
    %c0_15 = arith.constant 0 : index
    %8 = vector.load %arg2[%c0_14, %c0_15] : memref<8x8xf32, #tpu.memory_space<vmem>>, vector<8x8xf32>
    %cst = arith.constant dense<0.000000e+00> : vector<8x32xf32>
    %9 = tpu.matmul %1, %2, %cst {dimension_numbers = #tpu.dot_dimension_numbers<[1], [0], [0], [1], [0, 0, 1, 1], [], []>} : vector<8x32xf32>, vector<32x32xf32>, vector<8x32xf32> -> vector<8x32xf32>
    %10 = vector.broadcast %3 : vector<1x32xf32> to vector<8x32xf32>
    %11 = arith.addf %9, %10 : vector<8x32xf32>
    %cst_16 = arith.constant 0.353553385 : f32
    %12 = vector.broadcast %cst_16 : f32 to vector<8x32xf32>
    %13 = arith.mulf %11, %12 : vector<8x32xf32>
    %cst_17 = arith.constant dense<0.000000e+00> : vector<8x64xf32>
    %14 = tpu.matmul %1, %4, %cst_17 {dimension_numbers = #tpu.dot_dimension_numbers<[1], [0], [0], [1], [0, 0, 1, 1], [], []>} : vector<8x32xf32>, vector<32x64xf32>, vector<8x64xf32> -> vector<8x64xf32>
    %15 = vector.broadcast %5 : vector<1x64xf32> to vector<8x64xf32>
    %16 = arith.addf %14, %15 : vector<8x64xf32>
    %17 = vector.extract_strided_slice %16 {offsets = [0, 0], sizes = [8, 32], strides = [1, 1]} : vector<8x64xf32> to vector<8x32xf32>
    %18 = vector.extract_strided_slice %16 {offsets = [0, 32], sizes = [8, 32], strides = [1, 1]} : vector<8x64xf32> to vector<8x32xf32>
    %19 = vector.extract_strided_slice %13 {offsets = [0, 0], sizes = [8, 8], strides = [1, 1]} : vector<8x32xf32> to vector<8x8xf32>
    %20 = vector.extract_strided_slice %17 {offsets = [0, 0], sizes = [8, 8], strides = [1, 1]} : vector<8x32xf32> to vector<8x8xf32>
    %21 = tpu.transpose %20, [1, 0] : vector<8x8xf32> -> vector<8x8xf32>
    %cst_18 = arith.constant dense<0.000000e+00> : vector<8x8xf32>
    %22 = tpu.matmul %19, %21, %cst_18 {dimension_numbers = #tpu.dot_dimension_numbers<[1], [0], [0], [1], [0, 0, 1, 1], [], []>} : vector<8x8xf32>, vector<8x8xf32>, vector<8x8xf32> -> vector<8x8xf32>
    %23 = arith.addf %22, %8 : vector<8x8xf32>
    %cst_19 = arith.constant dense<0xFF800000> : vector<8xf32>
    %24 = vector.multi_reduction <maximumf>, %23, %cst_19 [1] : vector<8x8xf32> to vector<8xf32>
    %25 = vector.shape_cast %24 : vector<8xf32> to vector<8x1xf32>
    %26 = vector.broadcast %25 : vector<8x1xf32> to vector<8x8xf32>
    %27 = arith.subf %23, %26 : vector<8x8xf32>
    %28 = math.exp %27 : vector<8x8xf32>
    %cst_20 = arith.constant dense<0.000000e+00> : vector<8xf32>
    %29 = vector.multi_reduction <add>, %28, %cst_20 [1] : vector<8x8xf32> to vector<8xf32>
    %30 = vector.shape_cast %29 : vector<8xf32> to vector<8x1xf32>
    %31 = tpu.reciprocal %30 {approx = true} : vector<8x1xf32> -> vector<8x1xf32>
    %32 = vector.broadcast %31 : vector<8x1xf32> to vector<8x8xf32>
    %33 = arith.mulf %28, %32 : vector<8x8xf32>
    %34 = vector.extract_strided_slice %18 {offsets = [0, 0], sizes = [8, 8], strides = [1, 1]} : vector<8x32xf32> to vector<8x8xf32>
    %cst_21 = arith.constant dense<0.000000e+00> : vector<8x8xf32>
    %35 = tpu.matmul %33, %34, %cst_21 {dimension_numbers = #tpu.dot_dimension_numbers<[1], [0], [0], [1], [0, 0, 1, 1], [], []>} : vector<8x8xf32>, vector<8x8xf32>, vector<8x8xf32> -> vector<8x8xf32>
    %36 = vector.extract_strided_slice %13 {offsets = [0, 8], sizes = [8, 8], strides = [1, 1]} : vector<8x32xf32> to vector<8x8xf32>
    %37 = vector.extract_strided_slice %17 {offsets = [0, 8], sizes = [8, 8], strides = [1, 1]} : vector<8x32xf32> to vector<8x8xf32>
    %38 = tpu.transpose %37, [1, 0] : vector<8x8xf32> -> vector<8x8xf32>
    %cst_22 = arith.constant dense<0.000000e+00> : vector<8x8xf32>
    %39 = tpu.matmul %36, %38, %cst_22 {dimension_numbers = #tpu.dot_dimension_numbers<[1], [0], [0], [1], [0, 0, 1, 1], [], []>} : vector<8x8xf32>, vector<8x8xf32>, vector<8x8xf32> -> vector<8x8xf32>
    %40 = arith.addf %39, %8 : vector<8x8xf32>
    %cst_23 = arith.constant dense<0xFF800000> : vector<8xf32>
    %41 = vector.multi_reduction <maximumf>, %40, %cst_23 [1] : vector<8x8xf32> to vector<8xf32>
    %42 = vector.shape_cast %41 : vector<8xf32> to vector<8x1xf32>
    %43 = vector.broadcast %42 : vector<8x1xf32> to vector<8x8xf32>
    %44 = arith.subf %40, %43 : vector<8x8xf32>
    %45 = math.exp %44 : vector<8x8xf32>
    %cst_24 = arith.constant dense<0.000000e+00> : vector<8xf32>
    %46 = vector.multi_reduction <add>, %45, %cst_24 [1] : vector<8x8xf32> to vector<8xf32>
    %47 = vector.shape_cast %46 : vector<8xf32> to vector<8x1xf32>
    %48 = tpu.reciprocal %47 {approx = true} : vector<8x1xf32> -> vector<8x1xf32>
    %49 = vector.broadcast %48 : vector<8x1xf32> to vector<8x8xf32>
    %50 = arith.mulf %45, %49 : vector<8x8xf32>
    %51 = vector.extract_strided_slice %18 {offsets = [0, 8], sizes = [8, 8], strides = [1, 1]} : vector<8x32xf32> to vector<8x8xf32>
    %cst_25 = arith.constant dense<0.000000e+00> : vector<8x8xf32>
    %52 = tpu.matmul %50, %51, %cst_25 {dimension_numbers = #tpu.dot_dimension_numbers<[1], [0], [0], [1], [0, 0, 1, 1], [], []>} : vector<8x8xf32>, vector<8x8xf32>, vector<8x8xf32> -> vector<8x8xf32>
    %53 = vector.extract_strided_slice %13 {offsets = [0, 16], sizes = [8, 8], strides = [1, 1]} : vector<8x32xf32> to vector<8x8xf32>
    %54 = vector.extract_strided_slice %17 {offsets = [0, 16], sizes = [8, 8], strides = [1, 1]} : vector<8x32xf32> to vector<8x8xf32>
    %55 = tpu.transpose %54, [1, 0] : vector<8x8xf32> -> vector<8x8xf32>
    %cst_26 = arith.constant dense<0.000000e+00> : vector<8x8xf32>
    %56 = tpu.matmul %53, %55, %cst_26 {dimension_numbers = #tpu.dot_dimension_numbers<[1], [0], [0], [1], [0, 0, 1, 1], [], []>} : vector<8x8xf32>, vector<8x8xf32>, vector<8x8xf32> -> vector<8x8xf32>
    %57 = arith.addf %56, %8 : vector<8x8xf32>
    %cst_27 = arith.constant dense<0xFF800000> : vector<8xf32>
    %58 = vector.multi_reduction <maximumf>, %57, %cst_27 [1] : vector<8x8xf32> to vector<8xf32>
    %59 = vector.shape_cast %58 : vector<8xf32> to vector<8x1xf32>
    %60 = vector.broadcast %59 : vector<8x1xf32> to vector<8x8xf32>
    %61 = arith.subf %57, %60 : vector<8x8xf32>
    %62 = math.exp %61 : vector<8x8xf32>
    %cst_28 = arith.constant dense<0.000000e+00> : vector<8xf32>
    %63 = vector.multi_reduction <add>, %62, %cst_28 [1] : vector<8x8xf32> to vector<8xf32>
    %64 = vector.shape_cast %63 : vector<8xf32> to vector<8x1xf32>
    %65 = tpu.reciprocal %64 {approx = true} : vector<8x1xf32> -> vector<8x1xf32>
    %66 = vector.broadcast %65 : vector<8x1xf32> to vector<8x8xf32>
    %67 = arith.mulf %62, %66 : vector<8x8xf32>
    %68 = vector.extract_strided_slice %18 {offsets = [0, 16], sizes = [8, 8], strides = [1, 1]} : vector<8x32xf32> to vector<8x8xf32>
    %cst_29 = arith.constant dense<0.000000e+00> : vector<8x8xf32>
    %69 = tpu.matmul %67, %68, %cst_29 {dimension_numbers = #tpu.dot_dimension_numbers<[1], [0], [0], [1], [0, 0, 1, 1], [], []>} : vector<8x8xf32>, vector<8x8xf32>, vector<8x8xf32> -> vector<8x8xf32>
    %70 = vector.extract_strided_slice %13 {offsets = [0, 24], sizes = [8, 8], strides = [1, 1]} : vector<8x32xf32> to vector<8x8xf32>
    %71 = vector.extract_strided_slice %17 {offsets = [0, 24], sizes = [8, 8], strides = [1, 1]} : vector<8x32xf32> to vector<8x8xf32>
    %72 = tpu.transpose %71, [1, 0] : vector<8x8xf32> -> vector<8x8xf32>
    %cst_30 = arith.constant dense<0.000000e+00> : vector<8x8xf32>
    %73 = tpu.matmul %70, %72, %cst_30 {dimension_numbers = #tpu.dot_dimension_numbers<[1], [0], [0], [1], [0, 0, 1, 1], [], []>} : vector<8x8xf32>, vector<8x8xf32>, vector<8x8xf32> -> vector<8x8xf32>
    %74 = arith.addf %73, %8 : vector<8x8xf32>
    %cst_31 = arith.constant dense<0xFF800000> : vector<8xf32>
    %75 = vector.multi_reduction <maximumf>, %74, %cst_31 [1] : vector<8x8xf32> to vector<8xf32>
    %76 = vector.shape_cast %75 : vector<8xf32> to vector<8x1xf32>
    %77 = vector.broadcast %76 : vector<8x1xf32> to vector<8x8xf32>
    %78 = arith.subf %74, %77 : vector<8x8xf32>
    %79 = math.exp %78 : vector<8x8xf32>
    %cst_32 = arith.constant dense<0.000000e+00> : vector<8xf32>
    %80 = vector.multi_reduction <add>, %79, %cst_32 [1] : vector<8x8xf32> to vector<8xf32>
    %81 = vector.shape_cast %80 : vector<8xf32> to vector<8x1xf32>
    %82 = tpu.reciprocal %81 {approx = true} : vector<8x1xf32> -> vector<8x1xf32>
    %83 = vector.broadcast %82 : vector<8x1xf32> to vector<8x8xf32>
    %84 = arith.mulf %79, %83 : vector<8x8xf32>
    %85 = vector.extract_strided_slice %18 {offsets = [0, 24], sizes = [8, 8], strides = [1, 1]} : vector<8x32xf32> to vector<8x8xf32>
    %cst_33 = arith.constant dense<0.000000e+00> : vector<8x8xf32>
    %86 = tpu.matmul %84, %85, %cst_33 {dimension_numbers = #tpu.dot_dimension_numbers<[1], [0], [0], [1], [0, 0, 1, 1], [], []>} : vector<8x8xf32>, vector<8x8xf32>, vector<8x8xf32> -> vector<8x8xf32>
    %87 = tpu.concatenate %35, %52, %69, %86 in 1 : vector<8x8xf32>, vector<8x8xf32>, vector<8x8xf32>, vector<8x8xf32> -> vector<8x32xf32>
    %cst_34 = arith.constant dense<0.000000e+00> : vector<8x32xf32>
    %88 = tpu.matmul %87, %6, %cst_34 {dimension_numbers = #tpu.dot_dimension_numbers<[1], [0], [0], [1], [0, 0, 1, 1], [], []>} : vector<8x32xf32>, vector<32x32xf32>, vector<8x32xf32> -> vector<8x32xf32>
    %89 = vector.broadcast %7 : vector<1x32xf32> to vector<8x32xf32>
    %90 = arith.addf %88, %89 : vector<8x32xf32>
    %91 = arith.addf %1, %90 : vector<8x32xf32>
    %c0_35 = arith.constant 0 : index
    %c0_36 = arith.constant 0 : index
    %92 = vector.load %arg9[%c0_35, %c0_36] : memref<1x32xf32, #tpu.memory_space<vmem>>, vector<1x32xf32>
    %c0_37 = arith.constant 0 : index
    %c0_38 = arith.constant 0 : index
    %93 = vector.load %arg10[%c0_37, %c0_38] : memref<1x32xf32, #tpu.memory_space<vmem>>, vector<1x32xf32>
    %cst_39 = arith.constant dense<0.000000e+00> : vector<8xf32>
    %94 = vector.multi_reduction <add>, %91, %cst_39 [1] : vector<8x32xf32> to vector<8xf32>
    %95 = vector.shape_cast %94 : vector<8xf32> to vector<8x1xf32>
    %cst_40 = arith.constant 3.200000e+01 : f32
    %96 = vector.broadcast %cst_40 : f32 to vector<8x1xf32>
    %97 = arith.divf %95, %96 : vector<8x1xf32>
    %98 = vector.broadcast %97 : vector<8x1xf32> to vector<8x32xf32>
    %99 = arith.subf %91, %98 : vector<8x32xf32>
    %100 = arith.mulf %99, %99 : vector<8x32xf32>
    %cst_41 = arith.constant dense<0.000000e+00> : vector<8xf32>
    %101 = vector.multi_reduction <add>, %100, %cst_41 [1] : vector<8x32xf32> to vector<8xf32>
    %102 = vector.shape_cast %101 : vector<8xf32> to vector<8x1xf32>
    %cst_42 = arith.constant 3.200000e+01 : f32
    %103 = vector.broadcast %cst_42 : f32 to vector<8x1xf32>
    %104 = arith.divf %102, %103 : vector<8x1xf32>
    %105 = vector.broadcast %97 : vector<8x1xf32> to vector<8x32xf32>
    %106 = arith.subf %91, %105 : vector<8x32xf32>
    %cst_43 = arith.constant 9.99999974E-6 : f32
    %107 = vector.broadcast %cst_43 : f32 to vector<8x1xf32>
    %108 = arith.addf %104, %107 : vector<8x1xf32>
    %109 = math.rsqrt %108 : vector<8x1xf32>
    %110 = vector.broadcast %109 : vector<8x1xf32> to vector<8x32xf32>
    %111 = arith.mulf %106, %110 : vector<8x32xf32>
    %112 = vector.broadcast %92 : vector<1x32xf32> to vector<8x32xf32>
    %113 = arith.mulf %111, %112 : vector<8x32xf32>
    %114 = vector.broadcast %93 : vector<1x32xf32> to vector<8x32xf32>
    %115 = arith.addf %113, %114 : vector<8x32xf32>
    %c0_44 = arith.constant 0 : index
    %c0_45 = arith.constant 0 : index
    %116 = vector.load %arg11[%c0_44, %c0_45] : memref<32x64xf32, #tpu.memory_space<vmem>>, vector<32x64xf32>
    %c0_46 = arith.constant 0 : index
    %c0_47 = arith.constant 0 : index
    %117 = vector.load %arg12[%c0_46, %c0_47] : memref<1x64xf32, #tpu.memory_space<vmem>>, vector<1x64xf32>
    %c0_48 = arith.constant 0 : index
    %c0_49 = arith.constant 0 : index
    %118 = vector.load %arg13[%c0_48, %c0_49] : memref<64x32xf32, #tpu.memory_space<vmem>>, vector<64x32xf32>
    %c0_50 = arith.constant 0 : index
    %c0_51 = arith.constant 0 : index
    %119 = vector.load %arg14[%c0_50, %c0_51] : memref<1x32xf32, #tpu.memory_space<vmem>>, vector<1x32xf32>
    %cst_52 = arith.constant dense<0.000000e+00> : vector<8x64xf32>
    %120 = tpu.matmul %115, %116, %cst_52 {dimension_numbers = #tpu.dot_dimension_numbers<[1], [0], [0], [1], [0, 0, 1, 1], [], []>} : vector<8x32xf32>, vector<32x64xf32>, vector<8x64xf32> -> vector<8x64xf32>
    %121 = vector.broadcast %117 : vector<1x64xf32> to vector<8x64xf32>
    %122 = arith.addf %120, %121 : vector<8x64xf32>
    %cst_53 = arith.constant 0.000000e+00 : f32
    %123 = vector.broadcast %cst_53 : f32 to vector<8x64xf32>
    %124 = arith.maximumf %122, %123 : vector<8x64xf32>
    %cst_54 = arith.constant dense<0.000000e+00> : vector<8x32xf32>
    %125 = tpu.matmul %124, %118, %cst_54 {dimension_numbers = #tpu.dot_dimension_numbers<[1], [0], [0], [1], [0, 0, 1, 1], [], []>} : vector<8x64xf32>, vector<64x32xf32>, vector<8x32xf32> -> vector<8x32xf32>
    %126 = vector.broadcast %119 : vector<1x32xf32> to vector<8x32xf32>
    %127 = arith.addf %125, %126 : vector<8x32xf32>
    %128 = arith.addf %115, %127 : vector<8x32xf32>
    %c0_55 = arith.constant 0 : index
    %c0_56 = arith.constant 0 : index
    %129 = vector.load %arg15[%c0_55, %c0_56] : memref<1x32xf32, #tpu.memory_space<vmem>>, vector<1x32xf32>
    %c0_57 = arith.constant 0 : index
    %c0_58 = arith.constant 0 : index
    %130 = vector.load %arg16[%c0_57, %c0_58] : memref<1x32xf32, #tpu.memory_space<vmem>>, vector<1x32xf32>
    %cst_59 = arith.constant dense<0.000000e+00> : vector<8xf32>
    %131 = vector.multi_reduction <add>, %128, %cst_59 [1] : vector<8x32xf32> to vector<8xf32>
    %132 = vector.shape_cast %131 : vector<8xf32> to vector<8x1xf32>
    %cst_60 = arith.constant 3.200000e+01 : f32
    %133 = vector.broadcast %cst_60 : f32 to vector<8x1xf32>
    %134 = arith.divf %132, %133 : vector<8x1xf32>
    %135 = vector.broadcast %134 : vector<8x1xf32> to vector<8x32xf32>
    %136 = arith.subf %128, %135 : vector<8x32xf32>
    %137 = arith.mulf %136, %136 : vector<8x32xf32>
    %cst_61 = arith.constant dense<0.000000e+00> : vector<8xf32>
    %138 = vector.multi_reduction <add>, %137, %cst_61 [1] : vector<8x32xf32> to vector<8xf32>
    %139 = vector.shape_cast %138 : vector<8xf32> to vector<8x1xf32>
    %cst_62 = arith.constant 3.200000e+01 : f32
    %140 = vector.broadcast %cst_62 : f32 to vector<8x1xf32>
    %141 = arith.divf %139, %140 : vector<8x1xf32>
    %142 = vector.broadcast %134 : vector<8x1xf32> to vector<8x32xf32>
    %143 = arith.subf %128, %142 : vector<8x32xf32>
    %cst_63 = arith.constant 9.99999974E-6 : f32
    %144 = vector.broadcast %cst_63 : f32 to vector<8x1xf32>
    %145 = arith.addf %141, %144 : vector<8x1xf32>
    %146 = math.rsqrt %145 : vector<8x1xf32>
    %147 = vector.broadcast %146 : vector<8x1xf32> to vector<8x32xf32>
    %148 = arith.mulf %143, %147 : vector<8x32xf32>
    %149 = vector.broadcast %129 : vector<1x32xf32> to vector<8x32xf32>
    %150 = arith.mulf %148, %149 : vector<8x32xf32>
    %151 = vector.broadcast %130 : vector<1x32xf32> to vector<8x32xf32>
    %152 = arith.addf %150, %151 : vector<8x32xf32>
    %c0_64 = arith.constant 0 : index
    %c0_65 = arith.constant 0 : index
    %153 = vector.load %arg17[%c0_64, %c0_65] : memref<1x32xf32, #tpu.memory_space<vmem>>, vector<1x32xf32>
    %c0_66 = arith.constant 0 : index
    %c0_67 = arith.constant 0 : index
    %154 = vector.load %arg18[%c0_66, %c0_67] : memref<1x32xf32, #tpu.memory_space<vmem>>, vector<1x32xf32>
    %cst_68 = arith.constant dense<0.000000e+00> : vector<8xf32>
    %155 = vector.multi_reduction <add>, %152, %cst_68 [1] : vector<8x32xf32> to vector<8xf32>
    %156 = vector.shape_cast %155 : vector<8xf32> to vector<8x1xf32>
    %cst_69 = arith.constant 3.200000e+01 : f32
    %157 = vector.broadcast %cst_69 : f32 to vector<8x1xf32>
    %158 = arith.divf %156, %157 : vector<8x1xf32>
    %159 = vector.broadcast %158 : vector<8x1xf32> to vector<8x32xf32>
    %160 = arith.subf %152, %159 : vector<8x32xf32>
    %161 = arith.mulf %160, %160 : vector<8x32xf32>
    %cst_70 = arith.constant dense<0.000000e+00> : vector<8xf32>
    %162 = vector.multi_reduction <add>, %161, %cst_70 [1] : vector<8x32xf32> to vector<8xf32>
    %163 = vector.shape_cast %162 : vector<8xf32> to vector<8x1xf32>
    %cst_71 = arith.constant 3.200000e+01 : f32
    %164 = vector.broadcast %cst_71 : f32 to vector<8x1xf32>
    %165 = arith.divf %163, %164 : vector<8x1xf32>
    %166 = vector.broadcast %158 : vector<8x1xf32> to vector<8x32xf32>
    %167 = arith.subf %152, %166 : vector<8x32xf32>
    %cst_72 = arith.constant 9.99999974E-6 : f32
    %168 = vector.broadcast %cst_72 : f32 to vector<8x1xf32>
    %169 = arith.addf %165, %168 : vector<8x1xf32>
    %170 = math.rsqrt %169 : vector<8x1xf32>
    %171 = vector.broadcast %170 : vector<8x1xf32> to vector<8x32xf32>
    %172 = arith.mulf %167, %171 : vector<8x32xf32>
    %173 = vector.broadcast %153 : vector<1x32xf32> to vector<8x32xf32>
    %174 = arith.mulf %172, %173 : vector<8x32xf32>
    %175 = vector.broadcast %154 : vector<1x32xf32> to vector<8x32xf32>
    %176 = arith.addf %174, %175 : vector<8x32xf32>
    %c0_73 = arith.constant 0 : index
    %c0_74 = arith.constant 0 : index
    %c0_75 = arith.constant 0 : index
    %177 = vector.load %arg19[%c0_73, %c0_74, %c0_75] : memref<1x8x32xf32, #tpu.memory_space<vmem>>, vector<1x8x32xf32>
    %178 = vector.shape_cast %177 : vector<1x8x32xf32> to vector<8x32xf32>
    %179 = vector.shape_cast %176 : vector<8x32xf32> to vector<1x8x32xf32>
    tpu.vector_store %arg19[%c0_73, %c0_74, %c0_75], %179 {strides = array<i32>} : memref<1x8x32xf32, #tpu.memory_space<vmem>>, vector<1x8x32xf32>,
    return
  }
  func.func @transform_0(%arg0: i32) -> (i32, i32, i32) {
    %c0_i32 = arith.constant 0 : i32
    %c0_i32_0 = arith.constant 0 : i32
    %c0_i32_1 = arith.constant 0 : i32
    return %arg0, %c0_i32, %c0_i32_0 : i32, i32, i32
  }
  func.func @transform_1(%arg0: i32) -> (i32, i32) {
    %c0_i32 = arith.constant 0 : i32
    %c0_i32_0 = arith.constant 0 : i32
    %c0_i32_1 = arith.constant 0 : i32
    return %c0_i32, %c0_i32_0 : i32, i32
  }
  func.func @transform_2(%arg0: i32) -> (i32, i32) {
    %c0_i32 = arith.constant 0 : i32
    %c0_i32_0 = arith.constant 0 : i32
    %c0_i32_1 = arith.constant 0 : i32
    return %c0_i32, %c0_i32_0 : i32, i32
  }
  func.func @transform_3(%arg0: i32) -> (i32, i32) {
    %c0_i32 = arith.constant 0 : i32
    %c0_i32_0 = arith.constant 0 : i32
    %c0_i32_1 = arith.constant 0 : i32
    return %c0_i32, %c0_i32_0 : i32, i32
  }
  func.func @transform_4(%arg0: i32) -> (i32, i32) {
    %c0_i32 = arith.constant 0 : i32
    %c0_i32_0 = arith.constant 0 : i32
    %c0_i32_1 = arith.constant 0 : i32
    return %c0_i32, %c0_i32_0 : i32, i32
  }
  func.func @transform_5(%arg0: i32) -> (i32, i32) {
    %c0_i32 = arith.constant 0 : i32
    %c0_i32_0 = arith.constant 0 : i32
    %c0_i32_1 = arith.constant 0 : i32
    return %c0_i32, %c0_i32_0 : i32, i32
  }
  func.func @transform_6(%arg0: i32) -> (i32, i32) {
    %c0_i32 = arith.constant 0 : i32
    %c0_i32_0 = arith.constant 0 : i32
    %c0_i32_1 = arith.constant 0 : i32
    return %c0_i32, %c0_i32_0 : i32, i32
  }
  func.func @transform_7(%arg0: i32) -> (i32, i32) {
    %c0_i32 = arith.constant 0 : i32
    %c0_i32_0 = arith.constant 0 : i32
    %c0_i32_1 = arith.constant 0 : i32
    return %c0_i32, %c0_i32_0 : i32, i32
  }
  func.func @transform_8(%arg0: i32) -> (i32, i32) {
    %c0_i32 = arith.constant 0 : i32
    %c0_i32_0 = arith.constant 0 : i32
    %c0_i32_1 = arith.constant 0 : i32
    return %c0_i32, %c0_i32_0 : i32, i32
  }
  func.func @transform_9(%arg0: i32) -> (i32, i32) {
    %c0_i32 = arith.constant 0 : i32
    %c0_i32_0 = arith.constant 0 : i32
    %c0_i32_1 = arith.constant 0 : i32
    return %c0_i32, %c0_i32_0 : i32, i32
  }
  func.func @transform_10(%arg0: i32) -> (i32, i32) {
    %c0_i32 = arith.constant 0 : i32
    %c0_i32_0 = arith.constant 0 : i32
    %c0_i32_1 = arith.constant 0 : i32
    return %c0_i32, %c0_i32_0 : i32, i32
  }
  func.func @transform_11(%arg0: i32) -> (i32, i32) {
    %c0_i32 = arith.constant 0 : i32
    %c0_i32_0 = arith.constant 0 : i32
    %c0_i32_1 = arith.constant 0 : i32
    return %c0_i32, %c0_i32_0 : i32, i32
  }
  func.func @transform_12(%arg0: i32) -> (i32, i32) {
    %c0_i32 = arith.constant 0 : i32
    %c0_i32_0 = arith.constant 0 : i32
    %c0_i32_1 = arith.constant 0 : i32
    return %c0_i32, %c0_i32_0 : i32, i32
  }
  func.func @transform_13(%arg0: i32) -> (i32, i32) {
    %c0_i32 = arith.constant 0 : i32
    %c0_i32_0 = arith.constant 0 : i32
    %c0_i32_1 = arith.constant 0 : i32
    return %c0_i32, %c0_i32_0 : i32, i32
  }
  func.func @transform_14(%arg0: i32) -> (i32, i32) {
    %c0_i32 = arith.constant 0 : i32
    %c0_i32_0 = arith.constant 0 : i32
    %c0_i32_1 = arith.constant 0 : i32
    return %c0_i32, %c0_i32_0 : i32, i32
  }
  func.func @transform_15(%arg0: i32) -> (i32, i32) {
    %c0_i32 = arith.constant 0 : i32
    %c0_i32_0 = arith.constant 0 : i32
    %c0_i32_1 = arith.constant 0 : i32
    return %c0_i32, %c0_i32_0 : i32, i32
  }
  func.func @transform_16(%arg0: i32) -> (i32, i32) {
    %c0_i32 = arith.constant 0 : i32
    %c0_i32_0 = arith.constant 0 : i32
    %c0_i32_1 = arith.constant 0 : i32
    return %c0_i32, %c0_i32_0 : i32, i32
  }
  func.func @transform_17(%arg0: i32) -> (i32, i32) {
    %c0_i32 = arith.constant 0 : i32
    %c0_i32_0 = arith.constant 0 : i32
    %c0_i32_1 = arith.constant 0 : i32
    return %c0_i32, %c0_i32_0 : i32, i32
  }
  func.func @transform_18(%arg0: i32) -> (i32, i32, i32) {
    %c0_i32 = arith.constant 0 : i32
    %c0_i32_0 = arith.constant 0 : i32
    %c0_i32_1 = arith.constant 0 : i32
    return %arg0, %c0_i32, %c0_i32_0 : i32, i32, i32
  }
}

module attributes {stable_mosaic.version = 11 : i64} {
  func.func @_encode_pe_kernel(%arg0: i32, %arg1: memref<1x8x5xf32, #tpu.memory_space<vmem>>, %arg2: memref<5x32xf32, #tpu.memory_space<vmem>>, %arg3: memref<1x32xf32, #tpu.memory_space<vmem>>, %arg4: memref<8x32xf32, #tpu.memory_space<vmem>>, %arg5: memref<1x8x32xf32, #tpu.memory_space<vmem>>) attributes {dimension_semantics = [#tpu.dimension_semantics<parallel>], iteration_bounds = array<i64: 2>, scalar_prefetch = 0 : i64, scratch_operands = 0 : i64, tpu.core_type = #tpu.core_type<tc>, window_params = [{transform_indices = @transform_0, window_bounds = array<i64: 1, 8, 5>}, {pipeline_mode = #tpu.pipeline_mode<synchronous>, transform_indices = @transform_1, window_bounds = array<i64: 5, 32>}, {pipeline_mode = #tpu.pipeline_mode<synchronous>, transform_indices = @transform_2, window_bounds = array<i64: 1, 32>}, {pipeline_mode = #tpu.pipeline_mode<synchronous>, transform_indices = @transform_3, window_bounds = array<i64: 8, 32>}, {transform_indices = @transform_4, window_bounds = array<i64: 1, 8, 32>}]} {
    %c0 = arith.constant 0 : index
    %c0_0 = arith.constant 0 : index
    %c0_1 = arith.constant 0 : index
    %0 = vector.load %arg1[%c0, %c0_0, %c0_1] : memref<1x8x5xf32, #tpu.memory_space<vmem>>, vector<1x8x5xf32>
    %1 = vector.shape_cast %0 : vector<1x8x5xf32> to vector<8x5xf32>
    %c0_2 = arith.constant 0 : index
    %c0_3 = arith.constant 0 : index
    %2 = vector.load %arg2[%c0_2, %c0_3] : memref<5x32xf32, #tpu.memory_space<vmem>>, vector<5x32xf32>
    %cst = arith.constant dense<0.000000e+00> : vector<8x32xf32>
    %3 = tpu.matmul %1, %2, %cst {dimension_numbers = #tpu.dot_dimension_numbers<[1], [0], [0], [1], [0, 0, 1, 1], [], []>} : vector<8x5xf32>, vector<5x32xf32>, vector<8x32xf32> -> vector<8x32xf32>
    %c0_4 = arith.constant 0 : index
    %c0_5 = arith.constant 0 : index
    %4 = vector.load %arg3[%c0_4, %c0_5] : memref<1x32xf32, #tpu.memory_space<vmem>>, vector<1x32xf32>
    %5 = vector.broadcast %4 : vector<1x32xf32> to vector<8x32xf32>
    %6 = arith.addf %3, %5 : vector<8x32xf32>
    %c0_6 = arith.constant 0 : index
    %c0_7 = arith.constant 0 : index
    %7 = vector.load %arg4[%c0_6, %c0_7] : memref<8x32xf32, #tpu.memory_space<vmem>>, vector<8x32xf32>
    %8 = arith.addf %6, %7 : vector<8x32xf32>
    %c0_8 = arith.constant 0 : index
    %c0_9 = arith.constant 0 : index
    %c0_10 = arith.constant 0 : index
    %9 = vector.load %arg5[%c0_8, %c0_9, %c0_10] : memref<1x8x32xf32, #tpu.memory_space<vmem>>, vector<1x8x32xf32>
    %10 = vector.shape_cast %9 : vector<1x8x32xf32> to vector<8x32xf32>
    %11 = vector.shape_cast %8 : vector<8x32xf32> to vector<1x8x32xf32>
    tpu.vector_store %arg5[%c0_8, %c0_9, %c0_10], %11 {strides = array<i32>} : memref<1x8x32xf32, #tpu.memory_space<vmem>>, vector<1x8x32xf32>,
    return
  }
  func.func @transform_0(%arg0: i32) -> (i32, i32, i32) {
    %c0_i32 = arith.constant 0 : i32
    %c0_i32_0 = arith.constant 0 : i32
    %c0_i32_1 = arith.constant 0 : i32
    return %arg0, %c0_i32, %c0_i32_0 : i32, i32, i32
  }
  func.func @transform_1(%arg0: i32) -> (i32, i32) {
    %c0_i32 = arith.constant 0 : i32
    %c0_i32_0 = arith.constant 0 : i32
    %c0_i32_1 = arith.constant 0 : i32
    return %c0_i32, %c0_i32_0 : i32, i32
  }
  func.func @transform_2(%arg0: i32) -> (i32, i32) {
    %c0_i32 = arith.constant 0 : i32
    %c0_i32_0 = arith.constant 0 : i32
    %c0_i32_1 = arith.constant 0 : i32
    return %c0_i32, %c0_i32_0 : i32, i32
  }
  func.func @transform_3(%arg0: i32) -> (i32, i32) {
    %c0_i32 = arith.constant 0 : i32
    %c0_i32_0 = arith.constant 0 : i32
    %c0_i32_1 = arith.constant 0 : i32
    return %c0_i32, %c0_i32_0 : i32, i32
  }
  func.func @transform_4(%arg0: i32) -> (i32, i32, i32) {
    %c0_i32 = arith.constant 0 : i32
    %c0_i32_0 = arith.constant 0 : i32
    %c0_i32_1 = arith.constant 0 : i32
    return %arg0, %c0_i32, %c0_i32_0 : i32, i32, i32
  }
}

module attributes {stable_mosaic.version = 11 : i64} {
  func.func @_decoder_layer_kernel(%arg0: i32, %arg1: memref<1x8x32xf32, #tpu.memory_space<vmem>>, %arg2: memref<1x8x32xf32, #tpu.memory_space<vmem>>, %arg3: memref<8x8xf32, #tpu.memory_space<vmem>>, %arg4: memref<32x32xf32, #tpu.memory_space<vmem>>, %arg5: memref<1x32xf32, #tpu.memory_space<vmem>>, %arg6: memref<32x64xf32, #tpu.memory_space<vmem>>, %arg7: memref<1x64xf32, #tpu.memory_space<vmem>>, %arg8: memref<32x32xf32, #tpu.memory_space<vmem>>, %arg9: memref<1x32xf32, #tpu.memory_space<vmem>>, %arg10: memref<1x32xf32, #tpu.memory_space<vmem>>, %arg11: memref<1x32xf32, #tpu.memory_space<vmem>>, %arg12: memref<32x32xf32, #tpu.memory_space<vmem>>, %arg13: memref<1x32xf32, #tpu.memory_space<vmem>>, %arg14: memref<32x64xf32, #tpu.memory_space<vmem>>, %arg15: memref<1x64xf32, #tpu.memory_space<vmem>>, %arg16: memref<32x32xf32, #tpu.memory_space<vmem>>, %arg17: memref<1x32xf32, #tpu.memory_space<vmem>>, %arg18: memref<1x32xf32, #tpu.memory_space<vmem>>, %arg19: memref<1x32xf32, #tpu.memory_space<vmem>>, %arg20: memref<32x64xf32, #tpu.memory_space<vmem>>, %arg21: memref<1x64xf32, #tpu.memory_space<vmem>>, %arg22: memref<64x32xf32, #tpu.memory_space<vmem>>, %arg23: memref<1x32xf32, #tpu.memory_space<vmem>>, %arg24: memref<1x32xf32, #tpu.memory_space<vmem>>, %arg25: memref<1x32xf32, #tpu.memory_space<vmem>>, %arg26: memref<1x8x32xf32, #tpu.memory_space<vmem>>) attributes {dimension_semantics = [#tpu.dimension_semantics<parallel>], iteration_bounds = array<i64: 2>, scalar_prefetch = 0 : i64, scratch_operands = 0 : i64, tpu.core_type = #tpu.core_type<tc>, window_params = [{transform_indices = @transform_0, window_bounds = array<i64: 1, 8, 32>}, {transform_indices = @transform_1, window_bounds = array<i64: 1, 8, 32>}, {pipeline_mode = #tpu.pipeline_mode<synchronous>, transform_indices = @transform_2, window_bounds = array<i64: 8, 8>}, {pipeline_mode = #tpu.pipeline_mode<synchronous>, transform_indices = @transform_3, window_bounds = array<i64: 32, 32>}, {pipeline_mode = #tpu.pipeline_mode<synchronous>, transform_indices = @transform_4, window_bounds = array<i64: 1, 32>}, {pipeline_mode = #tpu.pipeline_mode<synchronous>, transform_indices = @transform_5, window_bounds = array<i64: 32, 64>}, {pipeline_mode = #tpu.pipeline_mode<synchronous>, transform_indices = @transform_6, window_bounds = array<i64: 1, 64>}, {pipeline_mode = #tpu.pipeline_mode<synchronous>, transform_indices = @transform_7, window_bounds = array<i64: 32, 32>}, {pipeline_mode = #tpu.pipeline_mode<synchronous>, transform_indices = @transform_8, window_bounds = array<i64: 1, 32>}, {pipeline_mode = #tpu.pipeline_mode<synchronous>, transform_indices = @transform_9, window_bounds = array<i64: 1, 32>}, {pipeline_mode = #tpu.pipeline_mode<synchronous>, transform_indices = @transform_10, window_bounds = array<i64: 1, 32>}, {pipeline_mode = #tpu.pipeline_mode<synchronous>, transform_indices = @transform_11, window_bounds = array<i64: 32, 32>}, {pipeline_mode = #tpu.pipeline_mode<synchronous>, transform_indices = @transform_12, window_bounds = array<i64: 1, 32>}, {pipeline_mode = #tpu.pipeline_mode<synchronous>, transform_indices = @transform_13, window_bounds = array<i64: 32, 64>}, {pipeline_mode = #tpu.pipeline_mode<synchronous>, transform_indices = @transform_14, window_bounds = array<i64: 1, 64>}, {pipeline_mode = #tpu.pipeline_mode<synchronous>, transform_indices = @transform_15, window_bounds = array<i64: 32, 32>}, {pipeline_mode = #tpu.pipeline_mode<synchronous>, transform_indices = @transform_16, window_bounds = array<i64: 1, 32>}, {pipeline_mode = #tpu.pipeline_mode<synchronous>, transform_indices = @transform_17, window_bounds = array<i64: 1, 32>}, {pipeline_mode = #tpu.pipeline_mode<synchronous>, transform_indices = @transform_18, window_bounds = array<i64: 1, 32>}, {pipeline_mode = #tpu.pipeline_mode<synchronous>, transform_indices = @transform_19, window_bounds = array<i64: 32, 64>}, {pipeline_mode = #tpu.pipeline_mode<synchronous>, transform_indices = @transform_20, window_bounds = array<i64: 1, 64>}, {pipeline_mode = #tpu.pipeline_mode<synchronous>, transform_indices = @transform_21, window_bounds = array<i64: 64, 32>}, {pipeline_mode = #tpu.pipeline_mode<synchronous>, transform_indices = @transform_22, window_bounds = array<i64: 1, 32>}, {pipeline_mode = #tpu.pipeline_mode<synchronous>, transform_indices = @transform_23, window_bounds = array<i64: 1, 32>}, {pipeline_mode = #tpu.pipeline_mode<synchronous>, transform_indices = @transform_24, window_bounds = array<i64: 1, 32>}, {transform_indices = @transform_25, window_bounds = array<i64: 1, 8, 32>}]} {
    %c0 = arith.constant 0 : index
    %c0_0 = arith.constant 0 : index
    %c0_1 = arith.constant 0 : index
    %0 = vector.load %arg1[%c0, %c0_0, %c0_1] : memref<1x8x32xf32, #tpu.memory_space<vmem>>, vector<1x8x32xf32>
    %1 = vector.shape_cast %0 : vector<1x8x32xf32> to vector<8x32xf32>
    %c0_2 = arith.constant 0 : index
    %c0_3 = arith.constant 0 : index
    %c0_4 = arith.constant 0 : index
    %2 = vector.load %arg2[%c0_2, %c0_3, %c0_4] : memref<1x8x32xf32, #tpu.memory_space<vmem>>, vector<1x8x32xf32>
    %3 = vector.shape_cast %2 : vector<1x8x32xf32> to vector<8x32xf32>
    %c0_5 = arith.constant 0 : index
    %c0_6 = arith.constant 0 : index
    %4 = vector.load %arg4[%c0_5, %c0_6] : memref<32x32xf32, #tpu.memory_space<vmem>>, vector<32x32xf32>
    %c0_7 = arith.constant 0 : index
    %c0_8 = arith.constant 0 : index
    %5 = vector.load %arg5[%c0_7, %c0_8] : memref<1x32xf32, #tpu.memory_space<vmem>>, vector<1x32xf32>
    %c0_9 = arith.constant 0 : index
    %c0_10 = arith.constant 0 : index
    %6 = vector.load %arg6[%c0_9, %c0_10] : memref<32x64xf32, #tpu.memory_space<vmem>>, vector<32x64xf32>
    %c0_11 = arith.constant 0 : index
    %c0_12 = arith.constant 0 : index
    %7 = vector.load %arg7[%c0_11, %c0_12] : memref<1x64xf32, #tpu.memory_space<vmem>>, vector<1x64xf32>
    %c0_13 = arith.constant 0 : index
    %c0_14 = arith.constant 0 : index
    %8 = vector.load %arg8[%c0_13, %c0_14] : memref<32x32xf32, #tpu.memory_space<vmem>>, vector<32x32xf32>
    %c0_15 = arith.constant 0 : index
    %c0_16 = arith.constant 0 : index
    %9 = vector.load %arg9[%c0_15, %c0_16] : memref<1x32xf32, #tpu.memory_space<vmem>>, vector<1x32xf32>
    %c0_17 = arith.constant 0 : index
    %c0_18 = arith.constant 0 : index
    %10 = vector.load %arg3[%c0_17, %c0_18] : memref<8x8xf32, #tpu.memory_space<vmem>>, vector<8x8xf32>
    %cst = arith.constant dense<0.000000e+00> : vector<8x32xf32>
    %11 = tpu.matmul %1, %4, %cst {dimension_numbers = #tpu.dot_dimension_numbers<[1], [0], [0], [1], [0, 0, 1, 1], [], []>} : vector<8x32xf32>, vector<32x32xf32>, vector<8x32xf32> -> vector<8x32xf32>
    %12 = vector.broadcast %5 : vector<1x32xf32> to vector<8x32xf32>
    %13 = arith.addf %11, %12 : vector<8x32xf32>
    %cst_19 = arith.constant 0.353553385 : f32
    %14 = vector.broadcast %cst_19 : f32 to vector<8x32xf32>
    %15 = arith.mulf %13, %14 : vector<8x32xf32>
    %cst_20 = arith.constant dense<0.000000e+00> : vector<8x64xf32>
    %16 = tpu.matmul %1, %6, %cst_20 {dimension_numbers = #tpu.dot_dimension_numbers<[1], [0], [0], [1], [0, 0, 1, 1], [], []>} : vector<8x32xf32>, vector<32x64xf32>, vector<8x64xf32> -> vector<8x64xf32>
    %17 = vector.broadcast %7 : vector<1x64xf32> to vector<8x64xf32>
    %18 = arith.addf %16, %17 : vector<8x64xf32>
    %19 = vector.extract_strided_slice %18 {offsets = [0, 0], sizes = [8, 32], strides = [1, 1]} : vector<8x64xf32> to vector<8x32xf32>
    %20 = vector.extract_strided_slice %18 {offsets = [0, 32], sizes = [8, 32], strides = [1, 1]} : vector<8x64xf32> to vector<8x32xf32>
    %21 = vector.extract_strided_slice %15 {offsets = [0, 0], sizes = [8, 8], strides = [1, 1]} : vector<8x32xf32> to vector<8x8xf32>
    %22 = vector.extract_strided_slice %19 {offsets = [0, 0], sizes = [8, 8], strides = [1, 1]} : vector<8x32xf32> to vector<8x8xf32>
    %23 = tpu.transpose %22, [1, 0] : vector<8x8xf32> -> vector<8x8xf32>
    %cst_21 = arith.constant dense<0.000000e+00> : vector<8x8xf32>
    %24 = tpu.matmul %21, %23, %cst_21 {dimension_numbers = #tpu.dot_dimension_numbers<[1], [0], [0], [1], [0, 0, 1, 1], [], []>} : vector<8x8xf32>, vector<8x8xf32>, vector<8x8xf32> -> vector<8x8xf32>
    %25 = arith.addf %24, %10 : vector<8x8xf32>
    %cst_22 = arith.constant dense<0xFF800000> : vector<8xf32>
    %26 = vector.multi_reduction <maximumf>, %25, %cst_22 [1] : vector<8x8xf32> to vector<8xf32>
    %27 = vector.shape_cast %26 : vector<8xf32> to vector<8x1xf32>
    %28 = vector.broadcast %27 : vector<8x1xf32> to vector<8x8xf32>
    %29 = arith.subf %25, %28 : vector<8x8xf32>
    %30 = math.exp %29 : vector<8x8xf32>
    %cst_23 = arith.constant dense<0.000000e+00> : vector<8xf32>
    %31 = vector.multi_reduction <add>, %30, %cst_23 [1] : vector<8x8xf32> to vector<8xf32>
    %32 = vector.shape_cast %31 : vector<8xf32> to vector<8x1xf32>
    %33 = tpu.reciprocal %32 {approx = true} : vector<8x1xf32> -> vector<8x1xf32>
    %34 = vector.broadcast %33 : vector<8x1xf32> to vector<8x8xf32>
    %35 = arith.mulf %30, %34 : vector<8x8xf32>
    %36 = vector.extract_strided_slice %20 {offsets = [0, 0], sizes = [8, 8], strides = [1, 1]} : vector<8x32xf32> to vector<8x8xf32>
    %cst_24 = arith.constant dense<0.000000e+00> : vector<8x8xf32>
    %37 = tpu.matmul %35, %36, %cst_24 {dimension_numbers = #tpu.dot_dimension_numbers<[1], [0], [0], [1], [0, 0, 1, 1], [], []>} : vector<8x8xf32>, vector<8x8xf32>, vector<8x8xf32> -> vector<8x8xf32>
    %38 = vector.extract_strided_slice %15 {offsets = [0, 8], sizes = [8, 8], strides = [1, 1]} : vector<8x32xf32> to vector<8x8xf32>
    %39 = vector.extract_strided_slice %19 {offsets = [0, 8], sizes = [8, 8], strides = [1, 1]} : vector<8x32xf32> to vector<8x8xf32>
    %40 = tpu.transpose %39, [1, 0] : vector<8x8xf32> -> vector<8x8xf32>
    %cst_25 = arith.constant dense<0.000000e+00> : vector<8x8xf32>
    %41 = tpu.matmul %38, %40, %cst_25 {dimension_numbers = #tpu.dot_dimension_numbers<[1], [0], [0], [1], [0, 0, 1, 1], [], []>} : vector<8x8xf32>, vector<8x8xf32>, vector<8x8xf32> -> vector<8x8xf32>
    %42 = arith.addf %41, %10 : vector<8x8xf32>
    %cst_26 = arith.constant dense<0xFF800000> : vector<8xf32>
    %43 = vector.multi_reduction <maximumf>, %42, %cst_26 [1] : vector<8x8xf32> to vector<8xf32>
    %44 = vector.shape_cast %43 : vector<8xf32> to vector<8x1xf32>
    %45 = vector.broadcast %44 : vector<8x1xf32> to vector<8x8xf32>
    %46 = arith.subf %42, %45 : vector<8x8xf32>
    %47 = math.exp %46 : vector<8x8xf32>
    %cst_27 = arith.constant dense<0.000000e+00> : vector<8xf32>
    %48 = vector.multi_reduction <add>, %47, %cst_27 [1] : vector<8x8xf32> to vector<8xf32>
    %49 = vector.shape_cast %48 : vector<8xf32> to vector<8x1xf32>
    %50 = tpu.reciprocal %49 {approx = true} : vector<8x1xf32> -> vector<8x1xf32>
    %51 = vector.broadcast %50 : vector<8x1xf32> to vector<8x8xf32>
    %52 = arith.mulf %47, %51 : vector<8x8xf32>
    %53 = vector.extract_strided_slice %20 {offsets = [0, 8], sizes = [8, 8], strides = [1, 1]} : vector<8x32xf32> to vector<8x8xf32>
    %cst_28 = arith.constant dense<0.000000e+00> : vector<8x8xf32>
    %54 = tpu.matmul %52, %53, %cst_28 {dimension_numbers = #tpu.dot_dimension_numbers<[1], [0], [0], [1], [0, 0, 1, 1], [], []>} : vector<8x8xf32>, vector<8x8xf32>, vector<8x8xf32> -> vector<8x8xf32>
    %55 = vector.extract_strided_slice %15 {offsets = [0, 16], sizes = [8, 8], strides = [1, 1]} : vector<8x32xf32> to vector<8x8xf32>
    %56 = vector.extract_strided_slice %19 {offsets = [0, 16], sizes = [8, 8], strides = [1, 1]} : vector<8x32xf32> to vector<8x8xf32>
    %57 = tpu.transpose %56, [1, 0] : vector<8x8xf32> -> vector<8x8xf32>
    %cst_29 = arith.constant dense<0.000000e+00> : vector<8x8xf32>
    %58 = tpu.matmul %55, %57, %cst_29 {dimension_numbers = #tpu.dot_dimension_numbers<[1], [0], [0], [1], [0, 0, 1, 1], [], []>} : vector<8x8xf32>, vector<8x8xf32>, vector<8x8xf32> -> vector<8x8xf32>
    %59 = arith.addf %58, %10 : vector<8x8xf32>
    %cst_30 = arith.constant dense<0xFF800000> : vector<8xf32>
    %60 = vector.multi_reduction <maximumf>, %59, %cst_30 [1] : vector<8x8xf32> to vector<8xf32>
    %61 = vector.shape_cast %60 : vector<8xf32> to vector<8x1xf32>
    %62 = vector.broadcast %61 : vector<8x1xf32> to vector<8x8xf32>
    %63 = arith.subf %59, %62 : vector<8x8xf32>
    %64 = math.exp %63 : vector<8x8xf32>
    %cst_31 = arith.constant dense<0.000000e+00> : vector<8xf32>
    %65 = vector.multi_reduction <add>, %64, %cst_31 [1] : vector<8x8xf32> to vector<8xf32>
    %66 = vector.shape_cast %65 : vector<8xf32> to vector<8x1xf32>
    %67 = tpu.reciprocal %66 {approx = true} : vector<8x1xf32> -> vector<8x1xf32>
    %68 = vector.broadcast %67 : vector<8x1xf32> to vector<8x8xf32>
    %69 = arith.mulf %64, %68 : vector<8x8xf32>
    %70 = vector.extract_strided_slice %20 {offsets = [0, 16], sizes = [8, 8], strides = [1, 1]} : vector<8x32xf32> to vector<8x8xf32>
    %cst_32 = arith.constant dense<0.000000e+00> : vector<8x8xf32>
    %71 = tpu.matmul %69, %70, %cst_32 {dimension_numbers = #tpu.dot_dimension_numbers<[1], [0], [0], [1], [0, 0, 1, 1], [], []>} : vector<8x8xf32>, vector<8x8xf32>, vector<8x8xf32> -> vector<8x8xf32>
    %72 = vector.extract_strided_slice %15 {offsets = [0, 24], sizes = [8, 8], strides = [1, 1]} : vector<8x32xf32> to vector<8x8xf32>
    %73 = vector.extract_strided_slice %19 {offsets = [0, 24], sizes = [8, 8], strides = [1, 1]} : vector<8x32xf32> to vector<8x8xf32>
    %74 = tpu.transpose %73, [1, 0] : vector<8x8xf32> -> vector<8x8xf32>
    %cst_33 = arith.constant dense<0.000000e+00> : vector<8x8xf32>
    %75 = tpu.matmul %72, %74, %cst_33 {dimension_numbers = #tpu.dot_dimension_numbers<[1], [0], [0], [1], [0, 0, 1, 1], [], []>} : vector<8x8xf32>, vector<8x8xf32>, vector<8x8xf32> -> vector<8x8xf32>
    %76 = arith.addf %75, %10 : vector<8x8xf32>
    %cst_34 = arith.constant dense<0xFF800000> : vector<8xf32>
    %77 = vector.multi_reduction <maximumf>, %76, %cst_34 [1] : vector<8x8xf32> to vector<8xf32>
    %78 = vector.shape_cast %77 : vector<8xf32> to vector<8x1xf32>
    %79 = vector.broadcast %78 : vector<8x1xf32> to vector<8x8xf32>
    %80 = arith.subf %76, %79 : vector<8x8xf32>
    %81 = math.exp %80 : vector<8x8xf32>
    %cst_35 = arith.constant dense<0.000000e+00> : vector<8xf32>
    %82 = vector.multi_reduction <add>, %81, %cst_35 [1] : vector<8x8xf32> to vector<8xf32>
    %83 = vector.shape_cast %82 : vector<8xf32> to vector<8x1xf32>
    %84 = tpu.reciprocal %83 {approx = true} : vector<8x1xf32> -> vector<8x1xf32>
    %85 = vector.broadcast %84 : vector<8x1xf32> to vector<8x8xf32>
    %86 = arith.mulf %81, %85 : vector<8x8xf32>
    %87 = vector.extract_strided_slice %20 {offsets = [0, 24], sizes = [8, 8], strides = [1, 1]} : vector<8x32xf32> to vector<8x8xf32>
    %cst_36 = arith.constant dense<0.000000e+00> : vector<8x8xf32>
    %88 = tpu.matmul %86, %87, %cst_36 {dimension_numbers = #tpu.dot_dimension_numbers<[1], [0], [0], [1], [0, 0, 1, 1], [], []>} : vector<8x8xf32>, vector<8x8xf32>, vector<8x8xf32> -> vector<8x8xf32>
    %89 = tpu.concatenate %37, %54, %71, %88 in 1 : vector<8x8xf32>, vector<8x8xf32>, vector<8x8xf32>, vector<8x8xf32> -> vector<8x32xf32>
    %cst_37 = arith.constant dense<0.000000e+00> : vector<8x32xf32>
    %90 = tpu.matmul %89, %8, %cst_37 {dimension_numbers = #tpu.dot_dimension_numbers<[1], [0], [0], [1], [0, 0, 1, 1], [], []>} : vector<8x32xf32>, vector<32x32xf32>, vector<8x32xf32> -> vector<8x32xf32>
    %91 = vector.broadcast %9 : vector<1x32xf32> to vector<8x32xf32>
    %92 = arith.addf %90, %91 : vector<8x32xf32>
    %93 = arith.addf %1, %92 : vector<8x32xf32>
    %c0_38 = arith.constant 0 : index
    %c0_39 = arith.constant 0 : index
    %94 = vector.load %arg10[%c0_38, %c0_39] : memref<1x32xf32, #tpu.memory_space<vmem>>, vector<1x32xf32>
    %c0_40 = arith.constant 0 : index
    %c0_41 = arith.constant 0 : index
    %95 = vector.load %arg11[%c0_40, %c0_41] : memref<1x32xf32, #tpu.memory_space<vmem>>, vector<1x32xf32>
    %cst_42 = arith.constant dense<0.000000e+00> : vector<8xf32>
    %96 = vector.multi_reduction <add>, %93, %cst_42 [1] : vector<8x32xf32> to vector<8xf32>
    %97 = vector.shape_cast %96 : vector<8xf32> to vector<8x1xf32>
    %cst_43 = arith.constant 3.200000e+01 : f32
    %98 = vector.broadcast %cst_43 : f32 to vector<8x1xf32>
    %99 = arith.divf %97, %98 : vector<8x1xf32>
    %100 = vector.broadcast %99 : vector<8x1xf32> to vector<8x32xf32>
    %101 = arith.subf %93, %100 : vector<8x32xf32>
    %102 = arith.mulf %101, %101 : vector<8x32xf32>
    %cst_44 = arith.constant dense<0.000000e+00> : vector<8xf32>
    %103 = vector.multi_reduction <add>, %102, %cst_44 [1] : vector<8x32xf32> to vector<8xf32>
    %104 = vector.shape_cast %103 : vector<8xf32> to vector<8x1xf32>
    %cst_45 = arith.constant 3.200000e+01 : f32
    %105 = vector.broadcast %cst_45 : f32 to vector<8x1xf32>
    %106 = arith.divf %104, %105 : vector<8x1xf32>
    %107 = vector.broadcast %99 : vector<8x1xf32> to vector<8x32xf32>
    %108 = arith.subf %93, %107 : vector<8x32xf32>
    %cst_46 = arith.constant 9.99999974E-6 : f32
    %109 = vector.broadcast %cst_46 : f32 to vector<8x1xf32>
    %110 = arith.addf %106, %109 : vector<8x1xf32>
    %111 = math.rsqrt %110 : vector<8x1xf32>
    %112 = vector.broadcast %111 : vector<8x1xf32> to vector<8x32xf32>
    %113 = arith.mulf %108, %112 : vector<8x32xf32>
    %114 = vector.broadcast %94 : vector<1x32xf32> to vector<8x32xf32>
    %115 = arith.mulf %113, %114 : vector<8x32xf32>
    %116 = vector.broadcast %95 : vector<1x32xf32> to vector<8x32xf32>
    %117 = arith.addf %115, %116 : vector<8x32xf32>
    %c0_47 = arith.constant 0 : index
    %c0_48 = arith.constant 0 : index
    %118 = vector.load %arg12[%c0_47, %c0_48] : memref<32x32xf32, #tpu.memory_space<vmem>>, vector<32x32xf32>
    %c0_49 = arith.constant 0 : index
    %c0_50 = arith.constant 0 : index
    %119 = vector.load %arg13[%c0_49, %c0_50] : memref<1x32xf32, #tpu.memory_space<vmem>>, vector<1x32xf32>
    %c0_51 = arith.constant 0 : index
    %c0_52 = arith.constant 0 : index
    %120 = vector.load %arg14[%c0_51, %c0_52] : memref<32x64xf32, #tpu.memory_space<vmem>>, vector<32x64xf32>
    %c0_53 = arith.constant 0 : index
    %c0_54 = arith.constant 0 : index
    %121 = vector.load %arg15[%c0_53, %c0_54] : memref<1x64xf32, #tpu.memory_space<vmem>>, vector<1x64xf32>
    %c0_55 = arith.constant 0 : index
    %c0_56 = arith.constant 0 : index
    %122 = vector.load %arg16[%c0_55, %c0_56] : memref<32x32xf32, #tpu.memory_space<vmem>>, vector<32x32xf32>
    %c0_57 = arith.constant 0 : index
    %c0_58 = arith.constant 0 : index
    %123 = vector.load %arg17[%c0_57, %c0_58] : memref<1x32xf32, #tpu.memory_space<vmem>>, vector<1x32xf32>
    %cst_59 = arith.constant dense<0.000000e+00> : vector<8x32xf32>
    %124 = tpu.matmul %117, %118, %cst_59 {dimension_numbers = #tpu.dot_dimension_numbers<[1], [0], [0], [1], [0, 0, 1, 1], [], []>} : vector<8x32xf32>, vector<32x32xf32>, vector<8x32xf32> -> vector<8x32xf32>
    %125 = vector.broadcast %119 : vector<1x32xf32> to vector<8x32xf32>
    %126 = arith.addf %124, %125 : vector<8x32xf32>
    %cst_60 = arith.constant 0.353553385 : f32
    %127 = vector.broadcast %cst_60 : f32 to vector<8x32xf32>
    %128 = arith.mulf %126, %127 : vector<8x32xf32>
    %cst_61 = arith.constant dense<0.000000e+00> : vector<8x64xf32>
    %129 = tpu.matmul %3, %120, %cst_61 {dimension_numbers = #tpu.dot_dimension_numbers<[1], [0], [0], [1], [0, 0, 1, 1], [], []>} : vector<8x32xf32>, vector<32x64xf32>, vector<8x64xf32> -> vector<8x64xf32>
    %130 = vector.broadcast %121 : vector<1x64xf32> to vector<8x64xf32>
    %131 = arith.addf %129, %130 : vector<8x64xf32>
    %132 = vector.extract_strided_slice %131 {offsets = [0, 0], sizes = [8, 32], strides = [1, 1]} : vector<8x64xf32> to vector<8x32xf32>
    %133 = vector.extract_strided_slice %131 {offsets = [0, 32], sizes = [8, 32], strides = [1, 1]} : vector<8x64xf32> to vector<8x32xf32>
    %134 = vector.extract_strided_slice %128 {offsets = [0, 0], sizes = [8, 8], strides = [1, 1]} : vector<8x32xf32> to vector<8x8xf32>
    %135 = vector.extract_strided_slice %132 {offsets = [0, 0], sizes = [8, 8], strides = [1, 1]} : vector<8x32xf32> to vector<8x8xf32>
    %136 = tpu.transpose %135, [1, 0] : vector<8x8xf32> -> vector<8x8xf32>
    %cst_62 = arith.constant dense<0.000000e+00> : vector<8x8xf32>
    %137 = tpu.matmul %134, %136, %cst_62 {dimension_numbers = #tpu.dot_dimension_numbers<[1], [0], [0], [1], [0, 0, 1, 1], [], []>} : vector<8x8xf32>, vector<8x8xf32>, vector<8x8xf32> -> vector<8x8xf32>
    %cst_63 = arith.constant dense<0xFF800000> : vector<8xf32>
    %138 = vector.multi_reduction <maximumf>, %137, %cst_63 [1] : vector<8x8xf32> to vector<8xf32>
    %139 = vector.shape_cast %138 : vector<8xf32> to vector<8x1xf32>
    %140 = vector.broadcast %139 : vector<8x1xf32> to vector<8x8xf32>
    %141 = arith.subf %137, %140 : vector<8x8xf32>
    %142 = math.exp %141 : vector<8x8xf32>
    %cst_64 = arith.constant dense<0.000000e+00> : vector<8xf32>
    %143 = vector.multi_reduction <add>, %142, %cst_64 [1] : vector<8x8xf32> to vector<8xf32>
    %144 = vector.shape_cast %143 : vector<8xf32> to vector<8x1xf32>
    %145 = tpu.reciprocal %144 {approx = true} : vector<8x1xf32> -> vector<8x1xf32>
    %146 = vector.broadcast %145 : vector<8x1xf32> to vector<8x8xf32>
    %147 = arith.mulf %142, %146 : vector<8x8xf32>
    %148 = vector.extract_strided_slice %133 {offsets = [0, 0], sizes = [8, 8], strides = [1, 1]} : vector<8x32xf32> to vector<8x8xf32>
    %cst_65 = arith.constant dense<0.000000e+00> : vector<8x8xf32>
    %149 = tpu.matmul %147, %148, %cst_65 {dimension_numbers = #tpu.dot_dimension_numbers<[1], [0], [0], [1], [0, 0, 1, 1], [], []>} : vector<8x8xf32>, vector<8x8xf32>, vector<8x8xf32> -> vector<8x8xf32>
    %150 = vector.extract_strided_slice %128 {offsets = [0, 8], sizes = [8, 8], strides = [1, 1]} : vector<8x32xf32> to vector<8x8xf32>
    %151 = vector.extract_strided_slice %132 {offsets = [0, 8], sizes = [8, 8], strides = [1, 1]} : vector<8x32xf32> to vector<8x8xf32>
    %152 = tpu.transpose %151, [1, 0] : vector<8x8xf32> -> vector<8x8xf32>
    %cst_66 = arith.constant dense<0.000000e+00> : vector<8x8xf32>
    %153 = tpu.matmul %150, %152, %cst_66 {dimension_numbers = #tpu.dot_dimension_numbers<[1], [0], [0], [1], [0, 0, 1, 1], [], []>} : vector<8x8xf32>, vector<8x8xf32>, vector<8x8xf32> -> vector<8x8xf32>
    %cst_67 = arith.constant dense<0xFF800000> : vector<8xf32>
    %154 = vector.multi_reduction <maximumf>, %153, %cst_67 [1] : vector<8x8xf32> to vector<8xf32>
    %155 = vector.shape_cast %154 : vector<8xf32> to vector<8x1xf32>
    %156 = vector.broadcast %155 : vector<8x1xf32> to vector<8x8xf32>
    %157 = arith.subf %153, %156 : vector<8x8xf32>
    %158 = math.exp %157 : vector<8x8xf32>
    %cst_68 = arith.constant dense<0.000000e+00> : vector<8xf32>
    %159 = vector.multi_reduction <add>, %158, %cst_68 [1] : vector<8x8xf32> to vector<8xf32>
    %160 = vector.shape_cast %159 : vector<8xf32> to vector<8x1xf32>
    %161 = tpu.reciprocal %160 {approx = true} : vector<8x1xf32> -> vector<8x1xf32>
    %162 = vector.broadcast %161 : vector<8x1xf32> to vector<8x8xf32>
    %163 = arith.mulf %158, %162 : vector<8x8xf32>
    %164 = vector.extract_strided_slice %133 {offsets = [0, 8], sizes = [8, 8], strides = [1, 1]} : vector<8x32xf32> to vector<8x8xf32>
    %cst_69 = arith.constant dense<0.000000e+00> : vector<8x8xf32>
    %165 = tpu.matmul %163, %164, %cst_69 {dimension_numbers = #tpu.dot_dimension_numbers<[1], [0], [0], [1], [0, 0, 1, 1], [], []>} : vector<8x8xf32>, vector<8x8xf32>, vector<8x8xf32> -> vector<8x8xf32>
    %166 = vector.extract_strided_slice %128 {offsets = [0, 16], sizes = [8, 8], strides = [1, 1]} : vector<8x32xf32> to vector<8x8xf32>
    %167 = vector.extract_strided_slice %132 {offsets = [0, 16], sizes = [8, 8], strides = [1, 1]} : vector<8x32xf32> to vector<8x8xf32>
    %168 = tpu.transpose %167, [1, 0] : vector<8x8xf32> -> vector<8x8xf32>
    %cst_70 = arith.constant dense<0.000000e+00> : vector<8x8xf32>
    %169 = tpu.matmul %166, %168, %cst_70 {dimension_numbers = #tpu.dot_dimension_numbers<[1], [0], [0], [1], [0, 0, 1, 1], [], []>} : vector<8x8xf32>, vector<8x8xf32>, vector<8x8xf32> -> vector<8x8xf32>
    %cst_71 = arith.constant dense<0xFF800000> : vector<8xf32>
    %170 = vector.multi_reduction <maximumf>, %169, %cst_71 [1] : vector<8x8xf32> to vector<8xf32>
    %171 = vector.shape_cast %170 : vector<8xf32> to vector<8x1xf32>
    %172 = vector.broadcast %171 : vector<8x1xf32> to vector<8x8xf32>
    %173 = arith.subf %169, %172 : vector<8x8xf32>
    %174 = math.exp %173 : vector<8x8xf32>
    %cst_72 = arith.constant dense<0.000000e+00> : vector<8xf32>
    %175 = vector.multi_reduction <add>, %174, %cst_72 [1] : vector<8x8xf32> to vector<8xf32>
    %176 = vector.shape_cast %175 : vector<8xf32> to vector<8x1xf32>
    %177 = tpu.reciprocal %176 {approx = true} : vector<8x1xf32> -> vector<8x1xf32>
    %178 = vector.broadcast %177 : vector<8x1xf32> to vector<8x8xf32>
    %179 = arith.mulf %174, %178 : vector<8x8xf32>
    %180 = vector.extract_strided_slice %133 {offsets = [0, 16], sizes = [8, 8], strides = [1, 1]} : vector<8x32xf32> to vector<8x8xf32>
    %cst_73 = arith.constant dense<0.000000e+00> : vector<8x8xf32>
    %181 = tpu.matmul %179, %180, %cst_73 {dimension_numbers = #tpu.dot_dimension_numbers<[1], [0], [0], [1], [0, 0, 1, 1], [], []>} : vector<8x8xf32>, vector<8x8xf32>, vector<8x8xf32> -> vector<8x8xf32>
    %182 = vector.extract_strided_slice %128 {offsets = [0, 24], sizes = [8, 8], strides = [1, 1]} : vector<8x32xf32> to vector<8x8xf32>
    %183 = vector.extract_strided_slice %132 {offsets = [0, 24], sizes = [8, 8], strides = [1, 1]} : vector<8x32xf32> to vector<8x8xf32>
    %184 = tpu.transpose %183, [1, 0] : vector<8x8xf32> -> vector<8x8xf32>
    %cst_74 = arith.constant dense<0.000000e+00> : vector<8x8xf32>
    %185 = tpu.matmul %182, %184, %cst_74 {dimension_numbers = #tpu.dot_dimension_numbers<[1], [0], [0], [1], [0, 0, 1, 1], [], []>} : vector<8x8xf32>, vector<8x8xf32>, vector<8x8xf32> -> vector<8x8xf32>
    %cst_75 = arith.constant dense<0xFF800000> : vector<8xf32>
    %186 = vector.multi_reduction <maximumf>, %185, %cst_75 [1] : vector<8x8xf32> to vector<8xf32>
    %187 = vector.shape_cast %186 : vector<8xf32> to vector<8x1xf32>
    %188 = vector.broadcast %187 : vector<8x1xf32> to vector<8x8xf32>
    %189 = arith.subf %185, %188 : vector<8x8xf32>
    %190 = math.exp %189 : vector<8x8xf32>
    %cst_76 = arith.constant dense<0.000000e+00> : vector<8xf32>
    %191 = vector.multi_reduction <add>, %190, %cst_76 [1] : vector<8x8xf32> to vector<8xf32>
    %192 = vector.shape_cast %191 : vector<8xf32> to vector<8x1xf32>
    %193 = tpu.reciprocal %192 {approx = true} : vector<8x1xf32> -> vector<8x1xf32>
    %194 = vector.broadcast %193 : vector<8x1xf32> to vector<8x8xf32>
    %195 = arith.mulf %190, %194 : vector<8x8xf32>
    %196 = vector.extract_strided_slice %133 {offsets = [0, 24], sizes = [8, 8], strides = [1, 1]} : vector<8x32xf32> to vector<8x8xf32>
    %cst_77 = arith.constant dense<0.000000e+00> : vector<8x8xf32>
    %197 = tpu.matmul %195, %196, %cst_77 {dimension_numbers = #tpu.dot_dimension_numbers<[1], [0], [0], [1], [0, 0, 1, 1], [], []>} : vector<8x8xf32>, vector<8x8xf32>, vector<8x8xf32> -> vector<8x8xf32>
    %198 = tpu.concatenate %149, %165, %181, %197 in 1 : vector<8x8xf32>, vector<8x8xf32>, vector<8x8xf32>, vector<8x8xf32> -> vector<8x32xf32>
    %cst_78 = arith.constant dense<0.000000e+00> : vector<8x32xf32>
    %199 = tpu.matmul %198, %122, %cst_78 {dimension_numbers = #tpu.dot_dimension_numbers<[1], [0], [0], [1], [0, 0, 1, 1], [], []>} : vector<8x32xf32>, vector<32x32xf32>, vector<8x32xf32> -> vector<8x32xf32>
    %200 = vector.broadcast %123 : vector<1x32xf32> to vector<8x32xf32>
    %201 = arith.addf %199, %200 : vector<8x32xf32>
    %202 = arith.addf %117, %201 : vector<8x32xf32>
    %c0_79 = arith.constant 0 : index
    %c0_80 = arith.constant 0 : index
    %203 = vector.load %arg18[%c0_79, %c0_80] : memref<1x32xf32, #tpu.memory_space<vmem>>, vector<1x32xf32>
    %c0_81 = arith.constant 0 : index
    %c0_82 = arith.constant 0 : index
    %204 = vector.load %arg19[%c0_81, %c0_82] : memref<1x32xf32, #tpu.memory_space<vmem>>, vector<1x32xf32>
    %cst_83 = arith.constant dense<0.000000e+00> : vector<8xf32>
    %205 = vector.multi_reduction <add>, %202, %cst_83 [1] : vector<8x32xf32> to vector<8xf32>
    %206 = vector.shape_cast %205 : vector<8xf32> to vector<8x1xf32>
    %cst_84 = arith.constant 3.200000e+01 : f32
    %207 = vector.broadcast %cst_84 : f32 to vector<8x1xf32>
    %208 = arith.divf %206, %207 : vector<8x1xf32>
    %209 = vector.broadcast %208 : vector<8x1xf32> to vector<8x32xf32>
    %210 = arith.subf %202, %209 : vector<8x32xf32>
    %211 = arith.mulf %210, %210 : vector<8x32xf32>
    %cst_85 = arith.constant dense<0.000000e+00> : vector<8xf32>
    %212 = vector.multi_reduction <add>, %211, %cst_85 [1] : vector<8x32xf32> to vector<8xf32>
    %213 = vector.shape_cast %212 : vector<8xf32> to vector<8x1xf32>
    %cst_86 = arith.constant 3.200000e+01 : f32
    %214 = vector.broadcast %cst_86 : f32 to vector<8x1xf32>
    %215 = arith.divf %213, %214 : vector<8x1xf32>
    %216 = vector.broadcast %208 : vector<8x1xf32> to vector<8x32xf32>
    %217 = arith.subf %202, %216 : vector<8x32xf32>
    %cst_87 = arith.constant 9.99999974E-6 : f32
    %218 = vector.broadcast %cst_87 : f32 to vector<8x1xf32>
    %219 = arith.addf %215, %218 : vector<8x1xf32>
    %220 = math.rsqrt %219 : vector<8x1xf32>
    %221 = vector.broadcast %220 : vector<8x1xf32> to vector<8x32xf32>
    %222 = arith.mulf %217, %221 : vector<8x32xf32>
    %223 = vector.broadcast %203 : vector<1x32xf32> to vector<8x32xf32>
    %224 = arith.mulf %222, %223 : vector<8x32xf32>
    %225 = vector.broadcast %204 : vector<1x32xf32> to vector<8x32xf32>
    %226 = arith.addf %224, %225 : vector<8x32xf32>
    %c0_88 = arith.constant 0 : index
    %c0_89 = arith.constant 0 : index
    %227 = vector.load %arg20[%c0_88, %c0_89] : memref<32x64xf32, #tpu.memory_space<vmem>>, vector<32x64xf32>
    %c0_90 = arith.constant 0 : index
    %c0_91 = arith.constant 0 : index
    %228 = vector.load %arg21[%c0_90, %c0_91] : memref<1x64xf32, #tpu.memory_space<vmem>>, vector<1x64xf32>
    %c0_92 = arith.constant 0 : index
    %c0_93 = arith.constant 0 : index
    %229 = vector.load %arg22[%c0_92, %c0_93] : memref<64x32xf32, #tpu.memory_space<vmem>>, vector<64x32xf32>
    %c0_94 = arith.constant 0 : index
    %c0_95 = arith.constant 0 : index
    %230 = vector.load %arg23[%c0_94, %c0_95] : memref<1x32xf32, #tpu.memory_space<vmem>>, vector<1x32xf32>
    %cst_96 = arith.constant dense<0.000000e+00> : vector<8x64xf32>
    %231 = tpu.matmul %226, %227, %cst_96 {dimension_numbers = #tpu.dot_dimension_numbers<[1], [0], [0], [1], [0, 0, 1, 1], [], []>} : vector<8x32xf32>, vector<32x64xf32>, vector<8x64xf32> -> vector<8x64xf32>
    %232 = vector.broadcast %228 : vector<1x64xf32> to vector<8x64xf32>
    %233 = arith.addf %231, %232 : vector<8x64xf32>
    %cst_97 = arith.constant 0.000000e+00 : f32
    %234 = vector.broadcast %cst_97 : f32 to vector<8x64xf32>
    %235 = arith.maximumf %233, %234 : vector<8x64xf32>
    %cst_98 = arith.constant dense<0.000000e+00> : vector<8x32xf32>
    %236 = tpu.matmul %235, %229, %cst_98 {dimension_numbers = #tpu.dot_dimension_numbers<[1], [0], [0], [1], [0, 0, 1, 1], [], []>} : vector<8x64xf32>, vector<64x32xf32>, vector<8x32xf32> -> vector<8x32xf32>
    %237 = vector.broadcast %230 : vector<1x32xf32> to vector<8x32xf32>
    %238 = arith.addf %236, %237 : vector<8x32xf32>
    %239 = arith.addf %226, %238 : vector<8x32xf32>
    %c0_99 = arith.constant 0 : index
    %c0_100 = arith.constant 0 : index
    %240 = vector.load %arg24[%c0_99, %c0_100] : memref<1x32xf32, #tpu.memory_space<vmem>>, vector<1x32xf32>
    %c0_101 = arith.constant 0 : index
    %c0_102 = arith.constant 0 : index
    %241 = vector.load %arg25[%c0_101, %c0_102] : memref<1x32xf32, #tpu.memory_space<vmem>>, vector<1x32xf32>
    %cst_103 = arith.constant dense<0.000000e+00> : vector<8xf32>
    %242 = vector.multi_reduction <add>, %239, %cst_103 [1] : vector<8x32xf32> to vector<8xf32>
    %243 = vector.shape_cast %242 : vector<8xf32> to vector<8x1xf32>
    %cst_104 = arith.constant 3.200000e+01 : f32
    %244 = vector.broadcast %cst_104 : f32 to vector<8x1xf32>
    %245 = arith.divf %243, %244 : vector<8x1xf32>
    %246 = vector.broadcast %245 : vector<8x1xf32> to vector<8x32xf32>
    %247 = arith.subf %239, %246 : vector<8x32xf32>
    %248 = arith.mulf %247, %247 : vector<8x32xf32>
    %cst_105 = arith.constant dense<0.000000e+00> : vector<8xf32>
    %249 = vector.multi_reduction <add>, %248, %cst_105 [1] : vector<8x32xf32> to vector<8xf32>
    %250 = vector.shape_cast %249 : vector<8xf32> to vector<8x1xf32>
    %cst_106 = arith.constant 3.200000e+01 : f32
    %251 = vector.broadcast %cst_106 : f32 to vector<8x1xf32>
    %252 = arith.divf %250, %251 : vector<8x1xf32>
    %253 = vector.broadcast %245 : vector<8x1xf32> to vector<8x32xf32>
    %254 = arith.subf %239, %253 : vector<8x32xf32>
    %cst_107 = arith.constant 9.99999974E-6 : f32
    %255 = vector.broadcast %cst_107 : f32 to vector<8x1xf32>
    %256 = arith.addf %252, %255 : vector<8x1xf32>
    %257 = math.rsqrt %256 : vector<8x1xf32>
    %258 = vector.broadcast %257 : vector<8x1xf32> to vector<8x32xf32>
    %259 = arith.mulf %254, %258 : vector<8x32xf32>
    %260 = vector.broadcast %240 : vector<1x32xf32> to vector<8x32xf32>
    %261 = arith.mulf %259, %260 : vector<8x32xf32>
    %262 = vector.broadcast %241 : vector<1x32xf32> to vector<8x32xf32>
    %263 = arith.addf %261, %262 : vector<8x32xf32>
    %c0_108 = arith.constant 0 : index
    %c0_109 = arith.constant 0 : index
    %c0_110 = arith.constant 0 : index
    %264 = vector.load %arg26[%c0_108, %c0_109, %c0_110] : memref<1x8x32xf32, #tpu.memory_space<vmem>>, vector<1x8x32xf32>
    %265 = vector.shape_cast %264 : vector<1x8x32xf32> to vector<8x32xf32>
    %266 = vector.shape_cast %263 : vector<8x32xf32> to vector<1x8x32xf32>
    tpu.vector_store %arg26[%c0_108, %c0_109, %c0_110], %266 {strides = array<i32>} : memref<1x8x32xf32, #tpu.memory_space<vmem>>, vector<1x8x32xf32>,
    return
  }
  func.func @transform_0(%arg0: i32) -> (i32, i32, i32) {
    %c0_i32 = arith.constant 0 : i32
    %c0_i32_0 = arith.constant 0 : i32
    %c0_i32_1 = arith.constant 0 : i32
    return %arg0, %c0_i32, %c0_i32_0 : i32, i32, i32
  }
  func.func @transform_1(%arg0: i32) -> (i32, i32, i32) {
    %c0_i32 = arith.constant 0 : i32
    %c0_i32_0 = arith.constant 0 : i32
    %c0_i32_1 = arith.constant 0 : i32
    return %arg0, %c0_i32, %c0_i32_0 : i32, i32, i32
  }
  func.func @transform_2(%arg0: i32) -> (i32, i32) {
    %c0_i32 = arith.constant 0 : i32
    %c0_i32_0 = arith.constant 0 : i32
    %c0_i32_1 = arith.constant 0 : i32
    return %c0_i32, %c0_i32_0 : i32, i32
  }
  func.func @transform_3(%arg0: i32) -> (i32, i32) {
    %c0_i32 = arith.constant 0 : i32
    %c0_i32_0 = arith.constant 0 : i32
    %c0_i32_1 = arith.constant 0 : i32
    return %c0_i32, %c0_i32_0 : i32, i32
  }
  func.func @transform_4(%arg0: i32) -> (i32, i32) {
    %c0_i32 = arith.constant 0 : i32
    %c0_i32_0 = arith.constant 0 : i32
    %c0_i32_1 = arith.constant 0 : i32
    return %c0_i32, %c0_i32_0 : i32, i32
  }
  func.func @transform_5(%arg0: i32) -> (i32, i32) {
    %c0_i32 = arith.constant 0 : i32
    %c0_i32_0 = arith.constant 0 : i32
    %c0_i32_1 = arith.constant 0 : i32
    return %c0_i32, %c0_i32_0 : i32, i32
  }
  func.func @transform_6(%arg0: i32) -> (i32, i32) {
    %c0_i32 = arith.constant 0 : i32
    %c0_i32_0 = arith.constant 0 : i32
    %c0_i32_1 = arith.constant 0 : i32
    return %c0_i32, %c0_i32_0 : i32, i32
  }
  func.func @transform_7(%arg0: i32) -> (i32, i32) {
    %c0_i32 = arith.constant 0 : i32
    %c0_i32_0 = arith.constant 0 : i32
    %c0_i32_1 = arith.constant 0 : i32
    return %c0_i32, %c0_i32_0 : i32, i32
  }
  func.func @transform_8(%arg0: i32) -> (i32, i32) {
    %c0_i32 = arith.constant 0 : i32
    %c0_i32_0 = arith.constant 0 : i32
    %c0_i32_1 = arith.constant 0 : i32
    return %c0_i32, %c0_i32_0 : i32, i32
  }
  func.func @transform_9(%arg0: i32) -> (i32, i32) {
    %c0_i32 = arith.constant 0 : i32
    %c0_i32_0 = arith.constant 0 : i32
    %c0_i32_1 = arith.constant 0 : i32
    return %c0_i32, %c0_i32_0 : i32, i32
  }
  func.func @transform_10(%arg0: i32) -> (i32, i32) {
    %c0_i32 = arith.constant 0 : i32
    %c0_i32_0 = arith.constant 0 : i32
    %c0_i32_1 = arith.constant 0 : i32
    return %c0_i32, %c0_i32_0 : i32, i32
  }
  func.func @transform_11(%arg0: i32) -> (i32, i32) {
    %c0_i32 = arith.constant 0 : i32
    %c0_i32_0 = arith.constant 0 : i32
    %c0_i32_1 = arith.constant 0 : i32
    return %c0_i32, %c0_i32_0 : i32, i32
  }
  func.func @transform_12(%arg0: i32) -> (i32, i32) {
    %c0_i32 = arith.constant 0 : i32
    %c0_i32_0 = arith.constant 0 : i32
    %c0_i32_1 = arith.constant 0 : i32
    return %c0_i32, %c0_i32_0 : i32, i32
  }
  func.func @transform_13(%arg0: i32) -> (i32, i32) {
    %c0_i32 = arith.constant 0 : i32
    %c0_i32_0 = arith.constant 0 : i32
    %c0_i32_1 = arith.constant 0 : i32
    return %c0_i32, %c0_i32_0 : i32, i32
  }
  func.func @transform_14(%arg0: i32) -> (i32, i32) {
    %c0_i32 = arith.constant 0 : i32
    %c0_i32_0 = arith.constant 0 : i32
    %c0_i32_1 = arith.constant 0 : i32
    return %c0_i32, %c0_i32_0 : i32, i32
  }
  func.func @transform_15(%arg0: i32) -> (i32, i32) {
    %c0_i32 = arith.constant 0 : i32
    %c0_i32_0 = arith.constant 0 : i32
    %c0_i32_1 = arith.constant 0 : i32
    return %c0_i32, %c0_i32_0 : i32, i32
  }
  func.func @transform_16(%arg0: i32) -> (i32, i32) {
    %c0_i32 = arith.constant 0 : i32
    %c0_i32_0 = arith.constant 0 : i32
    %c0_i32_1 = arith.constant 0 : i32
    return %c0_i32, %c0_i32_0 : i32, i32
  }
  func.func @transform_17(%arg0: i32) -> (i32, i32) {
    %c0_i32 = arith.constant 0 : i32
    %c0_i32_0 = arith.constant 0 : i32
    %c0_i32_1 = arith.constant 0 : i32
    return %c0_i32, %c0_i32_0 : i32, i32
  }
  func.func @transform_18(%arg0: i32) -> (i32, i32) {
    %c0_i32 = arith.constant 0 : i32
    %c0_i32_0 = arith.constant 0 : i32
    %c0_i32_1 = arith.constant 0 : i32
    return %c0_i32, %c0_i32_0 : i32, i32
  }
  func.func @transform_19(%arg0: i32) -> (i32, i32) {
    %c0_i32 = arith.constant 0 : i32
    %c0_i32_0 = arith.constant 0 : i32
    %c0_i32_1 = arith.constant 0 : i32
    return %c0_i32, %c0_i32_0 : i32, i32
  }
  func.func @transform_20(%arg0: i32) -> (i32, i32) {
    %c0_i32 = arith.constant 0 : i32
    %c0_i32_0 = arith.constant 0 : i32
    %c0_i32_1 = arith.constant 0 : i32
    return %c0_i32, %c0_i32_0 : i32, i32
  }
  func.func @transform_21(%arg0: i32) -> (i32, i32) {
    %c0_i32 = arith.constant 0 : i32
    %c0_i32_0 = arith.constant 0 : i32
    %c0_i32_1 = arith.constant 0 : i32
    return %c0_i32, %c0_i32_0 : i32, i32
  }
  func.func @transform_22(%arg0: i32) -> (i32, i32) {
    %c0_i32 = arith.constant 0 : i32
    %c0_i32_0 = arith.constant 0 : i32
    %c0_i32_1 = arith.constant 0 : i32
    return %c0_i32, %c0_i32_0 : i32, i32
  }
  func.func @transform_23(%arg0: i32) -> (i32, i32) {
    %c0_i32 = arith.constant 0 : i32
    %c0_i32_0 = arith.constant 0 : i32
    %c0_i32_1 = arith.constant 0 : i32
    return %c0_i32, %c0_i32_0 : i32, i32
  }
  func.func @transform_24(%arg0: i32) -> (i32, i32) {
    %c0_i32 = arith.constant 0 : i32
    %c0_i32_0 = arith.constant 0 : i32
    %c0_i32_1 = arith.constant 0 : i32
    return %c0_i32, %c0_i32_0 : i32, i32
  }
  func.func @transform_25(%arg0: i32) -> (i32, i32, i32) {
    %c0_i32 = arith.constant 0 : i32
    %c0_i32_0 = arith.constant 0 : i32
    %c0_i32_1 = arith.constant 0 : i32
    return %arg0, %c0_i32, %c0_i32_0 : i32, i32, i32
  }
}

module attributes {stable_mosaic.version = 11 : i64} {
  func.func @_decoder_layer_kernel(%arg0: i32, %arg1: memref<1x8x32xf32, #tpu.memory_space<vmem>>, %arg2: memref<1x8x32xf32, #tpu.memory_space<vmem>>, %arg3: memref<8x8xf32, #tpu.memory_space<vmem>>, %arg4: memref<32x32xf32, #tpu.memory_space<vmem>>, %arg5: memref<1x32xf32, #tpu.memory_space<vmem>>, %arg6: memref<32x64xf32, #tpu.memory_space<vmem>>, %arg7: memref<1x64xf32, #tpu.memory_space<vmem>>, %arg8: memref<32x32xf32, #tpu.memory_space<vmem>>, %arg9: memref<1x32xf32, #tpu.memory_space<vmem>>, %arg10: memref<1x32xf32, #tpu.memory_space<vmem>>, %arg11: memref<1x32xf32, #tpu.memory_space<vmem>>, %arg12: memref<32x32xf32, #tpu.memory_space<vmem>>, %arg13: memref<1x32xf32, #tpu.memory_space<vmem>>, %arg14: memref<32x64xf32, #tpu.memory_space<vmem>>, %arg15: memref<1x64xf32, #tpu.memory_space<vmem>>, %arg16: memref<32x32xf32, #tpu.memory_space<vmem>>, %arg17: memref<1x32xf32, #tpu.memory_space<vmem>>, %arg18: memref<1x32xf32, #tpu.memory_space<vmem>>, %arg19: memref<1x32xf32, #tpu.memory_space<vmem>>, %arg20: memref<32x64xf32, #tpu.memory_space<vmem>>, %arg21: memref<1x64xf32, #tpu.memory_space<vmem>>, %arg22: memref<64x32xf32, #tpu.memory_space<vmem>>, %arg23: memref<1x32xf32, #tpu.memory_space<vmem>>, %arg24: memref<1x32xf32, #tpu.memory_space<vmem>>, %arg25: memref<1x32xf32, #tpu.memory_space<vmem>>, %arg26: memref<1x32xf32, #tpu.memory_space<vmem>>, %arg27: memref<1x32xf32, #tpu.memory_space<vmem>>, %arg28: memref<1x8x32xf32, #tpu.memory_space<vmem>>) attributes {dimension_semantics = [#tpu.dimension_semantics<parallel>], iteration_bounds = array<i64: 2>, scalar_prefetch = 0 : i64, scratch_operands = 0 : i64, tpu.core_type = #tpu.core_type<tc>, window_params = [{transform_indices = @transform_0, window_bounds = array<i64: 1, 8, 32>}, {transform_indices = @transform_1, window_bounds = array<i64: 1, 8, 32>}, {pipeline_mode = #tpu.pipeline_mode<synchronous>, transform_indices = @transform_2, window_bounds = array<i64: 8, 8>}, {pipeline_mode = #tpu.pipeline_mode<synchronous>, transform_indices = @transform_3, window_bounds = array<i64: 32, 32>}, {pipeline_mode = #tpu.pipeline_mode<synchronous>, transform_indices = @transform_4, window_bounds = array<i64: 1, 32>}, {pipeline_mode = #tpu.pipeline_mode<synchronous>, transform_indices = @transform_5, window_bounds = array<i64: 32, 64>}, {pipeline_mode = #tpu.pipeline_mode<synchronous>, transform_indices = @transform_6, window_bounds = array<i64: 1, 64>}, {pipeline_mode = #tpu.pipeline_mode<synchronous>, transform_indices = @transform_7, window_bounds = array<i64: 32, 32>}, {pipeline_mode = #tpu.pipeline_mode<synchronous>, transform_indices = @transform_8, window_bounds = array<i64: 1, 32>}, {pipeline_mode = #tpu.pipeline_mode<synchronous>, transform_indices = @transform_9, window_bounds = array<i64: 1, 32>}, {pipeline_mode = #tpu.pipeline_mode<synchronous>, transform_indices = @transform_10, window_bounds = array<i64: 1, 32>}, {pipeline_mode = #tpu.pipeline_mode<synchronous>, transform_indices = @transform_11, window_bounds = array<i64: 32, 32>}, {pipeline_mode = #tpu.pipeline_mode<synchronous>, transform_indices = @transform_12, window_bounds = array<i64: 1, 32>}, {pipeline_mode = #tpu.pipeline_mode<synchronous>, transform_indices = @transform_13, window_bounds = array<i64: 32, 64>}, {pipeline_mode = #tpu.pipeline_mode<synchronous>, transform_indices = @transform_14, window_bounds = array<i64: 1, 64>}, {pipeline_mode = #tpu.pipeline_mode<synchronous>, transform_indices = @transform_15, window_bounds = array<i64: 32, 32>}, {pipeline_mode = #tpu.pipeline_mode<synchronous>, transform_indices = @transform_16, window_bounds = array<i64: 1, 32>}, {pipeline_mode = #tpu.pipeline_mode<synchronous>, transform_indices = @transform_17, window_bounds = array<i64: 1, 32>}, {pipeline_mode = #tpu.pipeline_mode<synchronous>, transform_indices = @transform_18, window_bounds = array<i64: 1, 32>}, {pipeline_mode = #tpu.pipeline_mode<synchronous>, transform_indices = @transform_19, window_bounds = array<i64: 32, 64>}, {pipeline_mode = #tpu.pipeline_mode<synchronous>, transform_indices = @transform_20, window_bounds = array<i64: 1, 64>}, {pipeline_mode = #tpu.pipeline_mode<synchronous>, transform_indices = @transform_21, window_bounds = array<i64: 64, 32>}, {pipeline_mode = #tpu.pipeline_mode<synchronous>, transform_indices = @transform_22, window_bounds = array<i64: 1, 32>}, {pipeline_mode = #tpu.pipeline_mode<synchronous>, transform_indices = @transform_23, window_bounds = array<i64: 1, 32>}, {pipeline_mode = #tpu.pipeline_mode<synchronous>, transform_indices = @transform_24, window_bounds = array<i64: 1, 32>}, {pipeline_mode = #tpu.pipeline_mode<synchronous>, transform_indices = @transform_25, window_bounds = array<i64: 1, 32>}, {pipeline_mode = #tpu.pipeline_mode<synchronous>, transform_indices = @transform_26, window_bounds = array<i64: 1, 32>}, {transform_indices = @transform_27, window_bounds = array<i64: 1, 8, 32>}]} {
    %c0 = arith.constant 0 : index
    %c0_0 = arith.constant 0 : index
    %c0_1 = arith.constant 0 : index
    %0 = vector.load %arg1[%c0, %c0_0, %c0_1] : memref<1x8x32xf32, #tpu.memory_space<vmem>>, vector<1x8x32xf32>
    %1 = vector.shape_cast %0 : vector<1x8x32xf32> to vector<8x32xf32>
    %c0_2 = arith.constant 0 : index
    %c0_3 = arith.constant 0 : index
    %c0_4 = arith.constant 0 : index
    %2 = vector.load %arg2[%c0_2, %c0_3, %c0_4] : memref<1x8x32xf32, #tpu.memory_space<vmem>>, vector<1x8x32xf32>
    %3 = vector.shape_cast %2 : vector<1x8x32xf32> to vector<8x32xf32>
    %c0_5 = arith.constant 0 : index
    %c0_6 = arith.constant 0 : index
    %4 = vector.load %arg4[%c0_5, %c0_6] : memref<32x32xf32, #tpu.memory_space<vmem>>, vector<32x32xf32>
    %c0_7 = arith.constant 0 : index
    %c0_8 = arith.constant 0 : index
    %5 = vector.load %arg5[%c0_7, %c0_8] : memref<1x32xf32, #tpu.memory_space<vmem>>, vector<1x32xf32>
    %c0_9 = arith.constant 0 : index
    %c0_10 = arith.constant 0 : index
    %6 = vector.load %arg6[%c0_9, %c0_10] : memref<32x64xf32, #tpu.memory_space<vmem>>, vector<32x64xf32>
    %c0_11 = arith.constant 0 : index
    %c0_12 = arith.constant 0 : index
    %7 = vector.load %arg7[%c0_11, %c0_12] : memref<1x64xf32, #tpu.memory_space<vmem>>, vector<1x64xf32>
    %c0_13 = arith.constant 0 : index
    %c0_14 = arith.constant 0 : index
    %8 = vector.load %arg8[%c0_13, %c0_14] : memref<32x32xf32, #tpu.memory_space<vmem>>, vector<32x32xf32>
    %c0_15 = arith.constant 0 : index
    %c0_16 = arith.constant 0 : index
    %9 = vector.load %arg9[%c0_15, %c0_16] : memref<1x32xf32, #tpu.memory_space<vmem>>, vector<1x32xf32>
    %c0_17 = arith.constant 0 : index
    %c0_18 = arith.constant 0 : index
    %10 = vector.load %arg3[%c0_17, %c0_18] : memref<8x8xf32, #tpu.memory_space<vmem>>, vector<8x8xf32>
    %cst = arith.constant dense<0.000000e+00> : vector<8x32xf32>
    %11 = tpu.matmul %1, %4, %cst {dimension_numbers = #tpu.dot_dimension_numbers<[1], [0], [0], [1], [0, 0, 1, 1], [], []>} : vector<8x32xf32>, vector<32x32xf32>, vector<8x32xf32> -> vector<8x32xf32>
    %12 = vector.broadcast %5 : vector<1x32xf32> to vector<8x32xf32>
    %13 = arith.addf %11, %12 : vector<8x32xf32>
    %cst_19 = arith.constant 0.353553385 : f32
    %14 = vector.broadcast %cst_19 : f32 to vector<8x32xf32>
    %15 = arith.mulf %13, %14 : vector<8x32xf32>
    %cst_20 = arith.constant dense<0.000000e+00> : vector<8x64xf32>
    %16 = tpu.matmul %1, %6, %cst_20 {dimension_numbers = #tpu.dot_dimension_numbers<[1], [0], [0], [1], [0, 0, 1, 1], [], []>} : vector<8x32xf32>, vector<32x64xf32>, vector<8x64xf32> -> vector<8x64xf32>
    %17 = vector.broadcast %7 : vector<1x64xf32> to vector<8x64xf32>
    %18 = arith.addf %16, %17 : vector<8x64xf32>
    %19 = vector.extract_strided_slice %18 {offsets = [0, 0], sizes = [8, 32], strides = [1, 1]} : vector<8x64xf32> to vector<8x32xf32>
    %20 = vector.extract_strided_slice %18 {offsets = [0, 32], sizes = [8, 32], strides = [1, 1]} : vector<8x64xf32> to vector<8x32xf32>
    %21 = vector.extract_strided_slice %15 {offsets = [0, 0], sizes = [8, 8], strides = [1, 1]} : vector<8x32xf32> to vector<8x8xf32>
    %22 = vector.extract_strided_slice %19 {offsets = [0, 0], sizes = [8, 8], strides = [1, 1]} : vector<8x32xf32> to vector<8x8xf32>
    %23 = tpu.transpose %22, [1, 0] : vector<8x8xf32> -> vector<8x8xf32>
    %cst_21 = arith.constant dense<0.000000e+00> : vector<8x8xf32>
    %24 = tpu.matmul %21, %23, %cst_21 {dimension_numbers = #tpu.dot_dimension_numbers<[1], [0], [0], [1], [0, 0, 1, 1], [], []>} : vector<8x8xf32>, vector<8x8xf32>, vector<8x8xf32> -> vector<8x8xf32>
    %25 = arith.addf %24, %10 : vector<8x8xf32>
    %cst_22 = arith.constant dense<0xFF800000> : vector<8xf32>
    %26 = vector.multi_reduction <maximumf>, %25, %cst_22 [1] : vector<8x8xf32> to vector<8xf32>
    %27 = vector.shape_cast %26 : vector<8xf32> to vector<8x1xf32>
    %28 = vector.broadcast %27 : vector<8x1xf32> to vector<8x8xf32>
    %29 = arith.subf %25, %28 : vector<8x8xf32>
    %30 = math.exp %29 : vector<8x8xf32>
    %cst_23 = arith.constant dense<0.000000e+00> : vector<8xf32>
    %31 = vector.multi_reduction <add>, %30, %cst_23 [1] : vector<8x8xf32> to vector<8xf32>
    %32 = vector.shape_cast %31 : vector<8xf32> to vector<8x1xf32>
    %33 = tpu.reciprocal %32 {approx = true} : vector<8x1xf32> -> vector<8x1xf32>
    %34 = vector.broadcast %33 : vector<8x1xf32> to vector<8x8xf32>
    %35 = arith.mulf %30, %34 : vector<8x8xf32>
    %36 = vector.extract_strided_slice %20 {offsets = [0, 0], sizes = [8, 8], strides = [1, 1]} : vector<8x32xf32> to vector<8x8xf32>
    %cst_24 = arith.constant dense<0.000000e+00> : vector<8x8xf32>
    %37 = tpu.matmul %35, %36, %cst_24 {dimension_numbers = #tpu.dot_dimension_numbers<[1], [0], [0], [1], [0, 0, 1, 1], [], []>} : vector<8x8xf32>, vector<8x8xf32>, vector<8x8xf32> -> vector<8x8xf32>
    %38 = vector.extract_strided_slice %15 {offsets = [0, 8], sizes = [8, 8], strides = [1, 1]} : vector<8x32xf32> to vector<8x8xf32>
    %39 = vector.extract_strided_slice %19 {offsets = [0, 8], sizes = [8, 8], strides = [1, 1]} : vector<8x32xf32> to vector<8x8xf32>
    %40 = tpu.transpose %39, [1, 0] : vector<8x8xf32> -> vector<8x8xf32>
    %cst_25 = arith.constant dense<0.000000e+00> : vector<8x8xf32>
    %41 = tpu.matmul %38, %40, %cst_25 {dimension_numbers = #tpu.dot_dimension_numbers<[1], [0], [0], [1], [0, 0, 1, 1], [], []>} : vector<8x8xf32>, vector<8x8xf32>, vector<8x8xf32> -> vector<8x8xf32>
    %42 = arith.addf %41, %10 : vector<8x8xf32>
    %cst_26 = arith.constant dense<0xFF800000> : vector<8xf32>
    %43 = vector.multi_reduction <maximumf>, %42, %cst_26 [1] : vector<8x8xf32> to vector<8xf32>
    %44 = vector.shape_cast %43 : vector<8xf32> to vector<8x1xf32>
    %45 = vector.broadcast %44 : vector<8x1xf32> to vector<8x8xf32>
    %46 = arith.subf %42, %45 : vector<8x8xf32>
    %47 = math.exp %46 : vector<8x8xf32>
    %cst_27 = arith.constant dense<0.000000e+00> : vector<8xf32>
    %48 = vector.multi_reduction <add>, %47, %cst_27 [1] : vector<8x8xf32> to vector<8xf32>
    %49 = vector.shape_cast %48 : vector<8xf32> to vector<8x1xf32>
    %50 = tpu.reciprocal %49 {approx = true} : vector<8x1xf32> -> vector<8x1xf32>
    %51 = vector.broadcast %50 : vector<8x1xf32> to vector<8x8xf32>
    %52 = arith.mulf %47, %51 : vector<8x8xf32>
    %53 = vector.extract_strided_slice %20 {offsets = [0, 8], sizes = [8, 8], strides = [1, 1]} : vector<8x32xf32> to vector<8x8xf32>
    %cst_28 = arith.constant dense<0.000000e+00> : vector<8x8xf32>
    %54 = tpu.matmul %52, %53, %cst_28 {dimension_numbers = #tpu.dot_dimension_numbers<[1], [0], [0], [1], [0, 0, 1, 1], [], []>} : vector<8x8xf32>, vector<8x8xf32>, vector<8x8xf32> -> vector<8x8xf32>
    %55 = vector.extract_strided_slice %15 {offsets = [0, 16], sizes = [8, 8], strides = [1, 1]} : vector<8x32xf32> to vector<8x8xf32>
    %56 = vector.extract_strided_slice %19 {offsets = [0, 16], sizes = [8, 8], strides = [1, 1]} : vector<8x32xf32> to vector<8x8xf32>
    %57 = tpu.transpose %56, [1, 0] : vector<8x8xf32> -> vector<8x8xf32>
    %cst_29 = arith.constant dense<0.000000e+00> : vector<8x8xf32>
    %58 = tpu.matmul %55, %57, %cst_29 {dimension_numbers = #tpu.dot_dimension_numbers<[1], [0], [0], [1], [0, 0, 1, 1], [], []>} : vector<8x8xf32>, vector<8x8xf32>, vector<8x8xf32> -> vector<8x8xf32>
    %59 = arith.addf %58, %10 : vector<8x8xf32>
    %cst_30 = arith.constant dense<0xFF800000> : vector<8xf32>
    %60 = vector.multi_reduction <maximumf>, %59, %cst_30 [1] : vector<8x8xf32> to vector<8xf32>
    %61 = vector.shape_cast %60 : vector<8xf32> to vector<8x1xf32>
    %62 = vector.broadcast %61 : vector<8x1xf32> to vector<8x8xf32>
    %63 = arith.subf %59, %62 : vector<8x8xf32>
    %64 = math.exp %63 : vector<8x8xf32>
    %cst_31 = arith.constant dense<0.000000e+00> : vector<8xf32>
    %65 = vector.multi_reduction <add>, %64, %cst_31 [1] : vector<8x8xf32> to vector<8xf32>
    %66 = vector.shape_cast %65 : vector<8xf32> to vector<8x1xf32>
    %67 = tpu.reciprocal %66 {approx = true} : vector<8x1xf32> -> vector<8x1xf32>
    %68 = vector.broadcast %67 : vector<8x1xf32> to vector<8x8xf32>
    %69 = arith.mulf %64, %68 : vector<8x8xf32>
    %70 = vector.extract_strided_slice %20 {offsets = [0, 16], sizes = [8, 8], strides = [1, 1]} : vector<8x32xf32> to vector<8x8xf32>
    %cst_32 = arith.constant dense<0.000000e+00> : vector<8x8xf32>
    %71 = tpu.matmul %69, %70, %cst_32 {dimension_numbers = #tpu.dot_dimension_numbers<[1], [0], [0], [1], [0, 0, 1, 1], [], []>} : vector<8x8xf32>, vector<8x8xf32>, vector<8x8xf32> -> vector<8x8xf32>
    %72 = vector.extract_strided_slice %15 {offsets = [0, 24], sizes = [8, 8], strides = [1, 1]} : vector<8x32xf32> to vector<8x8xf32>
    %73 = vector.extract_strided_slice %19 {offsets = [0, 24], sizes = [8, 8], strides = [1, 1]} : vector<8x32xf32> to vector<8x8xf32>
    %74 = tpu.transpose %73, [1, 0] : vector<8x8xf32> -> vector<8x8xf32>
    %cst_33 = arith.constant dense<0.000000e+00> : vector<8x8xf32>
    %75 = tpu.matmul %72, %74, %cst_33 {dimension_numbers = #tpu.dot_dimension_numbers<[1], [0], [0], [1], [0, 0, 1, 1], [], []>} : vector<8x8xf32>, vector<8x8xf32>, vector<8x8xf32> -> vector<8x8xf32>
    %76 = arith.addf %75, %10 : vector<8x8xf32>
    %cst_34 = arith.constant dense<0xFF800000> : vector<8xf32>
    %77 = vector.multi_reduction <maximumf>, %76, %cst_34 [1] : vector<8x8xf32> to vector<8xf32>
    %78 = vector.shape_cast %77 : vector<8xf32> to vector<8x1xf32>
    %79 = vector.broadcast %78 : vector<8x1xf32> to vector<8x8xf32>
    %80 = arith.subf %76, %79 : vector<8x8xf32>
    %81 = math.exp %80 : vector<8x8xf32>
    %cst_35 = arith.constant dense<0.000000e+00> : vector<8xf32>
    %82 = vector.multi_reduction <add>, %81, %cst_35 [1] : vector<8x8xf32> to vector<8xf32>
    %83 = vector.shape_cast %82 : vector<8xf32> to vector<8x1xf32>
    %84 = tpu.reciprocal %83 {approx = true} : vector<8x1xf32> -> vector<8x1xf32>
    %85 = vector.broadcast %84 : vector<8x1xf32> to vector<8x8xf32>
    %86 = arith.mulf %81, %85 : vector<8x8xf32>
    %87 = vector.extract_strided_slice %20 {offsets = [0, 24], sizes = [8, 8], strides = [1, 1]} : vector<8x32xf32> to vector<8x8xf32>
    %cst_36 = arith.constant dense<0.000000e+00> : vector<8x8xf32>
    %88 = tpu.matmul %86, %87, %cst_36 {dimension_numbers = #tpu.dot_dimension_numbers<[1], [0], [0], [1], [0, 0, 1, 1], [], []>} : vector<8x8xf32>, vector<8x8xf32>, vector<8x8xf32> -> vector<8x8xf32>
    %89 = tpu.concatenate %37, %54, %71, %88 in 1 : vector<8x8xf32>, vector<8x8xf32>, vector<8x8xf32>, vector<8x8xf32> -> vector<8x32xf32>
    %cst_37 = arith.constant dense<0.000000e+00> : vector<8x32xf32>
    %90 = tpu.matmul %89, %8, %cst_37 {dimension_numbers = #tpu.dot_dimension_numbers<[1], [0], [0], [1], [0, 0, 1, 1], [], []>} : vector<8x32xf32>, vector<32x32xf32>, vector<8x32xf32> -> vector<8x32xf32>
    %91 = vector.broadcast %9 : vector<1x32xf32> to vector<8x32xf32>
    %92 = arith.addf %90, %91 : vector<8x32xf32>
    %93 = arith.addf %1, %92 : vector<8x32xf32>
    %c0_38 = arith.constant 0 : index
    %c0_39 = arith.constant 0 : index
    %94 = vector.load %arg10[%c0_38, %c0_39] : memref<1x32xf32, #tpu.memory_space<vmem>>, vector<1x32xf32>
    %c0_40 = arith.constant 0 : index
    %c0_41 = arith.constant 0 : index
    %95 = vector.load %arg11[%c0_40, %c0_41] : memref<1x32xf32, #tpu.memory_space<vmem>>, vector<1x32xf32>
    %cst_42 = arith.constant dense<0.000000e+00> : vector<8xf32>
    %96 = vector.multi_reduction <add>, %93, %cst_42 [1] : vector<8x32xf32> to vector<8xf32>
    %97 = vector.shape_cast %96 : vector<8xf32> to vector<8x1xf32>
    %cst_43 = arith.constant 3.200000e+01 : f32
    %98 = vector.broadcast %cst_43 : f32 to vector<8x1xf32>
    %99 = arith.divf %97, %98 : vector<8x1xf32>
    %100 = vector.broadcast %99 : vector<8x1xf32> to vector<8x32xf32>
    %101 = arith.subf %93, %100 : vector<8x32xf32>
    %102 = arith.mulf %101, %101 : vector<8x32xf32>
    %cst_44 = arith.constant dense<0.000000e+00> : vector<8xf32>
    %103 = vector.multi_reduction <add>, %102, %cst_44 [1] : vector<8x32xf32> to vector<8xf32>
    %104 = vector.shape_cast %103 : vector<8xf32> to vector<8x1xf32>
    %cst_45 = arith.constant 3.200000e+01 : f32
    %105 = vector.broadcast %cst_45 : f32 to vector<8x1xf32>
    %106 = arith.divf %104, %105 : vector<8x1xf32>
    %107 = vector.broadcast %99 : vector<8x1xf32> to vector<8x32xf32>
    %108 = arith.subf %93, %107 : vector<8x32xf32>
    %cst_46 = arith.constant 9.99999974E-6 : f32
    %109 = vector.broadcast %cst_46 : f32 to vector<8x1xf32>
    %110 = arith.addf %106, %109 : vector<8x1xf32>
    %111 = math.rsqrt %110 : vector<8x1xf32>
    %112 = vector.broadcast %111 : vector<8x1xf32> to vector<8x32xf32>
    %113 = arith.mulf %108, %112 : vector<8x32xf32>
    %114 = vector.broadcast %94 : vector<1x32xf32> to vector<8x32xf32>
    %115 = arith.mulf %113, %114 : vector<8x32xf32>
    %116 = vector.broadcast %95 : vector<1x32xf32> to vector<8x32xf32>
    %117 = arith.addf %115, %116 : vector<8x32xf32>
    %c0_47 = arith.constant 0 : index
    %c0_48 = arith.constant 0 : index
    %118 = vector.load %arg12[%c0_47, %c0_48] : memref<32x32xf32, #tpu.memory_space<vmem>>, vector<32x32xf32>
    %c0_49 = arith.constant 0 : index
    %c0_50 = arith.constant 0 : index
    %119 = vector.load %arg13[%c0_49, %c0_50] : memref<1x32xf32, #tpu.memory_space<vmem>>, vector<1x32xf32>
    %c0_51 = arith.constant 0 : index
    %c0_52 = arith.constant 0 : index
    %120 = vector.load %arg14[%c0_51, %c0_52] : memref<32x64xf32, #tpu.memory_space<vmem>>, vector<32x64xf32>
    %c0_53 = arith.constant 0 : index
    %c0_54 = arith.constant 0 : index
    %121 = vector.load %arg15[%c0_53, %c0_54] : memref<1x64xf32, #tpu.memory_space<vmem>>, vector<1x64xf32>
    %c0_55 = arith.constant 0 : index
    %c0_56 = arith.constant 0 : index
    %122 = vector.load %arg16[%c0_55, %c0_56] : memref<32x32xf32, #tpu.memory_space<vmem>>, vector<32x32xf32>
    %c0_57 = arith.constant 0 : index
    %c0_58 = arith.constant 0 : index
    %123 = vector.load %arg17[%c0_57, %c0_58] : memref<1x32xf32, #tpu.memory_space<vmem>>, vector<1x32xf32>
    %cst_59 = arith.constant dense<0.000000e+00> : vector<8x32xf32>
    %124 = tpu.matmul %117, %118, %cst_59 {dimension_numbers = #tpu.dot_dimension_numbers<[1], [0], [0], [1], [0, 0, 1, 1], [], []>} : vector<8x32xf32>, vector<32x32xf32>, vector<8x32xf32> -> vector<8x32xf32>
    %125 = vector.broadcast %119 : vector<1x32xf32> to vector<8x32xf32>
    %126 = arith.addf %124, %125 : vector<8x32xf32>
    %cst_60 = arith.constant 0.353553385 : f32
    %127 = vector.broadcast %cst_60 : f32 to vector<8x32xf32>
    %128 = arith.mulf %126, %127 : vector<8x32xf32>
    %cst_61 = arith.constant dense<0.000000e+00> : vector<8x64xf32>
    %129 = tpu.matmul %3, %120, %cst_61 {dimension_numbers = #tpu.dot_dimension_numbers<[1], [0], [0], [1], [0, 0, 1, 1], [], []>} : vector<8x32xf32>, vector<32x64xf32>, vector<8x64xf32> -> vector<8x64xf32>
    %130 = vector.broadcast %121 : vector<1x64xf32> to vector<8x64xf32>
    %131 = arith.addf %129, %130 : vector<8x64xf32>
    %132 = vector.extract_strided_slice %131 {offsets = [0, 0], sizes = [8, 32], strides = [1, 1]} : vector<8x64xf32> to vector<8x32xf32>
    %133 = vector.extract_strided_slice %131 {offsets = [0, 32], sizes = [8, 32], strides = [1, 1]} : vector<8x64xf32> to vector<8x32xf32>
    %134 = vector.extract_strided_slice %128 {offsets = [0, 0], sizes = [8, 8], strides = [1, 1]} : vector<8x32xf32> to vector<8x8xf32>
    %135 = vector.extract_strided_slice %132 {offsets = [0, 0], sizes = [8, 8], strides = [1, 1]} : vector<8x32xf32> to vector<8x8xf32>
    %136 = tpu.transpose %135, [1, 0] : vector<8x8xf32> -> vector<8x8xf32>
    %cst_62 = arith.constant dense<0.000000e+00> : vector<8x8xf32>
    %137 = tpu.matmul %134, %136, %cst_62 {dimension_numbers = #tpu.dot_dimension_numbers<[1], [0], [0], [1], [0, 0, 1, 1], [], []>} : vector<8x8xf32>, vector<8x8xf32>, vector<8x8xf32> -> vector<8x8xf32>
    %cst_63 = arith.constant dense<0xFF800000> : vector<8xf32>
    %138 = vector.multi_reduction <maximumf>, %137, %cst_63 [1] : vector<8x8xf32> to vector<8xf32>
    %139 = vector.shape_cast %138 : vector<8xf32> to vector<8x1xf32>
    %140 = vector.broadcast %139 : vector<8x1xf32> to vector<8x8xf32>
    %141 = arith.subf %137, %140 : vector<8x8xf32>
    %142 = math.exp %141 : vector<8x8xf32>
    %cst_64 = arith.constant dense<0.000000e+00> : vector<8xf32>
    %143 = vector.multi_reduction <add>, %142, %cst_64 [1] : vector<8x8xf32> to vector<8xf32>
    %144 = vector.shape_cast %143 : vector<8xf32> to vector<8x1xf32>
    %145 = tpu.reciprocal %144 {approx = true} : vector<8x1xf32> -> vector<8x1xf32>
    %146 = vector.broadcast %145 : vector<8x1xf32> to vector<8x8xf32>
    %147 = arith.mulf %142, %146 : vector<8x8xf32>
    %148 = vector.extract_strided_slice %133 {offsets = [0, 0], sizes = [8, 8], strides = [1, 1]} : vector<8x32xf32> to vector<8x8xf32>
    %cst_65 = arith.constant dense<0.000000e+00> : vector<8x8xf32>
    %149 = tpu.matmul %147, %148, %cst_65 {dimension_numbers = #tpu.dot_dimension_numbers<[1], [0], [0], [1], [0, 0, 1, 1], [], []>} : vector<8x8xf32>, vector<8x8xf32>, vector<8x8xf32> -> vector<8x8xf32>
    %150 = vector.extract_strided_slice %128 {offsets = [0, 8], sizes = [8, 8], strides = [1, 1]} : vector<8x32xf32> to vector<8x8xf32>
    %151 = vector.extract_strided_slice %132 {offsets = [0, 8], sizes = [8, 8], strides = [1, 1]} : vector<8x32xf32> to vector<8x8xf32>
    %152 = tpu.transpose %151, [1, 0] : vector<8x8xf32> -> vector<8x8xf32>
    %cst_66 = arith.constant dense<0.000000e+00> : vector<8x8xf32>
    %153 = tpu.matmul %150, %152, %cst_66 {dimension_numbers = #tpu.dot_dimension_numbers<[1], [0], [0], [1], [0, 0, 1, 1], [], []>} : vector<8x8xf32>, vector<8x8xf32>, vector<8x8xf32> -> vector<8x8xf32>
    %cst_67 = arith.constant dense<0xFF800000> : vector<8xf32>
    %154 = vector.multi_reduction <maximumf>, %153, %cst_67 [1] : vector<8x8xf32> to vector<8xf32>
    %155 = vector.shape_cast %154 : vector<8xf32> to vector<8x1xf32>
    %156 = vector.broadcast %155 : vector<8x1xf32> to vector<8x8xf32>
    %157 = arith.subf %153, %156 : vector<8x8xf32>
    %158 = math.exp %157 : vector<8x8xf32>
    %cst_68 = arith.constant dense<0.000000e+00> : vector<8xf32>
    %159 = vector.multi_reduction <add>, %158, %cst_68 [1] : vector<8x8xf32> to vector<8xf32>
    %160 = vector.shape_cast %159 : vector<8xf32> to vector<8x1xf32>
    %161 = tpu.reciprocal %160 {approx = true} : vector<8x1xf32> -> vector<8x1xf32>
    %162 = vector.broadcast %161 : vector<8x1xf32> to vector<8x8xf32>
    %163 = arith.mulf %158, %162 : vector<8x8xf32>
    %164 = vector.extract_strided_slice %133 {offsets = [0, 8], sizes = [8, 8], strides = [1, 1]} : vector<8x32xf32> to vector<8x8xf32>
    %cst_69 = arith.constant dense<0.000000e+00> : vector<8x8xf32>
    %165 = tpu.matmul %163, %164, %cst_69 {dimension_numbers = #tpu.dot_dimension_numbers<[1], [0], [0], [1], [0, 0, 1, 1], [], []>} : vector<8x8xf32>, vector<8x8xf32>, vector<8x8xf32> -> vector<8x8xf32>
    %166 = vector.extract_strided_slice %128 {offsets = [0, 16], sizes = [8, 8], strides = [1, 1]} : vector<8x32xf32> to vector<8x8xf32>
    %167 = vector.extract_strided_slice %132 {offsets = [0, 16], sizes = [8, 8], strides = [1, 1]} : vector<8x32xf32> to vector<8x8xf32>
    %168 = tpu.transpose %167, [1, 0] : vector<8x8xf32> -> vector<8x8xf32>
    %cst_70 = arith.constant dense<0.000000e+00> : vector<8x8xf32>
    %169 = tpu.matmul %166, %168, %cst_70 {dimension_numbers = #tpu.dot_dimension_numbers<[1], [0], [0], [1], [0, 0, 1, 1], [], []>} : vector<8x8xf32>, vector<8x8xf32>, vector<8x8xf32> -> vector<8x8xf32>
    %cst_71 = arith.constant dense<0xFF800000> : vector<8xf32>
    %170 = vector.multi_reduction <maximumf>, %169, %cst_71 [1] : vector<8x8xf32> to vector<8xf32>
    %171 = vector.shape_cast %170 : vector<8xf32> to vector<8x1xf32>
    %172 = vector.broadcast %171 : vector<8x1xf32> to vector<8x8xf32>
    %173 = arith.subf %169, %172 : vector<8x8xf32>
    %174 = math.exp %173 : vector<8x8xf32>
    %cst_72 = arith.constant dense<0.000000e+00> : vector<8xf32>
    %175 = vector.multi_reduction <add>, %174, %cst_72 [1] : vector<8x8xf32> to vector<8xf32>
    %176 = vector.shape_cast %175 : vector<8xf32> to vector<8x1xf32>
    %177 = tpu.reciprocal %176 {approx = true} : vector<8x1xf32> -> vector<8x1xf32>
    %178 = vector.broadcast %177 : vector<8x1xf32> to vector<8x8xf32>
    %179 = arith.mulf %174, %178 : vector<8x8xf32>
    %180 = vector.extract_strided_slice %133 {offsets = [0, 16], sizes = [8, 8], strides = [1, 1]} : vector<8x32xf32> to vector<8x8xf32>
    %cst_73 = arith.constant dense<0.000000e+00> : vector<8x8xf32>
    %181 = tpu.matmul %179, %180, %cst_73 {dimension_numbers = #tpu.dot_dimension_numbers<[1], [0], [0], [1], [0, 0, 1, 1], [], []>} : vector<8x8xf32>, vector<8x8xf32>, vector<8x8xf32> -> vector<8x8xf32>
    %182 = vector.extract_strided_slice %128 {offsets = [0, 24], sizes = [8, 8], strides = [1, 1]} : vector<8x32xf32> to vector<8x8xf32>
    %183 = vector.extract_strided_slice %132 {offsets = [0, 24], sizes = [8, 8], strides = [1, 1]} : vector<8x32xf32> to vector<8x8xf32>
    %184 = tpu.transpose %183, [1, 0] : vector<8x8xf32> -> vector<8x8xf32>
    %cst_74 = arith.constant dense<0.000000e+00> : vector<8x8xf32>
    %185 = tpu.matmul %182, %184, %cst_74 {dimension_numbers = #tpu.dot_dimension_numbers<[1], [0], [0], [1], [0, 0, 1, 1], [], []>} : vector<8x8xf32>, vector<8x8xf32>, vector<8x8xf32> -> vector<8x8xf32>
    %cst_75 = arith.constant dense<0xFF800000> : vector<8xf32>
    %186 = vector.multi_reduction <maximumf>, %185, %cst_75 [1] : vector<8x8xf32> to vector<8xf32>
    %187 = vector.shape_cast %186 : vector<8xf32> to vector<8x1xf32>
    %188 = vector.broadcast %187 : vector<8x1xf32> to vector<8x8xf32>
    %189 = arith.subf %185, %188 : vector<8x8xf32>
    %190 = math.exp %189 : vector<8x8xf32>
    %cst_76 = arith.constant dense<0.000000e+00> : vector<8xf32>
    %191 = vector.multi_reduction <add>, %190, %cst_76 [1] : vector<8x8xf32> to vector<8xf32>
    %192 = vector.shape_cast %191 : vector<8xf32> to vector<8x1xf32>
    %193 = tpu.reciprocal %192 {approx = true} : vector<8x1xf32> -> vector<8x1xf32>
    %194 = vector.broadcast %193 : vector<8x1xf32> to vector<8x8xf32>
    %195 = arith.mulf %190, %194 : vector<8x8xf32>
    %196 = vector.extract_strided_slice %133 {offsets = [0, 24], sizes = [8, 8], strides = [1, 1]} : vector<8x32xf32> to vector<8x8xf32>
    %cst_77 = arith.constant dense<0.000000e+00> : vector<8x8xf32>
    %197 = tpu.matmul %195, %196, %cst_77 {dimension_numbers = #tpu.dot_dimension_numbers<[1], [0], [0], [1], [0, 0, 1, 1], [], []>} : vector<8x8xf32>, vector<8x8xf32>, vector<8x8xf32> -> vector<8x8xf32>
    %198 = tpu.concatenate %149, %165, %181, %197 in 1 : vector<8x8xf32>, vector<8x8xf32>, vector<8x8xf32>, vector<8x8xf32> -> vector<8x32xf32>
    %cst_78 = arith.constant dense<0.000000e+00> : vector<8x32xf32>
    %199 = tpu.matmul %198, %122, %cst_78 {dimension_numbers = #tpu.dot_dimension_numbers<[1], [0], [0], [1], [0, 0, 1, 1], [], []>} : vector<8x32xf32>, vector<32x32xf32>, vector<8x32xf32> -> vector<8x32xf32>
    %200 = vector.broadcast %123 : vector<1x32xf32> to vector<8x32xf32>
    %201 = arith.addf %199, %200 : vector<8x32xf32>
    %202 = arith.addf %117, %201 : vector<8x32xf32>
    %c0_79 = arith.constant 0 : index
    %c0_80 = arith.constant 0 : index
    %203 = vector.load %arg18[%c0_79, %c0_80] : memref<1x32xf32, #tpu.memory_space<vmem>>, vector<1x32xf32>
    %c0_81 = arith.constant 0 : index
    %c0_82 = arith.constant 0 : index
    %204 = vector.load %arg19[%c0_81, %c0_82] : memref<1x32xf32, #tpu.memory_space<vmem>>, vector<1x32xf32>
    %cst_83 = arith.constant dense<0.000000e+00> : vector<8xf32>
    %205 = vector.multi_reduction <add>, %202, %cst_83 [1] : vector<8x32xf32> to vector<8xf32>
    %206 = vector.shape_cast %205 : vector<8xf32> to vector<8x1xf32>
    %cst_84 = arith.constant 3.200000e+01 : f32
    %207 = vector.broadcast %cst_84 : f32 to vector<8x1xf32>
    %208 = arith.divf %206, %207 : vector<8x1xf32>
    %209 = vector.broadcast %208 : vector<8x1xf32> to vector<8x32xf32>
    %210 = arith.subf %202, %209 : vector<8x32xf32>
    %211 = arith.mulf %210, %210 : vector<8x32xf32>
    %cst_85 = arith.constant dense<0.000000e+00> : vector<8xf32>
    %212 = vector.multi_reduction <add>, %211, %cst_85 [1] : vector<8x32xf32> to vector<8xf32>
    %213 = vector.shape_cast %212 : vector<8xf32> to vector<8x1xf32>
    %cst_86 = arith.constant 3.200000e+01 : f32
    %214 = vector.broadcast %cst_86 : f32 to vector<8x1xf32>
    %215 = arith.divf %213, %214 : vector<8x1xf32>
    %216 = vector.broadcast %208 : vector<8x1xf32> to vector<8x32xf32>
    %217 = arith.subf %202, %216 : vector<8x32xf32>
    %cst_87 = arith.constant 9.99999974E-6 : f32
    %218 = vector.broadcast %cst_87 : f32 to vector<8x1xf32>
    %219 = arith.addf %215, %218 : vector<8x1xf32>
    %220 = math.rsqrt %219 : vector<8x1xf32>
    %221 = vector.broadcast %220 : vector<8x1xf32> to vector<8x32xf32>
    %222 = arith.mulf %217, %221 : vector<8x32xf32>
    %223 = vector.broadcast %203 : vector<1x32xf32> to vector<8x32xf32>
    %224 = arith.mulf %222, %223 : vector<8x32xf32>
    %225 = vector.broadcast %204 : vector<1x32xf32> to vector<8x32xf32>
    %226 = arith.addf %224, %225 : vector<8x32xf32>
    %c0_88 = arith.constant 0 : index
    %c0_89 = arith.constant 0 : index
    %227 = vector.load %arg20[%c0_88, %c0_89] : memref<32x64xf32, #tpu.memory_space<vmem>>, vector<32x64xf32>
    %c0_90 = arith.constant 0 : index
    %c0_91 = arith.constant 0 : index
    %228 = vector.load %arg21[%c0_90, %c0_91] : memref<1x64xf32, #tpu.memory_space<vmem>>, vector<1x64xf32>
    %c0_92 = arith.constant 0 : index
    %c0_93 = arith.constant 0 : index
    %229 = vector.load %arg22[%c0_92, %c0_93] : memref<64x32xf32, #tpu.memory_space<vmem>>, vector<64x32xf32>
    %c0_94 = arith.constant 0 : index
    %c0_95 = arith.constant 0 : index
    %230 = vector.load %arg23[%c0_94, %c0_95] : memref<1x32xf32, #tpu.memory_space<vmem>>, vector<1x32xf32>
    %cst_96 = arith.constant dense<0.000000e+00> : vector<8x64xf32>
    %231 = tpu.matmul %226, %227, %cst_96 {dimension_numbers = #tpu.dot_dimension_numbers<[1], [0], [0], [1], [0, 0, 1, 1], [], []>} : vector<8x32xf32>, vector<32x64xf32>, vector<8x64xf32> -> vector<8x64xf32>
    %232 = vector.broadcast %228 : vector<1x64xf32> to vector<8x64xf32>
    %233 = arith.addf %231, %232 : vector<8x64xf32>
    %cst_97 = arith.constant 0.000000e+00 : f32
    %234 = vector.broadcast %cst_97 : f32 to vector<8x64xf32>
    %235 = arith.maximumf %233, %234 : vector<8x64xf32>
    %cst_98 = arith.constant dense<0.000000e+00> : vector<8x32xf32>
    %236 = tpu.matmul %235, %229, %cst_98 {dimension_numbers = #tpu.dot_dimension_numbers<[1], [0], [0], [1], [0, 0, 1, 1], [], []>} : vector<8x64xf32>, vector<64x32xf32>, vector<8x32xf32> -> vector<8x32xf32>
    %237 = vector.broadcast %230 : vector<1x32xf32> to vector<8x32xf32>
    %238 = arith.addf %236, %237 : vector<8x32xf32>
    %239 = arith.addf %226, %238 : vector<8x32xf32>
    %c0_99 = arith.constant 0 : index
    %c0_100 = arith.constant 0 : index
    %240 = vector.load %arg24[%c0_99, %c0_100] : memref<1x32xf32, #tpu.memory_space<vmem>>, vector<1x32xf32>
    %c0_101 = arith.constant 0 : index
    %c0_102 = arith.constant 0 : index
    %241 = vector.load %arg25[%c0_101, %c0_102] : memref<1x32xf32, #tpu.memory_space<vmem>>, vector<1x32xf32>
    %cst_103 = arith.constant dense<0.000000e+00> : vector<8xf32>
    %242 = vector.multi_reduction <add>, %239, %cst_103 [1] : vector<8x32xf32> to vector<8xf32>
    %243 = vector.shape_cast %242 : vector<8xf32> to vector<8x1xf32>
    %cst_104 = arith.constant 3.200000e+01 : f32
    %244 = vector.broadcast %cst_104 : f32 to vector<8x1xf32>
    %245 = arith.divf %243, %244 : vector<8x1xf32>
    %246 = vector.broadcast %245 : vector<8x1xf32> to vector<8x32xf32>
    %247 = arith.subf %239, %246 : vector<8x32xf32>
    %248 = arith.mulf %247, %247 : vector<8x32xf32>
    %cst_105 = arith.constant dense<0.000000e+00> : vector<8xf32>
    %249 = vector.multi_reduction <add>, %248, %cst_105 [1] : vector<8x32xf32> to vector<8xf32>
    %250 = vector.shape_cast %249 : vector<8xf32> to vector<8x1xf32>
    %cst_106 = arith.constant 3.200000e+01 : f32
    %251 = vector.broadcast %cst_106 : f32 to vector<8x1xf32>
    %252 = arith.divf %250, %251 : vector<8x1xf32>
    %253 = vector.broadcast %245 : vector<8x1xf32> to vector<8x32xf32>
    %254 = arith.subf %239, %253 : vector<8x32xf32>
    %cst_107 = arith.constant 9.99999974E-6 : f32
    %255 = vector.broadcast %cst_107 : f32 to vector<8x1xf32>
    %256 = arith.addf %252, %255 : vector<8x1xf32>
    %257 = math.rsqrt %256 : vector<8x1xf32>
    %258 = vector.broadcast %257 : vector<8x1xf32> to vector<8x32xf32>
    %259 = arith.mulf %254, %258 : vector<8x32xf32>
    %260 = vector.broadcast %240 : vector<1x32xf32> to vector<8x32xf32>
    %261 = arith.mulf %259, %260 : vector<8x32xf32>
    %262 = vector.broadcast %241 : vector<1x32xf32> to vector<8x32xf32>
    %263 = arith.addf %261, %262 : vector<8x32xf32>
    %c0_108 = arith.constant 0 : index
    %c0_109 = arith.constant 0 : index
    %264 = vector.load %arg26[%c0_108, %c0_109] : memref<1x32xf32, #tpu.memory_space<vmem>>, vector<1x32xf32>
    %c0_110 = arith.constant 0 : index
    %c0_111 = arith.constant 0 : index
    %265 = vector.load %arg27[%c0_110, %c0_111] : memref<1x32xf32, #tpu.memory_space<vmem>>, vector<1x32xf32>
    %cst_112 = arith.constant dense<0.000000e+00> : vector<8xf32>
    %266 = vector.multi_reduction <add>, %263, %cst_112 [1] : vector<8x32xf32> to vector<8xf32>
    %267 = vector.shape_cast %266 : vector<8xf32> to vector<8x1xf32>
    %cst_113 = arith.constant 3.200000e+01 : f32
    %268 = vector.broadcast %cst_113 : f32 to vector<8x1xf32>
    %269 = arith.divf %267, %268 : vector<8x1xf32>
    %270 = vector.broadcast %269 : vector<8x1xf32> to vector<8x32xf32>
    %271 = arith.subf %263, %270 : vector<8x32xf32>
    %272 = arith.mulf %271, %271 : vector<8x32xf32>
    %cst_114 = arith.constant dense<0.000000e+00> : vector<8xf32>
    %273 = vector.multi_reduction <add>, %272, %cst_114 [1] : vector<8x32xf32> to vector<8xf32>
    %274 = vector.shape_cast %273 : vector<8xf32> to vector<8x1xf32>
    %cst_115 = arith.constant 3.200000e+01 : f32
    %275 = vector.broadcast %cst_115 : f32 to vector<8x1xf32>
    %276 = arith.divf %274, %275 : vector<8x1xf32>
    %277 = vector.broadcast %269 : vector<8x1xf32> to vector<8x32xf32>
    %278 = arith.subf %263, %277 : vector<8x32xf32>
    %cst_116 = arith.constant 9.99999974E-6 : f32
    %279 = vector.broadcast %cst_116 : f32 to vector<8x1xf32>
    %280 = arith.addf %276, %279 : vector<8x1xf32>
    %281 = math.rsqrt %280 : vector<8x1xf32>
    %282 = vector.broadcast %281 : vector<8x1xf32> to vector<8x32xf32>
    %283 = arith.mulf %278, %282 : vector<8x32xf32>
    %284 = vector.broadcast %264 : vector<1x32xf32> to vector<8x32xf32>
    %285 = arith.mulf %283, %284 : vector<8x32xf32>
    %286 = vector.broadcast %265 : vector<1x32xf32> to vector<8x32xf32>
    %287 = arith.addf %285, %286 : vector<8x32xf32>
    %c0_117 = arith.constant 0 : index
    %c0_118 = arith.constant 0 : index
    %c0_119 = arith.constant 0 : index
    %288 = vector.load %arg28[%c0_117, %c0_118, %c0_119] : memref<1x8x32xf32, #tpu.memory_space<vmem>>, vector<1x8x32xf32>
    %289 = vector.shape_cast %288 : vector<1x8x32xf32> to vector<8x32xf32>
    %290 = vector.shape_cast %287 : vector<8x32xf32> to vector<1x8x32xf32>
    tpu.vector_store %arg28[%c0_117, %c0_118, %c0_119], %290 {strides = array<i32>} : memref<1x8x32xf32, #tpu.memory_space<vmem>>, vector<1x8x32xf32>,
    return
  }
  func.func @transform_0(%arg0: i32) -> (i32, i32, i32) {
    %c0_i32 = arith.constant 0 : i32
    %c0_i32_0 = arith.constant 0 : i32
    %c0_i32_1 = arith.constant 0 : i32
    return %arg0, %c0_i32, %c0_i32_0 : i32, i32, i32
  }
  func.func @transform_1(%arg0: i32) -> (i32, i32, i32) {
    %c0_i32 = arith.constant 0 : i32
    %c0_i32_0 = arith.constant 0 : i32
    %c0_i32_1 = arith.constant 0 : i32
    return %arg0, %c0_i32, %c0_i32_0 : i32, i32, i32
  }
  func.func @transform_2(%arg0: i32) -> (i32, i32) {
    %c0_i32 = arith.constant 0 : i32
    %c0_i32_0 = arith.constant 0 : i32
    %c0_i32_1 = arith.constant 0 : i32
    return %c0_i32, %c0_i32_0 : i32, i32
  }
  func.func @transform_3(%arg0: i32) -> (i32, i32) {
    %c0_i32 = arith.constant 0 : i32
    %c0_i32_0 = arith.constant 0 : i32
    %c0_i32_1 = arith.constant 0 : i32
    return %c0_i32, %c0_i32_0 : i32, i32
  }
  func.func @transform_4(%arg0: i32) -> (i32, i32) {
    %c0_i32 = arith.constant 0 : i32
    %c0_i32_0 = arith.constant 0 : i32
    %c0_i32_1 = arith.constant 0 : i32
    return %c0_i32, %c0_i32_0 : i32, i32
  }
  func.func @transform_5(%arg0: i32) -> (i32, i32) {
    %c0_i32 = arith.constant 0 : i32
    %c0_i32_0 = arith.constant 0 : i32
    %c0_i32_1 = arith.constant 0 : i32
    return %c0_i32, %c0_i32_0 : i32, i32
  }
  func.func @transform_6(%arg0: i32) -> (i32, i32) {
    %c0_i32 = arith.constant 0 : i32
    %c0_i32_0 = arith.constant 0 : i32
    %c0_i32_1 = arith.constant 0 : i32
    return %c0_i32, %c0_i32_0 : i32, i32
  }
  func.func @transform_7(%arg0: i32) -> (i32, i32) {
    %c0_i32 = arith.constant 0 : i32
    %c0_i32_0 = arith.constant 0 : i32
    %c0_i32_1 = arith.constant 0 : i32
    return %c0_i32, %c0_i32_0 : i32, i32
  }
  func.func @transform_8(%arg0: i32) -> (i32, i32) {
    %c0_i32 = arith.constant 0 : i32
    %c0_i32_0 = arith.constant 0 : i32
    %c0_i32_1 = arith.constant 0 : i32
    return %c0_i32, %c0_i32_0 : i32, i32
  }
  func.func @transform_9(%arg0: i32) -> (i32, i32) {
    %c0_i32 = arith.constant 0 : i32
    %c0_i32_0 = arith.constant 0 : i32
    %c0_i32_1 = arith.constant 0 : i32
    return %c0_i32, %c0_i32_0 : i32, i32
  }
  func.func @transform_10(%arg0: i32) -> (i32, i32) {
    %c0_i32 = arith.constant 0 : i32
    %c0_i32_0 = arith.constant 0 : i32
    %c0_i32_1 = arith.constant 0 : i32
    return %c0_i32, %c0_i32_0 : i32, i32
  }
  func.func @transform_11(%arg0: i32) -> (i32, i32) {
    %c0_i32 = arith.constant 0 : i32
    %c0_i32_0 = arith.constant 0 : i32
    %c0_i32_1 = arith.constant 0 : i32
    return %c0_i32, %c0_i32_0 : i32, i32
  }
  func.func @transform_12(%arg0: i32) -> (i32, i32) {
    %c0_i32 = arith.constant 0 : i32
    %c0_i32_0 = arith.constant 0 : i32
    %c0_i32_1 = arith.constant 0 : i32
    return %c0_i32, %c0_i32_0 : i32, i32
  }
  func.func @transform_13(%arg0: i32) -> (i32, i32) {
    %c0_i32 = arith.constant 0 : i32
    %c0_i32_0 = arith.constant 0 : i32
    %c0_i32_1 = arith.constant 0 : i32
    return %c0_i32, %c0_i32_0 : i32, i32
  }
  func.func @transform_14(%arg0: i32) -> (i32, i32) {
    %c0_i32 = arith.constant 0 : i32
    %c0_i32_0 = arith.constant 0 : i32
    %c0_i32_1 = arith.constant 0 : i32
    return %c0_i32, %c0_i32_0 : i32, i32
  }
  func.func @transform_15(%arg0: i32) -> (i32, i32) {
    %c0_i32 = arith.constant 0 : i32
    %c0_i32_0 = arith.constant 0 : i32
    %c0_i32_1 = arith.constant 0 : i32
    return %c0_i32, %c0_i32_0 : i32, i32
  }
  func.func @transform_16(%arg0: i32) -> (i32, i32) {
    %c0_i32 = arith.constant 0 : i32
    %c0_i32_0 = arith.constant 0 : i32
    %c0_i32_1 = arith.constant 0 : i32
    return %c0_i32, %c0_i32_0 : i32, i32
  }
  func.func @transform_17(%arg0: i32) -> (i32, i32) {
    %c0_i32 = arith.constant 0 : i32
    %c0_i32_0 = arith.constant 0 : i32
    %c0_i32_1 = arith.constant 0 : i32
    return %c0_i32, %c0_i32_0 : i32, i32
  }
  func.func @transform_18(%arg0: i32) -> (i32, i32) {
    %c0_i32 = arith.constant 0 : i32
    %c0_i32_0 = arith.constant 0 : i32
    %c0_i32_1 = arith.constant 0 : i32
    return %c0_i32, %c0_i32_0 : i32, i32
  }
  func.func @transform_19(%arg0: i32) -> (i32, i32) {
    %c0_i32 = arith.constant 0 : i32
    %c0_i32_0 = arith.constant 0 : i32
    %c0_i32_1 = arith.constant 0 : i32
    return %c0_i32, %c0_i32_0 : i32, i32
  }
  func.func @transform_20(%arg0: i32) -> (i32, i32) {
    %c0_i32 = arith.constant 0 : i32
    %c0_i32_0 = arith.constant 0 : i32
    %c0_i32_1 = arith.constant 0 : i32
    return %c0_i32, %c0_i32_0 : i32, i32
  }
  func.func @transform_21(%arg0: i32) -> (i32, i32) {
    %c0_i32 = arith.constant 0 : i32
    %c0_i32_0 = arith.constant 0 : i32
    %c0_i32_1 = arith.constant 0 : i32
    return %c0_i32, %c0_i32_0 : i32, i32
  }
  func.func @transform_22(%arg0: i32) -> (i32, i32) {
    %c0_i32 = arith.constant 0 : i32
    %c0_i32_0 = arith.constant 0 : i32
    %c0_i32_1 = arith.constant 0 : i32
    return %c0_i32, %c0_i32_0 : i32, i32
  }
  func.func @transform_23(%arg0: i32) -> (i32, i32) {
    %c0_i32 = arith.constant 0 : i32
    %c0_i32_0 = arith.constant 0 : i32
    %c0_i32_1 = arith.constant 0 : i32
    return %c0_i32, %c0_i32_0 : i32, i32
  }
  func.func @transform_24(%arg0: i32) -> (i32, i32) {
    %c0_i32 = arith.constant 0 : i32
    %c0_i32_0 = arith.constant 0 : i32
    %c0_i32_1 = arith.constant 0 : i32
    return %c0_i32, %c0_i32_0 : i32, i32
  }
  func.func @transform_25(%arg0: i32) -> (i32, i32) {
    %c0_i32 = arith.constant 0 : i32
    %c0_i32_0 = arith.constant 0 : i32
    %c0_i32_1 = arith.constant 0 : i32
    return %c0_i32, %c0_i32_0 : i32, i32
  }
  func.func @transform_26(%arg0: i32) -> (i32, i32) {
    %c0_i32 = arith.constant 0 : i32
    %c0_i32_0 = arith.constant 0 : i32
    %c0_i32_1 = arith.constant 0 : i32
    return %c0_i32, %c0_i32_0 : i32, i32
  }
  func.func @transform_27(%arg0: i32) -> (i32, i32, i32) {
    %c0_i32 = arith.constant 0 : i32
    %c0_i32_0 = arith.constant 0 : i32
    %c0_i32_1 = arith.constant 0 : i32
    return %arg0, %c0_i32, %c0_i32_0 : i32, i32, i32
  }
}

module attributes {stable_mosaic.version = 11 : i64} {
  func.func @_out_head_kernel(%arg0: i32, %arg1: memref<16x32xf32, #tpu.memory_space<vmem>>, %arg2: memref<32x64xf32, #tpu.memory_space<vmem>>, %arg3: memref<1x64xf32, #tpu.memory_space<vmem>>, %arg4: memref<64x5xf32, #tpu.memory_space<vmem>>, %arg5: memref<1x5xf32, #tpu.memory_space<vmem>>, %arg6: memref<16x5xf32, #tpu.memory_space<vmem>>) attributes {dimension_semantics = [#tpu.dimension_semantics<parallel>], iteration_bounds = array<i64: 1>, scalar_prefetch = 0 : i64, scratch_operands = 0 : i64, tpu.core_type = #tpu.core_type<tc>, window_params = [{transform_indices = @transform_0, window_bounds = array<i64: 16, 32>}, {pipeline_mode = #tpu.pipeline_mode<synchronous>, transform_indices = @transform_1, window_bounds = array<i64: 32, 64>}, {pipeline_mode = #tpu.pipeline_mode<synchronous>, transform_indices = @transform_2, window_bounds = array<i64: 1, 64>}, {pipeline_mode = #tpu.pipeline_mode<synchronous>, transform_indices = @transform_3, window_bounds = array<i64: 64, 5>}, {pipeline_mode = #tpu.pipeline_mode<synchronous>, transform_indices = @transform_4, window_bounds = array<i64: 1, 5>}, {transform_indices = @transform_5, window_bounds = array<i64: 16, 5>}]} {
    %c0 = arith.constant 0 : index
    %c0_0 = arith.constant 0 : index
    %0 = vector.load %arg1[%c0, %c0_0] : memref<16x32xf32, #tpu.memory_space<vmem>>, vector<16x32xf32>
    %c0_1 = arith.constant 0 : index
    %c0_2 = arith.constant 0 : index
    %1 = vector.load %arg2[%c0_1, %c0_2] : memref<32x64xf32, #tpu.memory_space<vmem>>, vector<32x64xf32>
    %cst = arith.constant dense<0.000000e+00> : vector<16x64xf32>
    %2 = tpu.matmul %0, %1, %cst {dimension_numbers = #tpu.dot_dimension_numbers<[1], [0], [0], [1], [0, 0, 1, 1], [], []>} : vector<16x32xf32>, vector<32x64xf32>, vector<16x64xf32> -> vector<16x64xf32>
    %c0_3 = arith.constant 0 : index
    %c0_4 = arith.constant 0 : index
    %3 = vector.load %arg3[%c0_3, %c0_4] : memref<1x64xf32, #tpu.memory_space<vmem>>, vector<1x64xf32>
    %4 = vector.broadcast %3 : vector<1x64xf32> to vector<16x64xf32>
    %5 = arith.addf %2, %4 : vector<16x64xf32>
    %cst_5 = arith.constant 0.000000e+00 : f32
    %6 = vector.broadcast %cst_5 : f32 to vector<16x64xf32>
    %7 = arith.maximumf %5, %6 : vector<16x64xf32>
    %c0_6 = arith.constant 0 : index
    %c0_7 = arith.constant 0 : index
    %8 = vector.load %arg4[%c0_6, %c0_7] : memref<64x5xf32, #tpu.memory_space<vmem>>, vector<64x5xf32>
    %cst_8 = arith.constant dense<0.000000e+00> : vector<16x5xf32>
    %9 = tpu.matmul %7, %8, %cst_8 {dimension_numbers = #tpu.dot_dimension_numbers<[1], [0], [0], [1], [0, 0, 1, 1], [], []>} : vector<16x64xf32>, vector<64x5xf32>, vector<16x5xf32> -> vector<16x5xf32>
    %c0_9 = arith.constant 0 : index
    %c0_10 = arith.constant 0 : index
    %10 = vector.load %arg5[%c0_9, %c0_10] : memref<1x5xf32, #tpu.memory_space<vmem>>, vector<1x5xf32>
    %11 = vector.broadcast %10 : vector<1x5xf32> to vector<16x5xf32>
    %12 = arith.addf %9, %11 : vector<16x5xf32>
    %c0_11 = arith.constant 0 : index
    %c0_12 = arith.constant 0 : index
    %13 = vector.load %arg6[%c0_11, %c0_12] : memref<16x5xf32, #tpu.memory_space<vmem>>, vector<16x5xf32>
    tpu.vector_store %arg6[%c0_11, %c0_12], %12 {strides = array<i32>} : memref<16x5xf32, #tpu.memory_space<vmem>>, vector<16x5xf32>,
    return
  }
  func.func @transform_0(%arg0: i32) -> (i32, i32) {
    %c0_i32 = arith.constant 0 : i32
    %c0_i32_0 = arith.constant 0 : i32
    return %arg0, %c0_i32 : i32, i32
  }
  func.func @transform_1(%arg0: i32) -> (i32, i32) {
    %c0_i32 = arith.constant 0 : i32
    %c0_i32_0 = arith.constant 0 : i32
    %c0_i32_1 = arith.constant 0 : i32
    return %c0_i32, %c0_i32_0 : i32, i32
  }
  func.func @transform_2(%arg0: i32) -> (i32, i32) {
    %c0_i32 = arith.constant 0 : i32
    %c0_i32_0 = arith.constant 0 : i32
    %c0_i32_1 = arith.constant 0 : i32
    return %c0_i32, %c0_i32_0 : i32, i32
  }
  func.func @transform_3(%arg0: i32) -> (i32, i32) {
    %c0_i32 = arith.constant 0 : i32
    %c0_i32_0 = arith.constant 0 : i32
    %c0_i32_1 = arith.constant 0 : i32
    return %c0_i32, %c0_i32_0 : i32, i32
  }
  func.func @transform_4(%arg0: i32) -> (i32, i32) {
    %c0_i32 = arith.constant 0 : i32
    %c0_i32_0 = arith.constant 0 : i32
    %c0_i32_1 = arith.constant 0 : i32
    return %c0_i32, %c0_i32_0 : i32, i32
  }
  func.func @transform_5(%arg0: i32) -> (i32, i32) {
    %c0_i32 = arith.constant 0 : i32
    %c0_i32_0 = arith.constant 0 : i32
    return %arg0, %c0_i32 : i32, i32
  }
}

</mosaic_0001>

<bundles_post_ra>
// kernel: forward.7
= control target key start
LH: loop header
LB: loop body
LE: loop exit
PB: predicated region body
PF: predicated region fallthrough
CT: control target
= control target key end

     0   :  { %s401_s15 = smov 0   ;;  %s427_s0 = inlined_call_operand.vmem [shape: f32[2,8,6], index: 0, kind: input, shape index: {}]   ;;  %s428_s1 = inlined_call_operand.vmem [shape: f32[6,32], index: 1, kind: input, shape index: {}]   ;;  %s429_s2 = inlined_call_operand.vmem [shape: f32[1,32], index: 2, kind: input, shape index: {}]   ;;  %s430_s3 = inlined_call_operand.vmem [shape: f32[8,32], index: 3, kind: input, shape index: {}]   ;;  %s431_s4 = inlined_call_operand.vmem [shape: f32[2,8,32], index: 4, kind: output, shape index: {}]  }
   0x1 LB: > { %s337_s16 = sadd.s32 4294967295, %s372_s15   ;;  %p341_p0 = scmp.ge.s32.totalorder %s372_s15, 1  ;;  %s372_s15 = sphi %s401_s15, %s14_s15  }
   0x2   : > { %p161_p1 = scmp.lt.s32.totalorder %s372_s15, 3 }
   0x4   : > { %p162_p2 = pnand %p341_p0, %p161_p1 }
   0x5   : > { %v194_v0 = vld [vmem:[%s428_s1] sm:$0x3f] (!%p162_p2)  ;;  %vm206_vm0 = vcmask (!%p162_p2), 1045504   ;;  %p185_p3 = scmp.lt.s32.totalorder (!%p162_p2), %s337_s16, 1  ;;  %v374_v1 = vmov (!%p162_p2), 0.0   ;;  %vm375_vm1 = vmmov (!%p162_p2), 0  }
   0x6   : > { %165 = sbr.rel (%p162_p2) target bundleno = 234 (0xea), region = 36  ;;  %351 = vmatprep.subr.mxu0 (!%p162_p2), %v374_v1  ;;  %353 = vmatprep.mubr.msk.f32.mxu0 (!%p162_p2), %vm375_vm1, %v374_v1  ;;  %vm202_vm2 = vcmask (!%p162_p2), 48128   ;;  %v344_v3 = vld [vmem:[%s429_s2] ss:$0 sm:$0xff] (!%p162_p2)  ;;  %vm282_vm3 = vcmask (!%p162_p2), 261120  }
   0x7   : > { %352 = vmatpush3.msk.msra.mxu0 (!%p162_p2), %vm206_vm0, %v194_v0  ;;  %v280_v5 = vld [vmem:[%s430_s3] sm:$0xff] (!%p162_p2) }
   0xd   : > { %s433_s16 = smov (!%p185_p3, %s337_s16), 1 }
   0xe   : > { %s342_s19 = sshll.u32 %s433_s16, 3 }
   0xf   : > { %s188_s22 = scalar_lea.vmem %s427_s0, %s342_s19  ;;  %s192_s29 = scalar_lea.vmem %s431_s4, %s342_s19 }
  0x10   : > { %v193_v2 = vld [vmem:[%s188_s22] sm:$0xff] }
  0x11   : > { %354 = vmatmul.mubr.msk.f32.vlgmr.msra.gmra.mrb[0].mxu0 %vm202_vm2, %v193_v2 }
  0xe4   : > { %v276_v4 = vpop.f32.mrb[0].mxu0 }
  0xe5   : > { %v277_v6 = vadd.f32 %v344_v3, %v276_v4  ;;  %v355_v7 = vpop.f32.mrb[1].mxu0 }
  0xe7   : > { %v281_v8 = vadd.f32 %v280_v5, %v277_v6 }
  0xe9   : > { %283 = vst.msk [vmem:[%s192_s29] sm:$0xff] %vm282_vm3, %v281_v8 }
  0xea PF: > { %s14_s15 = sadd.s32 1, %s372_s15  }
  0xeb   : > { %p11_p4 = scmp.ge.s32.totalorder %s14_s15, 4  }
  0xed   :  { %13 = sbr.rel (!%p11_p4) target bundleno = 1 (0x1), region = 66 }

// kernel: forward.8
= control target key start
LH: loop header
LB: loop body
LE: loop exit
PB: predicated region body
PF: predicated region fallthrough
CT: control target
= control target key end

     0   :  { %s401_s15 = smov 0   ;;  %s427_s0 = inlined_call_operand.vmem [shape: f32[2,8,5], index: 0, kind: input, shape index: {}]   ;;  %s428_s1 = inlined_call_operand.vmem [shape: f32[5,32], index: 1, kind: input, shape index: {}]   ;;  %s429_s2 = inlined_call_operand.vmem [shape: f32[1,32], index: 2, kind: input, shape index: {}]   ;;  %s430_s3 = inlined_call_operand.vmem [shape: f32[8,32], index: 3, kind: input, shape index: {}]   ;;  %s431_s4 = inlined_call_operand.vmem [shape: f32[2,8,32], index: 4, kind: output, shape index: {}]  }
   0x1 LB: > { %s337_s16 = sadd.s32 4294967295, %s372_s15   ;;  %p341_p0 = scmp.ge.s32.totalorder %s372_s15, 1  ;;  %s372_s15 = sphi %s401_s15, %s14_s15  }
   0x2   : > { %p161_p1 = scmp.lt.s32.totalorder %s372_s15, 3 }
   0x4   : > { %p162_p2 = pnand %p341_p0, %p161_p1 }
   0x5   : > { %v194_v0 = vld [vmem:[%s428_s1] sm:$0x1f] (!%p162_p2)  ;;  %vm206_vm0 = vcmask (!%p162_p2), 1044480   ;;  %p185_p3 = scmp.lt.s32.totalorder (!%p162_p2), %s337_s16, 1  ;;  %v374_v1 = vmov (!%p162_p2), 0.0   ;;  %vm375_vm1 = vmmov (!%p162_p2), 0  }
   0x6   : > { %165 = sbr.rel (%p162_p2) target bundleno = 234 (0xea), region = 36  ;;  %351 = vmatprep.subr.mxu0 (!%p162_p2), %v374_v1  ;;  %353 = vmatprep.mubr.msk.f32.mxu0 (!%p162_p2), %vm375_vm1, %v374_v1  ;;  %vm202_vm2 = vcmask (!%p162_p2), 39936   ;;  %v344_v3 = vld [vmem:[%s429_s2] ss:$0 sm:$0xff] (!%p162_p2)  ;;  %vm282_vm3 = vcmask (!%p162_p2), 261120  }
   0x7   : > { %352 = vmatpush3.msk.msra.mxu0 (!%p162_p2), %vm206_vm0, %v194_v0  ;;  %v280_v5 = vld [vmem:[%s430_s3] sm:$0xff] (!%p162_p2) }
   0xd   : > { %s433_s16 = smov (!%p185_p3, %s337_s16), 1 }
   0xe   : > { %s342_s19 = sshll.u32 %s433_s16, 3 }
   0xf   : > { %s188_s22 = scalar_lea.vmem %s427_s0, %s342_s19  ;;  %s192_s29 = scalar_lea.vmem %s431_s4, %s342_s19 }
  0x10   : > { %v193_v2 = vld [vmem:[%s188_s22] sm:$0xff] }
  0x11   : > { %354 = vmatmul.mubr.msk.f32.vlgmr.msra.gmra.mrb[0].mxu0 %vm202_vm2, %v193_v2 }
  0xe4   : > { %v276_v4 = vpop.f32.mrb[0].mxu0 }
  0xe5   : > { %v277_v6 = vadd.f32 %v344_v3, %v276_v4  ;;  %v355_v7 = vpop.f32.mrb[1].mxu0 }
  0xe7   : > { %v281_v8 = vadd.f32 %v280_v5, %v277_v6 }
  0xe9   : > { %283 = vst.msk [vmem:[%s192_s29] sm:$0xff] %vm282_vm3, %v281_v8 }
  0xea PF: > { %s14_s15 = sadd.s32 1, %s372_s15  }
  0xeb   : > { %p11_p4 = scmp.ge.s32.totalorder %s14_s15, 4  }
  0xed   :  { %13 = sbr.rel (!%p11_p4) target bundleno = 1 (0x1), region = 66 }

// kernel: forward.9
= control target key start
LH: loop header
LB: loop body
LE: loop exit
PB: predicated region body
PF: predicated region fallthrough
CT: control target
= control target key end

     0   :  { %s2101_s21 = smov 0   ;;  %s2318_s0 = inlined_call_operand.vmem [shape: f32[2,8,32], index: 0, kind: input, shape index: {}]   ;;  %s2319_s1 = inlined_call_operand.vmem [shape: f32[8,8], index: 1, kind: input, shape index: {}]   ;;  %s2320_s2 = inlined_call_operand.vmem [shape: f32[32,32], index: 2, kind: input, shape index: {}]   ;;  %s2321_s3 = inlined_call_operand.vmem [shape: f32[1,32], index: 3, kind: input, shape index: {}]   ;;  %s2322_s4 = inlined_call_operand.vmem [shape: f32[32,64], index: 4, kind: input, shape index: {}]   ;;  %s2323_s5 = inlined_call_operand.vmem [shape: f32[1,64], index: 5, kind: input, shape index: {}]   ;;  %s2324_s6 = inlined_call_operand.vmem [shape: f32[32,32], index: 6, kind: input, shape index: {}]   ;;  %s2325_s7 = inlined_call_operand.vmem [shape: f32[1,32], index: 7, kind: input, shape index: {}]   ;;  %s2326_s8 = inlined_call_operand.vmem [shape: f32[1,32], index: 8, kind: input, shape index: {}]   ;;  %s2327_s9 = inlined_call_operand.vmem [shape: f32[1,32], index: 9, kind: input, shape index: {}]   ;;  %s2328_s10 = inlined_call_operand.vmem [shape: f32[32,64], index: 10, kind: input, shape index: {}]   ;;  %s2329_s11 = inlined_call_operand.vmem [shape: f32[1,64], index: 11, kind: input, shape index: {}]   ;;  %s2330_s12 = inlined_call_operand.vmem [shape: f32[64,32], index: 12, kind: input, shape index: {}]   ;;  %s2331_s13 = inlined_call_operand.vmem [shape: f32[1,32], index: 13, kind: input, shape index: {}]   ;;  %s2332_s14 = inlined_call_operand.vmem [shape: f32[1,32], index: 14, kind: input, shape index: {}]   ;;  %s2333_s15 = inlined_call_operand.vmem [shape: f32[1,32], index: 15, kind: input, shape index: {}]   ;;  %s2334_s16 = inlined_call_operand.vmem [shape: f32[2,8,32], index: 16, kind: output, shape index: {}]  }
   0x1   :  { %2335 = sst [smem:[#allocation2_spill]] %s2318_s0 }
   0x2 LB: > { %s1735_s22 = sadd.s32 4294967295, %s2001_s21   ;;  %p1739_p0 = scmp.ge.s32.totalorder %s2001_s21, 1  ;;  %s2001_s21 = sphi %s2101_s21, %s26_s21  }
   0x3   : > { %p461_p1 = scmp.lt.s32.totalorder %s2001_s21, 3 }
   0x5   : > { %p462_p2 = pnand %p1739_p0, %p461_p1 }
   0x6   : > { %v518_v0 = vld [vmem:[%s2320_s2] sm:$0xff] (!%p462_p2)  ;;  %v519_v1 = vld [vmem:[%s2320_s2 + $0x8] sm:$0xff] (!%p462_p2)  ;;  %v520_v2 = vld [vmem:[%s2320_s2 + $0x10] sm:$0xff] (!%p462_p2)  ;;  %v2003_v3 = vmov (!%p462_p2), 0.0|0.0   ;;  %vm2004_vm0 = vmmov (!%p462_p2), 0   ;;  %v2005_v6 = vmov (!%p462_p2), 0.0  }
   0x7   : > { %465 = sbr.rel (%p462_p2) target bundleno = 2499 (0x9c3), region = 84  ;;  %1918 = vmatprep.subr.bf16.mxu1 (!%p462_p2), %v2003_v3  ;;  %v1919_v4 = vpack.c.bf16 (!%p462_p2), %v519_v1, %v518_v0  ;;  %v521_v5 = vld [vmem:[%s2320_s2 + $0x18] sm:$0xff] (!%p462_p2)  ;;  %1823 = vmatprep.mubr.msk.f32.mxu1 (!%p462_p2), %vm2004_vm0, %v2005_v6  ;;  %p509_p3 = scmp.lt.s32.totalorder (!%p462_p2), %s1735_s22, 1  ;;  %v523_v8 = vld [vmem:[%s2322_s4] sm:$0xff] (!%p462_p2)  ;;  %v524_v9 = vld [vmem:[%s2322_s4 + $0x8] sm:$0xff] (!%p462_p2)  ;;  %vm540_vm1 = vcmask (!%p462_p2), 261120  }
   0x8   : > { %1837 = vmatprep.subr.mxu0 (!%p462_p2), %v2005_v6  ;;  %1839 = vmatprep.mubr.msk.f32.mxu0 (!%p462_p2), %vm2004_vm0, %v2005_v6  ;;  %v1922_v7 = vpack.c.bf16 (!%p462_p2), %v521_v5, %v520_v2  ;;  %s2336_s25 = sld [smem:[#allocation2_spill]] (!%p462_p2)  ;;  %v1925_v11 = vpack.c.bf16 (!%p462_p2), %v524_v9, %v523_v8  ;;  %v525_v12 = vld [vmem:[%s2322_s4 + $0x10] sm:$0xff] (!%p462_p2)  ;;  %v526_v13 = vld [vmem:[%s2322_s4 + $0x18] sm:$0xff] (!%p462_p2)  ;;  %v1742_v17 = vld [vmem:[%s2321_s3] ss:$0 sm:$0xff] (!%p462_p2)  ;;  %vm691_vm2 = vcmask (!%p462_p2), 64512  }
   0x9   : > { %1920 = vmatpush3.bf16.msra.mxu1 (!%p462_p2), %v1919_v4  ;;  %v1928_v14 = vpack.c.bf16 (!%p462_p2), %v526_v13, %v525_v12  ;;  %v1744_v18 = vld [vmem:[%s2323_s5] ss:$0 sm:$0xff] (!%p462_p2)  ;;  %s2006_s23 = smov (!%p462_p2), 112   ;;  %s2007_s24 = smov (!%p462_p2), 120   ;;  %vm1363_vm3 = vcmask (!%p462_p2), 130048   ;;  %vm1365_vm4 = vcmask (!%p462_p2), 195584  }
   0xa   : > { %1921 = vmatprep.subr.bf16.mxu1 (!%p462_p2), %v2003_v3  ;;  %v533_v30 = vld [vmem:[%s2319_s1] sm:$0xff] (!%p462_p2)  ;;  %s2009_s28 = smov (!%p462_p2), 96   ;;  %s2010_s29 = smov (!%p462_p2), 80   ;;  %vm1577_vm5 = vcmask (!%p462_p2), 523264  }
   0xb   : > { %s2011_s30 = smov (!%p462_p2), 72   ;;  %s2012_s0 = smov (!%p462_p2), 88  }
   0xd   : > { %1923 = vmatpush3.bf16.msra.mxu1 (!%p462_p2), %v1922_v7 }
   0xe   : > { %s2338_s22 = smov (!%p509_p3, %s1735_s22), 1  ;;  %1924 = vmatprep.subr.bf16.mxu1 %v2003_v3 }
   0xf   : > { %s1740_s20 = sshll.u32 %s2338_s22, 3 }
  0x10   : > { %s512_s26 = scalar_lea.vmem %s2336_s25, %s1740_s20  ;;  %s2008_s25 = smov 104  }
  0x11   : > { %v2142_v10 = vld [vmem:[%s512_s26] sm:$0xff] }
  0x12   : > { %1824 = vmatmul.mubr.msk.f32.vlgmr.msra.gmra.mrb[0].mxu1 %vm540_vm1, %v2142_v10 }
  0x13   : > { %1926 = vmatpush3.bf16.msra.mxu1 %v1925_v11  ;;  %1834 = vmatprep.mubr.msk.f32.mxu1 %vm2004_vm0, %v2005_v6 }
  0x14   : > { %1927 = vmatprep.subr.bf16.mxu1 %v2003_v3 }
  0x17   : > { %1929 = vmatpush3.bf16.msra.mxu1 %v1928_v14 }
  0x18   : > { %1842 = vmatprep.subr.mxu1 %v2005_v6 }
  0x1a   : > { %1835 = vmatmul.mubr.msk.f32.vlgmr.msra.gmra.mrb[2].mxu1 %vm540_vm1, %v2142_v10 }
  0x1b   : > { %1844 = vmatprep.mubr.msk.f32.mxu1 %vm2004_vm0, %v2005_v6 }
  0xe5   : > { %v610_v15 = vpop.f32.mrb[0].mxu1 }
  0xe6   : > { %v1825_v16 = vpop.f32.mrb[1].mxu1  ;;  %v611_v20 = vadd.f32 %v1742_v17, %v610_v15 }
  0xe8   : > { %v614_v23 = vmul.f32 0.35355338, %v611_v20 }
  0xed   : > { %v687_v19 = vpop.f32.mrb[2].mxu1 }
  0xee   : > { %v2167_v21 = vadd.f32 %v1744_v18, %v687_v19  ;;  %v1836_v22 = vpop.f32.mrb[3].mxu1 }
  0xf0   : > { %1022 = vrot.lane.b32.xlu1 %v2167_v21, %s2006_s23  ;;  %857 = vrot.lane.b32.xlu0 %v2167_v21, %s2007_s24 }
  0xf1   : > { %1838 = vmatpush3.xpose.msk.msra.mxu0 %vm691_vm2, %v2167_v21 }
  0xf2   : > { %1847 = vmatprep.subr.mxu0 %v2005_v6 }
  0xf4   : > { %1840 = vmatmul.mubr.msk.f32.vlgmr.msra.gmra.mrb[0].mxu0 %vm691_vm2, %v614_v23  ;;  %1020 = vrot.lane.b32.xlu1 %v614_v23, %s2006_s23  ;;  %s516_s23 = scalar_lea.vmem %s2334_s16, %s1740_s20 }
  0xf5   : > { %855 = vrot.lane.b32.xlu0 %v614_v23, %s2007_s24  ;;  %1849 = vmatprep.mubr.msk.f32.mxu0 %vm2004_vm0, %v2005_v6 }
  0xf8   : > { %1185 = vrot.lane.b32.xlu1 %v614_v23, %s2008_s25 }
  0xf9   : > { %1187 = vrot.lane.b32.xlu0 %v2167_v21, %s2008_s25 }
 0x162   : > { %v858_v24 = vpop.permute.xlu0 %857  ;;  %v1023_v25 = vpop.permute.xlu1 %1022 }
 0x163   : > { %1848 = vmatpush3.xpose.msk.msra.mxu0 %vm691_vm2, %v858_v24  ;;  %v528_v24 = vld [vmem:[%s2324_s6] sm:$0xff] }
 0x164   : > { %1857 = vmatprep.subr.mxu0 %v2005_v6 }
 0x166   : > { %v1021_v27 = vpop.permute.xlu1 %1020 }
 0x167   : > { %v856_v26 = vpop.permute.xlu0 %855 }
 0x168   : > { %1850 = vmatmul.mubr.msk.f32.vlgmr.msra.gmra.mrb[2].mxu0 %vm691_vm2, %v856_v26 }
 0x169   : > { %1858 = vmatpush3.xpose.msk.msra.mxu0 %vm691_vm2, %v1023_v25  ;;  %1859 = vmatprep.mubr.msk.f32.mxu0 %vm2004_vm0, %v2005_v6  ;;  %v529_v25 = vld [vmem:[%s2324_s6 + $0x8] sm:$0xff] }
 0x16a   : > { %1867 = vmatprep.subr.mxu0 %v2005_v6  ;;  %v1186_v29 = vpop.permute.xlu1 %1185  ;;  %v1931_v26 = vpack.c.bf16 %v529_v25, %v528_v24 }
 0x16b   : > { %v1188_v28 = vpop.permute.xlu0 %1187 }
 0x16c   : > { %1860 = vmatmul.mubr.msk.f32.vlgmr.msra.gmra.mrb[4].mxu0 %vm691_vm2, %v1021_v27  ;;  %v530_v27 = vld [vmem:[%s2324_s6 + $0x10] sm:$0xff] }
 0x16d   : > { %1868 = vmatpush3.xpose.msk.msra.mxu0 %vm691_vm2, %v1188_v28  ;;  %1869 = vmatprep.mubr.msk.f32.mxu0 %vm2004_vm0, %v2005_v6  ;;  %v531_v28 = vld [vmem:[%s2324_s6 + $0x18] sm:$0xff] }
 0x16e   : > { %1930 = vmatprep.subr.bf16.mxu0 %v2003_v3 }
 0x170   : > { %1870 = vmatmul.mubr.msk.f32.vlgmr.msra.gmra.mrb[6].mxu0 %vm691_vm2, %v1186_v29  ;;  %v1934_v29 = vpack.c.bf16 %v531_v28, %v530_v27 }
 0x171   : > { %1885 = vmatprep.mubr.msk.f32.mxu0 %vm2004_vm0, %v2005_v6  ;;  %1932 = vmatpush3.bf16.msra.mxu0 %v1931_v26 }
 0x172   : > { %1933 = vmatprep.subr.bf16.mxu0 %v2003_v3 }
 0x175   : > { %1935 = vmatpush3.bf16.msra.mxu0 %v1934_v29 }
 0x176   : > { %1942 = vmatprep.subr.bf16.mxu0 %v2003_v3 }
 0x1c7   : > { %v764_v31 = vpop.f32.mrb[0].mxu0 }
 0x1c8   : > { %v765_v32 = vadd.f32 %v764_v31, %v533_v30  ;;  %v1841_v33 = vpop.f32.mrb[1].mxu0 }
 0x1ca   : > { %v768_v34 = vsel %vm691_vm2, %v765_v32, -inf }
 0x1cb   : > { %769 = vmax.xlane.f32.xlu0 %v768_v34 }
 0x23b   : > { %v929_v35 = vpop.f32.mrb[2].mxu0 }
 0x23c   : > { %v930_v36 = vadd.f32 %v929_v35, %v533_v30  ;;  %v1851_v37 = vpop.f32.mrb[3].mxu0 }
 0x23e   : > { %v933_v38 = vsel %vm691_vm2, %v930_v36, -inf }
 0x23f   : > { %934 = vmax.xlane.f32.xlu1 %v933_v38  ;;  %v1094_v39 = vpop.f32.mrb[4].mxu0 }
 0x240   : > { %v1095_v40 = vadd.f32 %v1094_v39, %v533_v30  ;;  %v1861_v41 = vpop.f32.mrb[5].mxu0 }
 0x242   : > { %v1098_v42 = vsel %vm691_vm2, %v1095_v40, -inf }
 0x243   : > { %1099 = vmax.xlane.f32.xlu0 %v1098_v42  ;;  %v1259_v43 = vpop.f32.mrb[6].mxu0  ;;  %v1758_v42 = vld [vmem:[%s2325_s7] ss:$0 sm:$0xff] }
 0x244   : > { %v1260_v44 = vadd.f32 %v1259_v43, %v533_v30  ;;  %v1871_v45 = vpop.f32.mrb[7].mxu0 }
 0x246   : > { %v1263_v46 = vsel %vm691_vm2, %v1260_v44, -inf }
 0x247   : > { %1264 = vmax.xlane.f32.xlu0 %v1263_v46 }
 0x250   : > { %779 = vrot.lane.b32.xlu1 %v2167_v21, %s2009_s28  ;;  %s2013_s28 = smov 8  }
 0x258   : > { %v770_v47 = vpop.xlane.xlu0 %769 }
 0x259   : > { %v771_v48 = vsub.f32 %v765_v32, %v770_v47 }
 0x25b   : > { %v772_v49 = vmul.f32 1.442695, %v771_v48 }
 0x25d   : > { %1975 = vpow2.f32 %v772_v49 }
 0x267   : > { %v1976_v50 = vpop.eup %1975 }
 0x268   : > { %v774_v51 = vsel %vm691_vm2, %v1976_v50, 0.0 }
 0x274   : > { %775 = vadd.xlane.f32.xlu1 %v774_v51 }
 0x2cc   : > { %v935_v52 = vpop.xlane.xlu1 %934 }
 0x2cd   : > { %v936_v53 = vsub.f32 %v930_v36, %v935_v52 }
 0x2cf   : > { %v937_v54 = vmul.f32 1.442695, %v936_v53  ;;  %v1478_v53 = vld [vmem:[%s2328_s10 + $0x8] sm:$0xff] }
 0x2d0   : > { %v780_v55 = vpop.permute.xlu1 %779  ;;  %v1100_v56 = vpop.xlane.xlu0 %1099 }
 0x2d1   : > { %1977 = vpow2.f32 %v937_v54  ;;  %v1101_v57 = vsub.f32 %v1095_v40, %v1100_v56  ;;  %1843 = vmatpush3.msra.mxu1 %v780_v55  ;;  %v1480_v55 = vld [vmem:[%s2328_s10 + $0x18] sm:$0xff] }
 0x2d2   : > { %1852 = vmatprep.subr.mxu1 %v2005_v6 }
 0x2d3   : > { %v1102_v58 = vmul.f32 1.442695, %v1101_v57  ;;  %v1482_v57 = vld [vmem:[%s2330_s12] sm:$0xff] }
 0x2d4   : > { %v1265_v59 = vpop.xlane.xlu0 %1264 }
 0x2d5   : > { %1979 = vpow2.f32 %v1102_v58  ;;  %v1266_v60 = vsub.f32 %v1260_v44, %v1265_v59  ;;  %v1483_v58 = vld [vmem:[%s2330_s12 + $0x8] sm:$0xff]  ;;  %v1484_v59 = vld [vmem:[%s2330_s12 + $0x10] sm:$0xff] }
 0x2d7   : > { %v1267_v61 = vmul.f32 1.442695, %v1266_v60  ;;  %v1943_v60 = vpack.c.bf16 %v1483_v58, %v1482_v57 }
 0x2d9   : > { %1981 = vpow2.f32 %v1267_v61  ;;  %v1485_v61 = vld [vmem:[%s2330_s12 + $0x18] sm:$0xff] }
 0x2db   : > { %v1978_v62 = vpop.eup %1977 }
 0x2dc   : > { %v939_v63 = vsel %vm691_vm2, %v1978_v62, 0.0 }
 0x2dd   : > { %940 = vadd.xlane.f32.xlu0 %v939_v63  ;;  %v1486_v63 = vld [vmem:[%s2330_s12 + $0x20] sm:$0xff] }
 0x2df   : > { %v1980_v0 = vpop.eup %1979 }
 0x2e0   : > { %v1104_v1 = vsel %vm691_vm2, %v1980_v0, 0.0 }
 0x2e1   : > { %1105 = vadd.xlane.f32.xlu1 %v1104_v1 }
 0x2e3   : > { %v1982_v2 = vpop.eup %1981 }
 0x2e4   : > { %v1269_v4 = vsel %vm691_vm2, %v1982_v2, 0.0 }
 0x2e5   : > { %1270 = vadd.xlane.f32.xlu0 %v1269_v4 }
 0x2f2   : > { %1109 = vrot.lane.b32.xlu1 %v2167_v21, %s2010_s29  ;;  %s2014_s29 = smov 16  }
 0x2f6   : > { %1274 = vrot.lane.b32.xlu1 %v2167_v21, %s2011_s30  ;;  %s2015_s30 = smov 24  }
 0x2fb   : > { %944 = vrot.lane.b32.xlu0 %v2167_v21, %s2012_s0 }
 0x301   : > { %v776_v5 = vpop.xlane.xlu1 %775 }
 0x302   : > { %1983 = vrcp.f32 %v776_v5 }
 0x30c   : > { %v1984_v7 = vpop.eup %1983 }
 0x30d   : > { %v778_v8 = vmul.f32 %v1984_v7, %v1976_v50 }
 0x30f   : > { %1845 = vmatmul.mubr.msk.f32.vlgmr.msra.gmra.mrb[4].mxu1 %vm691_vm2, %v778_v8  ;;  %v1760_v8 = vld [vmem:[%s2326_s8] ss:$0 sm:$0xff] }
 0x310   : > { %1854 = vmatprep.mubr.msk.f32.mxu1 %vm2004_vm0, %v2005_v6 }
 0x36a   : > { %v941_v9 = vpop.xlane.xlu0 %940 }
 0x36b   : > { %1985 = vrcp.f32 %v941_v9 }
 0x36e   : > { %v1106_v11 = vpop.xlane.xlu1 %1105 }
 0x36f   : > { %1987 = vrcp.f32 %v1106_v11  ;;  %v1761_v11 = vld [vmem:[%s2327_s9] ss:$0 sm:$0xff] }
 0x372   : > { %v1271_v12 = vpop.xlane.xlu0 %1270  ;;  %v1110_v15 = vpop.permute.xlu1 %1109 }
 0x373   : > { %1989 = vrcp.f32 %v1271_v12 }
 0x375   : > { %v1986_v13 = vpop.eup %1985 }
 0x376   : > { %v943_v14 = vmul.f32 %v1986_v13, %v1978_v62  ;;  %v945_v16 = vpop.permute.xlu0 %944  ;;  %v1275_v19 = vpop.permute.xlu1 %1274  ;;  %v1946_v62 = vpack.c.bf16 %v1485_v61, %v1484_v59 }
 0x377   : > { %1853 = vmatpush3.msra.mxu1 %v945_v16  ;;  %v1762_v16 = vld [vmem:[%s2329_s11] ss:$0 sm:$0xff] }
 0x378   : > { %1855 = vmatmul.mubr.msk.f32.vlgmr.msra.gmra.mrb[6].mxu1 %vm691_vm2, %v943_v14  ;;  %1862 = vmatprep.subr.mxu1 %v2005_v6  ;;  %v1489_v14 = vld [vmem:[%s2330_s12 + $0x38] sm:$0xff] }
 0x379   : > { %v1988_v17 = vpop.eup %1987  ;;  %1863 = vmatpush3.msra.mxu1 %v1110_v15  ;;  %1864 = vmatprep.mubr.msk.f32.mxu1 %vm2004_vm0, %v2005_v6 }
 0x37a   : > { %v1108_v18 = vmul.f32 %v1988_v17, %v1980_v0  ;;  %1872 = vmatprep.subr.mxu1 %v2005_v6  ;;  %v1487_v0 = vld [vmem:[%s2330_s12 + $0x28] sm:$0xff] }
 0x37b   : > { %v1949_v1 = vpack.c.bf16 %v1487_v0, %v1486_v63 }
 0x37c   : > { %1865 = vmatmul.mubr.msk.f32.vlgmr.msra.gmra.mrb[8].mxu1 %vm691_vm2, %v1108_v18 }
 0x37d   : > { %v1990_v20 = vpop.eup %1989  ;;  %1873 = vmatpush3.msra.mxu1 %v1275_v19  ;;  %1874 = vmatprep.mubr.msk.f32.mxu1 %vm2004_vm0, %v2005_v6 }
 0x37e   : > { %v1273_v21 = vmul.f32 %v1990_v20, %v1982_v2  ;;  %1936 = vmatprep.subr.bf16.mxu1 %v2003_v3 }
 0x380   : > { %1875 = vmatmul.mubr.msk.f32.vlgmr.msra.gmra.mrb[10].mxu1 %vm691_vm2, %v1273_v21  ;;  %v1764_v21 = vld [vmem:[%s2331_s13] ss:$0 sm:$0xff] }
 0x381   : > { %1896 = vmatprep.mubr.msk.f32.mxu1 %vm2004_vm0, %v2005_v6 }
 0x3e2   : > { %v851_v22 = vpop.f32.mrb[4].mxu1 }
 0x3e3   : > { %v1846_v23 = vpop.f32.mrb[5].mxu1 }
 0x44b   : > { %v1016_v30 = vpop.f32.mrb[6].mxu1 }
 0x44c   : > { %1351 = vrot.lane.b32.xlu0 %v1016_v30, %s2013_s28  ;;  %v1856_v31 = vpop.f32.mrb[7].mxu1 }
 0x44f   : > { %v1181_v32 = vpop.f32.mrb[8].mxu1 }
 0x450   : > { %1355 = vrot.lane.b32.xlu1 %v1181_v32, %s2014_s29  ;;  %v1866_v33 = vpop.f32.mrb[9].mxu1 }
 0x453   : > { %v1346_v34 = vpop.f32.mrb[10].mxu1 }
 0x454   : > { %1359 = vrot.lane.b32.xlu0 %v1346_v34, %s2015_s30  ;;  %v1876_v35 = vpop.f32.mrb[11].mxu1 }
 0x4be   : > { %v1352_v36 = vpop.permute.xlu0 %1351 }
 0x4bf   : > { %v1362_v38 = vsel %vm691_vm2, %v851_v22, %v1352_v36  ;;  %v1766_v36 = vld [vmem:[%s2332_s14] ss:$0 sm:$0xff] }
 0x4c2   : > { %v1356_v37 = vpop.permute.xlu1 %1355 }
 0x4c3   : > { %v1364_v39 = vsel %vm1363_vm3, %v1362_v38, %v1356_v37  ;;  %v1767_v38 = vld [vmem:[%s2333_s15] ss:$0 sm:$0xff] }
 0x4c6   : > { %v1360_v40 = vpop.permute.xlu0 %1359 }
 0x4c7   : > { %v1366_v41 = vsel %vm1365_vm4, %v1364_v39, %v1360_v40 }
 0x4c8   : > { %1886 = vmatmul.mubr.msk.f32.vlgmr.msra.gmra.mrb[8].mxu0 %vm540_vm1, %v1366_v41 }
 0x4c9   : > { %1915 = vmatprep.mubr.msk.f32.mxu0 %vm2004_vm0, %v2005_v6  ;;  %v1477_v6 = vld [vmem:[%s2328_s10] sm:$0xff]  ;;  %1944 = vmatpush3.bf16.msra.mxu0 %v1943_v60 }
 0x4ca   : > { %v1937_v54 = vpack.c.bf16 %v1478_v53, %v1477_v6  ;;  %1945 = vmatprep.subr.bf16.mxu0 %v2003_v3 }
 0x4cc   : > { %1938 = vmatpush3.bf16.msra.mxu1 %v1937_v54 }
 0x4cd   : > { %1939 = vmatprep.subr.bf16.mxu1 %v2003_v3  ;;  %1947 = vmatpush3.bf16.msra.mxu0 %v1946_v62 }
 0x4ce   : > { %1948 = vmatprep.subr.bf16.mxu0 %v2003_v3 }
 0x4d1   : > { %1950 = vmatpush3.bf16.msra.mxu0 %v1949_v1 }
 0x4d2   : > { %1951 = vmatprep.subr.bf16.mxu0 %v2003_v3  ;;  %v1488_v3 = vld [vmem:[%s2330_s12 + $0x30] sm:$0xff] }
 0x4d3   : > { %v1952_v15 = vpack.c.bf16 %v1489_v14, %v1488_v3 }
 0x4d5   : > { %1953 = vmatpush3.bf16.msra.mxu0 %v1952_v15 }
 0x59b   : > { %v1442_v43 = vpop.f32.mrb[8].mxu0 }
 0x59c   : > { %v1443_v44 = vadd.f32 %v1758_v42, %v1442_v43  ;;  %v1887_v45 = vpop.f32.mrb[9].mxu0 }
 0x59e   : > { %v1446_v46 = vadd.f32 %v1443_v44, %v2142_v10  ;;  %v1479_v10 = vld [vmem:[%s2328_s10 + $0x10] sm:$0xff] }
 0x59f   : > { %v1940_v56 = vpack.c.bf16 %v1480_v55, %v1479_v10 }
 0x5a0   : > { %v1449_v47 = vsel %vm540_vm1, %v1446_v46, 0.0 }
 0x5a1   : > { %1450 = vadd.xlane.f32.xlu1 %v1449_v47  ;;  %1941 = vmatpush3.bf16.msra.mxu1 %v1940_v56 }
 0x62e   : > { %v1451_v48 = vpop.xlane.xlu1 %1450 }
 0x62f   : > { %v1453_v49 = vmul.f32 0.03125, %v1451_v48 }
 0x631   : > { %v1454_v50 = vsub.f32 %v1446_v46, %v1453_v49 }
 0x633   : > { %v1455_v51 = vmul.f32 %v1454_v50, %v1454_v50 }
 0x635   : > { %v1456_v52 = vsel %vm540_vm1, %v1455_v51, 0.0 }
 0x636   : > { %1457 = vadd.xlane.f32.xlu0 %v1456_v52 }
 0x6c3   : > { %v1458_v2 = vpop.xlane.xlu0 %1457 }
 0x6c4   : > { %v1459_v4 = vmul.f32 0.03125, %v1458_v2 }
 0x6c6   : > { %v1460_v5 = vadd.f32 1e-05, %v1459_v4 }
 0x6c8   : > { %1991 = vrsqrt.f32 %v1460_v5 }
 0x6d2   : > { %v1992_v7 = vpop.eup %1991 }
 0x6d3   : > { %v1462_v9 = vmul.f32 %v1992_v7, %v1454_v50 }
 0x6d5   : > { %v1469_v12 = vmul.f32 %v1760_v8, %v1462_v9 }
 0x6d7   : > { %v1476_v13 = vadd.f32 %v1761_v11, %v1469_v12 }
 0x6d9   : > { %1897 = vmatmul.mubr.msk.f32.vlgmr.msra.gmra.mrb[12].mxu1 %vm540_vm1, %v1476_v13 }
 0x7ac   : > { %v1566_v17 = vpop.f32.mrb[12].mxu1 }
 0x7ad   : > { %v1567_v18 = vadd.f32 %v1762_v16, %v1566_v17  ;;  %v1898_v19 = vpop.f32.mrb[13].mxu1 }
 0x7af   : > { %v1570_v20 = vmax.f32 %v1567_v18, 0.0 }
 0x7b1   : > { %1916 = vmatmul.mubr.msk.f32.vlgmr.msra.gmra.mrb[10].mxu0 %vm1577_vm5, %v1570_v20 }
 0x884   : > { %v1647_v22 = vpop.f32.mrb[10].mxu0 }
 0x885   : > { %v1648_v23 = vadd.f32 %v1764_v21, %v1647_v22  ;;  %v1917_v24 = vpop.f32.mrb[11].mxu0 }
 0x887   : > { %v1651_v25 = vadd.f32 %v1648_v23, %v1476_v13 }
 0x889   : > { %v1654_v26 = vsel %vm540_vm1, %v1651_v25, 0.0 }
 0x88a   : > { %1655 = vadd.xlane.f32.xlu0 %v1654_v26 }
 0x917   : > { %v1656_v27 = vpop.xlane.xlu0 %1655 }
 0x918   : > { %v1657_v28 = vmul.f32 0.03125, %v1656_v27 }
 0x91a   : > { %v1658_v29 = vsub.f32 %v1651_v25, %v1657_v28 }
 0x91c   : > { %v1659_v30 = vmul.f32 %v1658_v29, %v1658_v29 }
 0x91e   : > { %v1660_v31 = vsel %vm540_vm1, %v1659_v30, 0.0 }
 0x91f   : > { %1661 = vadd.xlane.f32.xlu1 %v1660_v31 }
 0x9ac   : > { %v1662_v32 = vpop.xlane.xlu1 %1661 }
 0x9ad   : > { %v1663_v33 = vmul.f32 0.03125, %v1662_v32 }
 0x9af   : > { %v1664_v34 = vadd.f32 1e-05, %v1663_v33 }
 0x9b1   : > { %1993 = vrsqrt.f32 %v1664_v34 }
 0x9bb   : > { %v1994_v35 = vpop.eup %1993 }
 0x9bc   : > { %v1666_v37 = vmul.f32 %v1994_v35, %v1658_v29 }
 0x9be   : > { %v1673_v39 = vmul.f32 %v1766_v36, %v1666_v37 }
 0x9c0   : > { %v1680_v40 = vadd.f32 %v1767_v38, %v1673_v39 }
 0x9c2   : > { %1681 = vst.msk [vmem:[%s516_s23] sm:$0xff] %vm540_vm1, %v1680_v40 }
 0x9c3 PF: > { %s26_s21 = sadd.s32 1, %s2001_s21  }
 0x9c4   : > { %p23_p4 = scmp.ge.s32.totalorder %s26_s21, 4  }
 0x9c6   :  { %25 = sbr.rel (!%p23_p4) target bundleno = 2 (0x2), region = 114 }

// kernel: forward.10
= control target key start
LH: loop header
LB: loop body
LE: loop exit
PB: predicated region body
PF: predicated region fallthrough
CT: control target
= control target key end

     0   :  { %s2198_s27 = smov 0   ;;  %s2423_s0 = inlined_call_operand.vmem [shape: f32[2,8,32], index: 0, kind: input, shape index: {}]   ;;  %s2424_s1 = inlined_call_operand.vmem [shape: f32[8,8], index: 1, kind: input, shape index: {}]   ;;  %s2425_s2 = inlined_call_operand.vmem [shape: f32[32,32], index: 2, kind: input, shape index: {}]   ;;  %s2426_s3 = inlined_call_operand.vmem [shape: f32[1,32], index: 3, kind: input, shape index: {}]   ;;  %s2427_s4 = inlined_call_operand.vmem [shape: f32[32,64], index: 4, kind: input, shape index: {}]   ;;  %s2428_s5 = inlined_call_operand.vmem [shape: f32[1,64], index: 5, kind: input, shape index: {}]   ;;  %s2429_s6 = inlined_call_operand.vmem [shape: f32[32,32], index: 6, kind: input, shape index: {}]   ;;  %s2430_s7 = inlined_call_operand.vmem [shape: f32[1,32], index: 7, kind: input, shape index: {}]   ;;  %s2431_s8 = inlined_call_operand.vmem [shape: f32[1,32], index: 8, kind: input, shape index: {}]   ;;  %s2432_s9 = inlined_call_operand.vmem [shape: f32[1,32], index: 9, kind: input, shape index: {}]   ;;  %s2433_s10 = inlined_call_operand.vmem [shape: f32[32,64], index: 10, kind: input, shape index: {}]   ;;  %s2434_s11 = inlined_call_operand.vmem [shape: f32[1,64], index: 11, kind: input, shape index: {}]   ;;  %s2435_s12 = inlined_call_operand.vmem [shape: f32[64,32], index: 12, kind: input, shape index: {}]   ;;  %s2436_s13 = inlined_call_operand.vmem [shape: f32[1,32], index: 13, kind: input, shape index: {}]   ;;  %s2437_s14 = inlined_call_operand.vmem [shape: f32[1,32], index: 14, kind: input, shape index: {}]   ;;  %s2438_s15 = inlined_call_operand.vmem [shape: f32[1,32], index: 15, kind: input, shape index: {}]   ;;  %s2439_s16 = inlined_call_operand.vmem [shape: f32[1,32], index: 16, kind: input, shape index: {}]   ;;  %s2440_s17 = inlined_call_operand.vmem [shape: f32[1,32], index: 17, kind: input, shape index: {}]   ;;  %s2441_s18 = inlined_call_operand.vmem [shape: f32[2,8,32], index: 18, kind: output, shape index: {}]  }
   0x1   :  { %2443 = sst [smem:[#allocation2_spill]] %s2423_s0 }
   0x2   :  { %2444 = sst [smem:[#allocation3_spill]] %s2424_s1 }
   0x3   :  { %2445 = sst [smem:[#allocation4_spill]] %s2425_s2 }
   0x4 LB: > { %s1818_s28 = sadd.s32 4294967295, %s2088_s27   ;;  %p1822_p0 = scmp.ge.s32.totalorder %s2088_s27, 1  ;;  %s2088_s27 = sphi %s2198_s27, %s28_s27  }
   0x5   : > { %p511_p1 = scmp.lt.s32.totalorder %s2088_s27, 3 }
   0x7   : > { %p512_p2 = pnand %p1822_p0, %p511_p1 }
   0x8   : > { %s2446_s0 = sld [smem:[#allocation4_spill]] (!%p512_p2)  ;;  %v2090_v3 = vmov (!%p512_p2), 0.0|0.0   ;;  %vm2091_vm0 = vmmov (!%p512_p2), 0   ;;  %v2092_v6 = vmov (!%p512_p2), 0.0   ;;  %p563_p3 = scmp.lt.s32.totalorder (!%p512_p2), %s1818_s28, 1  ;;  %v577_v8 = vld [vmem:[%s2427_s4] sm:$0xff] (!%p512_p2) }
   0x9   : > { %515 = sbr.rel (%p512_p2) target bundleno = 2818 (0xb02), region = 92  ;;  %2003 = vmatprep.subr.bf16.mxu1 (!%p512_p2), %v2090_v3  ;;  %1908 = vmatprep.mubr.msk.f32.mxu1 (!%p512_p2), %vm2091_vm0, %v2092_v6  ;;  %v578_v9 = vld [vmem:[%s2427_s4 + $0x8] sm:$0xff] (!%p512_p2)  ;;  %s2447_s1 = sld [smem:[#allocation2_spill]] (!%p512_p2)  ;;  %vm594_vm1 = vcmask (!%p512_p2), 261120   ;;  %v579_v12 = vld [vmem:[%s2427_s4 + $0x10] sm:$0xff] (!%p512_p2)  ;;  %v580_v13 = vld [vmem:[%s2427_s4 + $0x18] sm:$0xff] (!%p512_p2) }
   0xa   : > { %1922 = vmatprep.subr.mxu0 (!%p512_p2), %v2092_v6  ;;  %1924 = vmatprep.mubr.msk.f32.mxu0 (!%p512_p2), %vm2091_vm0, %v2092_v6  ;;  %v2010_v11 = vpack.c.bf16 (!%p512_p2), %v578_v9, %v577_v8  ;;  %v2013_v14 = vpack.c.bf16 (!%p512_p2), %v580_v13, %v579_v12  ;;  %v1825_v17 = vld [vmem:[%s2426_s3] ss:$0 sm:$0xff] (!%p512_p2)  ;;  %vm745_vm2 = vcmask (!%p512_p2), 64512   ;;  %s2093_s19 = smov (!%p512_p2), 112   ;;  %s2448_s2 = sld [smem:[#allocation3_spill]] (!%p512_p2)  ;;  %vm1417_vm3 = vcmask (!%p512_p2), 130048  }
   0xb   : > { %v1827_v18 = vld [vmem:[%s2428_s5] ss:$0 sm:$0xff] (!%p512_p2)  ;;  %s2096_s23 = smov (!%p512_p2), 96   ;;  %s2097_s24 = smov (!%p512_p2), 80   ;;  %vm1419_vm4 = vcmask (!%p512_p2), 195584   ;;  %vm1631_vm5 = vcmask (!%p512_p2), 523264  }
   0xc   : > { %s2098_s25 = smov (!%p512_p2), 72   ;;  %s2099_s26 = smov (!%p512_p2), 88  }
   0xe   : > { %v572_v0 = vld [vmem:[%s2446_s0] sm:$0xff] (!%p512_p2)  ;;  %v573_v1 = vld [vmem:[%s2446_s0 + $0x8] sm:$0xff] (!%p512_p2)  ;;  %v574_v2 = vld [vmem:[%s2446_s0 + $0x10] sm:$0xff] (!%p512_p2) }
   0xf   : > { %v2004_v4 = vpack.c.bf16 (!%p512_p2), %v573_v1, %v572_v0  ;;  %v575_v5 = vld [vmem:[%s2446_s0 + $0x18] sm:$0xff] (!%p512_p2) }
  0x10   : > { %v2007_v7 = vpack.c.bf16 %v575_v5, %v574_v2  ;;  %s2450_s28 = smov (!%p563_p3, %s1818_s28), 1  ;;  %v587_v30 = vld [vmem:[%s2448_s2] sm:$0xff] }
  0x11   : > { %2005 = vmatpush3.bf16.msra.mxu1 %v2004_v4  ;;  %s1823_s29 = sshll.u32 %s2450_s28, 3 }
  0x12   : > { %2006 = vmatprep.subr.bf16.mxu1 %v2090_v3  ;;  %s566_s20 = scalar_lea.vmem %s2447_s1, %s1823_s29  ;;  %s2094_s1 = smov 120  }
  0x13   : > { %v2239_v10 = vld [vmem:[%s566_s20] sm:$0xff]  ;;  %s2095_s20 = smov 104   ;;  %s570_s30 = scalar_lea.vmem %s2441_s18, %s1823_s29 }
  0x15   : > { %2008 = vmatpush3.bf16.msra.mxu1 %v2007_v7 }
  0x16   : > { %2009 = vmatprep.subr.bf16.mxu1 %v2090_v3 }
  0x18   : > { %1909 = vmatmul.mubr.msk.f32.vlgmr.msra.gmra.mrb[0].mxu1 %vm594_vm1, %v2239_v10 }
  0x19   : > { %2011 = vmatpush3.bf16.msra.mxu1 %v2010_v11  ;;  %1919 = vmatprep.mubr.msk.f32.mxu1 %vm2091_vm0, %v2092_v6 }
  0x1a   : > { %2012 = vmatprep.subr.bf16.mxu1 %v2090_v3 }
  0x1d   : > { %2014 = vmatpush3.bf16.msra.mxu1 %v2013_v14 }
  0x1e   : > { %1927 = vmatprep.subr.mxu1 %v2092_v6 }
  0x20   : > { %1920 = vmatmul.mubr.msk.f32.vlgmr.msra.gmra.mrb[2].mxu1 %vm594_vm1, %v2239_v10 }
  0x21   : > { %1929 = vmatprep.mubr.msk.f32.mxu1 %vm2091_vm0, %v2092_v6 }
  0xeb   : > { %v664_v15 = vpop.f32.mrb[0].mxu1 }
  0xec   : > { %v1910_v16 = vpop.f32.mrb[1].mxu1  ;;  %v665_v20 = vadd.f32 %v1825_v17, %v664_v15 }
  0xee   : > { %v668_v23 = vmul.f32 0.35355338, %v665_v20 }
  0xf3   : > { %v741_v19 = vpop.f32.mrb[2].mxu1 }
  0xf4   : > { %v2264_v21 = vadd.f32 %v1827_v18, %v741_v19  ;;  %v1921_v22 = vpop.f32.mrb[3].mxu1 }
  0xf6   : > { %1076 = vrot.lane.b32.xlu1 %v2264_v21, %s2093_s19  ;;  %911 = vrot.lane.b32.xlu0 %v2264_v21, %s2094_s1 }
  0xf7   : > { %1923 = vmatpush3.xpose.msk.msra.mxu0 %vm745_vm2, %v2264_v21 }
  0xf8   : > { %1932 = vmatprep.subr.mxu0 %v2092_v6 }
  0xfa   : > { %1925 = vmatmul.mubr.msk.f32.vlgmr.msra.gmra.mrb[0].mxu0 %vm745_vm2, %v668_v23  ;;  %1074 = vrot.lane.b32.xlu1 %v668_v23, %s2093_s19 }
  0xfb   : > { %909 = vrot.lane.b32.xlu0 %v668_v23, %s2094_s1  ;;  %1934 = vmatprep.mubr.msk.f32.mxu0 %vm2091_vm0, %v2092_v6 }
  0xfe   : > { %1239 = vrot.lane.b32.xlu1 %v668_v23, %s2095_s20 }
  0xff   : > { %1241 = vrot.lane.b32.xlu0 %v2264_v21, %s2095_s20 }
 0x168   : > { %v912_v24 = vpop.permute.xlu0 %911  ;;  %v1077_v25 = vpop.permute.xlu1 %1076 }
 0x169   : > { %1933 = vmatpush3.xpose.msk.msra.mxu0 %vm745_vm2, %v912_v24  ;;  %v582_v24 = vld [vmem:[%s2429_s6] sm:$0xff] }
 0x16a   : > { %1942 = vmatprep.subr.mxu0 %v2092_v6 }
 0x16c   : > { %v1075_v27 = vpop.permute.xlu1 %1074 }
 0x16d   : > { %v910_v26 = vpop.permute.xlu0 %909 }
 0x16e   : > { %1935 = vmatmul.mubr.msk.f32.vlgmr.msra.gmra.mrb[2].mxu0 %vm745_vm2, %v910_v26 }
 0x16f   : > { %1943 = vmatpush3.xpose.msk.msra.mxu0 %vm745_vm2, %v1077_v25  ;;  %1944 = vmatprep.mubr.msk.f32.mxu0 %vm2091_vm0, %v2092_v6  ;;  %v583_v25 = vld [vmem:[%s2429_s6 + $0x8] sm:$0xff] }
 0x170   : > { %1952 = vmatprep.subr.mxu0 %v2092_v6  ;;  %v1240_v29 = vpop.permute.xlu1 %1239  ;;  %v2016_v26 = vpack.c.bf16 %v583_v25, %v582_v24 }
 0x171   : > { %v1242_v28 = vpop.permute.xlu0 %1241 }
 0x172   : > { %1945 = vmatmul.mubr.msk.f32.vlgmr.msra.gmra.mrb[4].mxu0 %vm745_vm2, %v1075_v27  ;;  %v584_v27 = vld [vmem:[%s2429_s6 + $0x10] sm:$0xff] }
 0x173   : > { %1953 = vmatpush3.xpose.msk.msra.mxu0 %vm745_vm2, %v1242_v28  ;;  %1954 = vmatprep.mubr.msk.f32.mxu0 %vm2091_vm0, %v2092_v6  ;;  %v585_v28 = vld [vmem:[%s2429_s6 + $0x18] sm:$0xff] }
 0x174   : > { %2015 = vmatprep.subr.bf16.mxu0 %v2090_v3 }
 0x176   : > { %1955 = vmatmul.mubr.msk.f32.vlgmr.msra.gmra.mrb[6].mxu0 %vm745_vm2, %v1240_v29  ;;  %v2019_v29 = vpack.c.bf16 %v585_v28, %v584_v27 }
 0x177   : > { %1970 = vmatprep.mubr.msk.f32.mxu0 %vm2091_vm0, %v2092_v6  ;;  %2017 = vmatpush3.bf16.msra.mxu0 %v2016_v26 }
 0x178   : > { %2018 = vmatprep.subr.bf16.mxu0 %v2090_v3 }
 0x17b   : > { %2020 = vmatpush3.bf16.msra.mxu0 %v2019_v29 }
 0x17c   : > { %2027 = vmatprep.subr.bf16.mxu0 %v2090_v3 }
 0x1cd   : > { %v818_v31 = vpop.f32.mrb[0].mxu0 }
 0x1ce   : > { %v819_v32 = vadd.f32 %v818_v31, %v587_v30  ;;  %v1926_v33 = vpop.f32.mrb[1].mxu0 }
 0x1d0   : > { %v822_v34 = vsel %vm745_vm2, %v819_v32, -inf }
 0x1d1   : > { %823 = vmax.xlane.f32.xlu0 %v822_v34 }
 0x241   : > { %v983_v35 = vpop.f32.mrb[2].mxu0 }
 0x242   : > { %v984_v36 = vadd.f32 %v983_v35, %v587_v30  ;;  %v1936_v37 = vpop.f32.mrb[3].mxu0 }
 0x244   : > { %v987_v38 = vsel %vm745_vm2, %v984_v36, -inf }
 0x245   : > { %988 = vmax.xlane.f32.xlu1 %v987_v38  ;;  %v1148_v39 = vpop.f32.mrb[4].mxu0 }
 0x246   : > { %v1149_v40 = vadd.f32 %v1148_v39, %v587_v30  ;;  %v1946_v41 = vpop.f32.mrb[5].mxu0 }
 0x248   : > { %v1152_v42 = vsel %vm745_vm2, %v1149_v40, -inf }
 0x249   : > { %1153 = vmax.xlane.f32.xlu0 %v1152_v42  ;;  %v1313_v43 = vpop.f32.mrb[6].mxu0  ;;  %v1841_v42 = vld [vmem:[%s2430_s7] ss:$0 sm:$0xff] }
 0x24a   : > { %v1314_v44 = vadd.f32 %v1313_v43, %v587_v30  ;;  %v1956_v45 = vpop.f32.mrb[7].mxu0 }
 0x24c   : > { %v1317_v46 = vsel %vm745_vm2, %v1314_v44, -inf }
 0x24d   : > { %1318 = vmax.xlane.f32.xlu0 %v1317_v46 }
 0x256   : > { %833 = vrot.lane.b32.xlu1 %v2264_v21, %s2096_s23 }
 0x25e   : > { %v824_v47 = vpop.xlane.xlu0 %823 }
 0x25f   : > { %v825_v48 = vsub.f32 %v819_v32, %v824_v47 }
 0x261   : > { %v826_v49 = vmul.f32 1.442695, %v825_v48 }
 0x263   : > { %2060 = vpow2.f32 %v826_v49 }
 0x26d   : > { %v2061_v50 = vpop.eup %2060 }
 0x26e   : > { %v828_v51 = vsel %vm745_vm2, %v2061_v50, 0.0 }
 0x27a   : > { %829 = vadd.xlane.f32.xlu1 %v828_v51 }
 0x2d2   : > { %v989_v52 = vpop.xlane.xlu1 %988 }
 0x2d3   : > { %v990_v53 = vsub.f32 %v984_v36, %v989_v52 }
 0x2d5   : > { %v991_v54 = vmul.f32 1.442695, %v990_v53  ;;  %v1532_v53 = vld [vmem:[%s2433_s10 + $0x8] sm:$0xff] }
 0x2d6   : > { %v834_v55 = vpop.permute.xlu1 %833  ;;  %v1154_v56 = vpop.xlane.xlu0 %1153 }
 0x2d7   : > { %2062 = vpow2.f32 %v991_v54  ;;  %v1155_v57 = vsub.f32 %v1149_v40, %v1154_v56  ;;  %1928 = vmatpush3.msra.mxu1 %v834_v55  ;;  %v1534_v55 = vld [vmem:[%s2433_s10 + $0x18] sm:$0xff] }
 0x2d8   : > { %1937 = vmatprep.subr.mxu1 %v2092_v6 }
 0x2d9   : > { %v1156_v58 = vmul.f32 1.442695, %v1155_v57  ;;  %v1536_v57 = vld [vmem:[%s2435_s12] sm:$0xff] }
 0x2da   : > { %v1319_v59 = vpop.xlane.xlu0 %1318 }
 0x2db   : > { %2064 = vpow2.f32 %v1156_v58  ;;  %v1320_v60 = vsub.f32 %v1314_v44, %v1319_v59  ;;  %v1537_v58 = vld [vmem:[%s2435_s12 + $0x8] sm:$0xff]  ;;  %v1538_v59 = vld [vmem:[%s2435_s12 + $0x10] sm:$0xff] }
 0x2dd   : > { %v1321_v61 = vmul.f32 1.442695, %v1320_v60  ;;  %v2028_v60 = vpack.c.bf16 %v1537_v58, %v1536_v57 }
 0x2df   : > { %2066 = vpow2.f32 %v1321_v61  ;;  %v1539_v61 = vld [vmem:[%s2435_s12 + $0x18] sm:$0xff] }
 0x2e1   : > { %v2063_v62 = vpop.eup %2062 }
 0x2e2   : > { %v993_v63 = vsel %vm745_vm2, %v2063_v62, 0.0 }
 0x2e3   : > { %994 = vadd.xlane.f32.xlu0 %v993_v63  ;;  %v1540_v63 = vld [vmem:[%s2435_s12 + $0x20] sm:$0xff] }
 0x2e5   : > { %v2065_v0 = vpop.eup %2064 }
 0x2e6   : > { %v1158_v1 = vsel %vm745_vm2, %v2065_v0, 0.0 }
 0x2e7   : > { %1159 = vadd.xlane.f32.xlu1 %v1158_v1 }
 0x2e9   : > { %v2067_v2 = vpop.eup %2066 }
 0x2ea   : > { %v1323_v4 = vsel %vm745_vm2, %v2067_v2, 0.0 }
 0x2eb   : > { %1324 = vadd.xlane.f32.xlu0 %v1323_v4 }
 0x2f8   : > { %1163 = vrot.lane.b32.xlu1 %v2264_v21, %s2097_s24  ;;  %s2100_s24 = smov 8  }
 0x2fc   : > { %1328 = vrot.lane.b32.xlu1 %v2264_v21, %s2098_s25  ;;  %s2101_s25 = smov 16  }
 0x301   : > { %998 = vrot.lane.b32.xlu0 %v2264_v21, %s2099_s26  ;;  %s2102_s26 = smov 24  }
 0x307   : > { %v830_v5 = vpop.xlane.xlu1 %829 }
 0x308   : > { %2068 = vrcp.f32 %v830_v5 }
 0x312   : > { %v2069_v7 = vpop.eup %2068 }
 0x313   : > { %v832_v8 = vmul.f32 %v2069_v7, %v2061_v50 }
 0x315   : > { %1930 = vmatmul.mubr.msk.f32.vlgmr.msra.gmra.mrb[4].mxu1 %vm745_vm2, %v832_v8  ;;  %v1843_v8 = vld [vmem:[%s2431_s8] ss:$0 sm:$0xff] }
 0x316   : > { %1939 = vmatprep.mubr.msk.f32.mxu1 %vm2091_vm0, %v2092_v6 }
 0x370   : > { %v995_v9 = vpop.xlane.xlu0 %994 }
 0x371   : > { %2070 = vrcp.f32 %v995_v9 }
 0x374   : > { %v1160_v11 = vpop.xlane.xlu1 %1159 }
 0x375   : > { %2072 = vrcp.f32 %v1160_v11  ;;  %v1844_v11 = vld [vmem:[%s2432_s9] ss:$0 sm:$0xff] }
 0x378   : > { %v1325_v12 = vpop.xlane.xlu0 %1324  ;;  %v1164_v15 = vpop.permute.xlu1 %1163 }
 0x379   : > { %2074 = vrcp.f32 %v1325_v12 }
 0x37b   : > { %v2071_v13 = vpop.eup %2070 }
 0x37c   : > { %v997_v14 = vmul.f32 %v2071_v13, %v2063_v62  ;;  %v999_v16 = vpop.permute.xlu0 %998  ;;  %v1329_v19 = vpop.permute.xlu1 %1328  ;;  %v2031_v62 = vpack.c.bf16 %v1539_v61, %v1538_v59 }
 0x37d   : > { %1938 = vmatpush3.msra.mxu1 %v999_v16  ;;  %v1845_v16 = vld [vmem:[%s2434_s11] ss:$0 sm:$0xff] }
 0x37e   : > { %1940 = vmatmul.mubr.msk.f32.vlgmr.msra.gmra.mrb[6].mxu1 %vm745_vm2, %v997_v14  ;;  %1947 = vmatprep.subr.mxu1 %v2092_v6  ;;  %v1543_v14 = vld [vmem:[%s2435_s12 + $0x38] sm:$0xff] }
 0x37f   : > { %v2073_v17 = vpop.eup %2072  ;;  %1948 = vmatpush3.msra.mxu1 %v1164_v15  ;;  %1949 = vmatprep.mubr.msk.f32.mxu1 %vm2091_vm0, %v2092_v6 }
 0x380   : > { %v1162_v18 = vmul.f32 %v2073_v17, %v2065_v0  ;;  %1957 = vmatprep.subr.mxu1 %v2092_v6  ;;  %v1541_v0 = vld [vmem:[%s2435_s12 + $0x28] sm:$0xff] }
 0x381   : > { %v2034_v1 = vpack.c.bf16 %v1541_v0, %v1540_v63 }
 0x382   : > { %1950 = vmatmul.mubr.msk.f32.vlgmr.msra.gmra.mrb[8].mxu1 %vm745_vm2, %v1162_v18 }
 0x383   : > { %v2075_v20 = vpop.eup %2074  ;;  %1958 = vmatpush3.msra.mxu1 %v1329_v19  ;;  %1959 = vmatprep.mubr.msk.f32.mxu1 %vm2091_vm0, %v2092_v6 }
 0x384   : > { %v1327_v21 = vmul.f32 %v2075_v20, %v2067_v2  ;;  %2021 = vmatprep.subr.bf16.mxu1 %v2090_v3 }
 0x386   : > { %1960 = vmatmul.mubr.msk.f32.vlgmr.msra.gmra.mrb[10].mxu1 %vm745_vm2, %v1327_v21  ;;  %v1847_v21 = vld [vmem:[%s2436_s13] ss:$0 sm:$0xff] }
 0x387   : > { %1981 = vmatprep.mubr.msk.f32.mxu1 %vm2091_vm0, %v2092_v6 }
 0x3e8   : > { %v905_v22 = vpop.f32.mrb[4].mxu1 }
 0x3e9   : > { %v1931_v23 = vpop.f32.mrb[5].mxu1 }
 0x451   : > { %v1070_v30 = vpop.f32.mrb[6].mxu1 }
 0x452   : > { %1405 = vrot.lane.b32.xlu0 %v1070_v30, %s2100_s24  ;;  %v1941_v31 = vpop.f32.mrb[7].mxu1 }
 0x455   : > { %v1235_v32 = vpop.f32.mrb[8].mxu1 }
 0x456   : > { %1409 = vrot.lane.b32.xlu1 %v1235_v32, %s2101_s25  ;;  %v1951_v33 = vpop.f32.mrb[9].mxu1 }
 0x459   : > { %v1400_v34 = vpop.f32.mrb[10].mxu1 }
 0x45a   : > { %1413 = vrot.lane.b32.xlu0 %v1400_v34, %s2102_s26  ;;  %v1961_v35 = vpop.f32.mrb[11].mxu1 }
 0x4c4   : > { %v1406_v36 = vpop.permute.xlu0 %1405 }
 0x4c5   : > { %v1416_v38 = vsel %vm745_vm2, %v905_v22, %v1406_v36  ;;  %v1849_v36 = vld [vmem:[%s2437_s14] ss:$0 sm:$0xff] }
 0x4c8   : > { %v1410_v37 = vpop.permute.xlu1 %1409 }
 0x4c9   : > { %v1418_v39 = vsel %vm1417_vm3, %v1416_v38, %v1410_v37  ;;  %v1850_v38 = vld [vmem:[%s2438_s15] ss:$0 sm:$0xff] }
 0x4cc   : > { %v1414_v40 = vpop.permute.xlu0 %1413 }
 0x4cd   : > { %v1420_v41 = vsel %vm1419_vm4, %v1418_v39, %v1414_v40 }
 0x4ce   : > { %1971 = vmatmul.mubr.msk.f32.vlgmr.msra.gmra.mrb[8].mxu0 %vm594_vm1, %v1420_v41 }
 0x4cf   : > { %2000 = vmatprep.mubr.msk.f32.mxu0 %vm2091_vm0, %v2092_v6  ;;  %v1531_v6 = vld [vmem:[%s2433_s10] sm:$0xff]  ;;  %2029 = vmatpush3.bf16.msra.mxu0 %v2028_v60 }
 0x4d0   : > { %v2022_v54 = vpack.c.bf16 %v1532_v53, %v1531_v6  ;;  %2030 = vmatprep.subr.bf16.mxu0 %v2090_v3  ;;  %v1852_v6 = vld [vmem:[%s2440_s17] ss:$0 sm:$0xff] }
 0x4d2   : > { %2023 = vmatpush3.bf16.msra.mxu1 %v2022_v54 }
 0x4d3   : > { %2024 = vmatprep.subr.bf16.mxu1 %v2090_v3  ;;  %2032 = vmatpush3.bf16.msra.mxu0 %v2031_v62 }
 0x4d4   : > { %2033 = vmatprep.subr.bf16.mxu0 %v2090_v3 }
 0x4d7   : > { %2035 = vmatpush3.bf16.msra.mxu0 %v2034_v1 }
 0x4d8   : > { %2036 = vmatprep.subr.bf16.mxu0 %v2090_v3  ;;  %v1542_v3 = vld [vmem:[%s2435_s12 + $0x30] sm:$0xff] }
 0x4d9   : > { %v2037_v15 = vpack.c.bf16 %v1543_v14, %v1542_v3 }
 0x4db   : > { %2038 = vmatpush3.bf16.msra.mxu0 %v2037_v15 }
 0x5a1   : > { %v1496_v43 = vpop.f32.mrb[8].mxu0 }
 0x5a2   : > { %v1497_v44 = vadd.f32 %v1841_v42, %v1496_v43  ;;  %v1972_v45 = vpop.f32.mrb[9].mxu0 }
 0x5a4   : > { %v1500_v46 = vadd.f32 %v1497_v44, %v2239_v10  ;;  %v1533_v10 = vld [vmem:[%s2433_s10 + $0x10] sm:$0xff] }
 0x5a5   : > { %v2025_v56 = vpack.c.bf16 %v1534_v55, %v1533_v10 }
 0x5a6   : > { %v1503_v47 = vsel %vm594_vm1, %v1500_v46, 0.0 }
 0x5a7   : > { %1504 = vadd.xlane.f32.xlu1 %v1503_v47  ;;  %2026 = vmatpush3.bf16.msra.mxu1 %v2025_v56 }
 0x634   : > { %v1505_v48 = vpop.xlane.xlu1 %1504 }
 0x635   : > { %v1507_v49 = vmul.f32 0.03125, %v1505_v48 }
 0x637   : > { %v1508_v50 = vsub.f32 %v1500_v46, %v1507_v49 }
 0x639   : > { %v1509_v51 = vmul.f32 %v1508_v50, %v1508_v50 }
 0x63b   : > { %v1510_v52 = vsel %vm594_vm1, %v1509_v51, 0.0  ;;  %v1851_v51 = vld [vmem:[%s2439_s16] ss:$0 sm:$0xff] }
 0x63c   : > { %1511 = vadd.xlane.f32.xlu0 %v1510_v52 }
 0x6c9   : > { %v1512_v2 = vpop.xlane.xlu0 %1511 }
 0x6ca   : > { %v1513_v4 = vmul.f32 0.03125, %v1512_v2 }
 0x6cc   : > { %v1514_v5 = vadd.f32 1e-05, %v1513_v4 }
 0x6ce   : > { %2076 = vrsqrt.f32 %v1514_v5 }
 0x6d8   : > { %v2077_v7 = vpop.eup %2076 }
 0x6d9   : > { %v1516_v9 = vmul.f32 %v2077_v7, %v1508_v50 }
 0x6db   : > { %v1523_v12 = vmul.f32 %v1843_v8, %v1516_v9 }
 0x6dd   : > { %v1530_v13 = vadd.f32 %v1844_v11, %v1523_v12 }
 0x6df   : > { %1982 = vmatmul.mubr.msk.f32.vlgmr.msra.gmra.mrb[12].mxu1 %vm594_vm1, %v1530_v13 }
 0x7b2   : > { %v1620_v17 = vpop.f32.mrb[12].mxu1 }
 0x7b3   : > { %v1621_v18 = vadd.f32 %v1845_v16, %v1620_v17  ;;  %v1983_v19 = vpop.f32.mrb[13].mxu1 }
 0x7b5   : > { %v1624_v20 = vmax.f32 %v1621_v18, 0.0 }
 0x7b7   : > { %2001 = vmatmul.mubr.msk.f32.vlgmr.msra.gmra.mrb[10].mxu0 %vm1631_vm5, %v1624_v20 }
 0x88a   : > { %v1701_v22 = vpop.f32.mrb[10].mxu0 }
 0x88b   : > { %v1702_v23 = vadd.f32 %v1847_v21, %v1701_v22  ;;  %v2002_v24 = vpop.f32.mrb[11].mxu0 }
 0x88d   : > { %v1705_v25 = vadd.f32 %v1702_v23, %v1530_v13 }
 0x88f   : > { %v1708_v26 = vsel %vm594_vm1, %v1705_v25, 0.0 }
 0x890   : > { %1709 = vadd.xlane.f32.xlu0 %v1708_v26 }
 0x91d   : > { %v1710_v27 = vpop.xlane.xlu0 %1709 }
 0x91e   : > { %v1711_v28 = vmul.f32 0.03125, %v1710_v27 }
 0x920   : > { %v1712_v29 = vsub.f32 %v1705_v25, %v1711_v28 }
 0x922   : > { %v1713_v30 = vmul.f32 %v1712_v29, %v1712_v29 }
 0x924   : > { %v1714_v31 = vsel %vm594_vm1, %v1713_v30, 0.0 }
 0x925   : > { %1715 = vadd.xlane.f32.xlu1 %v1714_v31 }
 0x9b2   : > { %v1716_v32 = vpop.xlane.xlu1 %1715 }
 0x9b3   : > { %v1717_v33 = vmul.f32 0.03125, %v1716_v32 }
 0x9b5   : > { %v1718_v34 = vadd.f32 1e-05, %v1717_v33 }
 0x9b7   : > { %2078 = vrsqrt.f32 %v1718_v34 }
 0x9c1   : > { %v2079_v35 = vpop.eup %2078 }
 0x9c2   : > { %v1720_v37 = vmul.f32 %v2079_v35, %v1712_v29 }
 0x9c4   : > { %v1727_v39 = vmul.f32 %v1849_v36, %v1720_v37 }
 0x9c6   : > { %v1734_v40 = vadd.f32 %v1850_v38, %v1727_v39 }
 0x9c8   : > { %v1737_v41 = vsel %vm594_vm1, %v1734_v40, 0.0 }
 0x9c9   : > { %1738 = vadd.xlane.f32.xlu0 %v1737_v41 }
 0xa56   : > { %v1739_v42 = vpop.xlane.xlu0 %1738 }
 0xa57   : > { %v1740_v43 = vmul.f32 0.03125, %v1739_v42 }
 0xa59   : > { %v1741_v44 = vsub.f32 %v1734_v40, %v1740_v43 }
 0xa5b   : > { %v1742_v45 = vmul.f32 %v1741_v44, %v1741_v44 }
 0xa5d   : > { %v1743_v46 = vsel %vm594_vm1, %v1742_v45, 0.0 }
 0xa5e   : > { %1744 = vadd.xlane.f32.xlu1 %v1743_v46 }
 0xaeb   : > { %v1745_v47 = vpop.xlane.xlu1 %1744 }
 0xaec   : > { %v1746_v48 = vmul.f32 0.03125, %v1745_v47 }
 0xaee   : > { %v1747_v49 = vadd.f32 1e-05, %v1746_v48 }
 0xaf0   : > { %2080 = vrsqrt.f32 %v1747_v49 }
 0xafa   : > { %v2081_v50 = vpop.eup %2080 }
 0xafb   : > { %v1749_v52 = vmul.f32 %v2081_v50, %v1741_v44 }
 0xafd   : > { %v1756_v53 = vmul.f32 %v1851_v51, %v1749_v52 }
 0xaff   : > { %v1763_v54 = vadd.f32 %v1852_v6, %v1756_v53 }
 0xb01   : > { %1764 = vst.msk [vmem:[%s570_s30] sm:$0xff] %vm594_vm1, %v1763_v54 }
 0xb02 PF: > { %s28_s27 = sadd.s32 1, %s2088_s27  }
 0xb03   : > { %p25_p4 = scmp.ge.s32.totalorder %s28_s27, 4  }
 0xb05   :  { %27 = sbr.rel (!%p25_p4) target bundleno = 4 (0x4), region = 122 }

// kernel: forward.13
= control target key start
LH: loop header
LB: loop body
LE: loop exit
PB: predicated region body
PF: predicated region fallthrough
CT: control target
= control target key end

     0   :  { %vm33_vm0 = vcmask 261120   ;;  %vm132_vm1 = vcmask 523264   ;;  %vm214_vm2 = vcmask 39936   ;;  %s383_s1 = inlined_call_operand.vmem [shape: f32[32,64], index: 1, kind: input, shape index: {}]   ;;  %s384_s0 = inlined_call_operand.vmem [shape: f32[16,32], index: 0, kind: input, shape index: {}]   ;;  %s385_s3 = inlined_call_operand.vmem [shape: f32[64,5], index: 3, kind: input, shape index: {}]   ;;  %s386_s2 = inlined_call_operand.vmem [shape: f32[1,64], index: 2, kind: input, shape index: {}]   ;;  %s387_s4 = inlined_call_operand.vmem [shape: f32[1,5], index: 4, kind: input, shape index: {}]   ;;  %s388_s5 = inlined_call_operand.vmem [shape: f32[16,5], index: 5, kind: output, shape index: {}]  }
   0x1   :  { %v22_v0 = vld [vmem:[%s383_s1] sm:$0xff]  ;;  %v23_v1 = vld [vmem:[%s383_s1 + $0x8] sm:$0xff]  ;;  %v24_v2 = vld [vmem:[%s383_s1 + $0x10] sm:$0xff] }
   0x2   :  { %v273_v3 = vpack.c.bf16 %v23_v1, %v22_v0  ;;  %v25_v4 = vld [vmem:[%s383_s1 + $0x18] sm:$0xff]  ;;  %v20_v5 = vld [vmem:[%s384_s0] sm:$0xff]  ;;  %v118_v8 = vld [vmem:[%s385_s3 + $0x8] sm:$0xff] }
   0x3   :  { %v277_v6 = vpack.c.bf16 %v25_v4, %v24_v2  ;;  %251 = vmatprep.mubr.msk.f32.mxu0 %vm33_vm0, %v20_v5  ;;  %v117_v7 = vld [vmem:[%s385_s3] sm:$0xff]  ;;  %v119_v9 = vld [vmem:[%s385_s3 + $0x10] sm:$0xff]  ;;  %v120_v11 = vld [vmem:[%s385_s3 + $0x18] sm:$0xff] }
   0x4   :  { %274 = vmatprep.subr.bf16.mxu0 %v273_v3  ;;  %v281_v10 = vpack.c.bf16 %v118_v8, %v117_v7  ;;  %v285_v12 = vpack.c.bf16 %v120_v11, %v119_v9  ;;  %v121_v13 = vld [vmem:[%s385_s3 + $0x20] sm:$0xff]  ;;  %v122_v14 = vld [vmem:[%s385_s3 + $0x28] sm:$0xff]  ;;  %v123_v17 = vld [vmem:[%s385_s3 + $0x30] sm:$0xff] }
   0x5   :  { %276 = vmatpush3.bf16.msra.mxu0 %v273_v3  ;;  %v289_v15 = vpack.c.bf16 %v122_v14, %v121_v13  ;;  %v21_v16 = vld [vmem:[%s384_s0 + $0x8] sm:$0xff]  ;;  %v124_v18 = vld [vmem:[%s385_s3 + $0x38] sm:$0xff]  ;;  %v221_v20 = vld [vmem:[%s386_s2] ss:$0 sm:$0xff] }
   0x6   :  { %278 = vmatprep.subr.bf16.mxu0 %v277_v6  ;;  %282 = vmatprep.subr.bf16.mxu1 %v281_v10  ;;  %v293_v19 = vpack.c.bf16 %v124_v18, %v123_v17  ;;  %v224_v27 = vld [vmem:[%s387_s4] ss:$0 sm:$0xff] }
   0x7   :  { %284 = vmatpush3.bf16.msra.mxu1 %v281_v10 }
   0x8   :  { %286 = vmatprep.subr.bf16.mxu1 %v285_v12 }
   0x9   :  { %280 = vmatpush3.bf16.msra.mxu0 %v277_v6 }
   0xb   :  { %288 = vmatpush3.bf16.msra.mxu1 %v285_v12 }
   0xc   :  { %252 = vmatmul.mubr.msk.f32.vlgmr.msra.gmra.mrb[0].mxu0 %vm33_vm0, %v21_v16  ;;  %290 = vmatprep.subr.bf16.mxu1 %v289_v15 }
   0xf   :  { %292 = vmatpush3.bf16.msra.mxu1 %v289_v15 }
  0x10   :  { %294 = vmatprep.subr.bf16.mxu1 %v293_v19 }
  0x13   :  { %296 = vmatpush3.bf16.msra.mxu1 %v293_v19 }
  0xdf   :  { %v253_v21 = vpop.f32.mrb[0].mxu0 }
  0xe0   :  { %v112_v22 = vadd.f32 %v253_v21, %v221_v20  ;;  %v106_v23 = vpop.f32.mrb[1].mxu0 }
  0xe1   :  { %v107_v24 = vadd.f32 %v221_v20, %v106_v23 }
  0xe2   :  { %v116_v26 = vmax.f32 %v112_v22, 0.0 }
  0xe3   :  { %v115_v25 = vmax.f32 %v107_v24, 0.0 }
  0xe5   :  { %270 = vmatprep.mubr.msk.f32.mxu1 %vm132_vm1, %v115_v25 }
  0xe6   :  { %271 = vmatmul.mubr.msk.f32.vlgmr.msra.gmra.mrb[0].mxu1 %vm132_vm1, %v116_v26 }
 0x1b9   :  { %v272_v28 = vpop.f32.mrb[0].mxu1 }
 0x1ba   :  { %v211_v29 = vadd.f32 %v272_v28, %v224_v27  ;;  %v205_v30 = vpop.f32.mrb[1].mxu1 }
 0x1bb   :  { %v206_v31 = vadd.f32 %v224_v27, %v205_v30 }
 0x1bc   :  { %216 = vst.msk [vmem:[%s388_s5 + $0x8] sm:$0xff] %vm214_vm2, %v211_v29 }
 0x1bd   :  { %215 = vst.msk [vmem:[%s388_s5] sm:$0xff] %vm214_vm2, %v206_v31 }

// kernel: forward.11
= control target key start
LH: loop header
LB: loop body
LE: loop exit
PB: predicated region body
PF: predicated region fallthrough
CT: control target
= control target key end

     0   :  { %s4301_s0 = inlined_call_operand.vmem [shape: f32[2,8,32], index: 0, kind: input, shape index: {}]   ;;  %s4302_s1 = inlined_call_operand.vmem [shape: f32[2,8,32], index: 1, kind: input, shape index: {}]   ;;  %s4303_s2 = inlined_call_operand.vmem [shape: f32[8,8], index: 2, kind: input, shape index: {}]   ;;  %s4304_s3 = inlined_call_operand.vmem [shape: f32[32,32], index: 3, kind: input, shape index: {}]   ;;  %s4305_s4 = inlined_call_operand.vmem [shape: f32[1,32], index: 4, kind: input, shape index: {}]   ;;  %s4306_s5 = inlined_call_operand.vmem [shape: f32[32,64], index: 5, kind: input, shape index: {}]   ;;  %s4307_s6 = inlined_call_operand.vmem [shape: f32[1,64], index: 6, kind: input, shape index: {}]   ;;  %s4308_s7 = inlined_call_operand.vmem [shape: f32[32,32], index: 7, kind: input, shape index: {}]   ;;  %s4309_s8 = inlined_call_operand.vmem [shape: f32[1,32], index: 8, kind: input, shape index: {}]   ;;  %s4310_s9 = inlined_call_operand.vmem [shape: f32[1,32], index: 9, kind: input, shape index: {}]   ;;  %s4311_s10 = inlined_call_operand.vmem [shape: f32[1,32], index: 10, kind: input, shape index: {}]   ;;  %s4312_s11 = inlined_call_operand.vmem [shape: f32[32,32], index: 11, kind: input, shape index: {}]   ;;  %s4313_s12 = inlined_call_operand.vmem [shape: f32[1,32], index: 12, kind: input, shape index: {}]   ;;  %s4314_s13 = inlined_call_operand.vmem [shape: f32[32,64], index: 13, kind: input, shape index: {}]   ;;  %s4315_s14 = inlined_call_operand.vmem [shape: f32[1,64], index: 14, kind: input, shape index: {}]   ;;  %s4316_s15 = inlined_call_operand.vmem [shape: f32[32,32], index: 15, kind: input, shape index: {}]   ;;  %s4317_s16 = inlined_call_operand.vmem [shape: f32[1,32], index: 16, kind: input, shape index: {}]   ;;  %s4318_s17 = inlined_call_operand.vmem [shape: f32[1,32], index: 17, kind: input, shape index: {}]   ;;  %s4319_s18 = inlined_call_operand.vmem [shape: f32[1,32], index: 18, kind: input, shape index: {}]   ;;  %s4320_s19 = inlined_call_operand.vmem [shape: f32[32,64], index: 19, kind: input, shape index: {}]   ;;  %s4321_s20 = inlined_call_operand.hbm [shape: f32[1,64], index: 20, kind: input, shape index: {}]   ;;  %s4322_s21 = inlined_call_operand.vmem [shape: f32[64,32], index: 21, kind: input, shape index: {}]   ;;  %s4323_s22 = inlined_call_operand.hbm [shape: f32[1,32], index: 22, kind: input, shape index: {}]   ;;  %s4324_s23 = inlined_call_operand.hbm [shape: f32[1,32], index: 23, kind: input, shape index: {}]   ;;  %s4325_s24 = inlined_call_operand.hbm [shape: f32[1,32], index: 24, kind: input, shape index: {}]   ;;  %s4326_s25 = inlined_call_operand.vmem [shape: f32[2,8,32], index: 25, kind: output, shape index: {}]  }
   0x1   :  { %4344 = sst [smem:[#allocation13_spill]] %s4301_s0 }
   0x2   :  { %4345 = sst [smem:[#allocation14_spill]] %s4302_s1 }
   0x3   :  { %4346 = sst [smem:[#allocation15_spill]] %s4303_s2 }
   0x4   :  { %4347 = sst [smem:[#allocation16_spill]] %s4304_s3 }
   0x5   :  { %4348 = sst [smem:[#allocation17_spill]] %s4305_s4 }
   0x6   :  { %4349 = sst [smem:[#allocation18_spill]] %s4306_s5 }
   0x7   :  { %4350 = sst [smem:[#allocation19_spill]] %s4307_s6 }
   0x8   :  { %4351 = sst [smem:[#allocation20_spill]] %s4308_s7 }
   0x9   :  { %4352 = sst [smem:[#allocation21_spill]] %s4309_s8 }
   0xa   :  { %4353 = sst [smem:[#allocation22_spill]] %s4310_s9 }
   0xb   :  { %4354 = sst [smem:[#allocation23_spill]] %s4319_s18 }
   0xc   :  { %4355 = sst [smem:[#allocation24_spill]] %s4326_s25 }
   0xd   :  { %30 = vsyncpa [#allocation3], 0 }
   0xe   :  { %31 = vsyncpa [#allocation5], 0 }
   0xf   :  { %32 = vsyncpa [#allocation8], 0  ;;  %s3805_s29 = smov 0  }
  0x10 LB: > { %4356 = sst [smem:[#allocation12_spill]] %s3656_s29  ;;  %s3811_s2 = sadd.s32 4294967295, %s3656_s29   ;;  %s3656_s29 = sphi %s3805_s29, %s38_s29  }
  0x11   : > { %p3058_p0 = scmp.ge.s32.totalorder %s3656_s29, 1  ;;  %p604_p1 = scmp.lt.s32.totalorder %s3656_s29, 3 }
  0x12   : > { %p4331_p2 = scmp.eq.s32.totalorder %s3811_s2, 0  ;;  %s3658_s6 = smov [#allocation4]  }
  0x13   : > { %s685_s30 = sshll.u32 %s3658_s6, 4  ;;  %p3816_p3 = pnand %p3058_p0, %p604_p1  ;;  %s686_s30 = int_to_ptr.vmem [resolvable:$true] %s685_s30 }
  0x14   : > { %s3659_s3 = smov [#allocation2]   ;;  %s3660_s1 = smov [#allocation6]  }
  0x15   : > { %s4357_s7 = scalar_select %p3816_p3, 1, 0 }
  0x16   : > { %s671_s26 = sshll.u32 %s3659_s3, 4  ;;  %p3442_p4 = pneg %p3816_p3  ;;  %s3828_s26 = int_to_ptr.vmem [resolvable:$true] %s671_s26 }
  0x17   : > { %s696_s8 = sshll.u32 %s3660_s1, 4  ;;  %s3661_s4 = smov [#allocation7]   ;;  %s3830_s8 = int_to_ptr.vmem [resolvable:$true] %s696_s8 }
  0x18   : > { %p3824_p5 = pnand %p4331_p2, %p3442_p4  ;;  %s707_s28 = sshll.u32 %s3661_s4, 4  ;;  %s3832_s28 = int_to_ptr.vmem [resolvable:$true] %s707_s28 }
  0x19   : > { %s3526_s0 = scalar_lea.hbm %s4323_s22, 16 }
  0x1a   : > { %p3527_p6 = scmp.ne.s32.totalorder %s4323_s22, %s3526_s0  ;;  %p3842_p7 = pneg %p3824_p5 }
  0x1b   : > { %p3533_p10 = scmp.lt.u32.totalorder %s3526_s0, %s4323_s22 }
  0x1c   : > { %p3529_p8 = pnand %p3842_p7, %p3527_p6 }
  0x1e   : > { %p3530_p9 = pneg %p3529_p8 }
  0x20   : > { %p3535_p11 = pnand %p3533_p10, %p3530_p9 }
  0x22   : > { %3538 = shalt.err (!%p3535_p11)
}
  0x23   : > { %s3539_s9 = scalar_lea.vmem %s686_s30, 16  ;;  %s3546_s5 = scalar_lea.vmem %s686_s30, 32 }
  0x24   : > { %p3540_p12 = scmp.ne.s32.totalorder %s686_s30, %s3539_s9  ;;  %p3547_p1 = scmp.lt.s32.totalorder %s686_s30, %s686_s30 }
  0x25   : > { %p3548_p4 = scmp.lt.s32.totalorder %s3546_s5, %s3539_s9 }
  0x26   : > { %p3542_p13 = pnand %p3540_p12, %p3842_p7 }
  0x27   : > { %p3549_p2 = por %p3548_p4, %p3547_p1 }
  0x28   : > { %p3543_p0 = pneg %p3542_p13 }
  0x2a   : > { %p3550_p3 = pnand %p3549_p2, %p3543_p0 }
  0x2c   : > { %3553 = shalt.err (!%p3550_p3)
}
  0x2d   : > { %3448 = dma.hbm_to_vmem [thread:$0]  (!%p3824_p5), %s4323_s22, 16, %s686_s30, [#allocation5]  }
  0x2e   : > { %s3554_s4 = scalar_lea.hbm %s4321_s20, 16 }
  0x2f   : > { %p3555_p6 = scmp.ne.s32.totalorder %s4321_s20, %s3554_s4  ;;  %p3561_p2 = scmp.lt.u32.totalorder %s3554_s4, %s4321_s20 }
  0x31   : > { %p3557_p8 = pnand %p3555_p6, %p3842_p7 }
  0x33   : > { %p3558_p9 = pneg %p3557_p8 }
  0x35   : > { %p3563_p3 = pnand %p3561_p2, %p3558_p9 }
  0x37   : > { %3566 = shalt.err (!%p3563_p3)
}
  0x38   : > { %s3567_s30 = scalar_lea.vmem %s3828_s26, 16  ;;  %s3574_s18 = scalar_lea.vmem %s3828_s26, 32 }
  0x39   : > { %p3568_p10 = scmp.ne.s32.totalorder %s3828_s26, %s3567_s30  ;;  %p3575_p13 = scmp.lt.s32.totalorder %s3828_s26, %s3828_s26 }
  0x3a   : > { %p3576_p0 = scmp.lt.s32.totalorder %s3574_s18, %s3567_s30 }
  0x3b   : > { %p3570_p11 = pnand %p3568_p10, %p3842_p7 }
  0x3c   : > { %p3577_p1 = por %p3576_p0, %p3575_p13 }
  0x3d   : > { %p3571_p12 = pneg %p3570_p11 }
  0x3f   : > { %p3578_p4 = pnand %p3577_p1, %p3571_p12 }
  0x41   : > { %3581 = shalt.err (!%p3578_p4)
}
  0x42   : > { %3445 = dma.hbm_to_vmem [thread:$0]  (!%p3824_p5), %s4321_s20, 16, %s3828_s26, [#allocation3]  }
  0x43   : > { %s3582_s0 = scalar_lea.hbm %s4324_s23, 16 }
  0x44   : > { %p3583_p6 = scmp.ne.s32.totalorder %s4324_s23, %s3582_s0  ;;  %p3589_p2 = scmp.lt.u32.totalorder %s3582_s0, %s4324_s23 }
  0x46   : > { %p3585_p8 = pnand %p3583_p6, %p3842_p7 }
  0x48   : > { %p3586_p9 = pneg %p3585_p8 }
  0x4a   : > { %p3591_p3 = pnand %p3589_p2, %p3586_p9 }
  0x4c   : > { %3594 = shalt.err (!%p3591_p3)
}
  0x4d   : > { %s3595_s26 = scalar_lea.vmem %s3830_s8, 16  ;;  %s3602_s18 = scalar_lea.vmem %s3830_s8, 32 }
  0x4e   : > { %p3596_p10 = scmp.ne.s32.totalorder %s3830_s8, %s3595_s26  ;;  %p3603_p13 = scmp.lt.s32.totalorder %s3830_s8, %s3830_s8 }
  0x4f   : > { %p3604_p0 = scmp.lt.s32.totalorder %s3602_s18, %s3595_s26 }
  0x50   : > { %p3598_p11 = pnand %p3596_p10, %p3842_p7 }
  0x51   : > { %p3605_p1 = por %p3604_p0, %p3603_p13 }
  0x52   : > { %p3599_p12 = pneg %p3598_p11 }
  0x54   : > { %p3606_p4 = pnand %p3605_p1, %p3599_p12 }
  0x56   : > { %3609 = shalt.err (!%p3606_p4)
}
  0x57   : > { %3451 = dma.hbm_to_vmem [thread:$0]  (!%p3824_p5), %s4324_s23, 16, %s3830_s8, [#allocation5]  }
  0x58   : > { %s3610_s0 = scalar_lea.hbm %s4325_s24, 16 }
  0x59   : > { %p3611_p6 = scmp.ne.s32.totalorder %s4325_s24, %s3610_s0  ;;  %p3617_p2 = scmp.lt.u32.totalorder %s3610_s0, %s4325_s24 }
  0x5b   : > { %p3613_p8 = pnand %p3611_p6, %p3842_p7 }
  0x5d   : > { %p3614_p9 = pneg %p3613_p8 }
  0x5f   : > { %p3619_p3 = pnand %p3617_p2, %p3614_p9 }
  0x61   : > { %3622 = shalt.err (!%p3619_p3)
}
  0x62   : > { %s3623_s8 = scalar_lea.vmem %s3832_s28, 16  ;;  %s3630_s26 = scalar_lea.vmem %s3832_s28, 32 }
  0x63   : > { %p3624_p10 = scmp.ne.s32.totalorder %s3832_s28, %s3623_s8  ;;  %p3631_p13 = scmp.lt.s32.totalorder %s3832_s28, %s3832_s28 }
  0x64   : > { %p3632_p0 = scmp.lt.s32.totalorder %s3630_s26, %s3623_s8 }
  0x65   : > { %p3626_p11 = pnand %p3624_p10, %p3842_p7 }
  0x66   : > { %p3633_p1 = por %p3632_p0, %p3631_p13 }
  0x67   : > { %p3627_p12 = pneg %p3626_p11 }
  0x69   : > { %p3634_p4 = pnand %p3633_p1, %p3627_p12 }
  0x6b   : > { %3637 = shalt.err (!%p3634_p4)
}
  0x6c   : > { %3454 = dma.hbm_to_vmem [thread:$0]  (!%p3824_p5), %s4325_s24, 16, %s3832_s28, [#allocation8]  }
  0x6d   : > { %p4360_p6 = scmp.ne.s32.totalorder %s4357_s7, 0 }
  0x6e   : > { %p4361_p7 = scmp.eq.s32.totalorder (!%p4360_p6), %s3811_s2, 0 }
  0x6f   : > { %734 = sbr.rel (%p4360_p6) target bundleno = 4349 (0x10fd), region = 120 }
  0x76   : > { %3643 = dma.done.wait (%p4361_p7), [#allocation3], 16   ;;  %p4362_p8 = pmov %p4361_p7 }
  0x77   : > { %p4363_p9 = pmov %p4361_p7 }
  0x78   : > { %3645 = vsyncadd (%p4362_p8), [#allocation3], 4294967280 }
  0x79   : > { %3647 = dma.done.wait (%p4363_p9), [#allocation5], 32   ;;  %p4364_p2 = pmov %p4361_p7 }
  0x7b   : > { %3649 = vsyncadd (%p4364_p2), [#allocation5], 4294967264  ;;  %p4365_p3 = pmov %p4364_p2 }
  0x7c   : > { %p4366_p5 = pmov %p4364_p2 }
  0x7d   : > { %3651 = dma.done.wait (%p4365_p3), [#allocation8], 16  }
  0x7e   : > { %3653 = vsyncadd (%p4366_p5), [#allocation8], 4294967280  ;;  %p816_p10 = scmp.lt.s32.totalorder %s3811_s2, 1  ;;  %v3662_v0 = vmov 0.0|0.0   ;;  %vm3663_vm0 = vmmov 0   ;;  %v3664_v1 = vmov 0.0  }
  0x7f   : > { %3372 = vmatprep.subr.bf16.mxu1 %v3662_v0  ;;  %3204 = vmatprep.mubr.msk.f32.mxu1 %vm3663_vm0, %v3664_v1  ;;  %s4367_s28 = sld [smem:[#allocation16_spill]]  ;;  %s4368_s8 = sld [smem:[#allocation13_spill]]  ;;  %vm852_vm1 = vcmask 261120   ;;  %vm1003_vm2 = vcmask 64512   ;;  %vm1675_vm3 = vcmask 130048   ;;  %vm1677_vm4 = vcmask 195584  }
  0x80   : > { %3218 = vmatprep.subr.mxu0 %v3664_v1  ;;  %3220 = vmatprep.mubr.msk.f32.mxu0 %vm3663_vm0, %v3664_v1  ;;  %s4390_s2 = smov (!%p816_p10, %s3811_s2), 1  ;;  %s4369_s7 = sld [smem:[#allocation18_spill]]  ;;  %vm2845_vm5 = vcmask 523264  }
  0x81   : > { %s3964_s9 = sshll.u32 %s4390_s2, 3  ;;  %s4370_s5 = sld [smem:[#allocation17_spill]] }
  0x82   : > { %s4342_s18 = smov 112   ;;  %s3666_s25 = smov 120  }
  0x83   : > { %s4340_s27 = smov 104   ;;  %s4372_s6 = sld [smem:[#allocation15_spill]] }
  0x84   : > { %s4338_s3 = smov 96   ;;  %s4334_s29 = smov 80  }
  0x85   : > { %v830_v2 = vld [vmem:[%s4367_s28] sm:$0xff]  ;;  %v831_v3 = vld [vmem:[%s4367_s28 + $0x8] sm:$0xff]  ;;  %v832_v4 = vld [vmem:[%s4367_s28 + $0x10] sm:$0xff]  ;;  %s819_s26 = scalar_lea.vmem %s4368_s8, %s3964_s9  ;;  %s4333_s0 = smov 72  }
  0x86   : > { %v3373_v5 = vpack.c.bf16 %v831_v3, %v830_v2  ;;  %v833_v6 = vld [vmem:[%s4367_s28 + $0x18] sm:$0xff]  ;;  %v835_v8 = vld [vmem:[%s4369_s7] sm:$0xff]  ;;  %v836_v9 = vld [vmem:[%s4369_s7 + $0x8] sm:$0xff]  ;;  %s4339_s4 = smov 88   ;;  %s4373_s8 = sld [smem:[#allocation20_spill]] }
  0x87   : > { %v3376_v7 = vpack.c.bf16 %v833_v6, %v832_v4  ;;  %v3977_v10 = vld [vmem:[%s819_s26] sm:$0xff]  ;;  %v3379_v11 = vpack.c.bf16 %v836_v9, %v835_v8  ;;  %v837_v12 = vld [vmem:[%s4369_s7 + $0x10] sm:$0xff]  ;;  %v838_v13 = vld [vmem:[%s4369_s7 + $0x18] sm:$0xff]  ;;  %s4371_s26 = sld [smem:[#allocation19_spill]]  ;;  %s4336_s30 = smov 16  }
  0x88   : > { %3374 = vmatpush3.bf16.msra.mxu1 %v3373_v5  ;;  %v3382_v14 = vpack.c.bf16 %v838_v13, %v837_v12  ;;  %v3072_v17 = vld [vmem:[%s4370_s5] ss:$0 sm:$0xff]  ;;  %s4337_s5 = smov 8   ;;  %s4374_s1 = sld [smem:[#allocation21_spill]] }
  0x89   : > { %3375 = vmatprep.subr.bf16.mxu1 %v3662_v0  ;;  %v845_v30 = vld [vmem:[%s4372_s6] sm:$0xff] }
  0x8c   : > { %3377 = vmatpush3.bf16.msra.mxu1 %v3376_v7 }
  0x8d   : > { %3378 = vmatprep.subr.bf16.mxu1 %v3662_v0  ;;  %v3074_v18 = vld [vmem:[%s4371_s26] ss:$0 sm:$0xff]  ;;  %s4335_s26 = smov 24  }
  0x8f   : > { %3205 = vmatmul.mubr.msk.f32.vlgmr.msra.gmra.mrb[0].mxu1 %vm852_vm1, %v3977_v10 }
  0x90   : > { %3380 = vmatpush3.bf16.msra.mxu1 %v3379_v11  ;;  %3215 = vmatprep.mubr.msk.f32.mxu1 %vm3663_vm0, %v3664_v1 }
  0x91   : > { %3381 = vmatprep.subr.bf16.mxu1 %v3662_v0 }
  0x94   : > { %3383 = vmatpush3.bf16.msra.mxu1 %v3382_v14 }
  0x95   : > { %3223 = vmatprep.subr.mxu1 %v3664_v1 }
  0x97   : > { %3216 = vmatmul.mubr.msk.f32.vlgmr.msra.gmra.mrb[2].mxu1 %vm852_vm1, %v3977_v10 }
  0x98   : > { %3225 = vmatprep.mubr.msk.f32.mxu1 %vm3663_vm0, %v3664_v1 }
 0x162   : > { %v922_v15 = vpop.f32.mrb[0].mxu1 }
 0x163   : > { %v3206_v16 = vpop.f32.mrb[1].mxu1  ;;  %v923_v20 = vadd.f32 %v3072_v17, %v922_v15 }
 0x165   : > { %v926_v23 = vmul.f32 0.35355338, %v923_v20 }
 0x16a   : > { %v999_v19 = vpop.f32.mrb[2].mxu1 }
 0x16b   : > { %v4002_v21 = vadd.f32 %v3074_v18, %v999_v19  ;;  %v3217_v22 = vpop.f32.mrb[3].mxu1 }
 0x16d   : > { %1334 = vrot.lane.b32.xlu1 %v4002_v21, %s4342_s18  ;;  %1169 = vrot.lane.b32.xlu0 %v4002_v21, %s3666_s25 }
 0x16e   : > { %3219 = vmatpush3.xpose.msk.msra.mxu0 %vm1003_vm2, %v4002_v21 }
 0x16f   : > { %3228 = vmatprep.subr.mxu0 %v3664_v1 }
 0x171   : > { %3221 = vmatmul.mubr.msk.f32.vlgmr.msra.gmra.mrb[0].mxu0 %vm1003_vm2, %v926_v23  ;;  %1332 = vrot.lane.b32.xlu1 %v926_v23, %s4342_s18 }
 0x172   : > { %1167 = vrot.lane.b32.xlu0 %v926_v23, %s3666_s25  ;;  %3230 = vmatprep.mubr.msk.f32.mxu0 %vm3663_vm0, %v3664_v1 }
 0x175   : > { %1497 = vrot.lane.b32.xlu1 %v926_v23, %s4340_s27 }
 0x176   : > { %1499 = vrot.lane.b32.xlu0 %v4002_v21, %s4340_s27  ;;  %s4375_s27 = sld [smem:[#allocation14_spill]] }
 0x17c   : > { %s823_s18 = scalar_lea.vmem %s4375_s27, %s3964_s9  ;;  %s4381_s27 = smov 80  }
 0x1df   : > { %v1170_v24 = vpop.permute.xlu0 %1169  ;;  %v1335_v25 = vpop.permute.xlu1 %1334 }
 0x1e0   : > { %3229 = vmatpush3.xpose.msk.msra.mxu0 %vm1003_vm2, %v1170_v24  ;;  %v840_v24 = vld [vmem:[%s4373_s8] sm:$0xff] }
 0x1e1   : > { %3238 = vmatprep.subr.mxu0 %v3664_v1 }
 0x1e3   : > { %v1333_v27 = vpop.permute.xlu1 %1332 }
 0x1e4   : > { %v1168_v26 = vpop.permute.xlu0 %1167 }
 0x1e5   : > { %3231 = vmatmul.mubr.msk.f32.vlgmr.msra.gmra.mrb[2].mxu0 %vm1003_vm2, %v1168_v26 }
 0x1e6   : > { %3239 = vmatpush3.xpose.msk.msra.mxu0 %vm1003_vm2, %v1335_v25  ;;  %3240 = vmatprep.mubr.msk.f32.mxu0 %vm3663_vm0, %v3664_v1  ;;  %v841_v25 = vld [vmem:[%s4373_s8 + $0x8] sm:$0xff] }
 0x1e7   : > { %3248 = vmatprep.subr.mxu0 %v3664_v1  ;;  %v1498_v29 = vpop.permute.xlu1 %1497  ;;  %v3385_v26 = vpack.c.bf16 %v841_v25, %v840_v24 }
 0x1e8   : > { %v1500_v28 = vpop.permute.xlu0 %1499 }
 0x1e9   : > { %3241 = vmatmul.mubr.msk.f32.vlgmr.msra.gmra.mrb[4].mxu0 %vm1003_vm2, %v1333_v27  ;;  %v842_v27 = vld [vmem:[%s4373_s8 + $0x10] sm:$0xff] }
 0x1ea   : > { %3249 = vmatpush3.xpose.msk.msra.mxu0 %vm1003_vm2, %v1500_v28  ;;  %3250 = vmatprep.mubr.msk.f32.mxu0 %vm3663_vm0, %v3664_v1  ;;  %v843_v28 = vld [vmem:[%s4373_s8 + $0x18] sm:$0xff] }
 0x1eb   : > { %3384 = vmatprep.subr.bf16.mxu0 %v3662_v0 }
 0x1ed   : > { %3251 = vmatmul.mubr.msk.f32.vlgmr.msra.gmra.mrb[6].mxu0 %vm1003_vm2, %v1498_v29  ;;  %v3388_v29 = vpack.c.bf16 %v843_v28, %v842_v27 }
 0x1ee   : > { %3266 = vmatprep.mubr.msk.f32.mxu0 %vm3663_vm0, %v3664_v1  ;;  %3386 = vmatpush3.bf16.msra.mxu0 %v3385_v26 }
 0x1ef   : > { %3387 = vmatprep.subr.bf16.mxu0 %v3662_v0 }
 0x1f2   : > { %3389 = vmatpush3.bf16.msra.mxu0 %v3388_v29 }
 0x1f3   : > { %3396 = vmatprep.subr.bf16.mxu0 %v3662_v0 }
 0x244   : > { %v1076_v31 = vpop.f32.mrb[0].mxu0 }
 0x245   : > { %v1077_v32 = vadd.f32 %v1076_v31, %v845_v30  ;;  %v3222_v33 = vpop.f32.mrb[1].mxu0 }
 0x247   : > { %v1080_v34 = vsel %vm1003_vm2, %v1077_v32, -inf }
 0x248   : > { %1081 = vmax.xlane.f32.xlu0 %v1080_v34 }
 0x2b8   : > { %v1241_v35 = vpop.f32.mrb[2].mxu0 }
 0x2b9   : > { %v1242_v36 = vadd.f32 %v1241_v35, %v845_v30  ;;  %v3232_v37 = vpop.f32.mrb[3].mxu0 }
 0x2bb   : > { %v1245_v38 = vsel %vm1003_vm2, %v1242_v36, -inf }
 0x2bc   : > { %1246 = vmax.xlane.f32.xlu1 %v1245_v38  ;;  %v1406_v39 = vpop.f32.mrb[4].mxu0 }
 0x2bd   : > { %v1407_v40 = vadd.f32 %v1406_v39, %v845_v30  ;;  %v3242_v41 = vpop.f32.mrb[5].mxu0 }
 0x2bf   : > { %v1410_v42 = vsel %vm1003_vm2, %v1407_v40, -inf }
 0x2c0   : > { %1411 = vmax.xlane.f32.xlu0 %v1410_v42  ;;  %v1571_v43 = vpop.f32.mrb[6].mxu0  ;;  %v3088_v42 = vld [vmem:[%s4374_s1] ss:$0 sm:$0xff]  ;;  %s4380_s1 = smov 96  }
 0x2c1   : > { %v1572_v44 = vadd.f32 %v1571_v43, %v845_v30  ;;  %v3252_v45 = vpop.f32.mrb[7].mxu0 }
 0x2c3   : > { %v1575_v46 = vsel %vm1003_vm2, %v1572_v44, -inf }
 0x2c4   : > { %1576 = vmax.xlane.f32.xlu0 %v1575_v46 }
 0x2cd   : > { %1091 = vrot.lane.b32.xlu1 %v4002_v21, %s4338_s3  ;;  %s4382_s3 = smov 72  }
 0x2d5   : > { %v1082_v47 = vpop.xlane.xlu0 %1081 }
 0x2d6   : > { %v1083_v48 = vsub.f32 %v1077_v32, %v1082_v47 }
 0x2d8   : > { %v1084_v49 = vmul.f32 1.442695, %v1083_v48 }
 0x2da   : > { %3488 = vpow2.f32 %v1084_v49 }
 0x2e4   : > { %v3489_v50 = vpop.eup %3488 }
 0x2e5   : > { %v1086_v51 = vsel %vm1003_vm2, %v3489_v50, 0.0 }
 0x2f1   : > { %1087 = vadd.xlane.f32.xlu1 %v1086_v51 }
 0x349   : > { %v1247_v52 = vpop.xlane.xlu1 %1246 }
 0x34a   : > { %v1248_v53 = vsub.f32 %v1242_v36, %v1247_v52 }
 0x34c   : > { %v1249_v54 = vmul.f32 1.442695, %v1248_v53  ;;  %v1794_v53 = vld [vmem:[%s4314_s13] sm:$0xff] }
 0x34d   : > { %v1092_v55 = vpop.permute.xlu1 %1091  ;;  %v1412_v56 = vpop.xlane.xlu0 %1411 }
 0x34e   : > { %3490 = vpow2.f32 %v1249_v54  ;;  %v1413_v57 = vsub.f32 %v1407_v40, %v1412_v56  ;;  %3224 = vmatpush3.msra.mxu1 %v1092_v55  ;;  %v1795_v54 = vld [vmem:[%s4314_s13 + $0x8] sm:$0xff]  ;;  %v1789_v55 = vld [vmem:[%s4312_s11] sm:$0xff] }
 0x34f   : > { %3233 = vmatprep.subr.mxu1 %v3664_v1  ;;  %v1790_v56 = vld [vmem:[%s4312_s11 + $0x8] sm:$0xff] }
 0x350   : > { %v1414_v58 = vmul.f32 1.442695, %v1413_v57  ;;  %v3391_v57 = vpack.c.bf16 %v1790_v56, %v1789_v55 }
 0x351   : > { %v1577_v59 = vpop.xlane.xlu0 %1576 }
 0x352   : > { %3492 = vpow2.f32 %v1414_v58  ;;  %v1578_v60 = vsub.f32 %v1572_v44, %v1577_v59  ;;  %v1796_v58 = vld [vmem:[%s4314_s13 + $0x10] sm:$0xff]  ;;  %v1797_v59 = vld [vmem:[%s4314_s13 + $0x18] sm:$0xff] }
 0x354   : > { %v1579_v61 = vmul.f32 1.442695, %v1578_v60  ;;  %v3400_v60 = vpack.c.bf16 %v1797_v59, %v1796_v58 }
 0x356   : > { %3494 = vpow2.f32 %v1579_v61  ;;  %v1791_v61 = vld [vmem:[%s4312_s11 + $0x10] sm:$0xff] }
 0x358   : > { %v3491_v62 = vpop.eup %3490 }
 0x359   : > { %v1251_v63 = vsel %vm1003_vm2, %v3491_v62, 0.0 }
 0x35a   : > { %1252 = vadd.xlane.f32.xlu0 %v1251_v63 }
 0x35c   : > { %v3493_v2 = vpop.eup %3492 }
 0x35d   : > { %v1416_v3 = vsel %vm1003_vm2, %v3493_v2, 0.0 }
 0x35e   : > { %1417 = vadd.xlane.f32.xlu1 %v1416_v3 }
 0x360   : > { %v3495_v4 = vpop.eup %3494 }
 0x361   : > { %v1581_v5 = vsel %vm1003_vm2, %v3495_v4, 0.0 }
 0x362   : > { %1582 = vadd.xlane.f32.xlu0 %v1581_v5 }
 0x36f   : > { %1421 = vrot.lane.b32.xlu1 %v4002_v21, %s4334_s29 }
 0x373   : > { %1586 = vrot.lane.b32.xlu1 %v4002_v21, %s4333_s0 }
 0x378   : > { %1256 = vrot.lane.b32.xlu0 %v4002_v21, %s4339_s4  ;;  %s4376_s4 = sld [smem:[#allocation22_spill]] }
 0x37e   : > { %v1088_v6 = vpop.xlane.xlu1 %1087 }
 0x37f   : > { %3496 = vrcp.f32 %v1088_v6 }
 0x389   : > { %v3497_v7 = vpop.eup %3496 }
 0x38a   : > { %v1090_v8 = vmul.f32 %v3497_v7, %v3489_v50  ;;  %v3090_v7 = vld [vmem:[%s4376_s4] ss:$0 sm:$0xff] }
 0x38c   : > { %3226 = vmatmul.mubr.msk.f32.vlgmr.msra.gmra.mrb[4].mxu1 %vm1003_vm2, %v1090_v8 }
 0x38d   : > { %3235 = vmatprep.mubr.msk.f32.mxu1 %vm3663_vm0, %v3664_v1 }
 0x3e7   : > { %v1253_v9 = vpop.xlane.xlu0 %1252 }
 0x3e8   : > { %3498 = vrcp.f32 %v1253_v9  ;;  %v3091_v9 = vld [vmem:[%s4311_s10] ss:$0 sm:$0xff] }
 0x3eb   : > { %v1418_v11 = vpop.xlane.xlu1 %1417 }
 0x3ec   : > { %3500 = vrcp.f32 %v1418_v11 }
 0x3ef   : > { %v1583_v12 = vpop.xlane.xlu0 %1582  ;;  %v1422_v15 = vpop.permute.xlu1 %1421 }
 0x3f0   : > { %3502 = vrcp.f32 %v1583_v12 }
 0x3f2   : > { %v3499_v13 = vpop.eup %3498 }
 0x3f3   : > { %v1255_v14 = vmul.f32 %v3499_v13, %v3491_v62  ;;  %v1257_v16 = vpop.permute.xlu0 %1256  ;;  %v1587_v19 = vpop.permute.xlu1 %1586  ;;  %v1792_v62 = vld [vmem:[%s4312_s11 + $0x18] sm:$0xff]  ;;  %v3094_v13 = vld [vmem:[%s4315_s14] ss:$0 sm:$0xff] }
 0x3f4   : > { %3234 = vmatpush3.msra.mxu1 %v1257_v16  ;;  %v3394_v63 = vpack.c.bf16 %v1792_v62, %v1791_v61 }
 0x3f5   : > { %3236 = vmatmul.mubr.msk.f32.vlgmr.msra.gmra.mrb[6].mxu1 %vm1003_vm2, %v1255_v14  ;;  %3243 = vmatprep.subr.mxu1 %v3664_v1 }
 0x3f6   : > { %v3501_v17 = vpop.eup %3500  ;;  %3244 = vmatpush3.msra.mxu1 %v1422_v15  ;;  %3245 = vmatprep.mubr.msk.f32.mxu1 %vm3663_vm0, %v3664_v1 }
 0x3f7   : > { %v1420_v18 = vmul.f32 %v3501_v17, %v3493_v2  ;;  %3253 = vmatprep.subr.mxu1 %v3664_v1  ;;  %v829_v2 = vld [vmem:[%s823_s18] sm:$0xff] }
 0x3f9   : > { %3246 = vmatmul.mubr.msk.f32.vlgmr.msra.gmra.mrb[8].mxu1 %vm1003_vm2, %v1420_v18  ;;  %v3092_v18 = vld [vmem:[%s4313_s12] ss:$0 sm:$0xff] }
 0x3fa   : > { %v3503_v20 = vpop.eup %3502  ;;  %3254 = vmatpush3.msra.mxu1 %v1587_v19  ;;  %3255 = vmatprep.mubr.msk.f32.mxu1 %vm3663_vm0, %v3664_v1 }
 0x3fb   : > { %v1585_v21 = vmul.f32 %v3503_v20, %v3495_v4  ;;  %3390 = vmatprep.subr.bf16.mxu1 %v3662_v0 }
 0x3fd   : > { %3256 = vmatmul.mubr.msk.f32.vlgmr.msra.gmra.mrb[10].mxu1 %vm1003_vm2, %v1585_v21 }
 0x3fe   : > { %3277 = vmatprep.mubr.msk.f32.mxu1 %vm3663_vm0, %v3664_v1  ;;  %3392 = vmatpush3.bf16.msra.mxu1 %v3391_v57 }
 0x3ff   : > { %3393 = vmatprep.subr.bf16.mxu1 %v3662_v0 }
 0x402   : > { %3395 = vmatpush3.bf16.msra.mxu1 %v3394_v63 }
 0x403   : > { %3291 = vmatprep.subr.mxu1 %v3664_v1 }
 0x45f   : > { %v1163_v22 = vpop.f32.mrb[4].mxu1 }
 0x460   : > { %v3227_v23 = vpop.f32.mrb[5].mxu1 }
 0x4c8   : > { %v1328_v30 = vpop.f32.mrb[6].mxu1 }
 0x4c9   : > { %1663 = vrot.lane.b32.xlu0 %v1328_v30, %s4337_s5  ;;  %v3237_v31 = vpop.f32.mrb[7].mxu1  ;;  %s4377_s5 = smov 112  }
 0x4cc   : > { %v1493_v32 = vpop.f32.mrb[8].mxu1 }
 0x4cd   : > { %1667 = vrot.lane.b32.xlu1 %v1493_v32, %s4336_s30  ;;  %v3247_v33 = vpop.f32.mrb[9].mxu1  ;;  %s4378_s30 = smov 104  }
 0x4d0   : > { %v1658_v34 = vpop.f32.mrb[10].mxu1 }
 0x4d1   : > { %1671 = vrot.lane.b32.xlu0 %v1658_v34, %s4335_s26  ;;  %v3257_v35 = vpop.f32.mrb[11].mxu1  ;;  %s4387_s26 = sld [smem:[#allocation24_spill]] }
 0x4d7   : > { %s827_s0 = scalar_lea.vmem %s4387_s26, %s3964_s9 }
 0x53b   : > { %v1664_v36 = vpop.permute.xlu0 %1663 }
 0x53c   : > { %v1674_v38 = vsel %vm1003_vm2, %v1163_v22, %v1664_v36 }
 0x53f   : > { %v1668_v37 = vpop.permute.xlu1 %1667 }
 0x540   : > { %v1676_v39 = vsel %vm1675_vm3, %v1674_v38, %v1668_v37 }
 0x543   : > { %v1672_v40 = vpop.permute.xlu0 %1671 }
 0x544   : > { %v1678_v41 = vsel %vm1677_vm4, %v1676_v39, %v1672_v40 }
 0x545   : > { %3267 = vmatmul.mubr.msk.f32.vlgmr.msra.gmra.mrb[8].mxu0 %vm852_vm1, %v1678_v41 }
 0x546   : > { %3288 = vmatprep.mubr.msk.f32.mxu0 %vm3663_vm0, %v3664_v1 }
 0x618   : > { %v1754_v43 = vpop.f32.mrb[8].mxu0 }
 0x619   : > { %v1755_v44 = vadd.f32 %v3088_v42, %v1754_v43  ;;  %v3268_v45 = vpop.f32.mrb[9].mxu0 }
 0x61b   : > { %v1758_v46 = vadd.f32 %v1755_v44, %v3977_v10  ;;  %v3397_v10 = vpack.c.bf16 %v1795_v54, %v1794_v53 }
 0x61d   : > { %v1761_v47 = vsel %vm852_vm1, %v1758_v46, 0.0  ;;  %3398 = vmatpush3.bf16.msra.mxu0 %v3397_v10 }
 0x61e   : > { %1762 = vadd.xlane.f32.xlu1 %v1761_v47  ;;  %3399 = vmatprep.subr.bf16.mxu0 %v3662_v0 }
 0x621   : > { %3401 = vmatpush3.bf16.msra.mxu0 %v3400_v60 }
 0x622   : > { %3301 = vmatprep.subr.mxu0 %v3664_v1 }
 0x624   : > { %3289 = vmatmul.mubr.msk.f32.vlgmr.msra.gmra.mrb[10].mxu0 %vm852_vm1, %v829_v2 }
 0x625   : > { %3303 = vmatprep.mubr.msk.f32.mxu0 %vm3663_vm0, %v3664_v1 }
 0x6ab   : > { %v1763_v48 = vpop.xlane.xlu1 %1762 }
 0x6ac   : > { %v1765_v49 = vmul.f32 0.03125, %v1763_v48 }
 0x6ae   : > { %v1766_v50 = vsub.f32 %v1758_v46, %v1765_v49 }
 0x6b0   : > { %v1767_v51 = vmul.f32 %v1766_v50, %v1766_v50 }
 0x6b2   : > { %v1768_v52 = vsel %vm852_vm1, %v1767_v51, 0.0 }
 0x6b3   : > { %1769 = vadd.xlane.f32.xlu0 %v1768_v52 }
 0x6f7   : > { %v1959_v14 = vpop.f32.mrb[10].mxu0 }
 0x6f8   : > { %v4148_v15 = vadd.f32 %v3094_v13, %v1959_v14  ;;  %v3290_v16 = vpop.f32.mrb[11].mxu0 }
 0x6fa   : > { %2128 = vrot.lane.b32.xlu0 %v4148_v15, %s3666_s25 }
 0x740   : > { %v1770_v3 = vpop.xlane.xlu0 %1769 }
 0x741   : > { %v1771_v4 = vmul.f32 0.03125, %v1770_v3 }
 0x743   : > { %v1772_v5 = vadd.f32 1e-05, %v1771_v4 }
 0x745   : > { %3504 = vrsqrt.f32 %v1772_v5 }
 0x74f   : > { %v3505_v6 = vpop.eup %3504 }
 0x750   : > { %v1774_v8 = vmul.f32 %v3505_v6, %v1766_v50 }
 0x752   : > { %v1781_v11 = vmul.f32 %v3090_v7, %v1774_v8 }
 0x754   : > { %v4139_v12 = vadd.f32 %v3091_v9, %v1781_v11 }
 0x756   : > { %3278 = vmatmul.mubr.msk.f32.vlgmr.msra.gmra.mrb[12].mxu1 %vm852_vm1, %v4139_v12 }
 0x757   : > { %3293 = vmatprep.mubr.msk.f32.mxu1 %vm3663_vm0, %v3664_v1  ;;  %3292 = vmatpush3.xpose.msk.msra.mxu1 %vm1003_vm2, %v4148_v15 }
 0x758   : > { %3296 = vmatprep.subr.mxu1 %v3664_v1 }
 0x76c   : > { %v2129_v17 = vpop.permute.xlu0 %2128 }
 0x76d   : > { %3302 = vmatpush3.xpose.msk.msra.mxu0 %vm1003_vm2, %v2129_v17  ;;  %v1799_v17 = vld [vmem:[%s4316_s15] sm:$0xff] }
 0x76e   : > { %3311 = vmatprep.subr.mxu0 %v3664_v1 }
 0x829   : > { %v1879_v19 = vpop.f32.mrb[12].mxu1 }
 0x82a   : > { %v1880_v20 = vadd.f32 %v3092_v18, %v1879_v19  ;;  %v3279_v21 = vpop.f32.mrb[13].mxu1  ;;  %v1800_v18 = vld [vmem:[%s4316_s15 + $0x8] sm:$0xff] }
 0x82b   : > { %v3403_v19 = vpack.c.bf16 %v1800_v18, %v1799_v17  ;;  %v1802_v21 = vld [vmem:[%s4316_s15 + $0x18] sm:$0xff] }
 0x82c   : > { %v1883_v22 = vmul.f32 0.35355338, %v1880_v20  ;;  %v1801_v20 = vld [vmem:[%s4316_s15 + $0x10] sm:$0xff] }
 0x82e   : > { %2291 = vrot.lane.b32.xlu0 %v1883_v22, %s4377_s5  ;;  %2126 = vrot.lane.b32.xlu1 %v1883_v22, %s3666_s25  ;;  %s4379_s25 = smov 88  }
 0x82f   : > { %3294 = vmatmul.mubr.msk.f32.vlgmr.msra.gmra.mrb[14].mxu1 %vm1003_vm2, %v1883_v22 }
 0x830   : > { %3298 = vmatprep.mubr.msk.f32.mxu1 %vm3663_vm0, %v3664_v1 }
 0x832   : > { %2456 = vrot.lane.b32.xlu0 %v1883_v22, %s4378_s30  ;;  %2293 = vrot.lane.b32.xlu1 %v4148_v15, %s4377_s5  ;;  %v3406_v22 = vpack.c.bf16 %v1802_v21, %v1801_v20 }
 0x836   : > { %2458 = vrot.lane.b32.xlu1 %v4148_v15, %s4378_s30  ;;  %s4383_s30 = smov 8  }
 0x8a0   : > { %v2127_v23 = vpop.permute.xlu1 %2126  ;;  %v2292_v25 = vpop.permute.xlu0 %2291 }
 0x8a1   : > { %3304 = vmatmul.mubr.msk.f32.vlgmr.msra.gmra.mrb[12].mxu0 %vm1003_vm2, %v2127_v23 }
 0x8a2   : > { %3313 = vmatprep.mubr.msk.f32.mxu0 %vm3663_vm0, %v3664_v1 }
 0x8a4   : > { %v2294_v24 = vpop.permute.xlu1 %2293  ;;  %v2457_v27 = vpop.permute.xlu0 %2456 }
 0x8a5   : > { %3312 = vmatpush3.xpose.msk.msra.mxu0 %vm1003_vm2, %v2294_v24 }
 0x8a6   : > { %3321 = vmatprep.subr.mxu0 %v3664_v1 }
 0x8a8   : > { %3314 = vmatmul.mubr.msk.f32.vlgmr.msra.gmra.mrb[14].mxu0 %vm1003_vm2, %v2292_v25  ;;  %v2459_v26 = vpop.permute.xlu1 %2458 }
 0x8a9   : > { %3322 = vmatpush3.xpose.msk.msra.mxu0 %vm1003_vm2, %v2459_v26  ;;  %3323 = vmatprep.mubr.msk.f32.mxu0 %vm3663_vm0, %v3664_v1 }
 0x8aa   : > { %3402 = vmatprep.subr.bf16.mxu0 %v3662_v0 }
 0x8ac   : > { %3324 = vmatmul.mubr.msk.f32.vlgmr.msra.gmra.mrb[16].mxu0 %vm1003_vm2, %v2457_v27 }
 0x8ad   : > { %3339 = vmatprep.mubr.msk.f32.mxu0 %vm3663_vm0, %v3664_v1  ;;  %3404 = vmatpush3.bf16.msra.mxu0 %v3403_v19 }
 0x8ae   : > { %3405 = vmatprep.subr.bf16.mxu0 %v3662_v0 }
 0x8b1   : > { %3407 = vmatpush3.bf16.msra.mxu0 %v3406_v22 }
 0x8b2   : > { %3414 = vmatprep.subr.bf16.mxu0 %v3662_v0 }
 0x902   : > { %v2035_v28 = vpop.f32.mrb[14].mxu1 }
 0x903   : > { %v3295_v29 = vpop.f32.mrb[15].mxu1  ;;  %v2039_v30 = vsel %vm1003_vm2, %v2035_v28, -inf }
 0x904   : > { %2040 = vmax.xlane.f32.xlu1 %v2039_v30 }
 0x974   : > { %v2200_v31 = vpop.f32.mrb[12].mxu0 }
 0x975   : > { %v3305_v32 = vpop.f32.mrb[13].mxu0  ;;  %v2204_v33 = vsel %vm1003_vm2, %v2200_v31, -inf }
 0x976   : > { %2205 = vmax.xlane.f32.xlu0 %v2204_v33 }
 0x97b   : > { %v2365_v34 = vpop.f32.mrb[14].mxu0 }
 0x97c   : > { %v3315_v35 = vpop.f32.mrb[15].mxu0  ;;  %v2369_v36 = vsel %vm1003_vm2, %v2365_v34, -inf }
 0x97d   : > { %2370 = vmax.xlane.f32.xlu0 %v2369_v36  ;;  %v3108_v35 = vld [vmem:[%s4317_s16] ss:$0 sm:$0xff] }
 0x97f   : > { %v2530_v37 = vpop.f32.mrb[16].mxu0 }
 0x980   : > { %v3325_v38 = vpop.f32.mrb[17].mxu0  ;;  %v2534_v39 = vsel %vm1003_vm2, %v2530_v37, -inf }
 0x981   : > { %2535 = vmax.xlane.f32.xlu1 %v2534_v39 }
 0x991   : > { %v2041_v40 = vpop.xlane.xlu1 %2040 }
 0x992   : > { %v2042_v41 = vsub.f32 %v2035_v28, %v2041_v40  ;;  %2215 = vrot.lane.b32.xlu1 %v4148_v15, %s4379_s25  ;;  %s4384_s25 = smov 16  }
 0x994   : > { %v2043_v42 = vmul.f32 1.442695, %v2042_v41 }
 0x996   : > { %3506 = vpow2.f32 %v2043_v42 }
 0x9a0   : > { %v3507_v43 = vpop.eup %3506 }
 0x9a1   : > { %v2045_v44 = vsel %vm1003_vm2, %v3507_v43, 0.0 }
 0x9a2   : > { %2046 = vadd.xlane.f32.xlu0 %v2045_v44 }
 0x9b8   : > { %2050 = vrot.lane.b32.xlu0 %v4148_v15, %s4380_s1  ;;  %s4385_s1 = smov 24  }
 0xa03   : > { %v2206_v45 = vpop.xlane.xlu0 %2205 }
 0xa04   : > { %v2207_v46 = vsub.f32 %v2200_v31, %v2206_v45 }
 0xa06   : > { %v2208_v47 = vmul.f32 1.442695, %v2207_v46  ;;  %v2746_v46 = vld [vmem:[%s4320_s19 + $0x8] sm:$0xff] }
 0xa08   : > { %3508 = vpow2.f32 %v2208_v47 }
 0xa0a   : > { %v2371_v48 = vpop.xlane.xlu0 %2370 }
 0xa0b   : > { %v2372_v49 = vsub.f32 %v2365_v34, %v2371_v48  ;;  %v2748_v48 = vld [vmem:[%s4320_s19 + $0x18] sm:$0xff] }
 0xa0d   : > { %v2373_v50 = vmul.f32 1.442695, %v2372_v49 }
 0xa0e   : > { %v2536_v51 = vpop.xlane.xlu1 %2535 }
 0xa0f   : > { %3510 = vpow2.f32 %v2373_v50  ;;  %v2537_v52 = vsub.f32 %v2530_v37, %v2536_v51  ;;  %v2750_v50 = vld [vmem:[%s4322_s21] sm:$0xff]  ;;  %v2751_v51 = vld [vmem:[%s4322_s21 + $0x8] sm:$0xff] }
 0xa11   : > { %v2538_v53 = vmul.f32 1.442695, %v2537_v52  ;;  %v2752_v52 = vld [vmem:[%s4322_s21 + $0x10] sm:$0xff] }
 0xa12   : > { %v3509_v54 = vpop.eup %3508  ;;  %v2216_v63 = vpop.permute.xlu1 %2215 }
 0xa13   : > { %3512 = vpow2.f32 %v2538_v53  ;;  %v2210_v10 = vsel %vm1003_vm2, %v3509_v54, 0.0  ;;  %v3415_v53 = vpack.c.bf16 %v2751_v51, %v2750_v50 }
 0xa14   : > { %2211 = vadd.xlane.f32.xlu1 %v2210_v10 }
 0xa19   : > { %v3511_v55 = vpop.eup %3510 }
 0xa1a   : > { %v2375_v56 = vsel %vm1003_vm2, %v3511_v55, 0.0 }
 0xa1b   : > { %2376 = vadd.xlane.f32.xlu0 %v2375_v56  ;;  %v2755_v56 = vld [vmem:[%s4322_s21 + $0x28] sm:$0xff] }
 0xa1d   : > { %v3513_v57 = vpop.eup %3512 }
 0xa1e   : > { %v2540_v58 = vsel %vm1003_vm2, %v3513_v57, 0.0 }
 0xa1f   : > { %2541 = vadd.xlane.f32.xlu1 %v2540_v58 }
 0xa2f   : > { %v2047_v59 = vpop.xlane.xlu0 %2046 }
 0xa30   : > { %3514 = vrcp.f32 %v2047_v59  ;;  %2380 = vrot.lane.b32.xlu1 %v4148_v15, %s4381_s27  ;;  %s4386_s27 = sld [smem:[#allocation23_spill]] }
 0xa31   : > { %2545 = vrot.lane.b32.xlu0 %v4148_v15, %s4382_s3 }
 0xa33   : > { %v2051_v60 = vpop.permute.xlu0 %2050 }
 0xa34   : > { %3297 = vmatpush3.msra.mxu1 %v2051_v60 }
 0xa35   : > { %3306 = vmatprep.subr.mxu1 %v3664_v1 }
 0xa3a   : > { %v3515_v61 = vpop.eup %3514 }
 0xa3b   : > { %v2049_v62 = vmul.f32 %v3515_v61, %v3507_v43 }
 0xa3d   : > { %3299 = vmatmul.mubr.msk.f32.vlgmr.msra.gmra.mrb[16].mxu1 %vm1003_vm2, %v2049_v62  ;;  %v3110_v62 = vld [vmem:[%s4318_s17] ss:$0 sm:$0xff] }
 0xa3e   : > { %3307 = vmatpush3.msra.mxu1 %v2216_v63  ;;  %3308 = vmatprep.mubr.msk.f32.mxu1 %vm3663_vm0, %v3664_v1 }
 0xa3f   : > { %3316 = vmatprep.subr.mxu1 %v3664_v1 }
 0xaa1   : > { %v2212_v2 = vpop.xlane.xlu1 %2211 }
 0xaa2   : > { %3516 = vrcp.f32 %v2212_v2  ;;  %v3111_v2 = vld [vmem:[%s4386_s27] ss:$0 sm:$0xff] }
 0xaa8   : > { %v2377_v3 = vpop.xlane.xlu0 %2376 }
 0xaa9   : > { %3518 = vrcp.f32 %v2377_v3 }
 0xaac   : > { %v3517_v4 = vpop.eup %3516  ;;  %v2542_v5 = vpop.xlane.xlu1 %2541 }
 0xaad   : > { %v2214_v6 = vmul.f32 %v3517_v4, %v3509_v54  ;;  %3520 = vrcp.f32 %v2542_v5  ;;  %v2546_v11 = vpop.permute.xlu0 %2545  ;;  %v2753_v54 = vld [vmem:[%s4322_s21 + $0x18] sm:$0xff] }
 0xaae   : > { %v3418_v10 = vpack.c.bf16 %v2753_v54, %v2752_v52  ;;  %v2757_v5 = vld [vmem:[%s4322_s21 + $0x38] sm:$0xff] }
 0xaaf   : > { %3309 = vmatmul.mubr.msk.f32.vlgmr.msra.gmra.mrb[18].mxu1 %vm1003_vm2, %v2214_v6 }
 0xab0   : > { %v2381_v7 = vpop.permute.xlu1 %2380  ;;  %3318 = vmatprep.mubr.msk.f32.mxu1 %vm3663_vm0, %v3664_v1 }
 0xab1   : > { %3317 = vmatpush3.msra.mxu1 %v2381_v7  ;;  %v3112_v7 = vld [vmem:[#allocation2] ss:$0 sm:$0xff] }
 0xab2   : > { %3326 = vmatprep.subr.mxu1 %v3664_v1 }
 0xab3   : > { %v3519_v8 = vpop.eup %3518 }
 0xab4   : > { %v2379_v9 = vmul.f32 %v3519_v8, %v3511_v55  ;;  %v2754_v55 = vld [vmem:[%s4322_s21 + $0x20] sm:$0xff] }
 0xab6   : > { %3319 = vmatmul.mubr.msk.f32.vlgmr.msra.gmra.mrb[20].mxu1 %vm1003_vm2, %v2379_v9 }
 0xab7   : > { %v3521_v13 = vpop.eup %3520  ;;  %3327 = vmatpush3.msra.mxu1 %v2546_v11  ;;  %3328 = vmatprep.mubr.msk.f32.mxu1 %vm3663_vm0, %v3664_v1 }
 0xab8   : > { %v2544_v14 = vmul.f32 %v3521_v13, %v3513_v57  ;;  %3408 = vmatprep.subr.bf16.mxu1 %v3662_v0  ;;  %v3421_v57 = vpack.c.bf16 %v2755_v56, %v2754_v55 }
 0xaba   : > { %3329 = vmatmul.mubr.msk.f32.vlgmr.msra.gmra.mrb[22].mxu1 %vm1003_vm2, %v2544_v14  ;;  %v3114_v14 = vld [vmem:[#allocation4] ss:$0 sm:$0xff] }
 0xabb   : > { %3350 = vmatprep.mubr.msk.f32.mxu1 %vm3663_vm0, %v3664_v1 }
 0xb10   : > { %v2122_v15 = vpop.f32.mrb[16].mxu1 }
 0xb11   : > { %v3300_v16 = vpop.f32.mrb[17].mxu1 }
 0xb82   : > { %v2287_v23 = vpop.f32.mrb[18].mxu1 }
 0xb83   : > { %2622 = vrot.lane.b32.xlu1 %v2287_v23, %s4383_s30  ;;  %v3310_v24 = vpop.f32.mrb[19].mxu1 }
 0xb89   : > { %v2452_v25 = vpop.f32.mrb[20].mxu1 }
 0xb8a   : > { %2626 = vrot.lane.b32.xlu0 %v2452_v25, %s4384_s25  ;;  %v3320_v26 = vpop.f32.mrb[21].mxu1 }
 0xb8d   : > { %v2617_v27 = vpop.f32.mrb[22].mxu1 }
 0xb8e   : > { %2630 = vrot.lane.b32.xlu1 %v2617_v27, %s4385_s1  ;;  %v3330_v28 = vpop.f32.mrb[23].mxu1 }
 0xbf5   : > { %v2623_v29 = vpop.permute.xlu1 %2622 }
 0xbf6   : > { %v2633_v31 = vsel %vm1003_vm2, %v2122_v15, %v2623_v29  ;;  %v3116_v29 = vld [vmem:[#allocation6] ss:$0 sm:$0xff] }
 0xbfc   : > { %v2627_v30 = vpop.permute.xlu0 %2626 }
 0xbfd   : > { %v2634_v32 = vsel %vm1675_vm3, %v2633_v31, %v2627_v30  ;;  %v3117_v31 = vld [vmem:[#allocation7] ss:$0 sm:$0xff] }
 0xc00   : > { %v2631_v33 = vpop.permute.xlu1 %2630 }
 0xc01   : > { %v2635_v34 = vsel %vm1677_vm4, %v2634_v32, %v2631_v33 }
 0xc02   : > { %3340 = vmatmul.mubr.msk.f32.vlgmr.msra.gmra.mrb[18].mxu0 %vm852_vm1, %v2635_v34 }
 0xc03   : > { %3369 = vmatprep.mubr.msk.f32.mxu0 %vm3663_vm0, %v3664_v1  ;;  %v2745_v1 = vld [vmem:[%s4320_s19] sm:$0xff]  ;;  %3416 = vmatpush3.bf16.msra.mxu0 %v3415_v53 }
 0xc04   : > { %v3409_v47 = vpack.c.bf16 %v2746_v46, %v2745_v1  ;;  %3417 = vmatprep.subr.bf16.mxu0 %v3662_v0 }
 0xc06   : > { %3410 = vmatpush3.bf16.msra.mxu1 %v3409_v47 }
 0xc07   : > { %3411 = vmatprep.subr.bf16.mxu1 %v3662_v0  ;;  %3419 = vmatpush3.bf16.msra.mxu0 %v3418_v10 }
 0xc08   : > { %3420 = vmatprep.subr.bf16.mxu0 %v3662_v0 }
 0xc0b   : > { %3422 = vmatpush3.bf16.msra.mxu0 %v3421_v57 }
 0xc0c   : > { %3423 = vmatprep.subr.bf16.mxu0 %v3662_v0  ;;  %v2756_v0 = vld [vmem:[%s4322_s21 + $0x30] sm:$0xff] }
 0xc0d   : > { %v3424_v6 = vpack.c.bf16 %v2757_v5, %v2756_v0 }
 0xc0f   : > { %3425 = vmatpush3.bf16.msra.mxu0 %v3424_v6 }
 0xcd5   : > { %v2711_v36 = vpop.f32.mrb[18].mxu0 }
 0xcd6   : > { %v2712_v37 = vadd.f32 %v3108_v35, %v2711_v36  ;;  %v3341_v38 = vpop.f32.mrb[19].mxu0 }
 0xcd8   : > { %v2715_v39 = vadd.f32 %v2712_v37, %v4139_v12  ;;  %v2747_v12 = vld [vmem:[%s4320_s19 + $0x10] sm:$0xff] }
 0xcd9   : > { %v3412_v49 = vpack.c.bf16 %v2748_v48, %v2747_v12 }
 0xcda   : > { %v2718_v40 = vsel %vm852_vm1, %v2715_v39, 0.0 }
 0xcdb   : > { %2719 = vadd.xlane.f32.xlu0 %v2718_v40  ;;  %3413 = vmatpush3.bf16.msra.mxu1 %v3412_v49 }
 0xd68   : > { %v2720_v41 = vpop.xlane.xlu0 %2719 }
 0xd69   : > { %v2721_v42 = vmul.f32 0.03125, %v2720_v41 }
 0xd6b   : > { %v2722_v43 = vsub.f32 %v2715_v39, %v2721_v42 }
 0xd6d   : > { %v2723_v44 = vmul.f32 %v2722_v43, %v2722_v43 }
 0xd6f   : > { %v2724_v45 = vsel %vm852_vm1, %v2723_v44, 0.0 }
 0xd70   : > { %2725 = vadd.xlane.f32.xlu1 %v2724_v45 }
 0xdfd   : > { %v2726_v58 = vpop.xlane.xlu1 %2725 }
 0xdfe   : > { %v2727_v59 = vmul.f32 0.03125, %v2726_v58 }
 0xe00   : > { %v2728_v60 = vadd.f32 1e-05, %v2727_v59 }
 0xe02   : > { %3522 = vrsqrt.f32 %v2728_v60 }
 0xe0c   : > { %v3523_v61 = vpop.eup %3522 }
 0xe0d   : > { %v2730_v63 = vmul.f32 %v3523_v61, %v2722_v43 }
 0xe0f   : > { %v2737_v3 = vmul.f32 %v3110_v62, %v2730_v63 }
 0xe11   : > { %v2744_v4 = vadd.f32 %v3111_v2, %v2737_v3 }
 0xe13   : > { %3351 = vmatmul.mubr.msk.f32.vlgmr.msra.gmra.mrb[24].mxu1 %vm852_vm1, %v2744_v4 }
 0xee6   : > { %v2834_v8 = vpop.f32.mrb[24].mxu1 }
 0xee7   : > { %v2835_v9 = vadd.f32 %v3112_v7, %v2834_v8  ;;  %v3352_v11 = vpop.f32.mrb[25].mxu1 }
 0xee9   : > { %v2838_v13 = vmax.f32 %v2835_v9, 0.0 }
 0xeeb   : > { %3370 = vmatmul.mubr.msk.f32.vlgmr.msra.gmra.mrb[20].mxu0 %vm2845_vm5, %v2838_v13 }
 0xfbe   : > { %v2915_v15 = vpop.f32.mrb[20].mxu0 }
 0xfbf   : > { %v2916_v16 = vadd.f32 %v3114_v14, %v2915_v15  ;;  %v3371_v17 = vpop.f32.mrb[21].mxu0 }
 0xfc1   : > { %v2919_v18 = vadd.f32 %v2916_v16, %v2744_v4 }
 0xfc3   : > { %v2922_v19 = vsel %vm852_vm1, %v2919_v18, 0.0 }
 0xfc4   : > { %2923 = vadd.xlane.f32.xlu0 %v2922_v19 }
0x1051   : > { %v2924_v20 = vpop.xlane.xlu0 %2923 }
0x1052   : > { %v2925_v21 = vmul.f32 0.03125, %v2924_v20 }
0x1054   : > { %v2926_v22 = vsub.f32 %v2919_v18, %v2925_v21 }
0x1056   : > { %v2927_v23 = vmul.f32 %v2926_v22, %v2926_v22 }
0x1058   : > { %v2928_v24 = vsel %vm852_vm1, %v2927_v23, 0.0 }
0x1059   : > { %2929 = vadd.xlane.f32.xlu0 %v2928_v24 }
0x10e6   : > { %v2930_v25 = vpop.xlane.xlu0 %2929 }
0x10e7   : > { %v2931_v26 = vmul.f32 0.03125, %v2930_v25 }
0x10e9   : > { %v2932_v27 = vadd.f32 1e-05, %v2931_v26 }
0x10eb   : > { %3524 = vrsqrt.f32 %v2932_v27 }
0x10f5   : > { %v3525_v28 = vpop.eup %3524 }
0x10f6   : > { %v2934_v30 = vmul.f32 %v3525_v28, %v2926_v22 }
0x10f8   : > { %v2941_v32 = vmul.f32 %v3116_v29, %v2934_v30 }
0x10fa   : > { %v2948_v33 = vadd.f32 %v3117_v31, %v2941_v32 }
0x10fc   : > { %2949 = vst.msk [vmem:[%s827_s0] sm:$0xff] %vm852_vm1, %v2948_v33 }
0x10fd PF: > { %s4388_s5 = sld [smem:[#allocation12_spill]] }
0x1103   : > { %s38_s29 = sadd.s32 1, %s4388_s5  }
0x1104   : > { %p35_p11 = scmp.ge.s32.totalorder %s38_s29, 4  }
0x1106   :  { %37 = sbr.rel (!%p35_p11) target bundleno = 16 (0x10), region = 170 }
0x110d   :  { %2969 = vsyncpa [#allocation3], 1 }
0x110e   :  { %2971 = vsyncpa [#allocation3 + $0x1], 1 }
0x110f   :  { %2972 = vsyncpa [#allocation5], 1 }
0x1110   :  { %2973 = vsyncpa [#allocation8], 1 }

// kernel: forward.12
= control target key start
LH: loop header
LB: loop body
LE: loop exit
PB: predicated region body
PF: predicated region fallthrough
CT: control target
= control target key end

     0   :  { %s4016_s0 = inlined_call_operand.vmem [shape: f32[2,8,32], index: 0, kind: input, shape index: {}]   ;;  %s4017_s1 = inlined_call_operand.vmem [shape: f32[2,8,32], index: 1, kind: input, shape index: {}]   ;;  %s4018_s2 = inlined_call_operand.vmem [shape: f32[8,8], index: 2, kind: input, shape index: {}]   ;;  %s4019_s3 = inlined_call_operand.vmem [shape: f32[32,32], index: 3, kind: input, shape index: {}]   ;;  %s4020_s4 = inlined_call_operand.vmem [shape: f32[1,32], index: 4, kind: input, shape index: {}]   ;;  %s4021_s5 = inlined_call_operand.vmem [shape: f32[32,64], index: 5, kind: input, shape index: {}]   ;;  %s4022_s6 = inlined_call_operand.vmem [shape: f32[1,64], index: 6, kind: input, shape index: {}]   ;;  %s4023_s7 = inlined_call_operand.vmem [shape: f32[32,32], index: 7, kind: input, shape index: {}]   ;;  %s4024_s8 = inlined_call_operand.vmem [shape: f32[1,32], index: 8, kind: input, shape index: {}]   ;;  %s4025_s9 = inlined_call_operand.vmem [shape: f32[1,32], index: 9, kind: input, shape index: {}]   ;;  %s4026_s10 = inlined_call_operand.vmem [shape: f32[1,32], index: 10, kind: input, shape index: {}]   ;;  %s4027_s11 = inlined_call_operand.vmem [shape: f32[32,32], index: 11, kind: input, shape index: {}]   ;;  %s4028_s12 = inlined_call_operand.vmem [shape: f32[1,32], index: 12, kind: input, shape index: {}]   ;;  %s4029_s13 = inlined_call_operand.vmem [shape: f32[32,64], index: 13, kind: input, shape index: {}]   ;;  %s4030_s14 = inlined_call_operand.vmem [shape: f32[1,64], index: 14, kind: input, shape index: {}]   ;;  %s4031_s15 = inlined_call_operand.vmem [shape: f32[32,32], index: 15, kind: input, shape index: {}]   ;;  %s4032_s16 = inlined_call_operand.vmem [shape: f32[1,32], index: 16, kind: input, shape index: {}]   ;;  %s4033_s17 = inlined_call_operand.vmem [shape: f32[1,32], index: 17, kind: input, shape index: {}]   ;;  %s4034_s18 = inlined_call_operand.vmem [shape: f32[1,32], index: 18, kind: input, shape index: {}]   ;;  %s4035_s19 = inlined_call_operand.vmem [shape: f32[32,64], index: 19, kind: input, shape index: {}]   ;;  %s4036_s20 = inlined_call_operand.vmem [shape: f32[1,64], index: 20, kind: input, shape index: {}]   ;;  %s4037_s21 = inlined_call_operand.vmem [shape: f32[64,32], index: 21, kind: input, shape index: {}]   ;;  %s4038_s22 = inlined_call_operand.vmem [shape: f32[1,32], index: 22, kind: input, shape index: {}]   ;;  %s4039_s23 = inlined_call_operand.vmem [shape: f32[1,32], index: 23, kind: input, shape index: {}]   ;;  %s4040_s24 = inlined_call_operand.vmem [shape: f32[1,32], index: 24, kind: input, shape index: {}]   ;;  %s4041_s25 = inlined_call_operand.vmem [shape: f32[1,32], index: 25, kind: input, shape index: {}]   ;;  %s4042_s26 = inlined_call_operand.vmem [shape: f32[1,32], index: 26, kind: input, shape index: {}]   ;;  %s4043_s27 = inlined_call_operand.vmem [shape: f32[2,8,32], index: 27, kind: output, shape index: {}]  }
   0x1   :  { %4064 = sst [smem:[#allocation2_spill]] %s4016_s0 }
   0x2   :  { %4065 = sst [smem:[#allocation3_spill]] %s4017_s1 }
   0x3   :  { %4066 = sst [smem:[#allocation4_spill]] %s4018_s2 }
   0x4   :  { %4067 = sst [smem:[#allocation5_spill]] %s4019_s3 }
   0x5   :  { %4068 = sst [smem:[#allocation6_spill]] %s4020_s4 }
   0x6   :  { %4069 = sst [smem:[#allocation7_spill]] %s4021_s5 }
   0x7   :  { %4070 = sst [smem:[#allocation8_spill]] %s4022_s6 }
   0x8   :  { %4071 = sst [smem:[#allocation9_spill]] %s4023_s7  ;;  %s3633_s7 = smov 0  }
   0x9   :  { %4072 = sst [smem:[#allocation10_spill]] %s4024_s8 }
   0xa   :  { %4073 = sst [smem:[#allocation11_spill]] %s4025_s9 }
   0xb   :  { %4074 = sst [smem:[#allocation12_spill]] %s4026_s10 }
   0xc   :  { %4075 = sst [smem:[#allocation13_spill]] %s4027_s11 }
   0xd LB: > { %s3047_s4 = sadd.s32 4294967295, %s3478_s7   ;;  %p3051_p0 = scmp.ge.s32.totalorder %s3478_s7, 1  ;;  %s3478_s7 = sphi %s3633_s7, %s37_s7  }
   0xe   : > { %p745_p1 = scmp.lt.s32.totalorder %s3478_s7, 3 }
  0x10   : > { %p746_p2 = pnand %p3051_p0, %p745_p1 }
  0x11   : > { %s4076_s9 = sld [smem:[#allocation5_spill]] (!%p746_p2)  ;;  %v3480_v3 = vmov (!%p746_p2), 0.0|0.0   ;;  %vm3481_vm0 = vmmov (!%p746_p2), 0   ;;  %v3482_v6 = vmov (!%p746_p2), 0.0   ;;  %p819_p3 = scmp.lt.s32.totalorder (!%p746_p2), %s3047_s4, 1  ;;  %vm855_vm1 = vcmask (!%p746_p2), 261120  }
  0x12   : > { %749 = sbr.rel (%p746_p2) target bundleno = 4552 (0x11c8), region = 128  ;;  %3357 = vmatprep.subr.bf16.mxu1 (!%p746_p2), %v3480_v3  ;;  %3189 = vmatprep.mubr.msk.f32.mxu1 (!%p746_p2), %vm3481_vm0, %v3482_v6  ;;  %s4077_s2 = sld [smem:[#allocation7_spill]] (!%p746_p2)  ;;  %vm1006_vm2 = vcmask (!%p746_p2), 64512   ;;  %vm1678_vm3 = vcmask (!%p746_p2), 130048   ;;  %vm1680_vm4 = vcmask (!%p746_p2), 195584   ;;  %vm2848_vm5 = vcmask (!%p746_p2), 523264  }
  0x13   : > { %3203 = vmatprep.subr.mxu0 (!%p746_p2), %v3482_v6  ;;  %3205 = vmatprep.mubr.msk.f32.mxu0 (!%p746_p2), %vm3481_vm0, %v3482_v6  ;;  %s4078_s0 = sld [smem:[#allocation2_spill]] (!%p746_p2)  ;;  %s4079_s8 = sld [smem:[#allocation6_spill]] (!%p746_p2) }
  0x14   : > { %s4059_s29 = smov (!%p746_p2), 120   ;;  %s4052_s1 = smov (!%p746_p2), 104  }
  0x15   : > { %s4050_s3 = smov (!%p746_p2), 96   ;;  %s4048_s5 = smov (!%p746_p2), 72  }
  0x16   : > { %s4051_s28 = smov (!%p746_p2), 88   ;;  %s4082_s11 = sld [smem:[#allocation9_spill]] (!%p746_p2) }
  0x17   : > { %v833_v0 = vld [vmem:[%s4076_s9] sm:$0xff] (!%p746_p2)  ;;  %v834_v1 = vld [vmem:[%s4076_s9 + $0x8] sm:$0xff] (!%p746_p2)  ;;  %v835_v2 = vld [vmem:[%s4076_s9 + $0x10] sm:$0xff] (!%p746_p2)  ;;  %s4094_s6 = smov (!%p746_p2), 72  }
  0x18   : > { %v3358_v4 = vpack.c.bf16 (!%p746_p2), %v834_v1, %v833_v0  ;;  %v836_v5 = vld [vmem:[%s4076_s9 + $0x18] sm:$0xff] (!%p746_p2)  ;;  %v838_v8 = vld [vmem:[%s4077_s2] sm:$0xff] (!%p746_p2)  ;;  %v839_v9 = vld [vmem:[%s4077_s2 + $0x8] sm:$0xff] (!%p746_p2)  ;;  %s4085_s9 = sld [smem:[#allocation3_spill]] (!%p746_p2) }
  0x19   : > { %v3361_v7 = vpack.c.bf16 %v836_v5, %v835_v2  ;;  %s4099_s4 = smov (!%p819_p3, %s3047_s4), 1  ;;  %v3364_v11 = vpack.c.bf16 %v839_v9, %v838_v8  ;;  %v840_v12 = vld [vmem:[%s4077_s2 + $0x10] sm:$0xff]  ;;  %v841_v13 = vld [vmem:[%s4077_s2 + $0x18] sm:$0xff]  ;;  %v3055_v17 = vld [vmem:[%s4079_s8] ss:$0 sm:$0xff]  ;;  %s4049_s8 = smov 80  }
  0x1a   : > { %3359 = vmatpush3.bf16.msra.mxu1 %v3358_v4  ;;  %s3666_s30 = sshll.u32 %s4099_s4, 3  ;;  %v3367_v14 = vpack.c.bf16 %v841_v13, %v840_v12  ;;  %s4081_s4 = sld [smem:[#allocation4_spill]] }
  0x1b   : > { %3360 = vmatprep.subr.bf16.mxu1 %v3480_v3  ;;  %s822_s10 = scalar_lea.vmem %s4078_s0, %s3666_s30  ;;  %s4080_s0 = sld [smem:[#allocation8_spill]] }
  0x1c   : > { %v3672_v10 = vld [vmem:[%s822_s10] sm:$0xff]  ;;  %s4057_s10 = smov 112   ;;  %s4091_s2 = smov 88  }
  0x1e   : > { %3362 = vmatpush3.bf16.msra.mxu1 %v3361_v7 }
  0x1f   : > { %3363 = vmatprep.subr.bf16.mxu1 %v3480_v3 }
  0x20   : > { %v848_v30 = vld [vmem:[%s4081_s4] sm:$0xff]  ;;  %s4087_s4 = sld [smem:[#allocation12_spill]] }
  0x21   : > { %3190 = vmatmul.mubr.msk.f32.vlgmr.msra.gmra.mrb[0].mxu1 %vm855_vm1, %v3672_v10  ;;  %v3057_v18 = vld [vmem:[%s4080_s0] ss:$0 sm:$0xff]  ;;  %s4056_s0 = smov 8  }
  0x22   : > { %3365 = vmatpush3.bf16.msra.mxu1 %v3364_v11  ;;  %3200 = vmatprep.mubr.msk.f32.mxu1 %vm3481_vm0, %v3482_v6 }
  0x23   : > { %3366 = vmatprep.subr.bf16.mxu1 %v3480_v3 }
  0x26   : > { %3368 = vmatpush3.bf16.msra.mxu1 %v3367_v14 }
  0x27   : > { %3208 = vmatprep.subr.mxu1 %v3482_v6 }
  0x29   : > { %3201 = vmatmul.mubr.msk.f32.vlgmr.msra.gmra.mrb[2].mxu1 %vm855_vm1, %v3672_v10 }
  0x2a   : > { %3210 = vmatprep.mubr.msk.f32.mxu1 %vm3481_vm0, %v3482_v6 }
  0xf4   : > { %v925_v15 = vpop.f32.mrb[0].mxu1 }
  0xf5   : > { %v3191_v16 = vpop.f32.mrb[1].mxu1  ;;  %v926_v20 = vadd.f32 %v3055_v17, %v925_v15 }
  0xf7   : > { %v929_v23 = vmul.f32 0.35355338, %v926_v20 }
  0xfc   : > { %v1002_v19 = vpop.f32.mrb[2].mxu1 }
  0xfd   : > { %v3697_v21 = vadd.f32 %v3057_v18, %v1002_v19  ;;  %v3202_v22 = vpop.f32.mrb[3].mxu1 }
  0xff   : > { %1337 = vrot.lane.b32.xlu1 %v3697_v21, %s4057_s10  ;;  %1172 = vrot.lane.b32.xlu0 %v3697_v21, %s4059_s29 }
 0x100   : > { %3204 = vmatpush3.xpose.msk.msra.mxu0 %vm1006_vm2, %v3697_v21 }
 0x101   : > { %3213 = vmatprep.subr.mxu0 %v3482_v6 }
 0x103   : > { %3206 = vmatmul.mubr.msk.f32.vlgmr.msra.gmra.mrb[0].mxu0 %vm1006_vm2, %v929_v23  ;;  %1335 = vrot.lane.b32.xlu1 %v929_v23, %s4057_s10 }
 0x104   : > { %1170 = vrot.lane.b32.xlu0 %v929_v23, %s4059_s29  ;;  %3215 = vmatprep.mubr.msk.f32.mxu0 %vm3481_vm0, %v3482_v6  ;;  %s4086_s29 = sld [smem:[#allocation11_spill]] }
 0x107   : > { %1500 = vrot.lane.b32.xlu1 %v929_v23, %s4052_s1 }
 0x108   : > { %1502 = vrot.lane.b32.xlu0 %v3697_v21, %s4052_s1 }
 0x171   : > { %v1173_v24 = vpop.permute.xlu0 %1172  ;;  %v1338_v25 = vpop.permute.xlu1 %1337 }
 0x172   : > { %3214 = vmatpush3.xpose.msk.msra.mxu0 %vm1006_vm2, %v1173_v24  ;;  %v843_v24 = vld [vmem:[%s4082_s11] sm:$0xff] }
 0x173   : > { %3223 = vmatprep.subr.mxu0 %v3482_v6 }
 0x175   : > { %v1336_v27 = vpop.permute.xlu1 %1335 }
 0x176   : > { %v1171_v26 = vpop.permute.xlu0 %1170 }
 0x177   : > { %3216 = vmatmul.mubr.msk.f32.vlgmr.msra.gmra.mrb[2].mxu0 %vm1006_vm2, %v1171_v26 }
 0x178   : > { %3224 = vmatpush3.xpose.msk.msra.mxu0 %vm1006_vm2, %v1338_v25  ;;  %3225 = vmatprep.mubr.msk.f32.mxu0 %vm3481_vm0, %v3482_v6  ;;  %v844_v25 = vld [vmem:[%s4082_s11 + $0x8] sm:$0xff] }
 0x179   : > { %3233 = vmatprep.subr.mxu0 %v3482_v6  ;;  %v1501_v29 = vpop.permute.xlu1 %1500  ;;  %v3370_v26 = vpack.c.bf16 %v844_v25, %v843_v24 }
 0x17a   : > { %v1503_v28 = vpop.permute.xlu0 %1502 }
 0x17b   : > { %3226 = vmatmul.mubr.msk.f32.vlgmr.msra.gmra.mrb[4].mxu0 %vm1006_vm2, %v1336_v27  ;;  %v845_v27 = vld [vmem:[%s4082_s11 + $0x10] sm:$0xff] }
 0x17c   : > { %3234 = vmatpush3.xpose.msk.msra.mxu0 %vm1006_vm2, %v1503_v28  ;;  %3235 = vmatprep.mubr.msk.f32.mxu0 %vm3481_vm0, %v3482_v6  ;;  %v846_v28 = vld [vmem:[%s4082_s11 + $0x18] sm:$0xff]  ;;  %s826_s11 = scalar_lea.vmem %s4085_s9, %s3666_s30  ;;  %s4090_s9 = smov 104  }
 0x17d   : > { %3369 = vmatprep.subr.bf16.mxu0 %v3480_v3 }
 0x17f   : > { %3236 = vmatmul.mubr.msk.f32.vlgmr.msra.gmra.mrb[6].mxu0 %vm1006_vm2, %v1501_v29  ;;  %v3373_v29 = vpack.c.bf16 %v846_v28, %v845_v27 }
 0x180   : > { %3251 = vmatprep.mubr.msk.f32.mxu0 %vm3481_vm0, %v3482_v6  ;;  %3371 = vmatpush3.bf16.msra.mxu0 %v3370_v26 }
 0x181   : > { %3372 = vmatprep.subr.bf16.mxu0 %v3480_v3 }
 0x184   : > { %3374 = vmatpush3.bf16.msra.mxu0 %v3373_v29 }
 0x185   : > { %3381 = vmatprep.subr.bf16.mxu0 %v3480_v3 }
 0x1d6   : > { %v1079_v31 = vpop.f32.mrb[0].mxu0 }
 0x1d7   : > { %v1080_v32 = vadd.f32 %v1079_v31, %v848_v30  ;;  %v3207_v33 = vpop.f32.mrb[1].mxu0 }
 0x1d9   : > { %v1083_v34 = vsel %vm1006_vm2, %v1080_v32, -inf }
 0x1da   : > { %1084 = vmax.xlane.f32.xlu0 %v1083_v34 }
 0x24a   : > { %v1244_v35 = vpop.f32.mrb[2].mxu0 }
 0x24b   : > { %v1245_v36 = vadd.f32 %v1244_v35, %v848_v30  ;;  %v3217_v37 = vpop.f32.mrb[3].mxu0 }
 0x24d   : > { %v1248_v38 = vsel %vm1006_vm2, %v1245_v36, -inf }
 0x24e   : > { %1249 = vmax.xlane.f32.xlu1 %v1248_v38  ;;  %v1409_v39 = vpop.f32.mrb[4].mxu0 }
 0x24f   : > { %v1410_v40 = vadd.f32 %v1409_v39, %v848_v30  ;;  %v3227_v41 = vpop.f32.mrb[5].mxu0 }
 0x251   : > { %v1413_v42 = vsel %vm1006_vm2, %v1410_v40, -inf }
 0x252   : > { %1414 = vmax.xlane.f32.xlu0 %v1413_v42  ;;  %v1574_v43 = vpop.f32.mrb[6].mxu0 }
 0x253   : > { %v1575_v44 = vadd.f32 %v1574_v43, %v848_v30  ;;  %v3237_v45 = vpop.f32.mrb[7].mxu0 }
 0x255   : > { %v1578_v46 = vsel %vm1006_vm2, %v1575_v44, -inf }
 0x256   : > { %1579 = vmax.xlane.f32.xlu0 %v1578_v46 }
 0x25f   : > { %1094 = vrot.lane.b32.xlu1 %v3697_v21, %s4050_s3  ;;  %s4054_s3 = smov 24  }
 0x267   : > { %v1085_v47 = vpop.xlane.xlu0 %1084 }
 0x268   : > { %v1086_v48 = vsub.f32 %v1080_v32, %v1085_v47 }
 0x26a   : > { %v1087_v49 = vmul.f32 1.442695, %v1086_v48 }
 0x26c   : > { %3432 = vpow2.f32 %v1087_v49 }
 0x276   : > { %v3433_v50 = vpop.eup %3432 }
 0x277   : > { %v1089_v51 = vsel %vm1006_vm2, %v3433_v50, 0.0 }
 0x283   : > { %1090 = vadd.xlane.f32.xlu1 %v1089_v51 }
 0x2db   : > { %v1250_v52 = vpop.xlane.xlu1 %1249 }
 0x2dc   : > { %v1251_v53 = vsub.f32 %v1245_v36, %v1250_v52 }
 0x2de   : > { %v1252_v54 = vmul.f32 1.442695, %v1251_v53  ;;  %v1797_v53 = vld [vmem:[%s4029_s13] sm:$0xff] }
 0x2df   : > { %v1095_v55 = vpop.permute.xlu1 %1094  ;;  %v1415_v56 = vpop.xlane.xlu0 %1414 }
 0x2e0   : > { %3434 = vpow2.f32 %v1252_v54  ;;  %v1416_v57 = vsub.f32 %v1410_v40, %v1415_v56  ;;  %3209 = vmatpush3.msra.mxu1 %v1095_v55  ;;  %v1798_v54 = vld [vmem:[%s4029_s13 + $0x8] sm:$0xff] }
 0x2e1   : > { %3218 = vmatprep.subr.mxu1 %v3482_v6 }
 0x2e2   : > { %v1417_v58 = vmul.f32 1.442695, %v1416_v57 }
 0x2e3   : > { %v1580_v59 = vpop.xlane.xlu0 %1579 }
 0x2e4   : > { %3436 = vpow2.f32 %v1417_v58  ;;  %v1581_v60 = vsub.f32 %v1575_v44, %v1580_v59  ;;  %v1799_v58 = vld [vmem:[%s4029_s13 + $0x10] sm:$0xff]  ;;  %v1800_v59 = vld [vmem:[%s4029_s13 + $0x18] sm:$0xff] }
 0x2e6   : > { %v1582_v61 = vmul.f32 1.442695, %v1581_v60  ;;  %v3385_v60 = vpack.c.bf16 %v1800_v59, %v1799_v58 }
 0x2e8   : > { %3438 = vpow2.f32 %v1582_v61 }
 0x2ea   : > { %v3435_v62 = vpop.eup %3434 }
 0x2eb   : > { %v1254_v63 = vsel %vm1006_vm2, %v3435_v62, 0.0 }
 0x2ec   : > { %1255 = vadd.xlane.f32.xlu0 %v1254_v63 }
 0x2ee   : > { %v3437_v0 = vpop.eup %3436 }
 0x2ef   : > { %v1419_v1 = vsel %vm1006_vm2, %v3437_v0, 0.0 }
 0x2f0   : > { %1420 = vadd.xlane.f32.xlu1 %v1419_v1 }
 0x2f2   : > { %v3439_v2 = vpop.eup %3438 }
 0x2f3   : > { %v1584_v4 = vsel %vm1006_vm2, %v3439_v2, 0.0 }
 0x2f4   : > { %1585 = vadd.xlane.f32.xlu0 %v1584_v4 }
 0x301   : > { %1424 = vrot.lane.b32.xlu1 %v3697_v21, %s4049_s8  ;;  %s4088_s8 = smov 120  }
 0x305   : > { %1589 = vrot.lane.b32.xlu1 %v3697_v21, %s4048_s5  ;;  %s4055_s5 = smov 16  }
 0x30a   : > { %1259 = vrot.lane.b32.xlu0 %v3697_v21, %s4051_s28  ;;  %s4083_s28 = sld [smem:[#allocation10_spill]] }
 0x310   : > { %v1091_v5 = vpop.xlane.xlu1 %1090  ;;  %v3071_v42 = vld [vmem:[%s4083_s28] ss:$0 sm:$0xff]  ;;  %s4089_s28 = smov 112  }
 0x311   : > { %3440 = vrcp.f32 %v1091_v5 }
 0x31b   : > { %v3441_v7 = vpop.eup %3440 }
 0x31c   : > { %v1093_v8 = vmul.f32 %v3441_v7, %v3433_v50  ;;  %v3073_v7 = vld [vmem:[%s4086_s29] ss:$0 sm:$0xff]  ;;  %s4092_s29 = smov 96  }
 0x31e   : > { %3211 = vmatmul.mubr.msk.f32.vlgmr.msra.gmra.mrb[4].mxu1 %vm1006_vm2, %v1093_v8 }
 0x31f   : > { %3220 = vmatprep.mubr.msk.f32.mxu1 %vm3481_vm0, %v3482_v6 }
 0x379   : > { %v1256_v9 = vpop.xlane.xlu0 %1255 }
 0x37a   : > { %3442 = vrcp.f32 %v1256_v9  ;;  %v3074_v9 = vld [vmem:[%s4087_s4] ss:$0 sm:$0xff] }
 0x37d   : > { %v1421_v11 = vpop.xlane.xlu1 %1420 }
 0x37e   : > { %3444 = vrcp.f32 %v1421_v11 }
 0x381   : > { %v1586_v12 = vpop.xlane.xlu0 %1585  ;;  %v1425_v15 = vpop.permute.xlu1 %1424 }
 0x382   : > { %3446 = vrcp.f32 %v1586_v12 }
 0x384   : > { %v3443_v13 = vpop.eup %3442 }
 0x385   : > { %v1258_v14 = vmul.f32 %v3443_v13, %v3435_v62  ;;  %v1260_v16 = vpop.permute.xlu0 %1259  ;;  %v1590_v19 = vpop.permute.xlu1 %1589  ;;  %v3077_v13 = vld [vmem:[%s4030_s14] ss:$0 sm:$0xff] }
 0x386   : > { %3219 = vmatpush3.msra.mxu1 %v1260_v16 }
 0x387   : > { %3221 = vmatmul.mubr.msk.f32.vlgmr.msra.gmra.mrb[6].mxu1 %vm1006_vm2, %v1258_v14  ;;  %3228 = vmatprep.subr.mxu1 %v3482_v6 }
 0x388   : > { %v3445_v17 = vpop.eup %3444  ;;  %3229 = vmatpush3.msra.mxu1 %v1425_v15  ;;  %3230 = vmatprep.mubr.msk.f32.mxu1 %vm3481_vm0, %v3482_v6 }
 0x389   : > { %v1423_v18 = vmul.f32 %v3445_v17, %v3437_v0  ;;  %3238 = vmatprep.subr.mxu1 %v3482_v6  ;;  %v832_v0 = vld [vmem:[%s826_s11] sm:$0xff]  ;;  %s4093_s11 = smov 80  }
 0x38b   : > { %3231 = vmatmul.mubr.msk.f32.vlgmr.msra.gmra.mrb[8].mxu1 %vm1006_vm2, %v1423_v18  ;;  %v3075_v18 = vld [vmem:[%s4028_s12] ss:$0 sm:$0xff] }
 0x38c   : > { %v3447_v20 = vpop.eup %3446  ;;  %3239 = vmatpush3.msra.mxu1 %v1590_v19  ;;  %3240 = vmatprep.mubr.msk.f32.mxu1 %vm3481_vm0, %v3482_v6 }
 0x38d   : > { %v1588_v21 = vmul.f32 %v3447_v20, %v3439_v2  ;;  %3375 = vmatprep.subr.bf16.mxu1 %v3480_v3 }
 0x38f   : > { %3241 = vmatmul.mubr.msk.f32.vlgmr.msra.gmra.mrb[10].mxu1 %vm1006_vm2, %v1588_v21 }
 0x390   : > { %3262 = vmatprep.mubr.msk.f32.mxu1 %vm3481_vm0, %v3482_v6 }
 0x3f1   : > { %v1166_v22 = vpop.f32.mrb[4].mxu1 }
 0x3f2   : > { %v3212_v23 = vpop.f32.mrb[5].mxu1 }
 0x45a   : > { %v1331_v30 = vpop.f32.mrb[6].mxu1 }
 0x45b   : > { %1666 = vrot.lane.b32.xlu0 %v1331_v30, %s4056_s0  ;;  %v3222_v31 = vpop.f32.mrb[7].mxu1 }
 0x45e   : > { %v1496_v32 = vpop.f32.mrb[8].mxu1 }
 0x45f   : > { %1670 = vrot.lane.b32.xlu1 %v1496_v32, %s4055_s5  ;;  %v3232_v33 = vpop.f32.mrb[9].mxu1  ;;  %s4084_s5 = sld [smem:[#allocation13_spill]] }
 0x462   : > { %v1661_v34 = vpop.f32.mrb[10].mxu1 }
 0x463   : > { %1674 = vrot.lane.b32.xlu0 %v1661_v34, %s4054_s3  ;;  %v3242_v35 = vpop.f32.mrb[11].mxu1 }
 0x465   : > { %v1792_v55 = vld [vmem:[%s4084_s5] sm:$0xff]  ;;  %v1793_v56 = vld [vmem:[%s4084_s5 + $0x8] sm:$0xff]  ;;  %v1794_v61 = vld [vmem:[%s4084_s5 + $0x10] sm:$0xff] }
 0x466   : > { %v3376_v57 = vpack.c.bf16 %v1793_v56, %v1792_v55  ;;  %v1795_v62 = vld [vmem:[%s4084_s5 + $0x18] sm:$0xff] }
 0x467   : > { %v3379_v63 = vpack.c.bf16 %v1795_v62, %v1794_v61 }
 0x468   : > { %3377 = vmatpush3.bf16.msra.mxu1 %v3376_v57 }
 0x469   : > { %3378 = vmatprep.subr.bf16.mxu1 %v3480_v3 }
 0x46c   : > { %3380 = vmatpush3.bf16.msra.mxu1 %v3379_v63 }
 0x46d   : > { %3276 = vmatprep.subr.mxu1 %v3482_v6 }
 0x4cd   : > { %v1667_v36 = vpop.permute.xlu0 %1666 }
 0x4ce   : > { %v1677_v38 = vsel %vm1006_vm2, %v1166_v22, %v1667_v36 }
 0x4d1   : > { %v1671_v37 = vpop.permute.xlu1 %1670 }
 0x4d2   : > { %v1679_v39 = vsel %vm1678_vm3, %v1677_v38, %v1671_v37 }
 0x4d5   : > { %v1675_v40 = vpop.permute.xlu0 %1674 }
 0x4d6   : > { %v1681_v41 = vsel %vm1680_vm4, %v1679_v39, %v1675_v40 }
 0x4d7   : > { %3252 = vmatmul.mubr.msk.f32.vlgmr.msra.gmra.mrb[8].mxu0 %vm855_vm1, %v1681_v41 }
 0x4d8   : > { %3273 = vmatprep.mubr.msk.f32.mxu0 %vm3481_vm0, %v3482_v6 }
 0x5aa   : > { %v1757_v43 = vpop.f32.mrb[8].mxu0 }
 0x5ab   : > { %v1758_v44 = vadd.f32 %v3071_v42, %v1757_v43  ;;  %v3253_v45 = vpop.f32.mrb[9].mxu0 }
 0x5ad   : > { %v1761_v46 = vadd.f32 %v1758_v44, %v3672_v10  ;;  %v3382_v10 = vpack.c.bf16 %v1798_v54, %v1797_v53 }
 0x5af   : > { %v1764_v47 = vsel %vm855_vm1, %v1761_v46, 0.0  ;;  %3383 = vmatpush3.bf16.msra.mxu0 %v3382_v10 }
 0x5b0   : > { %1765 = vadd.xlane.f32.xlu1 %v1764_v47  ;;  %3384 = vmatprep.subr.bf16.mxu0 %v3480_v3 }
 0x5b3   : > { %3386 = vmatpush3.bf16.msra.mxu0 %v3385_v60 }
 0x5b4   : > { %3286 = vmatprep.subr.mxu0 %v3482_v6 }
 0x5b6   : > { %3274 = vmatmul.mubr.msk.f32.vlgmr.msra.gmra.mrb[10].mxu0 %vm855_vm1, %v832_v0 }
 0x5b7   : > { %3288 = vmatprep.mubr.msk.f32.mxu0 %vm3481_vm0, %v3482_v6 }
 0x63d   : > { %v1766_v48 = vpop.xlane.xlu1 %1765 }
 0x63e   : > { %v1768_v49 = vmul.f32 0.03125, %v1766_v48 }
 0x640   : > { %v1769_v50 = vsub.f32 %v1761_v46, %v1768_v49 }
 0x642   : > { %v1770_v51 = vmul.f32 %v1769_v50, %v1769_v50 }
 0x644   : > { %v1771_v52 = vsel %vm855_vm1, %v1770_v51, 0.0 }
 0x645   : > { %1772 = vadd.xlane.f32.xlu0 %v1771_v52 }
 0x689   : > { %v1962_v14 = vpop.f32.mrb[10].mxu0 }
 0x68a   : > { %v3843_v15 = vadd.f32 %v3077_v13, %v1962_v14  ;;  %v3275_v16 = vpop.f32.mrb[11].mxu0 }
 0x68c   : > { %2131 = vrot.lane.b32.xlu0 %v3843_v15, %s4088_s8 }
 0x6d2   : > { %v1773_v1 = vpop.xlane.xlu0 %1772 }
 0x6d3   : > { %v1774_v2 = vmul.f32 0.03125, %v1773_v1 }
 0x6d5   : > { %v1775_v4 = vadd.f32 1e-05, %v1774_v2 }
 0x6d7   : > { %3448 = vrsqrt.f32 %v1775_v4 }
 0x6e1   : > { %v3449_v5 = vpop.eup %3448 }
 0x6e2   : > { %v1777_v8 = vmul.f32 %v3449_v5, %v1769_v50 }
 0x6e4   : > { %v1784_v11 = vmul.f32 %v3073_v7, %v1777_v8 }
 0x6e6   : > { %v3834_v12 = vadd.f32 %v3074_v9, %v1784_v11 }
 0x6e8   : > { %3263 = vmatmul.mubr.msk.f32.vlgmr.msra.gmra.mrb[12].mxu1 %vm855_vm1, %v3834_v12 }
 0x6e9   : > { %3278 = vmatprep.mubr.msk.f32.mxu1 %vm3481_vm0, %v3482_v6  ;;  %3277 = vmatpush3.xpose.msk.msra.mxu1 %vm1006_vm2, %v3843_v15 }
 0x6ea   : > { %3281 = vmatprep.subr.mxu1 %v3482_v6 }
 0x6fe   : > { %v2132_v17 = vpop.permute.xlu0 %2131 }
 0x6ff   : > { %3287 = vmatpush3.xpose.msk.msra.mxu0 %vm1006_vm2, %v2132_v17  ;;  %v1802_v17 = vld [vmem:[%s4031_s15] sm:$0xff] }
 0x700   : > { %3296 = vmatprep.subr.mxu0 %v3482_v6 }
 0x7bb   : > { %v1882_v19 = vpop.f32.mrb[12].mxu1 }
 0x7bc   : > { %v1883_v20 = vadd.f32 %v3075_v18, %v1882_v19  ;;  %v3264_v21 = vpop.f32.mrb[13].mxu1  ;;  %v1803_v18 = vld [vmem:[%s4031_s15 + $0x8] sm:$0xff] }
 0x7bd   : > { %v3388_v19 = vpack.c.bf16 %v1803_v18, %v1802_v17  ;;  %v1805_v21 = vld [vmem:[%s4031_s15 + $0x18] sm:$0xff] }
 0x7be   : > { %v1886_v22 = vmul.f32 0.35355338, %v1883_v20  ;;  %v1804_v20 = vld [vmem:[%s4031_s15 + $0x10] sm:$0xff] }
 0x7c0   : > { %2294 = vrot.lane.b32.xlu0 %v1886_v22, %s4089_s28  ;;  %2129 = vrot.lane.b32.xlu1 %v1886_v22, %s4088_s8 }
 0x7c1   : > { %3279 = vmatmul.mubr.msk.f32.vlgmr.msra.gmra.mrb[14].mxu1 %vm1006_vm2, %v1886_v22 }
 0x7c2   : > { %3283 = vmatprep.mubr.msk.f32.mxu1 %vm3481_vm0, %v3482_v6 }
 0x7c4   : > { %2459 = vrot.lane.b32.xlu0 %v1886_v22, %s4090_s9  ;;  %2296 = vrot.lane.b32.xlu1 %v3843_v15, %s4089_s28  ;;  %v3391_v22 = vpack.c.bf16 %v1805_v21, %v1804_v20 }
 0x7c8   : > { %2461 = vrot.lane.b32.xlu1 %v3843_v15, %s4090_s9  ;;  %s830_s9 = scalar_lea.vmem %s4043_s27, %s3666_s30 }
 0x832   : > { %v2130_v23 = vpop.permute.xlu1 %2129  ;;  %v2295_v25 = vpop.permute.xlu0 %2294 }
 0x833   : > { %3289 = vmatmul.mubr.msk.f32.vlgmr.msra.gmra.mrb[12].mxu0 %vm1006_vm2, %v2130_v23 }
 0x834   : > { %3298 = vmatprep.mubr.msk.f32.mxu0 %vm3481_vm0, %v3482_v6 }
 0x836   : > { %v2297_v24 = vpop.permute.xlu1 %2296  ;;  %v2460_v27 = vpop.permute.xlu0 %2459 }
 0x837   : > { %3297 = vmatpush3.xpose.msk.msra.mxu0 %vm1006_vm2, %v2297_v24 }
 0x838   : > { %3306 = vmatprep.subr.mxu0 %v3482_v6 }
 0x83a   : > { %3299 = vmatmul.mubr.msk.f32.vlgmr.msra.gmra.mrb[14].mxu0 %vm1006_vm2, %v2295_v25  ;;  %v2462_v26 = vpop.permute.xlu1 %2461 }
 0x83b   : > { %3307 = vmatpush3.xpose.msk.msra.mxu0 %vm1006_vm2, %v2462_v26  ;;  %3308 = vmatprep.mubr.msk.f32.mxu0 %vm3481_vm0, %v3482_v6 }
 0x83c   : > { %3387 = vmatprep.subr.bf16.mxu0 %v3480_v3 }
 0x83e   : > { %3309 = vmatmul.mubr.msk.f32.vlgmr.msra.gmra.mrb[16].mxu0 %vm1006_vm2, %v2460_v27 }
 0x83f   : > { %3324 = vmatprep.mubr.msk.f32.mxu0 %vm3481_vm0, %v3482_v6  ;;  %3389 = vmatpush3.bf16.msra.mxu0 %v3388_v19 }
 0x840   : > { %3390 = vmatprep.subr.bf16.mxu0 %v3480_v3 }
 0x843   : > { %3392 = vmatpush3.bf16.msra.mxu0 %v3391_v22 }
 0x844   : > { %3399 = vmatprep.subr.bf16.mxu0 %v3480_v3 }
 0x894   : > { %v2038_v28 = vpop.f32.mrb[14].mxu1 }
 0x895   : > { %v3280_v29 = vpop.f32.mrb[15].mxu1  ;;  %v2042_v30 = vsel %vm1006_vm2, %v2038_v28, -inf }
 0x896   : > { %2043 = vmax.xlane.f32.xlu1 %v2042_v30 }
 0x906   : > { %v2203_v31 = vpop.f32.mrb[12].mxu0 }
 0x907   : > { %v3290_v32 = vpop.f32.mrb[13].mxu0  ;;  %v2207_v33 = vsel %vm1006_vm2, %v2203_v31, -inf }
 0x908   : > { %2208 = vmax.xlane.f32.xlu0 %v2207_v33 }
 0x90d   : > { %v2368_v34 = vpop.f32.mrb[14].mxu0 }
 0x90e   : > { %v3300_v35 = vpop.f32.mrb[15].mxu0  ;;  %v2372_v36 = vsel %vm1006_vm2, %v2368_v34, -inf }
 0x90f   : > { %2373 = vmax.xlane.f32.xlu0 %v2372_v36  ;;  %v3091_v35 = vld [vmem:[%s4032_s16] ss:$0 sm:$0xff] }
 0x911   : > { %v2533_v37 = vpop.f32.mrb[16].mxu0 }
 0x912   : > { %v3310_v38 = vpop.f32.mrb[17].mxu0  ;;  %v2537_v39 = vsel %vm1006_vm2, %v2533_v37, -inf }
 0x913   : > { %2538 = vmax.xlane.f32.xlu1 %v2537_v39 }
 0x923   : > { %v2044_v40 = vpop.xlane.xlu1 %2043 }
 0x924   : > { %v2045_v41 = vsub.f32 %v2038_v28, %v2044_v40  ;;  %2218 = vrot.lane.b32.xlu1 %v3843_v15, %s4091_s2  ;;  %s4095_s2 = smov 8  }
 0x926   : > { %v2046_v42 = vmul.f32 1.442695, %v2045_v41 }
 0x928   : > { %3450 = vpow2.f32 %v2046_v42 }
 0x932   : > { %v3451_v43 = vpop.eup %3450 }
 0x933   : > { %v2048_v44 = vsel %vm1006_vm2, %v3451_v43, 0.0 }
 0x934   : > { %2049 = vadd.xlane.f32.xlu0 %v2048_v44 }
 0x94a   : > { %2053 = vrot.lane.b32.xlu0 %v3843_v15, %s4092_s29  ;;  %s4096_s29 = smov 16  }
 0x995   : > { %v2209_v45 = vpop.xlane.xlu0 %2208 }
 0x996   : > { %v2210_v46 = vsub.f32 %v2203_v31, %v2209_v45 }
 0x998   : > { %v2211_v47 = vmul.f32 1.442695, %v2210_v46  ;;  %v2749_v46 = vld [vmem:[%s4035_s19 + $0x8] sm:$0xff] }
 0x99a   : > { %3452 = vpow2.f32 %v2211_v47 }
 0x99c   : > { %v2374_v48 = vpop.xlane.xlu0 %2373 }
 0x99d   : > { %v2375_v49 = vsub.f32 %v2368_v34, %v2374_v48  ;;  %v2751_v48 = vld [vmem:[%s4035_s19 + $0x18] sm:$0xff] }
 0x99f   : > { %v2376_v50 = vmul.f32 1.442695, %v2375_v49 }
 0x9a0   : > { %v2539_v51 = vpop.xlane.xlu1 %2538 }
 0x9a1   : > { %3454 = vpow2.f32 %v2376_v50  ;;  %v2540_v52 = vsub.f32 %v2533_v37, %v2539_v51  ;;  %v2753_v50 = vld [vmem:[%s4037_s21] sm:$0xff]  ;;  %v2754_v51 = vld [vmem:[%s4037_s21 + $0x8] sm:$0xff] }
 0x9a3   : > { %v2541_v53 = vmul.f32 1.442695, %v2540_v52  ;;  %v2755_v52 = vld [vmem:[%s4037_s21 + $0x10] sm:$0xff] }
 0x9a4   : > { %v3453_v54 = vpop.eup %3452  ;;  %v2219_v63 = vpop.permute.xlu1 %2218 }
 0x9a5   : > { %3456 = vpow2.f32 %v2541_v53  ;;  %v2213_v10 = vsel %vm1006_vm2, %v3453_v54, 0.0  ;;  %v3400_v53 = vpack.c.bf16 %v2754_v51, %v2753_v50 }
 0x9a6   : > { %2214 = vadd.xlane.f32.xlu1 %v2213_v10 }
 0x9ab   : > { %v3455_v55 = vpop.eup %3454 }
 0x9ac   : > { %v2378_v56 = vsel %vm1006_vm2, %v3455_v55, 0.0 }
 0x9ad   : > { %2379 = vadd.xlane.f32.xlu0 %v2378_v56  ;;  %v2758_v56 = vld [vmem:[%s4037_s21 + $0x28] sm:$0xff] }
 0x9af   : > { %v3457_v57 = vpop.eup %3456 }
 0x9b0   : > { %v2543_v58 = vsel %vm1006_vm2, %v3457_v57, 0.0 }
 0x9b1   : > { %2544 = vadd.xlane.f32.xlu1 %v2543_v58 }
 0x9c1   : > { %v2050_v59 = vpop.xlane.xlu0 %2049 }
 0x9c2   : > { %3458 = vrcp.f32 %v2050_v59  ;;  %2383 = vrot.lane.b32.xlu1 %v3843_v15, %s4093_s11  ;;  %s4097_s11 = smov 24  }
 0x9c3   : > { %2548 = vrot.lane.b32.xlu0 %v3843_v15, %s4094_s6 }
 0x9c5   : > { %v2054_v60 = vpop.permute.xlu0 %2053 }
 0x9c6   : > { %3282 = vmatpush3.msra.mxu1 %v2054_v60 }
 0x9c7   : > { %3291 = vmatprep.subr.mxu1 %v3482_v6 }
 0x9cc   : > { %v3459_v61 = vpop.eup %3458 }
 0x9cd   : > { %v2052_v62 = vmul.f32 %v3459_v61, %v3451_v43 }
 0x9cf   : > { %3284 = vmatmul.mubr.msk.f32.vlgmr.msra.gmra.mrb[16].mxu1 %vm1006_vm2, %v2052_v62  ;;  %v3093_v62 = vld [vmem:[%s4033_s17] ss:$0 sm:$0xff] }
 0x9d0   : > { %3292 = vmatpush3.msra.mxu1 %v2219_v63  ;;  %3293 = vmatprep.mubr.msk.f32.mxu1 %vm3481_vm0, %v3482_v6 }
 0x9d1   : > { %3301 = vmatprep.subr.mxu1 %v3482_v6 }
 0xa33   : > { %v2215_v0 = vpop.xlane.xlu1 %2214 }
 0xa34   : > { %3460 = vrcp.f32 %v2215_v0  ;;  %v3094_v0 = vld [vmem:[%s4034_s18] ss:$0 sm:$0xff] }
 0xa3a   : > { %v2380_v1 = vpop.xlane.xlu0 %2379 }
 0xa3b   : > { %3462 = vrcp.f32 %v2380_v1 }
 0xa3e   : > { %v3461_v2 = vpop.eup %3460  ;;  %v2545_v4 = vpop.xlane.xlu1 %2544 }
 0xa3f   : > { %v2217_v5 = vmul.f32 %v3461_v2, %v3453_v54  ;;  %3464 = vrcp.f32 %v2545_v4  ;;  %v2549_v11 = vpop.permute.xlu0 %2548  ;;  %v2756_v54 = vld [vmem:[%s4037_s21 + $0x18] sm:$0xff] }
 0xa40   : > { %v3403_v10 = vpack.c.bf16 %v2756_v54, %v2755_v52  ;;  %v2760_v4 = vld [vmem:[%s4037_s21 + $0x38] sm:$0xff] }
 0xa41   : > { %3294 = vmatmul.mubr.msk.f32.vlgmr.msra.gmra.mrb[18].mxu1 %vm1006_vm2, %v2217_v5 }
 0xa42   : > { %v2384_v7 = vpop.permute.xlu1 %2383  ;;  %3303 = vmatprep.mubr.msk.f32.mxu1 %vm3481_vm0, %v3482_v6 }
 0xa43   : > { %3302 = vmatpush3.msra.mxu1 %v2384_v7  ;;  %v3095_v7 = vld [vmem:[%s4036_s20] ss:$0 sm:$0xff] }
 0xa44   : > { %3311 = vmatprep.subr.mxu1 %v3482_v6 }
 0xa45   : > { %v3463_v8 = vpop.eup %3462 }
 0xa46   : > { %v2382_v9 = vmul.f32 %v3463_v8, %v3455_v55  ;;  %v2757_v55 = vld [vmem:[%s4037_s21 + $0x20] sm:$0xff] }
 0xa48   : > { %3304 = vmatmul.mubr.msk.f32.vlgmr.msra.gmra.mrb[20].mxu1 %vm1006_vm2, %v2382_v9 }
 0xa49   : > { %v3465_v13 = vpop.eup %3464  ;;  %3312 = vmatpush3.msra.mxu1 %v2549_v11  ;;  %3313 = vmatprep.mubr.msk.f32.mxu1 %vm3481_vm0, %v3482_v6 }
 0xa4a   : > { %v2547_v14 = vmul.f32 %v3465_v13, %v3457_v57  ;;  %3393 = vmatprep.subr.bf16.mxu1 %v3480_v3  ;;  %v3406_v57 = vpack.c.bf16 %v2758_v56, %v2757_v55 }
 0xa4c   : > { %3314 = vmatmul.mubr.msk.f32.vlgmr.msra.gmra.mrb[22].mxu1 %vm1006_vm2, %v2547_v14  ;;  %v3097_v14 = vld [vmem:[%s4038_s22] ss:$0 sm:$0xff] }
 0xa4d   : > { %3335 = vmatprep.mubr.msk.f32.mxu1 %vm3481_vm0, %v3482_v6 }
 0xaa2   : > { %v2125_v15 = vpop.f32.mrb[16].mxu1 }
 0xaa3   : > { %v3285_v16 = vpop.f32.mrb[17].mxu1 }
 0xb14   : > { %v2290_v23 = vpop.f32.mrb[18].mxu1 }
 0xb15   : > { %2625 = vrot.lane.b32.xlu1 %v2290_v23, %s4095_s2  ;;  %v3295_v24 = vpop.f32.mrb[19].mxu1 }
 0xb1b   : > { %v2455_v25 = vpop.f32.mrb[20].mxu1 }
 0xb1c   : > { %2629 = vrot.lane.b32.xlu0 %v2455_v25, %s4096_s29  ;;  %v3305_v26 = vpop.f32.mrb[21].mxu1 }
 0xb1f   : > { %v2620_v27 = vpop.f32.mrb[22].mxu1 }
 0xb20   : > { %2633 = vrot.lane.b32.xlu1 %v2620_v27, %s4097_s11  ;;  %v3315_v28 = vpop.f32.mrb[23].mxu1 }
 0xb87   : > { %v2626_v29 = vpop.permute.xlu1 %2625 }
 0xb88   : > { %v2636_v31 = vsel %vm1006_vm2, %v2125_v15, %v2626_v29  ;;  %v3099_v29 = vld [vmem:[%s4039_s23] ss:$0 sm:$0xff] }
 0xb8e   : > { %v2630_v30 = vpop.permute.xlu0 %2629 }
 0xb8f   : > { %v2637_v32 = vsel %vm1678_vm3, %v2636_v31, %v2630_v30  ;;  %v3100_v31 = vld [vmem:[%s4040_s24] ss:$0 sm:$0xff] }
 0xb92   : > { %v2634_v33 = vpop.permute.xlu1 %2633 }
 0xb93   : > { %v2638_v34 = vsel %vm1680_vm4, %v2637_v32, %v2634_v33 }
 0xb94   : > { %3325 = vmatmul.mubr.msk.f32.vlgmr.msra.gmra.mrb[18].mxu0 %vm855_vm1, %v2638_v34 }
 0xb95   : > { %3354 = vmatprep.mubr.msk.f32.mxu0 %vm3481_vm0, %v3482_v6  ;;  %v2748_v6 = vld [vmem:[%s4035_s19] sm:$0xff]  ;;  %3401 = vmatpush3.bf16.msra.mxu0 %v3400_v53 }
 0xb96   : > { %v3394_v47 = vpack.c.bf16 %v2749_v46, %v2748_v6  ;;  %3402 = vmatprep.subr.bf16.mxu0 %v3480_v3  ;;  %v3102_v6 = vld [vmem:[%s4042_s26] ss:$0 sm:$0xff] }
 0xb98   : > { %3395 = vmatpush3.bf16.msra.mxu1 %v3394_v47 }
 0xb99   : > { %3396 = vmatprep.subr.bf16.mxu1 %v3480_v3  ;;  %3404 = vmatpush3.bf16.msra.mxu0 %v3403_v10 }
 0xb9a   : > { %3405 = vmatprep.subr.bf16.mxu0 %v3480_v3 }
 0xb9d   : > { %3407 = vmatpush3.bf16.msra.mxu0 %v3406_v57 }
 0xb9e   : > { %3408 = vmatprep.subr.bf16.mxu0 %v3480_v3  ;;  %v2759_v3 = vld [vmem:[%s4037_s21 + $0x30] sm:$0xff] }
 0xb9f   : > { %v3409_v5 = vpack.c.bf16 %v2760_v4, %v2759_v3 }
 0xba1   : > { %3410 = vmatpush3.bf16.msra.mxu0 %v3409_v5 }
 0xc67   : > { %v2714_v36 = vpop.f32.mrb[18].mxu0 }
 0xc68   : > { %v2715_v37 = vadd.f32 %v3091_v35, %v2714_v36  ;;  %v3326_v38 = vpop.f32.mrb[19].mxu0 }
 0xc6a   : > { %v2718_v39 = vadd.f32 %v2715_v37, %v3834_v12  ;;  %v2750_v12 = vld [vmem:[%s4035_s19 + $0x10] sm:$0xff] }
 0xc6b   : > { %v3397_v49 = vpack.c.bf16 %v2751_v48, %v2750_v12 }
 0xc6c   : > { %v2721_v40 = vsel %vm855_vm1, %v2718_v39, 0.0 }
 0xc6d   : > { %2722 = vadd.xlane.f32.xlu0 %v2721_v40  ;;  %3398 = vmatpush3.bf16.msra.mxu1 %v3397_v49 }
 0xcfa   : > { %v2723_v41 = vpop.xlane.xlu0 %2722 }
 0xcfb   : > { %v2724_v42 = vmul.f32 0.03125, %v2723_v41 }
 0xcfd   : > { %v2725_v43 = vsub.f32 %v2718_v39, %v2724_v42 }
 0xcff   : > { %v2726_v44 = vmul.f32 %v2725_v43, %v2725_v43 }
 0xd01   : > { %v2727_v45 = vsel %vm855_vm1, %v2726_v44, 0.0  ;;  %v3101_v44 = vld [vmem:[%s4041_s25] ss:$0 sm:$0xff] }
 0xd02   : > { %2728 = vadd.xlane.f32.xlu1 %v2727_v45 }
 0xd8f   : > { %v2729_v58 = vpop.xlane.xlu1 %2728 }
 0xd90   : > { %v2730_v59 = vmul.f32 0.03125, %v2729_v58 }
 0xd92   : > { %v2731_v60 = vadd.f32 1e-05, %v2730_v59 }
 0xd94   : > { %3466 = vrsqrt.f32 %v2731_v60 }
 0xd9e   : > { %v3467_v61 = vpop.eup %3466 }
 0xd9f   : > { %v2733_v63 = vmul.f32 %v3467_v61, %v2725_v43 }
 0xda1   : > { %v2740_v1 = vmul.f32 %v3093_v62, %v2733_v63 }
 0xda3   : > { %v2747_v2 = vadd.f32 %v3094_v0, %v2740_v1 }
 0xda5   : > { %3336 = vmatmul.mubr.msk.f32.vlgmr.msra.gmra.mrb[24].mxu1 %vm855_vm1, %v2747_v2 }
 0xe78   : > { %v2837_v8 = vpop.f32.mrb[24].mxu1 }
 0xe79   : > { %v2838_v9 = vadd.f32 %v3095_v7, %v2837_v8  ;;  %v3337_v11 = vpop.f32.mrb[25].mxu1 }
 0xe7b   : > { %v2841_v13 = vmax.f32 %v2838_v9, 0.0 }
 0xe7d   : > { %3355 = vmatmul.mubr.msk.f32.vlgmr.msra.gmra.mrb[20].mxu0 %vm2848_vm5, %v2841_v13 }
 0xf50   : > { %v2918_v15 = vpop.f32.mrb[20].mxu0 }
 0xf51   : > { %v2919_v16 = vadd.f32 %v3097_v14, %v2918_v15  ;;  %v3356_v17 = vpop.f32.mrb[21].mxu0 }
 0xf53   : > { %v2922_v18 = vadd.f32 %v2919_v16, %v2747_v2 }
 0xf55   : > { %v2925_v19 = vsel %vm855_vm1, %v2922_v18, 0.0 }
 0xf56   : > { %2926 = vadd.xlane.f32.xlu0 %v2925_v19 }
 0xfe3   : > { %v2927_v20 = vpop.xlane.xlu0 %2926 }
 0xfe4   : > { %v2928_v21 = vmul.f32 0.03125, %v2927_v20 }
 0xfe6   : > { %v2929_v22 = vsub.f32 %v2922_v18, %v2928_v21 }
 0xfe8   : > { %v2930_v23 = vmul.f32 %v2929_v22, %v2929_v22 }
 0xfea   : > { %v2931_v24 = vsel %vm855_vm1, %v2930_v23, 0.0 }
 0xfeb   : > { %2932 = vadd.xlane.f32.xlu0 %v2931_v24 }
0x1078   : > { %v2933_v25 = vpop.xlane.xlu0 %2932 }
0x1079   : > { %v2934_v26 = vmul.f32 0.03125, %v2933_v25 }
0x107b   : > { %v2935_v27 = vadd.f32 1e-05, %v2934_v26 }
0x107d   : > { %3468 = vrsqrt.f32 %v2935_v27 }
0x1087   : > { %v3469_v28 = vpop.eup %3468 }
0x1088   : > { %v2937_v30 = vmul.f32 %v3469_v28, %v2929_v22 }
0x108a   : > { %v2944_v32 = vmul.f32 %v3099_v29, %v2937_v30 }
0x108c   : > { %v2951_v33 = vadd.f32 %v3100_v31, %v2944_v32 }
0x108e   : > { %v2954_v34 = vsel %vm855_vm1, %v2951_v33, 0.0 }
0x108f   : > { %2955 = vadd.xlane.f32.xlu1 %v2954_v34 }
0x111c   : > { %v2956_v35 = vpop.xlane.xlu1 %2955 }
0x111d   : > { %v2957_v36 = vmul.f32 0.03125, %v2956_v35 }
0x111f   : > { %v2958_v37 = vsub.f32 %v2951_v33, %v2957_v36 }
0x1121   : > { %v2959_v38 = vmul.f32 %v2958_v37, %v2958_v37 }
0x1123   : > { %v2960_v39 = vsel %vm855_vm1, %v2959_v38, 0.0 }
0x1124   : > { %2961 = vadd.xlane.f32.xlu0 %v2960_v39 }
0x11b1   : > { %v2962_v40 = vpop.xlane.xlu0 %2961 }
0x11b2   : > { %v2963_v41 = vmul.f32 0.03125, %v2962_v40 }
0x11b4   : > { %v2964_v42 = vadd.f32 1e-05, %v2963_v41 }
0x11b6   : > { %3470 = vrsqrt.f32 %v2964_v42 }
0x11c0   : > { %v3471_v43 = vpop.eup %3470 }
0x11c1   : > { %v2966_v45 = vmul.f32 %v3471_v43, %v2958_v37 }
0x11c3   : > { %v2973_v46 = vmul.f32 %v3101_v44, %v2966_v45 }
0x11c5   : > { %v2980_v47 = vadd.f32 %v3102_v6, %v2973_v46 }
0x11c7   : > { %2981 = vst.msk [vmem:[%s830_s9] sm:$0xff] %vm855_vm1, %v2980_v47 }
0x11c8 PF: > { %s37_s7 = sadd.s32 1, %s3478_s7  }
0x11c9   : > { %p34_p4 = scmp.ge.s32.totalorder %s37_s7, 4  }
0x11cb   :  { %36 = sbr.rel (!%p34_p4) target bundleno = 13 (0xd), region = 161 }

</bundles_post_ra>
